<compile_context>
chip_gen: v5e
topology: v5e:2x2
jax: 0.10.0
libtpu: 0.0.40
codegen_flags: <defaults>
</compile_context>

<pallas_src>
import jax
import jax.numpy as jnp
from jax import lax
from jax.experimental import pallas as pl
from jax.experimental.pallas import tpu as pltpu


# ---- static LeNet geometry (32x32 RGB) and flat-layout slab widths ----------
CIN, C1, C2 = 3, 6, 16        # channels: input, conv1 out, conv2 out
H0 = 32                       # input spatial size (fc1's 400 = 16*5*5 pins it)
X_W  = 1280                   # padded flat input width   (>= 132 + C1_W)
C1_W = 1024                   # conv1 accumulator width   (= 32*32)
P1_W = 864                    # pooled-1 slab width       (= 264 + C2_W)
C2_W = 600                    # conv2 accumulator width   (>= 2 + T2_W)
P2_W = 532                    # pooled-2 slab width       (>= 529)
T1_W = P1_W + 32              # pool1 horizontal-max temp width (897 <= C1_W)
T2_W = P2_W + 64              # pool2 horizontal-max temp width (598 <= C2_W)


# ------------------------------ fused kernel --------------------------------

def lenet_kernel(x_ref, w1_ref, b1_ref, w2_ref, b2_ref, sel_ref,
                 fw1_ref, fb1_ref, fw2_ref, fb2_ref, fw3_ref, fb3_ref,
                 o_ref, stk1, stk2, feat):
    B = o_ref.shape[0]
    f32, bf16 = jnp.float32, jnp.bfloat16

    # conv1: stack the 25 shifted input slabs (tap-major rows) -> 1 deep-K dot.
    # Tap (ky,kx) of the flat 32-wide image is a static lane shift 32*ky + kx.
    for ky in range(5):
        for kx in range(5):
            k = 5 * ky + kx
            stk1[k * B * CIN:(k + 1) * B * CIN, :] = \
                x_ref[:, 32 * ky + kx:32 * ky + kx + C1_W]
    acc1 = jnp.dot(w1_ref[...], stk1[...],
                   preferred_element_type=f32) + b1_ref[...]      # (B*6, 1024)

    # 2x2 maxpool + relu on the in-register accumulator (chained maxima).
    # Window corners at flat offsets {0,1,32,33}; result keeps the stride-2
    # "dilated" layout (valid lanes at 64*Y + 2*X).
    t1 = jnp.maximum(acc1[:, 0:T1_W], acc1[:, 1:1 + T1_W])
    p1 = jnp.maximum(t1[:, 0:P1_W], t1[:, 32:32 + P1_W])
    m1 = jnp.maximum(p1, 0.0).astype(bf16)                        # (B*6, 864)

    # conv2 on the dilated layout: tap (ky,kx) -> shift 64*ky + 2*kx.
    for ky in range(5):
        for kx in range(5):
            k = 5 * ky + kx
            stk2[k * B * C1:(k + 1) * B * C1, :] = \
                m1[:, 64 * ky + 2 * kx:64 * ky + 2 * kx + C2_W]
    acc2 = jnp.dot(w2_ref[...], stk2[...],
                   preferred_element_type=f32) + b2_ref[...]      # (16*B, 600)

    # 2x2 maxpool + relu, dilation-2 layout: corners at {0, 2, 64, 66}.
    t2 = jnp.maximum(acc2[:, 0:T2_W], acc2[:, 2:2 + T2_W])
    p2 = jnp.maximum(t2[:, 0:P2_W], t2[:, 64:64 + P2_W])
    m2 = jnp.maximum(p2, 0.0).astype(bf16)                        # (16*B, 532)

    # Gather the 25 valid pooled lanes per (co, b) row (one-hot matmul), then
    # place each channel's (B, 25) block at its torch-flatten lane offset.
    # 16 * 25 = 400 lanes -> every lane of `feat` is overwritten (no garbage).
    ssel = jnp.dot(m2, sel_ref[...], preferred_element_type=f32).astype(bf16)
    for co in range(C2):
        feat[:, co * 25:(co + 1) * 25] = ssel[co * B:(co + 1) * B, :]

    # fc1 / fc2 / fc3 + log_softmax (single dots, f32 accumulation).
    h = jnp.dot(feat[...], fw1_ref[...], preferred_element_type=f32) + fb1_ref[...]
    h = jnp.maximum(h, 0.0).astype(bf16)
    h = jnp.dot(h, fw2_ref[...], preferred_element_type=f32) + fb2_ref[...]
    h = jnp.maximum(h, 0.0).astype(bf16)
    z = jnp.dot(h, fw3_ref[...], preferred_element_type=f32) + fb3_ref[...]
    z = z - jnp.max(z, axis=-1, keepdims=True)
    o_ref[...] = (z - jnp.log(jnp.sum(jnp.exp(z), axis=-1, keepdims=True))
                  ).astype(o_ref.dtype)


# ------------------------------ wrappers -------------------------------------

def pack_params(params, batch):
    """One-time re-packing of torch-layout parameters for the fused kernel."""
    w1c, b1c, w2c, b2c, fw1, fb1, fw2, fb2, fw3, fb3 = params
    bf16 = jnp.bfloat16
    eye = jnp.eye(batch, dtype=jnp.float32)

    # conv taps -> batch-block-diagonal blocks, concatenated tap-major along K.
    # conv1: rows b*C1+co, cols k*(B*CIN) + b'*CIN + ci   (matches stk1 rows).
    w1r = jnp.transpose(w1c, (2, 3, 0, 1)).reshape(25, C1, CIN)        # [k,o,c]
    w1big = jnp.einsum('koc,bd->bokdc', w1r, eye).reshape(
        batch * C1, 25 * batch * CIN)
    # conv2: rows co*B+b (channel-major so fc1 can slice contiguous (B,25)
    # blocks per channel), cols k*(B*C1) + b'*C1 + c1     (matches stk2 rows).
    w2r = jnp.transpose(w2c, (2, 3, 0, 1)).reshape(25, C2, C1)
    w2big = jnp.einsum('koc,bd->obkdc', w2r, eye).reshape(
        C2 * batch, 25 * batch * C1)

    b1k = jnp.tile(b1c, batch).reshape(batch * C1, 1)                # rows b*6+co
    b2k = jnp.repeat(b2c, batch).reshape(C2 * batch, 1)              # rows co*B+b

    # One-hot matrix gathering the 25 valid pooled-2 lanes (at 128*y3 + 4*x3).
    yy, xx = jnp.meshgrid(jnp.arange(5), jnp.arange(5), indexing='ij')
    qpos = (128 * yy + 4 * xx).reshape(25)
    sel = jnp.zeros((P2_W, 25), jnp.float32).at[qpos, jnp.arange(25)].set(1.0)

    return (w1big.astype(bf16), b1k, w2big.astype(bf16), b2k, sel.astype(bf16),
            jnp.transpose(fw1).astype(bf16), fb1.reshape(1, 120),
            jnp.transpose(fw2).astype(bf16), fb2.reshape(1, 84),
            jnp.transpose(fw3).astype(bf16), fb3.reshape(1, 10))


def lenet_forward(x_nchw, packed):
    B = x_nchw.shape[0]
    x_flat = x_nchw.reshape(B * CIN, H0 * H0)                  # rows b*3 + ci
    x_pad = jnp.pad(x_flat, ((0, 0), (0, X_W - H0 * H0))).astype(jnp.bfloat16)
    vmem = pl.BlockSpec(memory_space=pltpu.MemorySpace.VMEM)
    return pl.pallas_call(
        lenet_kernel,
        out_shape=jax.ShapeDtypeStruct((B, 10), x_nchw.dtype),
        in_specs=[vmem] * 12,
        out_specs=vmem,
        scratch_shapes=[
            pltpu.VMEM((25 * B * CIN, C1_W), jnp.bfloat16),  # conv1 stacked taps
            pltpu.VMEM((25 * B * C1, C2_W), jnp.bfloat16),   # conv2 stacked taps
            pltpu.VMEM((B, 400), jnp.bfloat16),              # fc1 features
        ],
    )(x_pad, *packed)


# ------------------------- deterministic parameters --------------------------

def init_params(key):
    ks = jax.random.split(key, 10)

    def u(k, shape, fan_in):
        bound = 1.0 / float(fan_in) ** 0.5
        return jax.random.uniform(k, shape, jnp.float32, -bound, bound)

    w1c = u(ks[0], (6, 3, 5, 5), 3 * 25)     # conv1 (torch OIHW)
    b1c = u(ks[1], (6,), 3 * 25)
    w2c = u(ks[2], (16, 6, 5, 5), 6 * 25)    # conv2
    b2c = u(ks[3], (16,), 6 * 25)
    fw1 = u(ks[4], (120, 400), 400)          # fc1 (torch: out, in)
    fb1 = u(ks[5], (120,), 400)
    fw2 = u(ks[6], (84, 120), 120)           # fc2
    fb2 = u(ks[7], (84,), 120)
    fw3 = u(ks[8], (10, 84), 84)             # fc3
    fb3 = u(ks[9], (10,), 84)
    return (w1c, b1c, w2c, b2c, fw1, fb1, fw2, fb2, fw3, fb3)


# ----------------------------- pure-JAX reference ----------------------------

def lenet_reference(x_nchw, params):
    w1c, b1c, w2c, b2c, fw1, fb1, fw2, fb2, fw3, fb3 = params

    def conv(x, w, b):
        y = lax.conv_general_dilated(
            x, w, (1, 1), "VALID",
            dimension_numbers=("NCHW", "OIHW", "NCHW"),
            precision=lax.Precision.HIGHEST)
        return y + b.reshape(1, -1, 1, 1)

    def pool(x):
        B, C, H, W = x.shape
        return x.reshape(B, C, H // 2, 2, W // 2, 2).max(axis=(3, 5))

    x = jnp.maximum(pool(conv(x_nchw, w1c, b1c)), 0.0)
    x = jnp.maximum(pool(conv(x, w2c, b2c)), 0.0)
    x = x.reshape(x.shape[0], -1)
    x = jnp.maximum(jnp.dot(x, fw1.T, precision=lax.Precision.HIGHEST) + fb1, 0.0)
    x = jnp.maximum(jnp.dot(x, fw2.T, precision=lax.Precision.HIGHEST) + fb2, 0.0)
    z = jnp.dot(x, fw3.T, precision=lax.Precision.HIGHEST) + fb3
    return z - jax.scipy.special.logsumexp(z, axis=1, keepdims=True)


# ---------------------------------- main --------------------------------------

if __name__ == "__main__":
    key = jax.random.PRNGKey(0)
    pkey, xkey = jax.random.split(key)
    params = init_params(pkey)

    # fc1 expects 400 = 16*5*5 features -> spatial size is pinned to 32x32.
    x = jax.random.normal(xkey, (2, 3, 32, 32), jnp.float32)     # NCHW

    packed = pack_params(params, batch=x.shape[0])               # once, pre-jit
    fwd = jax.jit(lenet_forward)
    out = jax.block_until_ready(fwd(x, packed))

    ref = lenet_reference(x, params)
    assert out.shape == (2, 10)
    assert bool(jnp.all(jnp.isfinite(out)))
    # bf16 MXU operands with f32 accumulation; 1e-2 comfortably covers it.
    assert bool(jnp.max(jnp.abs(out - ref)) < 1e-2)

    print("KERNEL_OK")
</pallas_src>

<mosaic_0001>
module attributes {stable_mosaic.version = 11 : i64} {
  func.func @lenet_kernel(%arg0: memref<6x1280xbf16, #tpu.memory_space<vmem>>, %arg1: memref<12x150xbf16, #tpu.memory_space<vmem>>, %arg2: memref<12x1xf32, #tpu.memory_space<vmem>>, %arg3: memref<32x300xbf16, #tpu.memory_space<vmem>>, %arg4: memref<32x1xf32, #tpu.memory_space<vmem>>, %arg5: memref<532x25xbf16, #tpu.memory_space<vmem>>, %arg6: memref<400x120xbf16, #tpu.memory_space<vmem>>, %arg7: memref<1x120xf32, #tpu.memory_space<vmem>>, %arg8: memref<120x84xbf16, #tpu.memory_space<vmem>>, %arg9: memref<1x84xf32, #tpu.memory_space<vmem>>, %arg10: memref<84x10xbf16, #tpu.memory_space<vmem>>, %arg11: memref<1x10xf32, #tpu.memory_space<vmem>>, %arg12: memref<2x10xf32, #tpu.memory_space<vmem>>, %arg13: memref<150x1024xbf16, #tpu.memory_space<vmem>>, %arg14: memref<300x600xbf16, #tpu.memory_space<vmem>>, %arg15: memref<2x400xbf16, #tpu.memory_space<vmem>>) attributes {dimension_semantics = [], scalar_prefetch = 0 : i64, scratch_operands = 3 : i64, tpu.core_type = #tpu.core_type<tc>} {
    %c0 = arith.constant 0 : index
    %c0_0 = arith.constant 0 : index
    %0 = vector.load %arg0[%c0, %c0_0] : memref<6x1280xbf16, #tpu.memory_space<vmem>>, vector<6x1024xbf16>
    %c0_1 = arith.constant 0 : index
    %c0_2 = arith.constant 0 : index
    %1 = vector.load %arg13[%c0_1, %c0_2] : memref<150x1024xbf16, #tpu.memory_space<vmem>>, vector<6x1024xbf16>
    tpu.vector_store %arg13[%c0_1, %c0_2], %0 {strides = array<i32>} : memref<150x1024xbf16, #tpu.memory_space<vmem>>, vector<6x1024xbf16>,
    %c0_3 = arith.constant 0 : index
    %c1 = arith.constant 1 : index
    %2 = vector.load %arg0[%c0_3, %c1] : memref<6x1280xbf16, #tpu.memory_space<vmem>>, vector<6x1024xbf16>
    %c6 = arith.constant 6 : index
    %c0_4 = arith.constant 0 : index
    %3 = vector.load %arg13[%c6, %c0_4] : memref<150x1024xbf16, #tpu.memory_space<vmem>>, vector<6x1024xbf16>
    tpu.vector_store %arg13[%c6, %c0_4], %2 {strides = array<i32>} : memref<150x1024xbf16, #tpu.memory_space<vmem>>, vector<6x1024xbf16>,
    %c0_5 = arith.constant 0 : index
    %c2 = arith.constant 2 : index
    %4 = vector.load %arg0[%c0_5, %c2] : memref<6x1280xbf16, #tpu.memory_space<vmem>>, vector<6x1024xbf16>
    %c12 = arith.constant 12 : index
    %c0_6 = arith.constant 0 : index
    %5 = vector.load %arg13[%c12, %c0_6] : memref<150x1024xbf16, #tpu.memory_space<vmem>>, vector<6x1024xbf16>
    tpu.vector_store %arg13[%c12, %c0_6], %4 {strides = array<i32>} : memref<150x1024xbf16, #tpu.memory_space<vmem>>, vector<6x1024xbf16>,
    %c0_7 = arith.constant 0 : index
    %c3 = arith.constant 3 : index
    %6 = vector.load %arg0[%c0_7, %c3] : memref<6x1280xbf16, #tpu.memory_space<vmem>>, vector<6x1024xbf16>
    %c18 = arith.constant 18 : index
    %c0_8 = arith.constant 0 : index
    %7 = vector.load %arg13[%c18, %c0_8] : memref<150x1024xbf16, #tpu.memory_space<vmem>>, vector<6x1024xbf16>
    tpu.vector_store %arg13[%c18, %c0_8], %6 {strides = array<i32>} : memref<150x1024xbf16, #tpu.memory_space<vmem>>, vector<6x1024xbf16>,
    %c0_9 = arith.constant 0 : index
    %c4 = arith.constant 4 : index
    %8 = vector.load %arg0[%c0_9, %c4] : memref<6x1280xbf16, #tpu.memory_space<vmem>>, vector<6x1024xbf16>
    %c24 = arith.constant 24 : index
    %c0_10 = arith.constant 0 : index
    %9 = vector.load %arg13[%c24, %c0_10] : memref<150x1024xbf16, #tpu.memory_space<vmem>>, vector<6x1024xbf16>
    tpu.vector_store %arg13[%c24, %c0_10], %8 {strides = array<i32>} : memref<150x1024xbf16, #tpu.memory_space<vmem>>, vector<6x1024xbf16>,
    %c0_11 = arith.constant 0 : index
    %c32 = arith.constant 32 : index
    %10 = vector.load %arg0[%c0_11, %c32] : memref<6x1280xbf16, #tpu.memory_space<vmem>>, vector<6x1024xbf16>
    %c30 = arith.constant 30 : index
    %c0_12 = arith.constant 0 : index
    %11 = vector.load %arg13[%c30, %c0_12] : memref<150x1024xbf16, #tpu.memory_space<vmem>>, vector<6x1024xbf16>
    tpu.vector_store %arg13[%c30, %c0_12], %10 {strides = array<i32>} : memref<150x1024xbf16, #tpu.memory_space<vmem>>, vector<6x1024xbf16>,
    %c0_13 = arith.constant 0 : index
    %c33 = arith.constant 33 : index
    %12 = vector.load %arg0[%c0_13, %c33] : memref<6x1280xbf16, #tpu.memory_space<vmem>>, vector<6x1024xbf16>
    %c36 = arith.constant 36 : index
    %c0_14 = arith.constant 0 : index
    %13 = vector.load %arg13[%c36, %c0_14] : memref<150x1024xbf16, #tpu.memory_space<vmem>>, vector<6x1024xbf16>
    tpu.vector_store %arg13[%c36, %c0_14], %12 {strides = array<i32>} : memref<150x1024xbf16, #tpu.memory_space<vmem>>, vector<6x1024xbf16>,
    %c0_15 = arith.constant 0 : index
    %c34 = arith.constant 34 : index
    %14 = vector.load %arg0[%c0_15, %c34] : memref<6x1280xbf16, #tpu.memory_space<vmem>>, vector<6x1024xbf16>
    %c42 = arith.constant 42 : index
    %c0_16 = arith.constant 0 : index
    %15 = vector.load %arg13[%c42, %c0_16] : memref<150x1024xbf16, #tpu.memory_space<vmem>>, vector<6x1024xbf16>
    tpu.vector_store %arg13[%c42, %c0_16], %14 {strides = array<i32>} : memref<150x1024xbf16, #tpu.memory_space<vmem>>, vector<6x1024xbf16>,
    %c0_17 = arith.constant 0 : index
    %c35 = arith.constant 35 : index
    %16 = vector.load %arg0[%c0_17, %c35] : memref<6x1280xbf16, #tpu.memory_space<vmem>>, vector<6x1024xbf16>
    %c48 = arith.constant 48 : index
    %c0_18 = arith.constant 0 : index
    %17 = vector.load %arg13[%c48, %c0_18] : memref<150x1024xbf16, #tpu.memory_space<vmem>>, vector<6x1024xbf16>
    tpu.vector_store %arg13[%c48, %c0_18], %16 {strides = array<i32>} : memref<150x1024xbf16, #tpu.memory_space<vmem>>, vector<6x1024xbf16>,
    %c0_19 = arith.constant 0 : index
    %c36_20 = arith.constant 36 : index
    %18 = vector.load %arg0[%c0_19, %c36_20] : memref<6x1280xbf16, #tpu.memory_space<vmem>>, vector<6x1024xbf16>
    %c54 = arith.constant 54 : index
    %c0_21 = arith.constant 0 : index
    %19 = vector.load %arg13[%c54, %c0_21] : memref<150x1024xbf16, #tpu.memory_space<vmem>>, vector<6x1024xbf16>
    tpu.vector_store %arg13[%c54, %c0_21], %18 {strides = array<i32>} : memref<150x1024xbf16, #tpu.memory_space<vmem>>, vector<6x1024xbf16>,
    %c0_22 = arith.constant 0 : index
    %c64 = arith.constant 64 : index
    %20 = vector.load %arg0[%c0_22, %c64] : memref<6x1280xbf16, #tpu.memory_space<vmem>>, vector<6x1024xbf16>
    %c60 = arith.constant 60 : index
    %c0_23 = arith.constant 0 : index
    %21 = vector.load %arg13[%c60, %c0_23] : memref<150x1024xbf16, #tpu.memory_space<vmem>>, vector<6x1024xbf16>
    tpu.vector_store %arg13[%c60, %c0_23], %20 {strides = array<i32>} : memref<150x1024xbf16, #tpu.memory_space<vmem>>, vector<6x1024xbf16>,
    %c0_24 = arith.constant 0 : index
    %c65 = arith.constant 65 : index
    %22 = vector.load %arg0[%c0_24, %c65] : memref<6x1280xbf16, #tpu.memory_space<vmem>>, vector<6x1024xbf16>
    %c66 = arith.constant 66 : index
    %c0_25 = arith.constant 0 : index
    %23 = vector.load %arg13[%c66, %c0_25] : memref<150x1024xbf16, #tpu.memory_space<vmem>>, vector<6x1024xbf16>
    tpu.vector_store %arg13[%c66, %c0_25], %22 {strides = array<i32>} : memref<150x1024xbf16, #tpu.memory_space<vmem>>, vector<6x1024xbf16>,
    %c0_26 = arith.constant 0 : index
    %c66_27 = arith.constant 66 : index
    %24 = vector.load %arg0[%c0_26, %c66_27] : memref<6x1280xbf16, #tpu.memory_space<vmem>>, vector<6x1024xbf16>
    %c72 = arith.constant 72 : index
    %c0_28 = arith.constant 0 : index
    %25 = vector.load %arg13[%c72, %c0_28] : memref<150x1024xbf16, #tpu.memory_space<vmem>>, vector<6x1024xbf16>
    tpu.vector_store %arg13[%c72, %c0_28], %24 {strides = array<i32>} : memref<150x1024xbf16, #tpu.memory_space<vmem>>, vector<6x1024xbf16>,
    %c0_29 = arith.constant 0 : index
    %c67 = arith.constant 67 : index
    %26 = vector.load %arg0[%c0_29, %c67] : memref<6x1280xbf16, #tpu.memory_space<vmem>>, vector<6x1024xbf16>
    %c78 = arith.constant 78 : index
    %c0_30 = arith.constant 0 : index
    %27 = vector.load %arg13[%c78, %c0_30] : memref<150x1024xbf16, #tpu.memory_space<vmem>>, vector<6x1024xbf16>
    tpu.vector_store %arg13[%c78, %c0_30], %26 {strides = array<i32>} : memref<150x1024xbf16, #tpu.memory_space<vmem>>, vector<6x1024xbf16>,
    %c0_31 = arith.constant 0 : index
    %c68 = arith.constant 68 : index
    %28 = vector.load %arg0[%c0_31, %c68] : memref<6x1280xbf16, #tpu.memory_space<vmem>>, vector<6x1024xbf16>
    %c84 = arith.constant 84 : index
    %c0_32 = arith.constant 0 : index
    %29 = vector.load %arg13[%c84, %c0_32] : memref<150x1024xbf16, #tpu.memory_space<vmem>>, vector<6x1024xbf16>
    tpu.vector_store %arg13[%c84, %c0_32], %28 {strides = array<i32>} : memref<150x1024xbf16, #tpu.memory_space<vmem>>, vector<6x1024xbf16>,
    %c0_33 = arith.constant 0 : index
    %c96 = arith.constant 96 : index
    %30 = vector.load %arg0[%c0_33, %c96] : memref<6x1280xbf16, #tpu.memory_space<vmem>>, vector<6x1024xbf16>
    %c90 = arith.constant 90 : index
    %c0_34 = arith.constant 0 : index
    %31 = vector.load %arg13[%c90, %c0_34] : memref<150x1024xbf16, #tpu.memory_space<vmem>>, vector<6x1024xbf16>
    tpu.vector_store %arg13[%c90, %c0_34], %30 {strides = array<i32>} : memref<150x1024xbf16, #tpu.memory_space<vmem>>, vector<6x1024xbf16>,
    %c0_35 = arith.constant 0 : index
    %c97 = arith.constant 97 : index
    %32 = vector.load %arg0[%c0_35, %c97] : memref<6x1280xbf16, #tpu.memory_space<vmem>>, vector<6x1024xbf16>
    %c96_36 = arith.constant 96 : index
    %c0_37 = arith.constant 0 : index
    %33 = vector.load %arg13[%c96_36, %c0_37] : memref<150x1024xbf16, #tpu.memory_space<vmem>>, vector<6x1024xbf16>
    tpu.vector_store %arg13[%c96_36, %c0_37], %32 {strides = array<i32>} : memref<150x1024xbf16, #tpu.memory_space<vmem>>, vector<6x1024xbf16>,
    %c0_38 = arith.constant 0 : index
    %c98 = arith.constant 98 : index
    %34 = vector.load %arg0[%c0_38, %c98] : memref<6x1280xbf16, #tpu.memory_space<vmem>>, vector<6x1024xbf16>
    %c102 = arith.constant 102 : index
    %c0_39 = arith.constant 0 : index
    %35 = vector.load %arg13[%c102, %c0_39] : memref<150x1024xbf16, #tpu.memory_space<vmem>>, vector<6x1024xbf16>
    tpu.vector_store %arg13[%c102, %c0_39], %34 {strides = array<i32>} : memref<150x1024xbf16, #tpu.memory_space<vmem>>, vector<6x1024xbf16>,
    %c0_40 = arith.constant 0 : index
    %c99 = arith.constant 99 : index
    %36 = vector.load %arg0[%c0_40, %c99] : memref<6x1280xbf16, #tpu.memory_space<vmem>>, vector<6x1024xbf16>
    %c108 = arith.constant 108 : index
    %c0_41 = arith.constant 0 : index
    %37 = vector.load %arg13[%c108, %c0_41] : memref<150x1024xbf16, #tpu.memory_space<vmem>>, vector<6x1024xbf16>
    tpu.vector_store %arg13[%c108, %c0_41], %36 {strides = array<i32>} : memref<150x1024xbf16, #tpu.memory_space<vmem>>, vector<6x1024xbf16>,
    %c0_42 = arith.constant 0 : index
    %c100 = arith.constant 100 : index
    %38 = vector.load %arg0[%c0_42, %c100] : memref<6x1280xbf16, #tpu.memory_space<vmem>>, vector<6x1024xbf16>
    %c114 = arith.constant 114 : index
    %c0_43 = arith.constant 0 : index
    %39 = vector.load %arg13[%c114, %c0_43] : memref<150x1024xbf16, #tpu.memory_space<vmem>>, vector<6x1024xbf16>
    tpu.vector_store %arg13[%c114, %c0_43], %38 {strides = array<i32>} : memref<150x1024xbf16, #tpu.memory_space<vmem>>, vector<6x1024xbf16>,
    %c0_44 = arith.constant 0 : index
    %c128 = arith.constant 128 : index
    %40 = vector.load %arg0[%c0_44, %c128] : memref<6x1280xbf16, #tpu.memory_space<vmem>>, vector<6x1024xbf16>
    %c120 = arith.constant 120 : index
    %c0_45 = arith.constant 0 : index
    %41 = vector.load %arg13[%c120, %c0_45] : memref<150x1024xbf16, #tpu.memory_space<vmem>>, vector<6x1024xbf16>
    tpu.vector_store %arg13[%c120, %c0_45], %40 {strides = array<i32>} : memref<150x1024xbf16, #tpu.memory_space<vmem>>, vector<6x1024xbf16>,
    %c0_46 = arith.constant 0 : index
    %c129 = arith.constant 129 : index
    %42 = vector.load %arg0[%c0_46, %c129] : memref<6x1280xbf16, #tpu.memory_space<vmem>>, vector<6x1024xbf16>
    %c126 = arith.constant 126 : index
    %c0_47 = arith.constant 0 : index
    %43 = vector.load %arg13[%c126, %c0_47] : memref<150x1024xbf16, #tpu.memory_space<vmem>>, vector<6x1024xbf16>
    tpu.vector_store %arg13[%c126, %c0_47], %42 {strides = array<i32>} : memref<150x1024xbf16, #tpu.memory_space<vmem>>, vector<6x1024xbf16>,
    %c0_48 = arith.constant 0 : index
    %c130 = arith.constant 130 : index
    %44 = vector.load %arg0[%c0_48, %c130] : memref<6x1280xbf16, #tpu.memory_space<vmem>>, vector<6x1024xbf16>
    %c132 = arith.constant 132 : index
    %c0_49 = arith.constant 0 : index
    %45 = vector.load %arg13[%c132, %c0_49] : memref<150x1024xbf16, #tpu.memory_space<vmem>>, vector<6x1024xbf16>
    tpu.vector_store %arg13[%c132, %c0_49], %44 {strides = array<i32>} : memref<150x1024xbf16, #tpu.memory_space<vmem>>, vector<6x1024xbf16>,
    %c0_50 = arith.constant 0 : index
    %c131 = arith.constant 131 : index
    %46 = vector.load %arg0[%c0_50, %c131] : memref<6x1280xbf16, #tpu.memory_space<vmem>>, vector<6x1024xbf16>
    %c138 = arith.constant 138 : index
    %c0_51 = arith.constant 0 : index
    %47 = vector.load %arg13[%c138, %c0_51] : memref<150x1024xbf16, #tpu.memory_space<vmem>>, vector<6x1024xbf16>
    tpu.vector_store %arg13[%c138, %c0_51], %46 {strides = array<i32>} : memref<150x1024xbf16, #tpu.memory_space<vmem>>, vector<6x1024xbf16>,
    %c0_52 = arith.constant 0 : index
    %c132_53 = arith.constant 132 : index
    %48 = vector.load %arg0[%c0_52, %c132_53] : memref<6x1280xbf16, #tpu.memory_space<vmem>>, vector<6x1024xbf16>
    %c144 = arith.constant 144 : index
    %c0_54 = arith.constant 0 : index
    %49 = vector.load %arg13[%c144, %c0_54] : memref<150x1024xbf16, #tpu.memory_space<vmem>>, vector<6x1024xbf16>
    tpu.vector_store %arg13[%c144, %c0_54], %48 {strides = array<i32>} : memref<150x1024xbf16, #tpu.memory_space<vmem>>, vector<6x1024xbf16>,
    %c0_55 = arith.constant 0 : index
    %c0_56 = arith.constant 0 : index
    %50 = vector.load %arg1[%c0_55, %c0_56] : memref<12x150xbf16, #tpu.memory_space<vmem>>, vector<12x150xbf16>
    %c0_57 = arith.constant 0 : index
    %c0_58 = arith.constant 0 : index
    %51 = vector.load %arg13[%c0_57, %c0_58] : memref<150x1024xbf16, #tpu.memory_space<vmem>>, vector<150x1024xbf16>
    %cst = arith.constant dense<0.000000e+00> : vector<12x1024xf32>
    %52 = tpu.matmul %50, %51, %cst {dimension_numbers = #tpu.dot_dimension_numbers<[1], [0], [0], [1], [0, 0, 1, 1], [], []>} : vector<12x150xbf16>, vector<150x1024xbf16>, vector<12x1024xf32> -> vector<12x1024xf32>
    %c0_59 = arith.constant 0 : index
    %c0_60 = arith.constant 0 : index
    %53 = vector.load %arg2[%c0_59, %c0_60] : memref<12x1xf32, #tpu.memory_space<vmem>>, vector<12x1xf32>
    %54 = vector.broadcast %53 : vector<12x1xf32> to vector<12x1024xf32>
    %55 = arith.addf %52, %54 : vector<12x1024xf32>
    %56 = vector.extract_strided_slice %55 {offsets = [0, 0], sizes = [12, 896], strides = [1, 1]} : vector<12x1024xf32> to vector<12x896xf32>
    %57 = vector.extract_strided_slice %55 {offsets = [0, 1], sizes = [12, 896], strides = [1, 1]} : vector<12x1024xf32> to vector<12x896xf32>
    %58 = arith.maximumf %56, %57 : vector<12x896xf32>
    %59 = vector.extract_strided_slice %58 {offsets = [0, 0], sizes = [12, 864], strides = [1, 1]} : vector<12x896xf32> to vector<12x864xf32>
    %60 = vector.extract_strided_slice %58 {offsets = [0, 32], sizes = [12, 864], strides = [1, 1]} : vector<12x896xf32> to vector<12x864xf32>
    %61 = arith.maximumf %59, %60 : vector<12x864xf32>
    %cst_61 = arith.constant 0.000000e+00 : f32
    %62 = vector.broadcast %cst_61 : f32 to vector<12x864xf32>
    %63 = arith.maximumf %61, %62 : vector<12x864xf32>
    %64 = arith.truncf %63 : vector<12x864xf32> to vector<12x864xbf16>
    %65 = vector.extract_strided_slice %64 {offsets = [0, 0], sizes = [12, 600], strides = [1, 1]} : vector<12x864xbf16> to vector<12x600xbf16>
    %c0_62 = arith.constant 0 : index
    %c0_63 = arith.constant 0 : index
    %66 = vector.load %arg14[%c0_62, %c0_63] : memref<300x600xbf16, #tpu.memory_space<vmem>>, vector<12x600xbf16>
    tpu.vector_store %arg14[%c0_62, %c0_63], %65 {strides = array<i32>} : memref<300x600xbf16, #tpu.memory_space<vmem>>, vector<12x600xbf16>,
    %67 = vector.extract_strided_slice %64 {offsets = [0, 2], sizes = [12, 600], strides = [1, 1]} : vector<12x864xbf16> to vector<12x600xbf16>
    %c12_64 = arith.constant 12 : index
    %c0_65 = arith.constant 0 : index
    %68 = vector.load %arg14[%c12_64, %c0_65] : memref<300x600xbf16, #tpu.memory_space<vmem>>, vector<12x600xbf16>
    tpu.vector_store %arg14[%c12_64, %c0_65], %67 {strides = array<i32>} : memref<300x600xbf16, #tpu.memory_space<vmem>>, vector<12x600xbf16>,
    %69 = vector.extract_strided_slice %64 {offsets = [0, 4], sizes = [12, 600], strides = [1, 1]} : vector<12x864xbf16> to vector<12x600xbf16>
    %c24_66 = arith.constant 24 : index
    %c0_67 = arith.constant 0 : index
    %70 = vector.load %arg14[%c24_66, %c0_67] : memref<300x600xbf16, #tpu.memory_space<vmem>>, vector<12x600xbf16>
    tpu.vector_store %arg14[%c24_66, %c0_67], %69 {strides = array<i32>} : memref<300x600xbf16, #tpu.memory_space<vmem>>, vector<12x600xbf16>,
    %71 = vector.extract_strided_slice %64 {offsets = [0, 6], sizes = [12, 600], strides = [1, 1]} : vector<12x864xbf16> to vector<12x600xbf16>
    %c36_68 = arith.constant 36 : index
    %c0_69 = arith.constant 0 : index
    %72 = vector.load %arg14[%c36_68, %c0_69] : memref<300x600xbf16, #tpu.memory_space<vmem>>, vector<12x600xbf16>
    tpu.vector_store %arg14[%c36_68, %c0_69], %71 {strides = array<i32>} : memref<300x600xbf16, #tpu.memory_space<vmem>>, vector<12x600xbf16>,
    %73 = vector.extract_strided_slice %64 {offsets = [0, 8], sizes = [12, 600], strides = [1, 1]} : vector<12x864xbf16> to vector<12x600xbf16>
    %c48_70 = arith.constant 48 : index
    %c0_71 = arith.constant 0 : index
    %74 = vector.load %arg14[%c48_70, %c0_71] : memref<300x600xbf16, #tpu.memory_space<vmem>>, vector<12x600xbf16>
    tpu.vector_store %arg14[%c48_70, %c0_71], %73 {strides = array<i32>} : memref<300x600xbf16, #tpu.memory_space<vmem>>, vector<12x600xbf16>,
    %75 = vector.extract_strided_slice %64 {offsets = [0, 64], sizes = [12, 600], strides = [1, 1]} : vector<12x864xbf16> to vector<12x600xbf16>
    %c60_72 = arith.constant 60 : index
    %c0_73 = arith.constant 0 : index
    %76 = vector.load %arg14[%c60_72, %c0_73] : memref<300x600xbf16, #tpu.memory_space<vmem>>, vector<12x600xbf16>
    tpu.vector_store %arg14[%c60_72, %c0_73], %75 {strides = array<i32>} : memref<300x600xbf16, #tpu.memory_space<vmem>>, vector<12x600xbf16>,
    %77 = vector.extract_strided_slice %64 {offsets = [0, 66], sizes = [12, 600], strides = [1, 1]} : vector<12x864xbf16> to vector<12x600xbf16>
    %c72_74 = arith.constant 72 : index
    %c0_75 = arith.constant 0 : index
    %78 = vector.load %arg14[%c72_74, %c0_75] : memref<300x600xbf16, #tpu.memory_space<vmem>>, vector<12x600xbf16>
    tpu.vector_store %arg14[%c72_74, %c0_75], %77 {strides = array<i32>} : memref<300x600xbf16, #tpu.memory_space<vmem>>, vector<12x600xbf16>,
    %79 = vector.extract_strided_slice %64 {offsets = [0, 68], sizes = [12, 600], strides = [1, 1]} : vector<12x864xbf16> to vector<12x600xbf16>
    %c84_76 = arith.constant 84 : index
    %c0_77 = arith.constant 0 : index
    %80 = vector.load %arg14[%c84_76, %c0_77] : memref<300x600xbf16, #tpu.memory_space<vmem>>, vector<12x600xbf16>
    tpu.vector_store %arg14[%c84_76, %c0_77], %79 {strides = array<i32>} : memref<300x600xbf16, #tpu.memory_space<vmem>>, vector<12x600xbf16>,
    %81 = vector.extract_strided_slice %64 {offsets = [0, 70], sizes = [12, 600], strides = [1, 1]} : vector<12x864xbf16> to vector<12x600xbf16>
    %c96_78 = arith.constant 96 : index
    %c0_79 = arith.constant 0 : index
    %82 = vector.load %arg14[%c96_78, %c0_79] : memref<300x600xbf16, #tpu.memory_space<vmem>>, vector<12x600xbf16>
    tpu.vector_store %arg14[%c96_78, %c0_79], %81 {strides = array<i32>} : memref<300x600xbf16, #tpu.memory_space<vmem>>, vector<12x600xbf16>,
    %83 = vector.extract_strided_slice %64 {offsets = [0, 72], sizes = [12, 600], strides = [1, 1]} : vector<12x864xbf16> to vector<12x600xbf16>
    %c108_80 = arith.constant 108 : index
    %c0_81 = arith.constant 0 : index
    %84 = vector.load %arg14[%c108_80, %c0_81] : memref<300x600xbf16, #tpu.memory_space<vmem>>, vector<12x600xbf16>
    tpu.vector_store %arg14[%c108_80, %c0_81], %83 {strides = array<i32>} : memref<300x600xbf16, #tpu.memory_space<vmem>>, vector<12x600xbf16>,
    %85 = vector.extract_strided_slice %64 {offsets = [0, 128], sizes = [12, 600], strides = [1, 1]} : vector<12x864xbf16> to vector<12x600xbf16>
    %c120_82 = arith.constant 120 : index
    %c0_83 = arith.constant 0 : index
    %86 = vector.load %arg14[%c120_82, %c0_83] : memref<300x600xbf16, #tpu.memory_space<vmem>>, vector<12x600xbf16>
    tpu.vector_store %arg14[%c120_82, %c0_83], %85 {strides = array<i32>} : memref<300x600xbf16, #tpu.memory_space<vmem>>, vector<12x600xbf16>,
    %87 = vector.extract_strided_slice %64 {offsets = [0, 130], sizes = [12, 600], strides = [1, 1]} : vector<12x864xbf16> to vector<12x600xbf16>
    %c132_84 = arith.constant 132 : index
    %c0_85 = arith.constant 0 : index
    %88 = vector.load %arg14[%c132_84, %c0_85] : memref<300x600xbf16, #tpu.memory_space<vmem>>, vector<12x600xbf16>
    tpu.vector_store %arg14[%c132_84, %c0_85], %87 {strides = array<i32>} : memref<300x600xbf16, #tpu.memory_space<vmem>>, vector<12x600xbf16>,
    %89 = vector.extract_strided_slice %64 {offsets = [0, 132], sizes = [12, 600], strides = [1, 1]} : vector<12x864xbf16> to vector<12x600xbf16>
    %c144_86 = arith.constant 144 : index
    %c0_87 = arith.constant 0 : index
    %90 = vector.load %arg14[%c144_86, %c0_87] : memref<300x600xbf16, #tpu.memory_space<vmem>>, vector<12x600xbf16>
    tpu.vector_store %arg14[%c144_86, %c0_87], %89 {strides = array<i32>} : memref<300x600xbf16, #tpu.memory_space<vmem>>, vector<12x600xbf16>,
    %91 = vector.extract_strided_slice %64 {offsets = [0, 134], sizes = [12, 600], strides = [1, 1]} : vector<12x864xbf16> to vector<12x600xbf16>
    %c156 = arith.constant 156 : index
    %c0_88 = arith.constant 0 : index
    %92 = vector.load %arg14[%c156, %c0_88] : memref<300x600xbf16, #tpu.memory_space<vmem>>, vector<12x600xbf16>
    tpu.vector_store %arg14[%c156, %c0_88], %91 {strides = array<i32>} : memref<300x600xbf16, #tpu.memory_space<vmem>>, vector<12x600xbf16>,
    %93 = vector.extract_strided_slice %64 {offsets = [0, 136], sizes = [12, 600], strides = [1, 1]} : vector<12x864xbf16> to vector<12x600xbf16>
    %c168 = arith.constant 168 : index
    %c0_89 = arith.constant 0 : index
    %94 = vector.load %arg14[%c168, %c0_89] : memref<300x600xbf16, #tpu.memory_space<vmem>>, vector<12x600xbf16>
    tpu.vector_store %arg14[%c168, %c0_89], %93 {strides = array<i32>} : memref<300x600xbf16, #tpu.memory_space<vmem>>, vector<12x600xbf16>,
    %95 = vector.extract_strided_slice %64 {offsets = [0, 192], sizes = [12, 600], strides = [1, 1]} : vector<12x864xbf16> to vector<12x600xbf16>
    %c180 = arith.constant 180 : index
    %c0_90 = arith.constant 0 : index
    %96 = vector.load %arg14[%c180, %c0_90] : memref<300x600xbf16, #tpu.memory_space<vmem>>, vector<12x600xbf16>
    tpu.vector_store %arg14[%c180, %c0_90], %95 {strides = array<i32>} : memref<300x600xbf16, #tpu.memory_space<vmem>>, vector<12x600xbf16>,
    %97 = vector.extract_strided_slice %64 {offsets = [0, 194], sizes = [12, 600], strides = [1, 1]} : vector<12x864xbf16> to vector<12x600xbf16>
    %c192 = arith.constant 192 : index
    %c0_91 = arith.constant 0 : index
    %98 = vector.load %arg14[%c192, %c0_91] : memref<300x600xbf16, #tpu.memory_space<vmem>>, vector<12x600xbf16>
    tpu.vector_store %arg14[%c192, %c0_91], %97 {strides = array<i32>} : memref<300x600xbf16, #tpu.memory_space<vmem>>, vector<12x600xbf16>,
    %99 = vector.extract_strided_slice %64 {offsets = [0, 196], sizes = [12, 600], strides = [1, 1]} : vector<12x864xbf16> to vector<12x600xbf16>
    %c204 = arith.constant 204 : index
    %c0_92 = arith.constant 0 : index
    %100 = vector.load %arg14[%c204, %c0_92] : memref<300x600xbf16, #tpu.memory_space<vmem>>, vector<12x600xbf16>
    tpu.vector_store %arg14[%c204, %c0_92], %99 {strides = array<i32>} : memref<300x600xbf16, #tpu.memory_space<vmem>>, vector<12x600xbf16>,
    %101 = vector.extract_strided_slice %64 {offsets = [0, 198], sizes = [12, 600], strides = [1, 1]} : vector<12x864xbf16> to vector<12x600xbf16>
    %c216 = arith.constant 216 : index
    %c0_93 = arith.constant 0 : index
    %102 = vector.load %arg14[%c216, %c0_93] : memref<300x600xbf16, #tpu.memory_space<vmem>>, vector<12x600xbf16>
    tpu.vector_store %arg14[%c216, %c0_93], %101 {strides = array<i32>} : memref<300x600xbf16, #tpu.memory_space<vmem>>, vector<12x600xbf16>,
    %103 = vector.extract_strided_slice %64 {offsets = [0, 200], sizes = [12, 600], strides = [1, 1]} : vector<12x864xbf16> to vector<12x600xbf16>
    %c228 = arith.constant 228 : index
    %c0_94 = arith.constant 0 : index
    %104 = vector.load %arg14[%c228, %c0_94] : memref<300x600xbf16, #tpu.memory_space<vmem>>, vector<12x600xbf16>
    tpu.vector_store %arg14[%c228, %c0_94], %103 {strides = array<i32>} : memref<300x600xbf16, #tpu.memory_space<vmem>>, vector<12x600xbf16>,
    %105 = vector.extract_strided_slice %64 {offsets = [0, 256], sizes = [12, 600], strides = [1, 1]} : vector<12x864xbf16> to vector<12x600xbf16>
    %c240 = arith.constant 240 : index
    %c0_95 = arith.constant 0 : index
    %106 = vector.load %arg14[%c240, %c0_95] : memref<300x600xbf16, #tpu.memory_space<vmem>>, vector<12x600xbf16>
    tpu.vector_store %arg14[%c240, %c0_95], %105 {strides = array<i32>} : memref<300x600xbf16, #tpu.memory_space<vmem>>, vector<12x600xbf16>,
    %107 = vector.extract_strided_slice %64 {offsets = [0, 258], sizes = [12, 600], strides = [1, 1]} : vector<12x864xbf16> to vector<12x600xbf16>
    %c252 = arith.constant 252 : index
    %c0_96 = arith.constant 0 : index
    %108 = vector.load %arg14[%c252, %c0_96] : memref<300x600xbf16, #tpu.memory_space<vmem>>, vector<12x600xbf16>
    tpu.vector_store %arg14[%c252, %c0_96], %107 {strides = array<i32>} : memref<300x600xbf16, #tpu.memory_space<vmem>>, vector<12x600xbf16>,
    %109 = vector.extract_strided_slice %64 {offsets = [0, 260], sizes = [12, 600], strides = [1, 1]} : vector<12x864xbf16> to vector<12x600xbf16>
    %c264 = arith.constant 264 : index
    %c0_97 = arith.constant 0 : index
    %110 = vector.load %arg14[%c264, %c0_97] : memref<300x600xbf16, #tpu.memory_space<vmem>>, vector<12x600xbf16>
    tpu.vector_store %arg14[%c264, %c0_97], %109 {strides = array<i32>} : memref<300x600xbf16, #tpu.memory_space<vmem>>, vector<12x600xbf16>,
    %111 = vector.extract_strided_slice %64 {offsets = [0, 262], sizes = [12, 600], strides = [1, 1]} : vector<12x864xbf16> to vector<12x600xbf16>
    %c276 = arith.constant 276 : index
    %c0_98 = arith.constant 0 : index
    %112 = vector.load %arg14[%c276, %c0_98] : memref<300x600xbf16, #tpu.memory_space<vmem>>, vector<12x600xbf16>
    tpu.vector_store %arg14[%c276, %c0_98], %111 {strides = array<i32>} : memref<300x600xbf16, #tpu.memory_space<vmem>>, vector<12x600xbf16>,
    %113 = vector.extract_strided_slice %64 {offsets = [0, 264], sizes = [12, 600], strides = [1, 1]} : vector<12x864xbf16> to vector<12x600xbf16>
    %c288 = arith.constant 288 : index
    %c0_99 = arith.constant 0 : index
    %114 = vector.load %arg14[%c288, %c0_99] : memref<300x600xbf16, #tpu.memory_space<vmem>>, vector<12x600xbf16>
    tpu.vector_store %arg14[%c288, %c0_99], %113 {strides = array<i32>} : memref<300x600xbf16, #tpu.memory_space<vmem>>, vector<12x600xbf16>,
    %c0_100 = arith.constant 0 : index
    %c0_101 = arith.constant 0 : index
    %115 = vector.load %arg3[%c0_100, %c0_101] : memref<32x300xbf16, #tpu.memory_space<vmem>>, vector<32x300xbf16>
    %c0_102 = arith.constant 0 : index
    %c0_103 = arith.constant 0 : index
    %116 = vector.load %arg14[%c0_102, %c0_103] : memref<300x600xbf16, #tpu.memory_space<vmem>>, vector<300x600xbf16>
    %cst_104 = arith.constant dense<0.000000e+00> : vector<32x600xf32>
    %117 = tpu.matmul %115, %116, %cst_104 {dimension_numbers = #tpu.dot_dimension_numbers<[1], [0], [0], [1], [0, 0, 1, 1], [], []>} : vector<32x300xbf16>, vector<300x600xbf16>, vector<32x600xf32> -> vector<32x600xf32>
    %c0_105 = arith.constant 0 : index
    %c0_106 = arith.constant 0 : index
    %118 = vector.load %arg4[%c0_105, %c0_106] : memref<32x1xf32, #tpu.memory_space<vmem>>, vector<32x1xf32>
    %119 = vector.broadcast %118 : vector<32x1xf32> to vector<32x600xf32>
    %120 = arith.addf %117, %119 : vector<32x600xf32>
    %121 = vector.extract_strided_slice %120 {offsets = [0, 0], sizes = [32, 596], strides = [1, 1]} : vector<32x600xf32> to vector<32x596xf32>
    %122 = vector.extract_strided_slice %120 {offsets = [0, 2], sizes = [32, 596], strides = [1, 1]} : vector<32x600xf32> to vector<32x596xf32>
    %123 = arith.maximumf %121, %122 : vector<32x596xf32>
    %124 = vector.extract_strided_slice %123 {offsets = [0, 0], sizes = [32, 532], strides = [1, 1]} : vector<32x596xf32> to vector<32x532xf32>
    %125 = vector.extract_strided_slice %123 {offsets = [0, 64], sizes = [32, 532], strides = [1, 1]} : vector<32x596xf32> to vector<32x532xf32>
    %126 = arith.maximumf %124, %125 : vector<32x532xf32>
    %cst_107 = arith.constant 0.000000e+00 : f32
    %127 = vector.broadcast %cst_107 : f32 to vector<32x532xf32>
    %128 = arith.maximumf %126, %127 : vector<32x532xf32>
    %129 = arith.truncf %128 : vector<32x532xf32> to vector<32x532xbf16>
    %c0_108 = arith.constant 0 : index
    %c0_109 = arith.constant 0 : index
    %130 = vector.load %arg5[%c0_108, %c0_109] : memref<532x25xbf16, #tpu.memory_space<vmem>>, vector<532x25xbf16>
    %cst_110 = arith.constant dense<0.000000e+00> : vector<32x25xf32>
    %131 = tpu.matmul %129, %130, %cst_110 {dimension_numbers = #tpu.dot_dimension_numbers<[1], [0], [0], [1], [0, 0, 1, 1], [], []>} : vector<32x532xbf16>, vector<532x25xbf16>, vector<32x25xf32> -> vector<32x25xf32>
    %132 = arith.truncf %131 : vector<32x25xf32> to vector<32x25xbf16>
    %133 = vector.extract_strided_slice %132 {offsets = [0, 0], sizes = [2, 25], strides = [1, 1]} : vector<32x25xbf16> to vector<2x25xbf16>
    %c0_111 = arith.constant 0 : index
    %c0_112 = arith.constant 0 : index
    %134 = vector.load %arg15[%c0_111, %c0_112] : memref<2x400xbf16, #tpu.memory_space<vmem>>, vector<2x25xbf16>
    tpu.vector_store %arg15[%c0_111, %c0_112], %133 {strides = array<i32>} : memref<2x400xbf16, #tpu.memory_space<vmem>>, vector<2x25xbf16>,
    %135 = vector.extract_strided_slice %132 {offsets = [2, 0], sizes = [2, 25], strides = [1, 1]} : vector<32x25xbf16> to vector<2x25xbf16>
    %c0_113 = arith.constant 0 : index
    %c25 = arith.constant 25 : index
    %136 = vector.load %arg15[%c0_113, %c25] : memref<2x400xbf16, #tpu.memory_space<vmem>>, vector<2x25xbf16>
    tpu.vector_store %arg15[%c0_113, %c25], %135 {strides = array<i32>} : memref<2x400xbf16, #tpu.memory_space<vmem>>, vector<2x25xbf16>,
    %137 = vector.extract_strided_slice %132 {offsets = [4, 0], sizes = [2, 25], strides = [1, 1]} : vector<32x25xbf16> to vector<2x25xbf16>
    %c0_114 = arith.constant 0 : index
    %c50 = arith.constant 50 : index
    %138 = vector.load %arg15[%c0_114, %c50] : memref<2x400xbf16, #tpu.memory_space<vmem>>, vector<2x25xbf16>
    tpu.vector_store %arg15[%c0_114, %c50], %137 {strides = array<i32>} : memref<2x400xbf16, #tpu.memory_space<vmem>>, vector<2x25xbf16>,
    %139 = vector.extract_strided_slice %132 {offsets = [6, 0], sizes = [2, 25], strides = [1, 1]} : vector<32x25xbf16> to vector<2x25xbf16>
    %c0_115 = arith.constant 0 : index
    %c75 = arith.constant 75 : index
    %140 = vector.load %arg15[%c0_115, %c75] : memref<2x400xbf16, #tpu.memory_space<vmem>>, vector<2x25xbf16>
    tpu.vector_store %arg15[%c0_115, %c75], %139 {strides = array<i32>} : memref<2x400xbf16, #tpu.memory_space<vmem>>, vector<2x25xbf16>,
    %141 = vector.extract_strided_slice %132 {offsets = [8, 0], sizes = [2, 25], strides = [1, 1]} : vector<32x25xbf16> to vector<2x25xbf16>
    %c0_116 = arith.constant 0 : index
    %c100_117 = arith.constant 100 : index
    %142 = vector.load %arg15[%c0_116, %c100_117] : memref<2x400xbf16, #tpu.memory_space<vmem>>, vector<2x25xbf16>
    tpu.vector_store %arg15[%c0_116, %c100_117], %141 {strides = array<i32>} : memref<2x400xbf16, #tpu.memory_space<vmem>>, vector<2x25xbf16>,
    %143 = vector.extract_strided_slice %132 {offsets = [10, 0], sizes = [2, 25], strides = [1, 1]} : vector<32x25xbf16> to vector<2x25xbf16>
    %c0_118 = arith.constant 0 : index
    %c125 = arith.constant 125 : index
    %144 = vector.load %arg15[%c0_118, %c125] : memref<2x400xbf16, #tpu.memory_space<vmem>>, vector<2x25xbf16>
    tpu.vector_store %arg15[%c0_118, %c125], %143 {strides = array<i32>} : memref<2x400xbf16, #tpu.memory_space<vmem>>, vector<2x25xbf16>,
    %145 = vector.extract_strided_slice %132 {offsets = [12, 0], sizes = [2, 25], strides = [1, 1]} : vector<32x25xbf16> to vector<2x25xbf16>
    %c0_119 = arith.constant 0 : index
    %c150 = arith.constant 150 : index
    %146 = vector.load %arg15[%c0_119, %c150] : memref<2x400xbf16, #tpu.memory_space<vmem>>, vector<2x25xbf16>
    tpu.vector_store %arg15[%c0_119, %c150], %145 {strides = array<i32>} : memref<2x400xbf16, #tpu.memory_space<vmem>>, vector<2x25xbf16>,
    %147 = vector.extract_strided_slice %132 {offsets = [14, 0], sizes = [2, 25], strides = [1, 1]} : vector<32x25xbf16> to vector<2x25xbf16>
    %c0_120 = arith.constant 0 : index
    %c175 = arith.constant 175 : index
    %148 = vector.load %arg15[%c0_120, %c175] : memref<2x400xbf16, #tpu.memory_space<vmem>>, vector<2x25xbf16>
    tpu.vector_store %arg15[%c0_120, %c175], %147 {strides = array<i32>} : memref<2x400xbf16, #tpu.memory_space<vmem>>, vector<2x25xbf16>,
    %149 = vector.extract_strided_slice %132 {offsets = [16, 0], sizes = [2, 25], strides = [1, 1]} : vector<32x25xbf16> to vector<2x25xbf16>
    %c0_121 = arith.constant 0 : index
    %c200 = arith.constant 200 : index
    %150 = vector.load %arg15[%c0_121, %c200] : memref<2x400xbf16, #tpu.memory_space<vmem>>, vector<2x25xbf16>
    tpu.vector_store %arg15[%c0_121, %c200], %149 {strides = array<i32>} : memref<2x400xbf16, #tpu.memory_space<vmem>>, vector<2x25xbf16>,
    %151 = vector.extract_strided_slice %132 {offsets = [18, 0], sizes = [2, 25], strides = [1, 1]} : vector<32x25xbf16> to vector<2x25xbf16>
    %c0_122 = arith.constant 0 : index
    %c225 = arith.constant 225 : index
    %152 = vector.load %arg15[%c0_122, %c225] : memref<2x400xbf16, #tpu.memory_space<vmem>>, vector<2x25xbf16>
    tpu.vector_store %arg15[%c0_122, %c225], %151 {strides = array<i32>} : memref<2x400xbf16, #tpu.memory_space<vmem>>, vector<2x25xbf16>,
    %153 = vector.extract_strided_slice %132 {offsets = [20, 0], sizes = [2, 25], strides = [1, 1]} : vector<32x25xbf16> to vector<2x25xbf16>
    %c0_123 = arith.constant 0 : index
    %c250 = arith.constant 250 : index
    %154 = vector.load %arg15[%c0_123, %c250] : memref<2x400xbf16, #tpu.memory_space<vmem>>, vector<2x25xbf16>
    tpu.vector_store %arg15[%c0_123, %c250], %153 {strides = array<i32>} : memref<2x400xbf16, #tpu.memory_space<vmem>>, vector<2x25xbf16>,
    %155 = vector.extract_strided_slice %132 {offsets = [22, 0], sizes = [2, 25], strides = [1, 1]} : vector<32x25xbf16> to vector<2x25xbf16>
    %c0_124 = arith.constant 0 : index
    %c275 = arith.constant 275 : index
    %156 = vector.load %arg15[%c0_124, %c275] : memref<2x400xbf16, #tpu.memory_space<vmem>>, vector<2x25xbf16>
    tpu.vector_store %arg15[%c0_124, %c275], %155 {strides = array<i32>} : memref<2x400xbf16, #tpu.memory_space<vmem>>, vector<2x25xbf16>,
    %157 = vector.extract_strided_slice %132 {offsets = [24, 0], sizes = [2, 25], strides = [1, 1]} : vector<32x25xbf16> to vector<2x25xbf16>
    %c0_125 = arith.constant 0 : index
    %c300 = arith.constant 300 : index
    %158 = vector.load %arg15[%c0_125, %c300] : memref<2x400xbf16, #tpu.memory_space<vmem>>, vector<2x25xbf16>
    tpu.vector_store %arg15[%c0_125, %c300], %157 {strides = array<i32>} : memref<2x400xbf16, #tpu.memory_space<vmem>>, vector<2x25xbf16>,
    %159 = vector.extract_strided_slice %132 {offsets = [26, 0], sizes = [2, 25], strides = [1, 1]} : vector<32x25xbf16> to vector<2x25xbf16>
    %c0_126 = arith.constant 0 : index
    %c325 = arith.constant 325 : index
    %160 = vector.load %arg15[%c0_126, %c325] : memref<2x400xbf16, #tpu.memory_space<vmem>>, vector<2x25xbf16>
    tpu.vector_store %arg15[%c0_126, %c325], %159 {strides = array<i32>} : memref<2x400xbf16, #tpu.memory_space<vmem>>, vector<2x25xbf16>,
    %161 = vector.extract_strided_slice %132 {offsets = [28, 0], sizes = [2, 25], strides = [1, 1]} : vector<32x25xbf16> to vector<2x25xbf16>
    %c0_127 = arith.constant 0 : index
    %c350 = arith.constant 350 : index
    %162 = vector.load %arg15[%c0_127, %c350] : memref<2x400xbf16, #tpu.memory_space<vmem>>, vector<2x25xbf16>
    tpu.vector_store %arg15[%c0_127, %c350], %161 {strides = array<i32>} : memref<2x400xbf16, #tpu.memory_space<vmem>>, vector<2x25xbf16>,
    %163 = vector.extract_strided_slice %132 {offsets = [30, 0], sizes = [2, 25], strides = [1, 1]} : vector<32x25xbf16> to vector<2x25xbf16>
    %c0_128 = arith.constant 0 : index
    %c375 = arith.constant 375 : index
    %164 = vector.load %arg15[%c0_128, %c375] : memref<2x400xbf16, #tpu.memory_space<vmem>>, vector<2x25xbf16>
    tpu.vector_store %arg15[%c0_128, %c375], %163 {strides = array<i32>} : memref<2x400xbf16, #tpu.memory_space<vmem>>, vector<2x25xbf16>,
    %c0_129 = arith.constant 0 : index
    %c0_130 = arith.constant 0 : index
    %165 = vector.load %arg15[%c0_129, %c0_130] : memref<2x400xbf16, #tpu.memory_space<vmem>>, vector<2x400xbf16>
    %c0_131 = arith.constant 0 : index
    %c0_132 = arith.constant 0 : index
    %166 = vector.load %arg6[%c0_131, %c0_132] : memref<400x120xbf16, #tpu.memory_space<vmem>>, vector<400x120xbf16>
    %cst_133 = arith.constant dense<0.000000e+00> : vector<2x120xf32>
    %167 = tpu.matmul %165, %166, %cst_133 {dimension_numbers = #tpu.dot_dimension_numbers<[1], [0], [0], [1], [0, 0, 1, 1], [], []>} : vector<2x400xbf16>, vector<400x120xbf16>, vector<2x120xf32> -> vector<2x120xf32>
    %c0_134 = arith.constant 0 : index
    %c0_135 = arith.constant 0 : index
    %168 = vector.load %arg7[%c0_134, %c0_135] : memref<1x120xf32, #tpu.memory_space<vmem>>, vector<1x120xf32>
    %169 = vector.broadcast %168 : vector<1x120xf32> to vector<2x120xf32>
    %170 = arith.addf %167, %169 : vector<2x120xf32>
    %cst_136 = arith.constant 0.000000e+00 : f32
    %171 = vector.broadcast %cst_136 : f32 to vector<2x120xf32>
    %172 = arith.maximumf %170, %171 : vector<2x120xf32>
    %173 = arith.truncf %172 : vector<2x120xf32> to vector<2x120xbf16>
    %c0_137 = arith.constant 0 : index
    %c0_138 = arith.constant 0 : index
    %174 = vector.load %arg8[%c0_137, %c0_138] : memref<120x84xbf16, #tpu.memory_space<vmem>>, vector<120x84xbf16>
    %cst_139 = arith.constant dense<0.000000e+00> : vector<2x84xf32>
    %175 = tpu.matmul %173, %174, %cst_139 {dimension_numbers = #tpu.dot_dimension_numbers<[1], [0], [0], [1], [0, 0, 1, 1], [], []>} : vector<2x120xbf16>, vector<120x84xbf16>, vector<2x84xf32> -> vector<2x84xf32>
    %c0_140 = arith.constant 0 : index
    %c0_141 = arith.constant 0 : index
    %176 = vector.load %arg9[%c0_140, %c0_141] : memref<1x84xf32, #tpu.memory_space<vmem>>, vector<1x84xf32>
    %177 = vector.broadcast %176 : vector<1x84xf32> to vector<2x84xf32>
    %178 = arith.addf %175, %177 : vector<2x84xf32>
    %cst_142 = arith.constant 0.000000e+00 : f32
    %179 = vector.broadcast %cst_142 : f32 to vector<2x84xf32>
    %180 = arith.maximumf %178, %179 : vector<2x84xf32>
    %181 = arith.truncf %180 : vector<2x84xf32> to vector<2x84xbf16>
    %c0_143 = arith.constant 0 : index
    %c0_144 = arith.constant 0 : index
    %182 = vector.load %arg10[%c0_143, %c0_144] : memref<84x10xbf16, #tpu.memory_space<vmem>>, vector<84x10xbf16>
    %cst_145 = arith.constant dense<0.000000e+00> : vector<2x10xf32>
    %183 = tpu.matmul %181, %182, %cst_145 {dimension_numbers = #tpu.dot_dimension_numbers<[1], [0], [0], [1], [0, 0, 1, 1], [], []>} : vector<2x84xbf16>, vector<84x10xbf16>, vector<2x10xf32> -> vector<2x10xf32>
    %c0_146 = arith.constant 0 : index
    %c0_147 = arith.constant 0 : index
    %184 = vector.load %arg11[%c0_146, %c0_147] : memref<1x10xf32, #tpu.memory_space<vmem>>, vector<1x10xf32>
    %185 = vector.broadcast %184 : vector<1x10xf32> to vector<2x10xf32>
    %186 = arith.addf %183, %185 : vector<2x10xf32>
    %cst_148 = arith.constant dense<0xFF800000> : vector<2xf32>
    %187 = vector.multi_reduction <maximumf>, %186, %cst_148 [1] : vector<2x10xf32> to vector<2xf32>
    %188 = vector.shape_cast %187 : vector<2xf32> to vector<2x1xf32>
    %189 = vector.broadcast %188 : vector<2x1xf32> to vector<2x10xf32>
    %190 = arith.subf %186, %189 : vector<2x10xf32>
    %191 = math.exp %190 : vector<2x10xf32>
    %cst_149 = arith.constant dense<0.000000e+00> : vector<2xf32>
    %192 = vector.multi_reduction <add>, %191, %cst_149 [1] : vector<2x10xf32> to vector<2xf32>
    %193 = vector.shape_cast %192 : vector<2xf32> to vector<2x1xf32>
    %194 = math.log %193 : vector<2x1xf32>
    %195 = vector.broadcast %194 : vector<2x1xf32> to vector<2x10xf32>
    %196 = arith.subf %190, %195 : vector<2x10xf32>
    %c0_150 = arith.constant 0 : index
    %c0_151 = arith.constant 0 : index
    %197 = vector.load %arg12[%c0_150, %c0_151] : memref<2x10xf32, #tpu.memory_space<vmem>>, vector<2x10xf32>
    tpu.vector_store %arg12[%c0_150, %c0_151], %196 {strides = array<i32>} : memref<2x10xf32, #tpu.memory_space<vmem>>, vector<2x10xf32>,
    return
  }
}

</mosaic_0001>

<bundles_post_ra>
// kernel: lenet_forward.1
= control target key start
LH: loop header
LB: loop body
LE: loop exit
PB: predicated region body
PF: predicated region fallthrough
CT: control target
= control target key end

     0   :  { %s6871_s27 = smov 28   ;;  %s10362_s28 = smov 127   ;;  %s10301_s0 = inlined_call_operand.vmem [shape: bf16[6,1280], index: 0, kind: input, shape index: {}]   ;;  %s10302_s1 = inlined_call_operand.vmem [shape: bf16[12,150], index: 1, kind: input, shape index: {}]   ;;  %s10303_s2 = inlined_call_operand.vmem [shape: f32[12,1], index: 2, kind: input, shape index: {}]   ;;  %s10304_s3 = inlined_call_operand.vmem [shape: bf16[32,300], index: 3, kind: input, shape index: {}]   ;;  %s10305_s4 = inlined_call_operand.vmem [shape: f32[32,1], index: 4, kind: input, shape index: {}]   ;;  %s10306_s5 = inlined_call_operand.vmem [shape: bf16[532,25], index: 5, kind: input, shape index: {}]   ;;  %s10307_s6 = inlined_call_operand.vmem [shape: bf16[400,120], index: 6, kind: input, shape index: {}]   ;;  %s10308_s7 = inlined_call_operand.vmem [shape: f32[1,120], index: 7, kind: input, shape index: {}]   ;;  %s10309_s8 = inlined_call_operand.vmem [shape: bf16[120,84], index: 8, kind: input, shape index: {}]   ;;  %s10310_s9 = inlined_call_operand.vmem [shape: f32[1,84], index: 9, kind: input, shape index: {}]   ;;  %s10311_s10 = inlined_call_operand.vmem [shape: bf16[84,10], index: 10, kind: input, shape index: {}]   ;;  %s10312_s11 = inlined_call_operand.vmem [shape: f32[1,10], index: 11, kind: input, shape index: {}]   ;;  %s10313_s12 = inlined_call_operand.hbm [shape: f32[2,10], index: 12, kind: output, shape index: {}]  }
   0x1   :  { %v1239_v0 = vld [vmem:[%s10301_s0 + $0x8] sm:$0x77]  ;;  %v1157_v6 = vld [vmem:[%s10301_s0 + $0x10] sm:$0x77]  ;;  %s6873_s17 = smov 29  }
   0x2   :  { %v6979_v1 = vld [vmem:[%s10301_s0 + $0xc] sm:$0x77]  ;;  %v1249_v2 = vrot.slane %v1239_v0, 7  ;;  %v6998_v9 = vld [vmem:[%s10301_s0 + $0x14] sm:$0x77]  ;;  %v1167_v10 = vrot.slane %v1157_v6, 6 }
   0x3   :  { %v1304_v3 = vrot.slane %v6979_v1, 5  ;;  %v1156_v4 = vld [vmem:[%s10301_s0 + $0x8] sm:$0x77]  ;;  %v1240_v8 = vld [vmem:[%s10301_s0 + $0x10] sm:$0x77]  ;;  %v1305_v12 = vrot.slane %v6998_v9, 5 }
   0x4   :  { %v1166_v5 = vrot.slane %v1156_v4, 6  ;;  %1255 = vrot.lane.b32.xlu1 %v1249_v2, %s6871_s27  ;;  %v1250_v11 = vrot.slane %v1240_v8, 7  ;;  %v1172_v13 = vrot.slane %v1167_v10, 4  ;;  %v1155_v14 = vld [vmem:[%s10301_s0] sm:$0x77] }
   0x5   :  { %1315 = vrot.lane.b32.xlu2 %v1304_v3, %s10362_s28 }
   0x6   :  { %v1171_v7 = vrot.slane %v1166_v5, 4 }
   0x8   :  { %1187 = vrot.lane.b32.xlu0 %v1171_v7, %s6873_s17 }
   0xc   :  { %1257 = vrot.lane.b32.xlu1 %v1250_v11, %s6871_s27 }
   0xd   :  { %1317 = vrot.lane.b32.xlu2 %v1305_v12, %s10362_s28 }
   0xe   :  { %17 = vsyncpa [#allocation6], 0  ;;  %v1238_v15 = vld [vmem:[%s10301_s0] sm:$0x77]  ;;  %v1165_v17 = vrot.slane %v1155_v14, 6  ;;  %s6874_s14 = smov 31  }
   0xf   :  { %v7015_v16 = vld [vmem:[%s10301_s0 + $0x4] sm:$0x77]  ;;  %v1248_v18 = vrot.slane %v1238_v15, 7  ;;  %v1032_v23 = vld [vmem:[%s10301_s0 + $0x10] sm:$0x77]  ;;  %s6875_s15 = smov 30  }
  0x10   :  { %1189 = vrot.lane.b32.xlu0 %v1172_v13, %s6873_s17  ;;  %v1303_v19 = vrot.slane %v7015_v16, 5  ;;  %v1170_v20 = vrot.slane %v1165_v17, 4  ;;  %v1073_v21 = vld [vmem:[%s10301_s0 + $0x8] sm:$0x77]  ;;  %v1074_v24 = vld [vmem:[%s10301_s0 + $0x10] sm:$0x77] }
  0x11   :  { %v1083_v22 = vrot.slane %v1073_v21, 5  ;;  %v1031_v25 = vld [vmem:[%s10301_s0 + $0x8] sm:$0x77]  ;;  %v1084_v26 = vrot.slane %v1074_v24, 5  ;;  %s10354_s21 = smov 124   ;;  %s6877_s16 = smov 61  }
  0x12   :  { %v1503_v29 = vld [vmem:[%s10301_s0 + $0x4] sm:$0x77]  ;;  %v1504_v34 = vld [vmem:[%s10301_s0 + $0xc] sm:$0x77]  ;;  %s6878_s25 = smov 60   ;;  %s10356_s18 = smov 32  }
  0x13   :  { %v1088_v27 = vrot.slane %v1083_v22, 4  ;;  %v1089_v28 = vrot.slane %v1084_v26, 4  ;;  %v1072_v30 = vld [vmem:[%s10301_s0] sm:$0x77]  ;;  %v7057_v33 = vld [vmem:[%s10301_s0 + $0x8] sm:$0x77] }
  0x14   :  { %1253 = vrot.lane.b32.xlu1 %v1248_v18, %s6871_s27  ;;  %v1082_v31 = vrot.slane %v1072_v30, 5  ;;  %v1030_v32 = vld [vmem:[%s10301_s0] sm:$0x77]  ;;  %v828_v35 = vrot.slane %v7057_v33, 5  ;;  %v7073_v38 = vld [vmem:[%s10301_s0 + $0x10] sm:$0x77] }
  0x15   :  { %1313 = vrot.lane.b32.xlu2 %v1303_v19, %s10362_s28  ;;  %v901_v39 = vld [vmem:[%s10301_s0 + $0x8] sm:$0x77]  ;;  %v902_v40 = vld [vmem:[%s10301_s0 + $0x10] sm:$0x77]  ;;  %v829_v41 = vrot.slane %v7073_v38, 5  ;;  %s10322_s13 = smov 64  }
  0x16   :  { %v833_v36 = vrot.slane %v828_v35, 4  ;;  %v1087_v37 = vrot.slane %v1082_v31, 4  ;;  %v911_v42 = vrot.slane %v901_v39, 6  ;;  %v912_v43 = vrot.slane %v902_v40, 6  ;;  %v984_v45 = vld [vmem:[%s10301_s0 + $0x8] sm:$0x77] }
  0x17   :  { %v834_v44 = vrot.slane %v829_v41, 4  ;;  %v994_v47 = vrot.slane %v984_v45, 7  ;;  %v7094_v48 = vld [vmem:[%s10301_s0] sm:$0x77]  ;;  %v985_v54 = vld [vmem:[%s10301_s0 + $0x10] sm:$0x77] }
  0x18   :  { %1185 = vrot.lane.b32.xlu0 %v1170_v20, %s6873_s17  ;;  %v917_v46 = vrot.slane %v912_v43, 4  ;;  %v916_v49 = vrot.slane %v911_v42, 4  ;;  %v827_v50 = vrot.slane %v7094_v48, 5  ;;  %v900_v51 = vld [vmem:[%s10301_s0] sm:$0x77]  ;;  %v995_v56 = vrot.slane %v985_v54, 7 }
  0x19   :  { %v910_v53 = vrot.slane %v900_v51, 6  ;;  %v7111_v55 = vld [vmem:[%s10301_s0 + $0x8] sm:$0x77]  ;;  %v983_v58 = vld [vmem:[%s10301_s0] sm:$0x77]  ;;  %s10316_s19 = smov 63  }
  0x1a   :  { %v832_v52 = vrot.slane %v827_v50, 4  ;;  %v656_v57 = vrot.slane %v7111_v55, 6  ;;  %v993_v59 = vrot.slane %v983_v58, 7  ;;  %v7127_v62 = vld [vmem:[%s10301_s0 + $0x10] sm:$0x77]  ;;  %vm101_vm0 = vcmask 1043456  }
  0x1b   :  { %v915_v61 = vrot.slane %v910_v53, 4  ;;  %v729_v63 = vld [vmem:[%s10301_s0 + $0x8] sm:$0x77]  ;;  %v730_v0 = vld [vmem:[%s10301_s0 + $0x10] sm:$0x77]  ;;  %v657_v4 = vrot.slane %v7127_v62, 6 }
  0x1c   :  { %1044 = vrot.lane.b32.xlu1 %v1032_v23, %s6874_s14  ;;  %v661_v60 = vrot.slane %v656_v57, 4  ;;  %v740_v6 = vrot.slane %v730_v0, 7  ;;  %v1286_v8 = vld [vmem:[%s10301_s0 + $0xc] sm:$0x77]  ;;  %v1285_v11 = vld [vmem:[%s10301_s0 + $0x4] sm:$0x77] }
  0x1d   :  { %1094 = vrot.lane.b32.xlu2 %v1083_v22, %s6875_s15  ;;  %v662_v7 = vrot.slane %v657_v4, 4  ;;  %1290 = vst [vmem:[#allocation2 + $0x1e8] sm:$0x77] %v1286_v8  ;;  %vm103_vm1 = vcmask 1039360   ;;  %s10314_s26 = smov 62   ;;  %v1309_v23 = vrot.slane %v1304_v3, 4 }
  0x1e   :  { %1289 = vst [vmem:[#allocation2 + $0x1e0] sm:$0x77] %v1285_v11  ;;  %v776_v20 = vld [vmem:[%s10301_s0 + $0x8] sm:$0x77]  ;;  %v1308_v24 = vrot.slane %v1303_v19, 4  ;;  %s10364_s29 = smov 126  }
  0x1f   :  { %v1376_v1 = vld [vmem:[%s10301_s0 + $0xc] sm:$0x77]  ;;  %vm1269_vm2 = vcmask 228352   ;;  %vm1206_vm3 = vcmask 236544   ;;  %s6884_s24 = smov 125   ;;  %vm1123_vm4 = vcmask 244736  }
  0x20   :  { %1042 = vrot.lane.b32.xlu0 %v1031_v25, %s6874_s14  ;;  %v1386_v19 = vrot.slane %v1376_v1, 6  ;;  %v1458_v33 = vld [vmem:[%s10301_s0 + $0xc] sm:$0x77]  ;;  %vm1056_vm5 = vcmask 252928   ;;  %s10320_s22 = smov 93   ;;  %s10318_s23 = smov 92  }
  0x21   :  { %v1468_v38 = vrot.slane %v1458_v33, 7  ;;  %v7319_v62 = vld [vmem:[%s10301_s0 + $0x8] sm:$0x77]  ;;  %vm291_vm6 = vcmask 1014784   ;;  %vm951_vm7 = vcmask 490496   ;;  %vm2027_vm8 = vcmask 1042432  }
  0x22   :  { %vm868_vm9 = vcmask 498688   ;;  %s10326_s20 = smov 95   ;;  %vm10339_vm10 = vcmask 261120   ;;  %vm10338_vm11 = vcmask 515072   ;;  %vm10347_vm12 = vcmask 523264   ;;  %s10394_s30 = smov 63  }
  0x23   :  { %vm10381_vm13 = vcmask 506880   ;;  %vm186_vm14 = vcmask 1031168   ;;  %vm10392_vm15 = vcmask 1022976  }
  0x24   :  { %1104 = vrot.lane.b32.xlu1 %v1088_v27, %s6875_s15 }
  0x25   :  { %1106 = vrot.lane.b32.xlu2 %v1089_v28, %s6875_s15 }
  0x28   :  { %1096 = vrot.lane.b32.xlu0 %v1084_v26, %s6875_s15  ;;  %v1375_v26 = vld [vmem:[%s10301_s0 + $0x4] sm:$0x77] }
  0x29   :  { %v1385_v28 = vrot.slane %v1375_v26, 6 }
  0x2c   :  { %1179 = vrot.lane.b32.xlu1 %v1167_v10, %s6873_s17 }
  0x2d   :  { %1513 = vrot.lane.b32.xlu2 %v1503_v29, %s10354_s21  ;;  %v1390_v29 = vrot.slane %v1385_v28, 4 }
  0x30   :  { %1177 = vrot.lane.b32.xlu0 %v1166_v5, %s6873_s17  ;;  %v739_v5 = vrot.slane %v729_v63, 7 }
  0x34   :  { %1040 = vrot.lane.b32.xlu1 %v1030_v32, %s6874_s14  ;;  %v1457_v32 = vld [vmem:[%s10301_s0 + $0x4] sm:$0x77] }
  0x35   :  { %1092 = vrot.lane.b32.xlu2 %v1082_v31, %s6875_s15 }
  0x38   :  { %1515 = vrot.lane.b32.xlu0 %v1504_v34, %s10354_s21 }
  0x3c   :  { %1175 = vrot.lane.b32.xlu1 %v1165_v17, %s6873_s17  ;;  %v777_v17 = vld [vmem:[%s10301_s0 + $0x10] sm:$0x77] }
  0x3d   :  { %849 = vrot.lane.b32.xlu2 %v833_v36, %s6877_s16 }
  0x40   :  { %1102 = vrot.lane.b32.xlu0 %v1087_v37, %s6875_s15  ;;  %v1467_v37 = vrot.slane %v1457_v32, 7 }
  0x44   :  { %922 = vrot.lane.b32.xlu1 %v911_v42, %s6878_s25 }
  0x45   :  { %924 = vrot.lane.b32.xlu2 %v912_v43, %s6878_s25 }
  0x48   :  { %851 = vrot.lane.b32.xlu0 %v834_v44, %s6877_s16  ;;  %v1391_v44 = vrot.slane %v1386_v19, 4 }
  0x4c   :  { %934 = vrot.lane.b32.xlu1 %v917_v46, %s6878_s25  ;;  %v7214_v46 = vld [vmem:[%s10301_s0] sm:$0x77] }
  0x4d   :  { %1000 = vrot.lane.b32.xlu2 %v994_v47, %s10356_s18  ;;  %v655_v54 = vrot.slane %v7214_v46, 6 }
  0x4f   :  { %v660_v0 = vrot.slane %v655_v54, 4 }
  0x50   :  { %932 = vrot.lane.b32.xlu0 %v916_v49, %s6878_s25  ;;  %v728_v49 = vld [vmem:[%s10301_s0] sm:$0x77] }
  0x54   :  { %847 = vrot.lane.b32.xlu1 %v832_v52, %s6877_s16 }
  0x55   :  { %920 = vrot.lane.b32.xlu2 %v910_v53, %s6878_s25 }
  0x58   :  { %1002 = vrot.lane.b32.xlu0 %v995_v56, %s10356_s18  ;;  %v738_v56 = vrot.slane %v728_v49, 7 }
  0x5c   :  { %998 = vrot.lane.b32.xlu1 %v993_v59, %s10356_s18 }
  0x5d   :  { %677 = vrot.lane.b32.xlu2 %v661_v60, %s10322_s13  ;;  %v775_v60 = vld [vmem:[%s10301_s0] sm:$0x77] }
  0x5f   :  { %v1316_v2 = vpop.permute.xlu2 %1315 }
  0x60   :  { %930 = vrot.lane.b32.xlu0 %v915_v61, %s6878_s25  ;;  %v1334_v10 = vrot.slane %v1316_v2, 4 }
  0x64   :  { %745 = vrot.lane.b32.xlu1 %v739_v5, %s10316_s19 }
  0x65   :  { %747 = vrot.lane.b32.xlu2 %v740_v6, %s10316_s19 }
  0x67   :  { %v7147_v13 = vpop.permute.xlu2 %1317 }
  0x68   :  { %679 = vrot.lane.b32.xlu0 %v662_v7, %s10322_s13  ;;  %v10360_v14 = vrot.slane %v7147_v13, 4 }
  0x6a   :  { %v1345_v15 = vsel %vm101_vm0, %v1334_v10, %v10360_v14 }
  0x6b   :  { %v1346_v18 = vsel %vm103_vm1, %v1316_v2, %v1345_v15  ;;  %v563_v15 = vld [vmem:[%s10301_s0 + $0x8] sm:$0x77] }
  0x6c   :  { %1368 = vst [vmem:[#allocation2 + $0x1e8] sm:$0x88] %v1346_v18  ;;  %789 = vrot.lane.b32.xlu1 %v777_v17, %s10314_s26 }
  0x6d   :  { %839 = vrot.lane.b32.xlu2 %v828_v35, %s6877_s16 }
  0x6f   :  { %v1314_v21 = vpop.permute.xlu2 %1313 }
  0x70   :  { %787 = vrot.lane.b32.xlu0 %v776_v20, %s10314_s26  ;;  %v1333_v22 = vrot.slane %v1314_v21, 4  ;;  %v521_v20 = vld [vmem:[%s10301_s0 + $0x8] sm:$0x77] }
  0x72   :  { %v1343_v25 = vsel %vm101_vm0, %v1333_v22, %v1334_v10 }
  0x73   :  { %v1344_v27 = vsel %vm103_vm1, %v1314_v21, %v1343_v25  ;;  %v522_v21 = vld [vmem:[%s10301_s0 + $0x10] sm:$0x77] }
  0x74   :  { %1367 = vst [vmem:[#allocation2 + $0x1e0] sm:$0x88] %v1344_v27  ;;  %1323 = vrot.lane.b32.xlu1 %v1308_v24, %s10362_s28  ;;  %v573_v24 = vrot.slane %v563_v15, 5 }
  0x75   :  { %1325 = vrot.lane.b32.xlu2 %v1309_v23, %s10362_s28 }
  0x76   :  { %v1256_v3 = vpop.permute.xlu1 %1255 }
  0x77   :  { %v7180_v16 = vpop.permute.xlu2 %1094  ;;  %v1264_v31 = vrot.slane %v1256_v3, 4 }
  0x78   :  { %841 = vrot.lane.b32.xlu0 %v829_v41, %s6877_s16  ;;  %v1113_v5 = vrot.slane %v7180_v16, 4 }
  0x7a   :  { %v1188_v30 = vpop.permute.xlu0 %1187 }
  0x7b   :  { %v1201_v41 = vrot.slane %v1188_v30, 4  ;;  %v6440_v26 = vld [vmem:[#allocation2 + $0x1dc] sm:$0xf0]  ;;  %v5611_v27 = vld [vmem:[#allocation2 + $0x1e0] sm:$0xf0] }
  0x7c   :  { %1397 = vrot.lane.b32.xlu1 %v1386_v19, %s10364_s29 }
  0x7d   :  { %1405 = vrot.lane.b32.xlu2 %v1390_v29, %s10364_s29 }
  0x7e   :  { %v7193_v34 = vpop.permute.xlu1 %1257 }
  0x7f   :  { %v7195_v35 = vpop.permute.xlu2 %1106  ;;  %v1265_v36 = vrot.slane %v7193_v34, 4 }
  0x80   :  { %1395 = vrot.lane.b32.xlu0 %v1385_v28, %s10364_s29  ;;  %v564_v28 = vld [vmem:[%s10301_s0 + $0x10] sm:$0x77]  ;;  %v10352_v1 = vrot.slane %v7195_v35, 4 }
  0x81   :  { %v1271_v39 = vsel %vm101_vm0, %v1264_v31, %v1265_v36 }
  0x82   :  { %v7202_v40 = vpop.permute.xlu0 %1189  ;;  %v1272_v43 = vsel %vm1269_vm2, %v1256_v3, %v1271_v39  ;;  %v578_v39 = vrot.slane %v573_v24, 4 }
  0x83   :  { %v1202_v42 = vrot.slane %v7202_v40, 4  ;;  %1282 = vst [vmem:[#allocation2 + $0x1c8] sm:$0xee] %v1272_v43 }
  0x84   :  { %1472 = vrot.lane.b32.xlu1 %v1467_v37, %s6884_s24 }
  0x85   :  { %v1216_v45 = vsel %vm101_vm0, %v1201_v41, %v1202_v42  ;;  %1474 = vrot.lane.b32.xlu2 %v1468_v38, %s6884_s24  ;;  %v574_v38 = vrot.slane %v564_v28, 5 }
  0x86   :  { %v1217_v47 = vsel %vm1206_vm3, %v1188_v30, %v1216_v45  ;;  %v1254_v51 = vpop.permute.xlu1 %1253 }
  0x87   :  { %1235 = vst [vmem:[#allocation2 + $0x1c8] sm:$0x11] %v1217_v47  ;;  %v7220_v52 = vpop.permute.xlu2 %1513  ;;  %v1263_v53 = vrot.slane %v1254_v51, 4 }
  0x88   :  { %1407 = vrot.lane.b32.xlu0 %v1391_v44, %s10364_s29 }
  0x89   :  { %v1268_v58 = vsel %vm101_vm0, %v1263_v53, %v1264_v31 }
  0x8a   :  { %v1186_v59 = vpop.permute.xlu0 %1185  ;;  %v1270_v61 = vsel %vm1269_vm2, %v1254_v51, %v1268_v58 }
  0x8b   :  { %v1200_v63 = vrot.slane %v1186_v59, 4  ;;  %1281 = vst [vmem:[#allocation2 + $0x1c0] sm:$0xee] %v1270_v61 }
  0x8c   :  { %743 = vrot.lane.b32.xlu1 %v738_v56, %s10316_s19  ;;  %v562_v56 = vld [vmem:[%s10301_s0] sm:$0x77]  ;;  %s6887_s19 = smov 96  }
  0x8d   :  { %v1214_v2 = vsel %vm101_vm0, %v1200_v63, %v1201_v41  ;;  %785 = vrot.lane.b32.xlu2 %v775_v60, %s10314_s26  ;;  %v572_v60 = vrot.slane %v562_v56, 5 }
  0x8e   :  { %v1215_v6 = vsel %vm1206_vm3, %v1186_v59, %v1214_v2  ;;  %v7236_v7 = vpop.permute.xlu1 %1044  ;;  %v579_v59 = vrot.slane %v574_v38, 4 }
  0x8f   :  { %1234 = vst [vmem:[#allocation2 + $0x1c0] sm:$0x11] %v1215_v6  ;;  %v1093_v8 = vpop.permute.xlu2 %1092  ;;  %v1052_v11 = vrot.slane %v7236_v7, 4  ;;  %v577_v6 = vrot.slane %v572_v60, 4 }
  0x90   :  { %675 = vrot.lane.b32.xlu0 %v660_v0, %s10322_s13  ;;  %v1112_v10 = vrot.slane %v1093_v8, 4 }
  0x92   :  { %v1122_v17 = vsel %vm101_vm0, %v1112_v10, %v1113_v5  ;;  %v7244_v18 = vpop.permute.xlu0 %1042 }
  0x93   :  { %v1124_v22 = vsel %vm1123_vm4, %v1093_v8, %v1122_v17  ;;  %v1051_v23 = vrot.slane %v7244_v18, 4  ;;  %v520_v17 = vld [vmem:[%s10301_s0] sm:$0x77] }
  0x94   :  { %1147 = vst [vmem:[#allocation2 + $0x180] sm:$0x88] %v1124_v22  ;;  %532 = vrot.lane.b32.xlu1 %v521_v20, %s10320_s22 }
  0x95   :  { %v1058_v25 = vsel %vm101_vm0, %v1051_v23, %v1052_v11  ;;  %534 = vrot.lane.b32.xlu2 %v522_v21, %s10320_s22 }
  0x96   :  { %v1059_v3 = vsel %vm1056_vm5, %v7244_v18, %v1058_v25  ;;  %v5609_v19 = vld [vmem:[#allocation2 + $0x1c0] sm:$0xf]  ;;  %v6436_v29 = vld [vmem:[#allocation2 + $0x1c4] sm:$0xf]  ;;  %v7265_v30 = vpop.permute.xlu1 %1104  ;;  %v318_v18 = vrot.slane %v7319_v62, 5 }
  0x97   :  { %1069 = vst [vmem:[#allocation2 + $0x188] sm:$0x77] %v1059_v3  ;;  %v7267_v31 = vpop.permute.xlu2 %849  ;;  %v5610_v32 = vor.u32 %v6440_v26, %v5609_v19  ;;  %v5614_v33 = vor.u32 %v6436_v29, %v5611_v27  ;;  %v1118_v37 = vrot.slane %v7265_v30, 4  ;;  %v391_v3 = vld [vmem:[%s10301_s0 + $0x8] sm:$0x77] }
  0x98   :  { %837 = vrot.lane.b32.xlu0 %v827_v50, %s6877_s16  ;;  %v323_v25 = vrot.slane %v318_v18, 4  ;;  %v863_v56 = vrot.slane %v7267_v31, 4  ;;  %v218_v62 = vld [vmem:[%s10301_s0] sm:$0x77] }
  0x99   :  { %2052 = vmatpush.bf16.msra.mxu0 %v5610_v32  ;;  %2080 = vmatpush.bf16.msra.mxu2 %v5614_v33  ;;  %v1133_v41 = vsel %vm101_vm0, %v1118_v37, %v10352_v1  ;;  %v401_v32 = vrot.slane %v391_v3, 6  ;;  %v475_v3 = vld [vmem:[%s10301_s0 + $0x10] sm:$0x77] }
  0x9a   :  { %v7278_v43 = vpop.permute.xlu0 %1096  ;;  %v1134_v44 = vsel %vm1123_vm4, %v7265_v30, %v1133_v41 }
  0x9b   :  { %v10337_v45 = vrot.slane %v7278_v43, 4  ;;  %1152 = vst [vmem:[#allocation2 + $0x1a8] sm:$0x33] %v1134_v44  ;;  %v392_v44 = vld [vmem:[%s10301_s0 + $0x10] sm:$0x77] }
  0x9c   :  { %586 = vrot.lane.b32.xlu1 %v574_v38, %s10318_s23 }
  0x9d   :  { %v1125_v48 = vsel %vm101_vm0, %v1113_v5, %v10337_v45  ;;  %594 = vrot.lane.b32.xlu2 %v578_v39, %s10318_s23  ;;  %v1523_v5 = vrot.slane %v7220_v52, 4 }
  0x9e   :  { %v1126_v50 = vsel %vm1123_vm4, %v7180_v16, %v1125_v48  ;;  %v7290_v47 = vpop.permute.xlu1 %1179 }
  0x9f   :  { %1148 = vst [vmem:[#allocation2 + $0x188] sm:$0x88] %v1126_v50  ;;  %v7292_v49 = vpop.permute.xlu2 %924  ;;  %v1197_v51 = vrot.slane %v7290_v47, 4 }
  0xa0   :  { %584 = vrot.lane.b32.xlu0 %v573_v24, %s10318_s23  ;;  %v10336_v33 = vrot.slane %v7292_v49, 4 }
  0xa2   :  { %v1178_v53 = vpop.permute.xlu0 %1177 }
  0xa3   :  { %v1196_v58 = vrot.slane %v1178_v53, 4 }
  0xa4   :  { %667 = vrot.lane.b32.xlu1 %v656_v57, %s10322_s13 }
  0xa5   :  { %v1208_v16 = vsel %vm101_vm0, %v1196_v58, %v1197_v51  ;;  %669 = vrot.lane.b32.xlu2 %v657_v4, %s10322_s13  ;;  %v7324_v4 = vld [vmem:[%s10301_s0 + $0x10] sm:$0x77] }
  0xa6   :  { %v1209_v61 = vsel %vm1206_vm3, %v1178_v53, %v1208_v16  ;;  %v1041_v63 = vpop.permute.xlu1 %1040  ;;  %v319_v20 = vrot.slane %v7324_v4, 5  ;;  %v402_v16 = vrot.slane %v392_v44, 6 }
  0xa7   :  { %1231 = vst [vmem:[#allocation2 + $0x1a8] sm:$0xcc] %v1209_v61  ;;  %v7309_v0 = vpop.permute.xlu2 %1000  ;;  %v1050_v2 = vrot.slane %v1041_v63, 4 }
  0xa8   :  { %596 = vrot.lane.b32.xlu0 %v579_v59, %s10318_s23  ;;  %v324_v26 = vrot.slane %v319_v20, 4 }
  0xa9   :  { %v1055_v55 = vsel %vm101_vm0, %v1050_v2, %v1051_v23  ;;  %v406_v2 = vrot.slane %v401_v32, 4 }
  0xaa   :  { %v7314_v57 = vpop.permute.xlu0 %1515  ;;  %v1057_v8 = vsel %vm1056_vm5, %v1041_v63, %v1055_v55 }
  0xab   :  { %v10359_v10 = vrot.slane %v7314_v57, 4  ;;  %1068 = vst [vmem:[#allocation2 + $0x180] sm:$0x77] %v1057_v8 }
  0xac   :  { %582 = vrot.lane.b32.xlu1 %v572_v60, %s10318_s23 }
  0xad   :  { %v1528_v15 = vsel %vm101_vm0, %v1523_v5, %v10359_v10  ;;  %592 = vrot.lane.b32.xlu2 %v577_v6, %s10318_s23  ;;  %s10395_s23 = smov 62  }
  0xae   :  { %v1529_v21 = vsel %vm291_vm6, %v7220_v52, %v1528_v15  ;;  %v1176_v22 = vpop.permute.xlu1 %1175 }
  0xaf   :  { %1540 = vst [vmem:[#allocation2 + $0x240] sm:$0x77] %v1529_v21  ;;  %v921_v23 = vpop.permute.xlu2 %920  ;;  %v1195_v24 = vrot.slane %v1176_v22, 4 }
  0xb0   :  { %530 = vrot.lane.b32.xlu0 %v520_v17, %s10320_s22  ;;  %v940_v38 = vrot.slane %v921_v23, 4  ;;  %v474_v17 = vld [vmem:[%s10301_s0 + $0x8] sm:$0x77]  ;;  %s10324_s22 = smov 94  }
  0xb1   :  { %v1205_v27 = vsel %vm101_vm0, %v1195_v24, %v1196_v58 }
  0xb2   :  { %v1103_v28 = vpop.permute.xlu0 %1102  ;;  %v1207_v52 = vsel %vm1206_vm3, %v1176_v22, %v1205_v27  ;;  %v5577_v15 = vld [vmem:[#allocation2 + $0x180] sm:$0xf] }
  0xb3   :  { %v1117_v19 = vrot.slane %v1103_v28, 4  ;;  %1230 = vst [vmem:[#allocation2 + $0x1a0] sm:$0xcc] %v1207_v52  ;;  %v484_v52 = vrot.slane %v474_v17, 7 }
  0xb4   :  { %339 = vrot.lane.b32.xlu1 %v323_v25, %s6887_s19 }
  0xb5   :  { %v1131_v29 = vsel %vm101_vm0, %v1117_v19, %v1118_v37  ;;  %341 = vrot.lane.b32.xlu2 %v324_v26, %s6887_s19 }
  0xb6   :  { %v1132_v39 = vsel %vm1123_vm4, %v1103_v28, %v1131_v29  ;;  %v1618_v41 = vld [vmem:[#allocation2 + $0x240] sm:$0x77]  ;;  %v923_v30 = vpop.permute.xlu1 %922  ;;  %v485_v29 = vrot.slane %v475_v3, 7 }
  0xb7   :  { %1151 = vst [vmem:[#allocation2 + $0x1a0] sm:$0x33] %v1132_v39  ;;  %v7360_v48 = vpop.permute.xlu2 %677  ;;  %v1863_v37 = vunpack.c.l.b16 %v1618_v41  ;;  %v1864_v50 = vunpack.c.h.b16 %v1618_v41  ;;  %v941_v53 = vrot.slane %v923_v30, 4  ;;  %v390_v39 = vld [vmem:[%s10301_s0] sm:$0x77]  ;;  %v407_v41 = vrot.slane %v402_v16, 4 }
  0xb8   :  { %665 = vrot.lane.b32.xlu0 %v655_v54, %s10322_s13  ;;  %s10396_s13 = smov 64  }
  0xb9   :  { %v1943_v58 = vpack.c.b16 %v1863_v37, %v1863_v37  ;;  %v1944_v59 = vpack.c.b16 %v1864_v50, %v1864_v50  ;;  %v950_v60 = vsel %vm101_vm0, %v940_v38, %v941_v53  ;;  %v953_v61 = vsel %vm101_vm0, %v941_v53, %v10336_v33 }
  0xba   :  { %v7370_v63 = vpop.permute.xlu0 %851  ;;  %v952_v5 = vsel %vm951_vm7, %v921_v23, %v950_v60  ;;  %v954_v46 = vsel %vm951_vm7, %v923_v30, %v953_v61  ;;  %v6428_v23 = vld [vmem:[#allocation2 + $0x184] sm:$0xf]  ;;  %v400_v37 = vrot.slane %v390_v39, 6 }
  0xbb   :  { %v10334_v54 = vrot.slane %v7370_v63, 4  ;;  %v2029_v6 = vsel %vm2027_vm8, %v1943_v58, 0  ;;  %975 = vst [vmem:[#allocation2 + $0x140] sm:$0xcc] %v952_v5  ;;  %v2032_v55 = vsel %vm2027_vm8, %v1944_v59, 0 }
  0xbc   :  { %2072 = vmatpush.bf16.msra.mxu1 %v2029_v6  ;;  %976 = vst [vmem:[#allocation2 + $0x148] sm:$0xcc] %v954_v46  ;;  %2100 = vmatpush.bf16.msra.mxu3 %v2032_v55  ;;  %v7421_v5 = vld [vmem:[%s10301_s0 + $0x8] sm:$0x77]  ;;  %v7428_v55 = vld [vmem:[%s10301_s0 + $0x10] sm:$0x77] }
  0xbd   :  { %v878_v8 = vsel %vm101_vm0, %v863_v56, %v10334_v54  ;;  %414 = vrot.lane.b32.xlu1 %v402_v16, %s10326_s20  ;;  %422 = vrot.lane.b32.xlu2 %v406_v2, %s10326_s20  ;;  %v1009_v16 = vrot.slane %v7309_v0, 4  ;;  %v405_v2 = vrot.slane %v400_v37, 4 }
  0xbe   :  { %v879_v21 = vsel %vm868_vm9, %v7267_v31, %v878_v8  ;;  %v6432_v22 = vld [vmem:[#allocation2 + $0x19c] sm:$0xf0]  ;;  %v5579_v24 = vld [vmem:[#allocation2 + $0x1a0] sm:$0xf0]  ;;  %v7387_v25 = vpop.permute.xlu1 %934 }
  0xbf   :  { %897 = vst [vmem:[#allocation2 + $0x148] sm:$0x33] %v879_v21  ;;  %v7389_v26 = vpop.permute.xlu2 %747  ;;  %v5578_v27 = vor.u32 %v6432_v22, %v5577_v15  ;;  %v5582_v28 = vor.u32 %v6428_v23, %v5579_v24  ;;  %v947_v31 = vrot.slane %v7387_v25, 4  ;;  %v146_v15 = vrot.slane %v7421_v5, 6 }
  0xc0   :  { %412 = vrot.lane.b32.xlu0 %v401_v32, %s10326_s20  ;;  %v7406_v32 = vld [vmem:[%s10301_s0] sm:$0x77]  ;;  %v147_v21 = vrot.slane %v7428_v55, 6 }
  0xc1   :  { %2053 = vmatpush.bf16.msra.mxu0 %v5578_v27  ;;  %2081 = vmatpush.bf16.msra.mxu2 %v5582_v28  ;;  %v317_v59 = vrot.slane %v7406_v32, 5  ;;  %v151_v27 = vrot.slane %v146_v15, 4  ;;  %v473_v28 = vld [vmem:[%s10301_s0] sm:$0x77] }
  0xc2   :  { %v933_v19 = vpop.permute.xlu0 %932  ;;  %v483_v39 = vrot.slane %v473_v28, 7 }
  0xc3   :  { %v946_v38 = vrot.slane %v933_v19, 4 }
  0xc5   :  { %v961_v44 = vsel %vm101_vm0, %v946_v38, %v947_v31  ;;  %490 = vrot.lane.b32.xlu1 %v484_v52, %s10324_s22  ;;  %492 = vrot.lane.b32.xlu2 %v485_v29, %s10324_s22 }
  0xc6   :  { %v962_v30 = vsel %vm951_vm7, %v933_v19, %v961_v44  ;;  %v848_v50 = vpop.permute.xlu1 %847  ;;  %v10330_v44 = vrot.slane %v7389_v26, 4 }
  0xc7   :  { %980 = vst [vmem:[#allocation2 + $0x168] sm:$0x11] %v962_v30  ;;  %v7410_v53 = vpop.permute.xlu2 %839  ;;  %v862_v58 = vrot.slane %v848_v50, 4 }
  0xc8   :  { %424 = vrot.lane.b32.xlu0 %v407_v41, %s10326_s20 }
  0xc9   :  { %v876_v60 = vsel %vm101_vm0, %v862_v58, %v863_v56  ;;  %v322_v56 = vrot.slane %v317_v59, 4 }
  0xca   :  { %v7416_v61 = vpop.permute.xlu0 %1002  ;;  %v877_v46 = vsel %vm868_vm9, %v848_v50, %v876_v60 }
  0xcb   :  { %v10333_v6 = vrot.slane %v7416_v61, 4  ;;  %896 = vst [vmem:[#allocation2 + $0x140] sm:$0x33] %v877_v46 }
  0xcd   :  { %v1016_v8 = vsel %vm101_vm0, %v1009_v16, %v10333_v6  ;;  %410 = vrot.lane.b32.xlu1 %v400_v37, %s10326_s20  ;;  %420 = vrot.lane.b32.xlu2 %v405_v2, %s10326_s20  ;;  %v220_v37 = vld [vmem:[%s10301_s0 + $0x10] sm:$0x77]  ;;  %v219_v2 = vld [vmem:[%s10301_s0 + $0x8] sm:$0x77]  ;;  %s10404_s20 = smov 126  }
  0xce   :  { %v1017_v17 = vsel %vm10339_vm10, %v7309_v0, %v1016_v8  ;;  %v999_v22 = vpop.permute.xlu1 %998  ;;  %v152_v0 = vrot.slane %v147_v21, 4  ;;  %v230_v60 = vrot.slane %v220_v37, 7 }
  0xcf   :  { %1027 = vst [vmem:[#allocation2 + $0x168] sm:$0xee] %v1017_v17  ;;  %v7441_v23 = vpop.permute.xlu2 %1325  ;;  %v1008_v24 = vrot.slane %v999_v22, 4 }
  0xd0   :  { %337 = vrot.lane.b32.xlu0 %v322_v56, %s6887_s19 }
  0xd1   :  { %v1013_v3 = vsel %vm101_vm0, %v1008_v24, %v1009_v16  ;;  %v691_v16 = vrot.slane %v7360_v48, 4  ;;  %v229_v24 = vrot.slane %v219_v2, 7 }
  0xd2   :  { %v931_v52 = vpop.permute.xlu0 %930  ;;  %v1015_v19 = vsel %vm10339_vm10, %v999_v22, %v1013_v3  ;;  %v266_v22 = vld [vmem:[%s10301_s0 + $0x8] sm:$0x77]  ;;  %vm10343_vm10 = vcmask 752640  }
  0xd3   :  { %v945_v29 = vrot.slane %v931_v52, 4  ;;  %1026 = vst [vmem:[#allocation2 + $0x160] sm:$0xee] %v1015_v19  ;;  %v5545_v28 = vld [vmem:[#allocation2 + $0x140] sm:$0xf] }
  0xd5   :  { %v959_v41 = vsel %vm101_vm0, %v945_v29, %v946_v38  ;;  %167 = vrot.lane.b32.xlu1 %v151_v27, %s10364_s29  ;;  %169 = vrot.lane.b32.xlu2 %v152_v0, %s10364_s29  ;;  %v6420_v0 = vld [vmem:[#allocation2 + $0x144] sm:$0xf] }
  0xd6   :  { %v960_v30 = vsel %vm951_vm7, %v931_v52, %v959_v41  ;;  %v7461_v50 = vpop.permute.xlu1 %745 }
  0xd7   :  { %979 = vst [vmem:[#allocation2 + $0x160] sm:$0x11] %v960_v30  ;;  %v7463_v58 = vpop.permute.xlu2 %1405  ;;  %v754_v38 = vrot.slane %v7461_v50, 4 }
  0xd8   :  { %488 = vrot.lane.b32.xlu0 %v483_v39, %s10324_s22  ;;  %s10398_s22 = smov 92  }
  0xd9   :  { %v761_v46 = vsel %vm101_vm0, %v754_v38, %v10330_v44 }
  0xda   :  { %v7476_v56 = vpop.permute.xlu0 %679  ;;  %v762_v8 = vsel %vm10338_vm11, %v7461_v50, %v761_v46 }
  0xdb   :  { %v10329_v17 = vrot.slane %v7476_v56, 4  ;;  %772 = vst [vmem:[#allocation2 + $0x108] sm:$0xee] %v762_v8  ;;  %v267_v8 = vld [vmem:[%s10301_s0 + $0x10] sm:$0x77] }
  0xdd   :  { %v706_v27 = vsel %vm101_vm0, %v691_v16, %v10329_v17  ;;  %237 = vrot.lane.b32.xlu1 %v230_v60, %s6884_s24  ;;  %277 = vrot.lane.b32.xlu2 %v266_v22, %s10354_s21  ;;  %v7511_v22 = vld [vmem:[%s10301_s0] sm:$0x77] }
  0xde   :  { %v707_v3 = vsel %vm10347_vm12, %v7360_v48, %v706_v27  ;;  %v6424_v52 = vld [vmem:[#allocation2 + $0x15c] sm:$0xf0]  ;;  %v5547_v19 = vld [vmem:[#allocation2 + $0x160] sm:$0xf0]  ;;  %v7493_v29 = vpop.permute.xlu1 %789  ;;  %v6441_v48 = vld [vmem:[#allocation2 + $0x1e4] sm:$0xf0] }
  0xdf   :  { %725 = vst [vmem:[#allocation2 + $0x108] sm:$0x11] %v707_v3  ;;  %v7495_v39 = vpop.permute.xlu2 %1474  ;;  %v5546_v41 = vor.u32 %v6424_v52, %v5545_v28  ;;  %v5550_v30 = vor.u32 %v6420_v0, %v5547_v19  ;;  %v10335_v37 = vrot.slane %v7493_v29, 4  ;;  %v145_v0 = vrot.slane %v7511_v22, 6  ;;  %v903_v22 = vld [vmem:[%s10301_s0 + $0x18] sm:$0x77] }
  0xe0   :  { %235 = vrot.lane.b32.xlu0 %v229_v24, %s6884_s24  ;;  %v10353_v24 = vrot.slane %v7441_v23, 4  ;;  %v858_v19 = vrot.slane %v7410_v53, 4 }
  0xe1   :  { %2054 = vmatpush.bf16.msra.mxu0 %v5546_v41  ;;  %2082 = vmatpush.bf16.msra.mxu2 %v5550_v30  ;;  %v228_v41 = vrot.slane %v218_v62, 7  ;;  %v150_v62 = vrot.slane %v145_v0, 4 }
  0xe2   :  { %v788_v60 = vpop.permute.xlu0 %787 }
  0xe3   :  { %v796_v2 = vrot.slane %v788_v60, 4 }
  0xe5   :  { %v803_v46 = vsel %vm101_vm0, %v796_v2, %v10335_v37  ;;  %329 = vrot.lane.b32.xlu1 %v318_v18, %s6887_s19  ;;  %331 = vrot.lane.b32.xlu2 %v319_v20, %s6887_s19 }
  0xe6   :  { %v804_v27 = vsel %vm10381_vm13, %v788_v60, %v803_v46  ;;  %v1324_v18 = vpop.permute.xlu1 %1323 }
  0xe7   :  { %814 = vst [vmem:[#allocation2 + $0x128] sm:$0x77] %v804_v27  ;;  %v786_v28 = vpop.permute.xlu2 %785  ;;  %v1338_v3 = vrot.slane %v1324_v18, 4  ;;  %v265_v27 = vld [vmem:[%s10301_s0] sm:$0x77] }
  0xe8   :  { %279 = vrot.lane.b32.xlu0 %v267_v8, %s10354_s21  ;;  %v795_v52 = vrot.slane %v786_v28, 4 }
  0xe9   :  { %v1351_v4 = vsel %vm101_vm0, %v1338_v3, %v10353_v24 }
  0xea   :  { %v800_v20 = vsel %vm101_vm0, %v795_v52, %v796_v2  ;;  %v7528_v30 = vpop.permute.xlu0 %841  ;;  %v1352_v60 = vsel %vm103_vm1, %v1324_v18, %v1351_v4  ;;  %v53_v4 = vld [vmem:[%s10301_s0 + $0x10] sm:$0x77] }
  0xeb   :  { %v802_v46 = vsel %vm10381_vm13, %v786_v28, %v800_v20  ;;  %v10328_v8 = vrot.slane %v7528_v30, 4  ;;  %1371 = vst [vmem:[#allocation2 + $0x200] sm:$0x33] %v1352_v60  ;;  %v52_v28 = vld [vmem:[%s10301_s0 + $0x8] sm:$0x77] }
  0xec   :  { %813 = vst [vmem:[#allocation2 + $0x120] sm:$0x77] %v802_v46  ;;  %v62_v20 = vrot.slane %v52_v28, 5  ;;  %v63_v46 = vrot.slane %v53_v4, 5  ;;  %v1420_v4 = vrot.slane %v7463_v58, 4 }
  0xed   :  { %v870_v2 = vsel %vm101_vm0, %v858_v19, %v10328_v8  ;;  %233 = vrot.lane.b32.xlu1 %v228_v41, %s6884_s24  ;;  %275 = vrot.lane.b32.xlu2 %v265_v27, %s10354_s21 }
  0xee   :  { %v871_v18 = vsel %vm868_vm9, %v7410_v53, %v870_v2  ;;  %v7550_v3 = vpop.permute.xlu1 %1397 }
  0xef   :  { %893 = vst [vmem:[#allocation2 + $0x128] sm:$0x88] %v871_v18  ;;  %v7552_v52 = vpop.permute.xlu2 %534  ;;  %v10331_v41 = vrot.slane %v7550_v3, 4  ;;  %v10341_v18 = vrot.slane %v7495_v39, 4 }
  0xf0   :  { %165 = vrot.lane.b32.xlu0 %v150_v62, %s10364_s29 }
  0xf2   :  { %v1396_v60 = vpop.permute.xlu0 %1395 }
  0xf3   :  { %v1415_v27 = vrot.slane %v1396_v60, 4 }
  0xf5   :  { %v1425_v2 = vsel %vm101_vm0, %v1415_v27, %v10331_v41  ;;  %73 = vrot.lane.b32.xlu1 %v62_v20, %s10362_s28  ;;  %75 = vrot.lane.b32.xlu2 %v63_v46, %s10362_s28  ;;  %v68_v27 = vrot.slane %v63_v46, 4 }
  0xf6   :  { %v1426_v8 = vsel %vm186_vm14, %v1396_v60, %v1425_v2  ;;  %v1473_v62 = vpop.permute.xlu1 %1472 }
  0xf7   :  { %1449 = vst [vmem:[#allocation2 + $0x200] sm:$0xcc] %v1426_v8  ;;  %v7566_v17 = vpop.permute.xlu2 %594  ;;  %v1482_v28 = vrot.slane %v1473_v62, 4  ;;  %v7580_v8 = vld [vmem:[%s10301_s0 + $0x18] sm:$0x77] }
  0xf8   :  { %327 = vrot.lane.b32.xlu0 %v317_v59, %s6887_s19  ;;  %v67_v59 = vrot.slane %v62_v20, 4  ;;  %v1241_v20 = vld [vmem:[%s10301_s0 + $0x18] sm:$0x77]  ;;  %v608_v6 = vrot.slane %v7566_v17, 4 }
  0xf9   :  { %v1487_v44 = vsel %vm101_vm0, %v1482_v28, %v10341_v18  ;;  %v1168_v28 = vrot.slane %v7580_v8, 6 }
  0xfa   :  { %v7575_v60 = vpop.permute.xlu0 %1407  ;;  %v1488_v2 = vsel %vm10392_vm15, %v1473_v62, %v1487_v44 }
  0xfb   :  { %v10332_v32 = vrot.slane %v7575_v60, 4  ;;  %1499 = vst [vmem:[#allocation2 + $0x220] sm:$0xee] %v1488_v2 }
  0xfd   :  { %v1433_v46 = vsel %vm101_vm0, %v1420_v4, %v10332_v32  ;;  %85 = vrot.lane.b32.xlu1 %v68_v27, %s10362_s28  ;;  %157 = vrot.lane.b32.xlu2 %v146_v15, %s10364_s29  ;;  %v1173_v27 = vrot.slane %v1168_v28, 4  ;;  %v1251_v15 = vrot.slane %v1241_v20, 7  ;;  %v5617_v32 = vld [vmem:[#allocation2 + $0x1c8] sm:$0xf] }
  0xfe   :  { %v1434_v41 = vsel %vm186_vm14, %v7463_v58, %v1433_v46  ;;  %v744_v44 = vpop.permute.xlu1 %743 }
  0xff   :  { %1453 = vst [vmem:[#allocation2 + $0x220] sm:$0x11] %v1434_v41  ;;  %v7594_v62 = vpop.permute.xlu2 %669  ;;  %v753_v4 = vrot.slane %v744_v44, 4  ;;  %v51_v41 = vld [vmem:[%s10301_s0] sm:$0x77] }
 0x100   :  { %83 = vrot.lane.b32.xlu0 %v67_v59, %s10362_s28  ;;  %v10340_v59 = vrot.slane %v7552_v52, 4  ;;  %v61_v20 = vrot.slane %v51_v41, 5  ;;  %v7626_v41 = vld [vmem:[%s10301_s0 + $0x1c] sm:$0x77] }
 0x101   :  { %v758_v58 = vsel %vm101_vm0, %v753_v4, %v754_v38  ;;  %v5641_v38 = vld [vmem:[#allocation2 + $0x200] sm:$0xf] }
 0x102   :  { %v676_v5 = vpop.permute.xlu0 %675  ;;  %v760_v2 = vsel %vm10338_vm11, %v744_v44, %v758_v58  ;;  %v6444_v58 = vld [vmem:[#allocation2 + $0x204] sm:$0xf]  ;;  %vm10344_vm11 = vcmask 760832  }
 0x103   :  { %v690_v46 = vrot.slane %v676_v5, 4  ;;  %771 = vst [vmem:[#allocation2 + $0x100] sm:$0xee] %v760_v2 }
 0x105   :  { %v704_v50 = vsel %vm101_vm0, %v690_v46, %v691_v16  ;;  %1191 = vrot.lane.b32.xlu1 %v1173_v27, %s6873_s17  ;;  %1259 = vrot.lane.b32.xlu2 %v1251_v15, %s6871_s27  ;;  %v6433_v15 = vld [vmem:[#allocation2 + $0x1a4] sm:$0xf0] }
 0x106   :  { %v705_v4 = vsel %vm10347_vm12, %v676_v5, %v704_v50  ;;  %v6448_v44 = vld [vmem:[#allocation2 + $0x21c] sm:$0xf0]  ;;  %v5643_v2 = vld [vmem:[#allocation2 + $0x220] sm:$0xf0]  ;;  %v7617_v54 = vpop.permute.xlu1 %532  ;;  %v5618_v5 = vor.u32 %v6441_v48, %v5617_v32 }
 0x107   :  { %724 = vst [vmem:[#allocation2 + $0x100] sm:$0x11] %v705_v4  ;;  %v593_v37 = vpop.permute.xlu2 %592  ;;  %v5642_v33 = vor.u32 %v6448_v44, %v5641_v38  ;;  %v5646_v45 = vor.u32 %v6444_v58, %v5643_v2  ;;  %v541_v16 = vrot.slane %v7617_v54, 4  ;;  %v5585_v38 = vld [vmem:[#allocation2 + $0x188] sm:$0xf]  ;;  %v1306_v44 = vrot.slane %v7626_v41, 5 }
 0x108   :  { %v607_v27 = vrot.slane %v593_v37, 4  ;;  %159 = vrot.lane.b32.xlu0 %v147_v21, %s10364_s29  ;;  %v5586_v4 = vor.u32 %v6433_v15, %v5585_v38  ;;  %v6425_v2 = vld [vmem:[#allocation2 + $0x164] sm:$0xf0] }
 0x109   :  { %2073 = vmatpush.bf16.msra.mxu1 %v5642_v33  ;;  %2101 = vmatpush.bf16.msra.mxu3 %v5646_v45  ;;  %v548_v46 = vsel %vm101_vm0, %v541_v16, %v10340_v59  ;;  %v66_v45 = vrot.slane %v61_v20, 4 }
 0x10a   :  { %v621_v55 = vsel %vm101_vm0, %v607_v27, %v608_v6  ;;  %v838_v21 = vpop.permute.xlu0 %837  ;;  %v549_v33 = vsel %vm10344_vm11, %v7617_v54, %v548_v46  ;;  %v1505_v46 = vld [vmem:[%s10301_s0 + $0x14] sm:$0x77] }
 0x10b   :  { %v622_v32 = vsel %vm10343_vm10, %v593_v37, %v621_v55  ;;  %v857_v50 = vrot.slane %v838_v21, 4  ;;  %559 = vst [vmem:[#allocation2 + $0xc8] sm:$0x77] %v549_v33  ;;  %v1075_v55 = vld [vmem:[%s10301_s0 + $0x18] sm:$0x77] }
 0x10c   :  { %641 = vst [vmem:[#allocation2 + $0xe0] sm:$0x33] %v622_v32  ;;  %v1033_v33 = vld [vmem:[%s10301_s0 + $0x18] sm:$0x77] }
 0x10d   :  { %2108 = vmatpush.bf16.msrb.mxu1 %v5618_v5  ;;  %v867_v58 = vsel %vm101_vm0, %v857_v50, %v858_v19  ;;  %71 = vrot.lane.b32.xlu1 %v61_v20, %s10362_s28  ;;  %v5553_v5 = vld [vmem:[#allocation2 + $0x148] sm:$0xf]  ;;  %v10349_v50 = vrot.slane %v7594_v62, 4 }
 0x10e   :  { %v869_v48 = vsel %vm868_vm9, %v838_v21, %v867_v58  ;;  %81 = vrot.lane.b32.xlu2 %v66_v45, %s10362_s28  ;;  %v7646_v37 = vpop.permute.xlu1 %586  ;;  %v5554_v53 = vor.u32 %v6425_v2, %v5553_v5  ;;  %v6417_v20 = vld [vmem:[#allocation2 + $0x124] sm:$0xf0]  ;;  %v1085_v58 = vrot.slane %v1075_v55, 5  ;;  %v6412_v5 = vld [vmem:[#allocation2 + $0x104] sm:$0xf] }
 0x10f   :  { %892 = vst [vmem:[#allocation2 + $0x120] sm:$0x88] %v869_v48  ;;  %v7648_v27 = vpop.permute.xlu2 %341  ;;  %v10342_v19 = vrot.slane %v7646_v37, 4  ;;  %v5521_v45 = vld [vmem:[#allocation2 + $0x108] sm:$0xf] }
 0x110   :  { %1319 = vrot.lane.b32.xlu0 %v1306_v44, %s10362_s28  ;;  %v5522_v32 = vor.u32 %v6417_v20, %v5521_v45 }
 0x111   :  { %2109 = vmatpush.bf16.msrb.mxu1 %v5586_v4  ;;  %v5513_v4 = vld [vmem:[#allocation2 + $0x100] sm:$0xf] }
 0x112   :  { %v585_v15 = vpop.permute.xlu0 %584 }
 0x113   :  { %v603_v21 = vrot.slane %v585_v15, 4 }
 0x115   :  { %2110 = vmatpush.bf16.msrb.mxu1 %v5554_v53  ;;  %v615_v38 = vsel %vm101_vm0, %v603_v21, %v10342_v19  ;;  %1517 = vrot.lane.b32.xlu1 %v1505_v46, %s10354_s21 }
 0x116   :  { %v616_v2 = vsel %vm10343_vm10, %v585_v15, %v615_v38  ;;  %1046 = vrot.lane.b32.xlu2 %v1033_v33, %s6874_s14  ;;  %v6416_v48 = vld [vmem:[#allocation2 + $0x11c] sm:$0xf0]  ;;  %v5515_v53 = vld [vmem:[#allocation2 + $0x120] sm:$0xf0]  ;;  %v7670_v20 = vpop.permute.xlu1 %667  ;;  %v1090_v15 = vrot.slane %v1085_v58, 4 }
 0x117   :  { %638 = vst [vmem:[#allocation2 + $0xc8] sm:$0x88] %v616_v2  ;;  %v5514_v45 = vor.u32 %v6416_v48, %v5513_v4  ;;  %v5518_v59 = vor.u32 %v6412_v5, %v5515_v53  ;;  %v686_v18 = vrot.slane %v7670_v20, 4  ;;  %v7673_v19 = vpop.permute.xlu2 %422  ;;  %v913_v4 = vrot.slane %v903_v22, 6 }
 0x118   :  { %155 = vrot.lane.b32.xlu0 %v145_v0, %s10364_s29 }
 0x119   :  { %2111 = vmatpush.bf16.msrb.mxu1 %v5522_v32  ;;  %2055 = vmatpush.bf16.msra.mxu0 %v5514_v45  ;;  %v698_v46 = vsel %vm101_vm0, %v686_v18, %v10349_v50 }
 0x11a   :  { %2083 = vmatpush.bf16.msra.mxu2 %v5518_v59  ;;  %v7683_v55 = vpop.permute.xlu0 %596  ;;  %v699_v33 = vsel %vm10347_vm12, %v7670_v20, %v698_v46  ;;  %v7700_v59 = vld [vmem:[%s10301_s0 + $0x18] sm:$0x77] }
 0x11b   :  { %v10346_v32 = vrot.slane %v7683_v55, 4  ;;  %721 = vst [vmem:[#allocation2 + $0xe8] sm:$0xcc] %v699_v33 }
 0x11d   :  { %v623_v0 = vsel %vm101_vm0, %v608_v6, %v10346_v32  ;;  %1108 = vrot.lane.b32.xlu1 %v1090_v15, %s6875_s15  ;;  %v830_v6 = vrot.slane %v7700_v59, 5  ;;  %v918_v15 = vrot.slane %v913_v4, 4 }
 0x11e   :  { %v624_v38 = vsel %vm10343_vm10, %v7566_v17, %v623_v0  ;;  %1181 = vrot.lane.b32.xlu2 %v1168_v28, %s6873_s17  ;;  %v583_v2 = vpop.permute.xlu1 %582  ;;  %v436_v0 = vrot.slane %v7673_v19, 4 }
 0x11f   :  { %642 = vst [vmem:[#allocation2 + $0xe8] sm:$0x33] %v624_v38  ;;  %v602_v48 = vrot.slane %v583_v2, 4  ;;  %v7707_v5 = vpop.permute.xlu2 %492  ;;  %v835_v8 = vrot.slane %v830_v6, 4 }
 0x120   :  { %1098 = vrot.lane.b32.xlu0 %v1085_v58, %s6875_s15  ;;  %v10345_v58 = vrot.slane %v7648_v27, 4 }
 0x121   :  { %v612_v53 = vsel %vm101_vm0, %v602_v48, %v603_v21  ;;  %v5489_v21 = vld [vmem:[#allocation2 + $0xc8] sm:$0xf]  ;;  %v986_v48 = vld [vmem:[%s10301_s0 + $0x18] sm:$0x77] }
 0x122   :  { %v531_v45 = vpop.permute.xlu0 %530  ;;  %v614_v17 = vsel %vm10343_vm10, %v583_v2, %v612_v53  ;;  %vm358_vm10 = vcmask 785408  }
 0x123   :  { %v540_v46 = vrot.slane %v531_v45, 4  ;;  %637 = vst [vmem:[#allocation2 + $0xc0] sm:$0x88] %v614_v17  ;;  %v1310_v17 = vrot.slane %v1305_v12, 4 }
 0x125   :  { %v545_v28 = vsel %vm101_vm0, %v540_v46, %v541_v16  ;;  %926 = vrot.lane.b32.xlu1 %v913_v4, %s6878_s25  ;;  %v1377_v46 = vld [vmem:[%s10301_s0 + $0x14] sm:$0x77] }
 0x126   :  { %v547_v33 = vsel %vm10344_vm11, %v531_v45, %v545_v28  ;;  %936 = vrot.lane.b32.xlu2 %v918_v15, %s6878_s25  ;;  %v6409_v22 = vld [vmem:[#allocation2 + $0xe4] sm:$0xf0]  ;;  %v7723_v38 = vpop.permute.xlu1 %339  ;;  %v1506_v15 = vld [vmem:[%s10301_s0 + $0x1c] sm:$0x77]  ;;  %vm441_vm11 = vcmask 777216   ;;  %v1387_v12 = vrot.slane %v1377_v46, 6 }
 0x127   :  { %558 = vst [vmem:[#allocation2 + $0xc0] sm:$0x77] %v547_v33  ;;  %v5490_v2 = vor.u32 %v6409_v22, %v5489_v21  ;;  %v353_v54 = vrot.slane %v7723_v38, 4  ;;  %v421_v16 = vpop.permute.xlu2 %420  ;;  %v996_v22 = vrot.slane %v986_v48, 7 }
 0x128   :  { %853 = vrot.lane.b32.xlu0 %v835_v8, %s6877_s16  ;;  %v435_v4 = vrot.slane %v421_v16, 4  ;;  %v1392_v20 = vrot.slane %v1387_v12, 4 }
 0x129   :  { %2112 = vmatpush.bf16.msrb.mxu1 %v5490_v2  ;;  %v368_v53 = vsel %vm101_vm0, %v353_v54, %v10345_v58 }
 0x12a   :  { %v666_v45 = vpop.permute.xlu0 %665  ;;  %v369_v8 = vsel %vm358_vm10, %v7723_v38, %v368_v53  ;;  %v449_v28 = vsel %vm101_vm0, %v435_v4, %v436_v0  ;;  %v565_v38 = vld [vmem:[%s10301_s0 + $0x18] sm:$0x77] }
 0x12b   :  { %v685_v33 = vrot.slane %v666_v45, 4  ;;  %387 = vst [vmem:[#allocation2 + $0x88] sm:$0x33] %v369_v8  ;;  %v450_v21 = vsel %vm441_vm11, %v421_v16, %v449_v28  ;;  %v1459_v16 = vld [vmem:[%s10301_s0 + $0x14] sm:$0x77]  ;;  %v575_v59 = vrot.slane %v565_v38, 5 }
 0x12c   :  { %469 = vst [vmem:[#allocation2 + $0xa0] sm:$0x11] %v450_v21 }
 0x12d   :  { %v695_v9 = vsel %vm101_vm0, %v685_v33, %v686_v18  ;;  %1519 = vrot.lane.b32.xlu1 %v1506_v15, %s10354_s21  ;;  %v1469_v15 = vrot.slane %v1459_v16, 7  ;;  %v7775_v33 = vld [vmem:[%s10301_s0 + $0x18] sm:$0x77]  ;;  %s10401_s21 = smov 32  }
 0x12e   :  { %v697_v2 = vsel %vm10347_vm12, %v666_v45, %v695_v9  ;;  %1327 = vrot.lane.b32.xlu2 %v1310_v17, %s10362_s28  ;;  %v731_v45 = vld [vmem:[%s10301_s0 + $0x18] sm:$0x77]  ;;  %v10350_v17 = vrot.slane %v7707_v5, 4  ;;  %v5481_v28 = vld [vmem:[#allocation2 + $0xc0] sm:$0xf]  ;;  %vm10374_vm12 = vcmask 769024  }
 0x12f   :  { %720 = vst [vmem:[#allocation2 + $0xe0] sm:$0xcc] %v697_v2  ;;  %v7755_v53 = vpop.permute.xlu1 %414  ;;  %v7760_v4 = vpop.permute.xlu2 %169  ;;  %v6404_v9 = vld [vmem:[#allocation2 + $0xc4] sm:$0xf]  ;;  %v658_v50 = vrot.slane %v7775_v33, 6 }
 0x130   :  { %1004 = vrot.lane.b32.xlu0 %v996_v22, %s10356_s18  ;;  %v10348_v18 = vrot.slane %v7755_v53, 4  ;;  %v10357_v1 = vrot.slane %v7760_v4, 4  ;;  %v1460_v33 = vld [vmem:[%s10301_s0 + $0x1c] sm:$0x77] }
 0x132   :  { %v413_v48 = vpop.permute.xlu0 %412 }
 0x133   :  { %v431_v46 = vrot.slane %v413_v48, 4 }
 0x135   :  { %v443_v8 = vsel %vm101_vm0, %v431_v46, %v10348_v18  ;;  %1409 = vrot.lane.b32.xlu1 %v1392_v20, %s10364_s29 }
 0x136   :  { %v444_v21 = vsel %vm441_vm11, %v413_v48, %v443_v8  ;;  %1476 = vrot.lane.b32.xlu2 %v1469_v15, %s6884_s24  ;;  %v6408_v22 = vld [vmem:[#allocation2 + $0xdc] sm:$0xf0]  ;;  %v5483_v2 = vld [vmem:[#allocation2 + $0xe0] sm:$0xf0]  ;;  %v741_v48 = vrot.slane %v731_v45, 7  ;;  %v663_v45 = vrot.slane %v658_v50, 4 }
 0x137   :  { %466 = vst [vmem:[#allocation2 + $0x88] sm:$0xcc] %v444_v21  ;;  %v7779_v16 = vpop.permute.xlu1 %490  ;;  %v5482_v58 = vor.u32 %v6408_v22, %v5481_v28  ;;  %v5486_v32 = vor.u32 %v6404_v9, %v5483_v2  ;;  %v7782_v18 = vpop.permute.xlu2 %277  ;;  %v7796_v28 = vld [vmem:[%s10301_s0 + $0x20] sm:$0x7] }
 0x138   :  { %v499_v20 = vrot.slane %v7779_v16, 4  ;;  %1399 = vrot.lane.b32.xlu0 %v1387_v12, %s10364_s29  ;;  %v1169_v22 = vrot.slane %v7796_v28, 6 }
 0x139   :  { %2056 = vmatpush.bf16.msra.mxu0 %v5482_v58  ;;  %2084 = vmatpush.bf16.msra.mxu2 %v5486_v32  ;;  %v778_v32 = vld [vmem:[%s10301_s0 + $0x18] sm:$0x77] }
 0x13a   :  { %v506_v15 = vsel %vm101_vm0, %v499_v20, %v10350_v17  ;;  %v7791_v8 = vpop.permute.xlu0 %424 }
 0x13b   :  { %v507_v12 = vsel %vm10374_vm12, %v7779_v16, %v506_v15  ;;  %v10351_v58 = vrot.slane %v7791_v8, 4  ;;  %v1242_v15 = vld [vmem:[%s10301_s0 + $0x20] sm:$0x7] }
 0x13c   :  { %517 = vst [vmem:[#allocation2 + $0xa8] sm:$0xee] %v507_v12 }
 0x13d   :  { %v451_v21 = vsel %vm101_vm0, %v436_v0, %v10351_v58  ;;  %749 = vrot.lane.b32.xlu1 %v741_v48, %s10394_s30  ;;  %v1174_v0 = vrot.slane %v1169_v22, 4 }
 0x13e   :  { %v452_v9 = vsel %vm441_vm11, %v7673_v19, %v451_v21  ;;  %791 = vrot.lane.b32.xlu2 %v778_v32, %s10395_s23  ;;  %v1252_v19 = vrot.slane %v1242_v15, 7  ;;  %v5457_v24 = vld [vmem:[#allocation2 + $0x88] sm:$0xf]  ;;  %v286_v15 = vrot.slane %v7782_v18, 4 }
 0x13f   :  { %470 = vst [vmem:[#allocation2 + $0xa8] sm:$0x11] %v452_v9  ;;  %v411_v2 = vpop.permute.xlu1 %410  ;;  %v7819_v17 = vpop.permute.xlu2 %331 }
 0x140   :  { %v430_v12 = vrot.slane %v411_v2, 4  ;;  %681 = vrot.lane.b32.xlu0 %v663_v45, %s10396_s13 }
 0x142   :  { %v440_v48 = vsel %vm101_vm0, %v430_v12, %v431_v46  ;;  %v338_v58 = vpop.permute.xlu0 %337 }
 0x143   :  { %v442_v32 = vsel %vm441_vm11, %v411_v2, %v440_v48  ;;  %v352_v21 = vrot.slane %v338_v58, 4  ;;  %v7846_v48 = vld [vmem:[%s10301_s0 + $0x24] sm:$0x7] }
 0x144   :  { %465 = vst [vmem:[#allocation2 + $0x80] sm:$0xcc] %v442_v32  ;;  %v523_v32 = vld [vmem:[%s10301_s0 + $0x18] sm:$0x77] }
 0x145   :  { %v366_v9 = vsel %vm101_vm0, %v352_v21, %v353_v54  ;;  %1193 = vrot.lane.b32.xlu1 %v1174_v0, %s6873_s17 }
 0x146   :  { %v367_v45 = vsel %vm358_vm10, %v338_v58, %v366_v9  ;;  %1261 = vrot.lane.b32.xlu2 %v1252_v19, %s6871_s27  ;;  %v6401_v46 = vld [vmem:[#allocation2 + $0xa4] sm:$0xf0]  ;;  %s10397_s27 = smov 93  }
 0x147   :  { %386 = vst [vmem:[#allocation2 + $0x80] sm:$0x33] %v367_v45  ;;  %v7834_v2 = vpop.permute.xlu1 %167  ;;  %v5458_v12 = vor.u32 %v6401_v46, %v5457_v24  ;;  %v276_v0 = vpop.permute.xlu2 %275  ;;  %v10358_v46 = vrot.slane %v7846_v48, 5 }
 0x148   :  { %v181_v54 = vrot.slane %v7834_v2, 4  ;;  %843 = vrot.lane.b32.xlu0 %v830_v6, %s6877_s16  ;;  %v285_v58 = vrot.slane %v276_v0, 4 }
 0x149   :  { %2113 = vmatpush.bf16.msrb.mxu1 %v5458_v12 }
 0x14a   :  { %v196_v24 = vsel %vm101_vm0, %v181_v54, %v10357_v1  ;;  %v489_v19 = vpop.permute.xlu0 %488  ;;  %v290_v21 = vsel %vm101_vm0, %v285_v58, %v286_v15 }
 0x14b   :  { %v197_v6 = vsel %vm186_vm14, %v7834_v2, %v196_v24  ;;  %v498_v9 = vrot.slane %v489_v19, 4  ;;  %v292_v45 = vsel %vm291_vm6, %v276_v0, %v290_v21  ;;  %v44_v21 = vld [vmem:[%s10301_s0 + $0x8] sm:$0x77] }
 0x14c   :  { %215 = vst [vmem:[#allocation2 + $0x48] sm:$0x11] %v197_v6  ;;  %v580_v6 = vrot.slane %v575_v59, 4 }
 0x14d   :  { %303 = vst [vmem:[#allocation2 + $0x60] sm:$0x77] %v292_v45  ;;  %v503_v12 = vsel %vm101_vm0, %v498_v9, %v499_v20  ;;  %536 = vrot.lane.b32.xlu1 %v523_v32, %s10397_s27  ;;  %v1311_v20 = vrot.slane %v1306_v44, 4  ;;  %v10361_v9 = vrot.slane %v7819_v17, 4 }
 0x14e   :  { %v505_v38 = vsel %vm10374_vm12, %v489_v19, %v503_v12  ;;  %588 = vrot.lane.b32.xlu2 %v575_v59, %s10398_s22  ;;  %v1378_v19 = vld [vmem:[%s10301_s0 + $0x1c] sm:$0x77]  ;;  %v5449_v41 = vld [vmem:[#allocation2 + $0x80] sm:$0xf]  ;;  %48 = vst [vmem:[#allocation2 + $0x8] sm:$0x77] %v44_v21 }
 0x14f   :  { %516 = vst [vmem:[#allocation2 + $0xa0] sm:$0xee] %v505_v38  ;;  %v7869_v24 = vpop.permute.xlu1 %237  ;;  %v7871_v58 = vpop.permute.xlu2 %75  ;;  %v1388_v44 = vrot.slane %v1378_v19, 6  ;;  %v6396_v38 = vld [vmem:[#allocation2 + $0x84] sm:$0xf]  ;;  %v1470_v21 = vrot.slane %v1460_v33, 7 }
 0x150   :  { %1321 = vrot.lane.b32.xlu0 %v10358_v46, %s10362_s28  ;;  %v10366_v0 = vrot.slane %v7869_v24, 4  ;;  %vm2023_vm12 = vcmask 179200  }
 0x152   :  { %v236_v16 = vpop.permute.xlu0 %235 }
 0x153   :  { %v244_v32 = vrot.slane %v236_v16, 4 }
 0x155   :  { %v251_v45 = vsel %vm101_vm0, %v244_v32, %v10366_v0  ;;  %671 = vrot.lane.b32.xlu1 %v658_v50, %s10396_s13 }
 0x156   :  { %v252_v12 = vsel %vm10392_vm15, %v236_v16, %v251_v45  ;;  %1329 = vrot.lane.b32.xlu2 %v1311_v20, %s10362_s28  ;;  %v6400_v59 = vld [vmem:[#allocation2 + $0x9c] sm:$0xf0]  ;;  %v5451_v1 = vld [vmem:[#allocation2 + $0xa0] sm:$0xf0]  ;;  %v1393_v16 = vrot.slane %v1388_v44, 4 }
 0x157   :  { %262 = vst [vmem:[#allocation2 + $0x48] sm:$0xee] %v252_v12  ;;  %v7894_v46 = vpop.permute.xlu1 %329  ;;  %v5450_v10 = vor.u32 %v6400_v59, %v5449_v41  ;;  %v5454_v14 = vor.u32 %v6396_v38, %v5451_v1  ;;  %v7900_v19 = vpop.permute.xlu2 %157 }
 0x158   :  { %v348_v50 = vrot.slane %v7894_v46, 4  ;;  %598 = vrot.lane.b32.xlu0 %v580_v6, %s10398_s22 }
 0x159   :  { %2057 = vmatpush.bf16.msra.mxu0 %v5450_v10  ;;  %2085 = vmatpush.bf16.msra.mxu2 %v5454_v14  ;;  %v1076_v10 = vld [vmem:[%s10301_s0 + $0x20] sm:$0x7] }
 0x15a   :  { %v360_v20 = vsel %vm101_vm0, %v348_v50, %v10361_v9  ;;  %v7908_v1 = vpop.permute.xlu0 %279  ;;  %v1086_v12 = vrot.slane %v1076_v10, 5  ;;  %v1034_v10 = vld [vmem:[%s10301_s0 + $0x20] sm:$0x7] }
 0x15b   :  { %v361_v45 = vsel %vm358_vm10, %v7894_v46, %v360_v20  ;;  %v10368_v41 = vrot.slane %v7908_v1, 4 }
 0x15c   :  { %383 = vst [vmem:[#allocation2 + $0x68] sm:$0x88] %v361_v45  ;;  %v1091_v9 = vrot.slane %v1086_v12, 4 }
 0x15d   :  { %v293_v14 = vsel %vm101_vm0, %v286_v15, %v10368_v41  ;;  %1411 = vrot.lane.b32.xlu1 %v1393_v16, %s10364_s29 }
 0x15e   :  { %v294_v6 = vsel %vm291_vm6, %v7782_v18, %v293_v14  ;;  %1478 = vrot.lane.b32.xlu2 %v1470_v21, %s6884_s24  ;;  %v7933_v18 = vld [vmem:[%s10301_s0 + $0x18] sm:$0x77]  ;;  %v10367_v14 = vrot.slane %v7871_v58, 4 }
 0x15f   :  { %304 = vst [vmem:[#allocation2 + $0x68] sm:$0x77] %v294_v6  ;;  %v234_v59 = vpop.permute.xlu1 %233  ;;  %v7925_v33 = vpop.permute.xlu2 %1259 }
 0x160   :  { %v243_v38 = vrot.slane %v234_v59, 4  ;;  %1401 = vrot.lane.b32.xlu0 %v1388_v44, %s10364_s29  ;;  %v10369_v20 = vrot.slane %v7925_v33, 4  ;;  %s10411_s29 = smov 127  }
 0x162   :  { %v248_v45 = vsel %vm101_vm0, %v243_v38, %v244_v32  ;;  %v166_v15 = vpop.permute.xlu0 %165  ;;  %v1273_v21 = vsel %vm101_vm0, %v1265_v36, %v10369_v20  ;;  %v320_v36 = vrot.slane %v7933_v18, 5  ;;  %v5425_v38 = vld [vmem:[#allocation2 + $0x48] sm:$0xf]  ;;  %v10407_v18 = vrot.slane %v7195_v35, 4 }
 0x163   :  { %v250_v16 = vsel %vm10392_vm15, %v234_v59, %v248_v45  ;;  %v180_v44 = vrot.slane %v166_v15, 4  ;;  %v1274_v32 = vsel %vm1269_vm2, %v7193_v34, %v1273_v21  ;;  %v43_v59 = vld [vmem:[%s10301_s0] sm:$0x77] }
 0x164   :  { %261 = vst [vmem:[#allocation2 + $0x40] sm:$0xee] %v250_v16 }
 0x165   :  { %1283 = vst [vmem:[#allocation2 + $0x1d0] sm:$0xee] %v1274_v32  ;;  %v194_v6 = vsel %vm101_vm0, %v180_v44, %v181_v54  ;;  %1100 = vrot.lane.b32.xlu1 %v1086_v12, %s6875_s15  ;;  %v393_v54 = vld [vmem:[%s10301_s0 + $0x18] sm:$0x77] }
 0x166   :  { %v195_v34 = vsel %vm186_vm14, %v166_v15, %v194_v6  ;;  %1110 = vrot.lane.b32.xlu2 %v1091_v9, %s6875_s15  ;;  %v6393_v45 = vld [vmem:[#allocation2 + $0x64] sm:$0xf0]  ;;  %47 = vst [vmem:[#allocation2] sm:$0x77] %v43_v59  ;;  %v1287_v12 = vld [vmem:[%s10301_s0 + $0x14] sm:$0x77] }
 0x167   :  { %214 = vst [vmem:[#allocation2 + $0x40] sm:$0x11] %v195_v34  ;;  %v7957_v16 = vpop.permute.xlu1 %73  ;;  %v5426_v2 = vor.u32 %v6393_v45, %v5425_v38  ;;  %v325_v15 = vrot.slane %v320_v36, 4  ;;  %v403_v6 = vrot.slane %v393_v54, 6  ;;  %s10399_s15 = smov 95  }
 0x168   :  { %v92_v21 = vrot.slane %v7957_v16, 4  ;;  %1048 = vrot.lane.b32.xlu0 %v1034_v10, %s6874_s14  ;;  %v82_v9 = vpop.permute.xlu2 %81  ;;  %1291 = vst [vmem:[#allocation2 + $0x1f0] sm:$0x77] %v1287_v12  ;;  %v7979_v10 = vld [vmem:[%s10301_s0 + $0x20] sm:$0x7]  ;;  %s6897_s14 = smov 50  }
 0x169   :  { %2114 = vmatpush.bf16.msrb.mxu1 %v5426_v2  ;;  %v476_v2 = vld [vmem:[%s10301_s0 + $0x18] sm:$0x77]  ;;  %v10370_v54 = vrot.slane %v7979_v10, 5  ;;  %v408_v0 = vrot.slane %v403_v6, 4 }
 0x16a   :  { %v105_v44 = vsel %vm101_vm0, %v92_v21, %v10367_v14  ;;  %v328_v32 = vpop.permute.xlu0 %327 }
 0x16b   :  { %v106_v59 = vsel %vm103_vm1, %v7957_v16, %v105_v44  ;;  %v347_v34 = vrot.slane %v328_v32, 4  ;;  %v268_v16 = vld [vmem:[%s10301_s0 + $0x18] sm:$0x77] }
 0x16c   :  { %128 = vst [vmem:[#allocation2 + $0x8] sm:$0x88] %v106_v59 }
 0x16d   :  { %v357_v38 = vsel %vm101_vm0, %v347_v34, %v348_v50  ;;  %343 = vrot.lane.b32.xlu1 %v325_v15, %s6887_s19  ;;  %v96_v50 = vrot.slane %v82_v9, 4  ;;  %v836_v34 = vrot.slane %v10370_v54, 4 }
 0x16e   :  { %v359_v45 = vsel %vm358_vm10, %v328_v32, %v357_v38  ;;  %416 = vrot.lane.b32.xlu2 %v403_v6, %s10399_s15  ;;  %v486_v32 = vrot.slane %v476_v2, 7  ;;  %v904_v38 = vld [vmem:[%s10301_s0 + $0x20] sm:$0x7]  ;;  %v5417_v41 = vld [vmem:[#allocation2 + $0x40] sm:$0xf] }
 0x16f   :  { %382 = vst [vmem:[#allocation2 + $0x60] sm:$0x88] %v359_v45  ;;  %v7991_v12 = vpop.permute.xlu1 %85  ;;  %v914_v20 = vrot.slane %v904_v38, 6 }
 0x170   :  { %1183 = vrot.lane.b32.xlu0 %v1169_v22, %s6873_s17  ;;  %v7996_v46 = vpop.permute.xlu2 %1046  ;;  %v10372_v15 = vrot.slane %v7991_v12, 4  ;;  %s10400_s17 = smov 94  }
 0x171   :  { %v10371_v44 = vrot.slane %v7996_v46, 4 }
 0x172   :  { %v84_v59 = vpop.permute.xlu0 %83 }
 0x173   :  { %v1060_v28 = vsel %vm101_vm0, %v1052_v11, %v10371_v44  ;;  %v97_v22 = vrot.slane %v84_v59, 4 }
 0x174   :  { %v1061_v45 = vsel %vm1056_vm5, %v7236_v7, %v1060_v28  ;;  %v6388_v7 = vld [vmem:[#allocation2 + $0x44] sm:$0xf] }
 0x175   :  { %1070 = vst [vmem:[#allocation2 + $0x190] sm:$0x77] %v1061_v45  ;;  %v111_v2 = vsel %vm101_vm0, %v96_v50, %v97_v22  ;;  %v113_v14 = vsel %vm101_vm0, %v97_v22, %v10372_v15  ;;  %494 = vrot.lane.b32.xlu1 %v486_v32, %s10400_s17  ;;  %v987_v32 = vld [vmem:[%s10301_s0 + $0x20] sm:$0x7] }
 0x176   :  { %v112_v54 = vsel %vm103_vm1, %v82_v9, %v111_v2  ;;  %v114_v11 = vsel %vm103_vm1, %v84_v59, %v113_v14  ;;  %855 = vrot.lane.b32.xlu2 %v836_v34, %s6877_s16  ;;  %v6392_v44 = vld [vmem:[#allocation2 + $0x5c] sm:$0xf0]  ;;  %v5419_v6 = vld [vmem:[#allocation2 + $0x60] sm:$0xf0]  ;;  %v176_v9 = vrot.slane %v7900_v19, 4  ;;  %v997_v34 = vrot.slane %v987_v32, 7 }
 0x177   :  { %131 = vst [vmem:[#allocation2 + $0x20] sm:$0x33] %v112_v54  ;;  %v8020_v28 = vpop.permute.xlu1 %1191  ;;  %v5418_v50 = vor.u32 %v6392_v44, %v5417_v41  ;;  %v5422_v45 = vor.u32 %v6388_v7, %v5419_v6  ;;  %v919_v54 = vrot.slane %v914_v20, 4 }
 0x178   :  { %132 = vst [vmem:[#allocation2 + $0x28] sm:$0x33] %v114_v11  ;;  %v1203_v38 = vrot.slane %v8020_v28, 4  ;;  %426 = vrot.lane.b32.xlu0 %v408_v0, %s10399_s15  ;;  %v8027_v14 = vpop.permute.xlu2 %1181 }
 0x179   :  { %v10376_v59 = vrot.slane %v8027_v14, 4  ;;  %2058 = vmatpush.bf16.msra.mxu0 %v5418_v50  ;;  %2086 = vmatpush.bf16.msra.mxu2 %v5422_v45 }
 0x17a   :  { %v1218_v41 = vsel %vm101_vm0, %v1202_v42, %v1203_v38  ;;  %v8036_v44 = vpop.permute.xlu0 %159 }
 0x17b   :  { %v1219_v0 = vsel %vm1206_vm3, %v7202_v40, %v1218_v41  ;;  %v1210_v22 = vsel %vm101_vm0, %v1197_v51, %v10376_v59  ;;  %v10373_v2 = vrot.slane %v8036_v44, 4  ;;  %v8057_v40 = vld [vmem:[%s10301_s0 + $0x18] sm:$0x77] }
 0x17c   :  { %1236 = vst [vmem:[#allocation2 + $0x1d0] sm:$0x11] %v1219_v0  ;;  %v1211_v11 = vsel %vm1206_vm3, %v7290_v47, %v1210_v22  ;;  %v221_v47 = vld [vmem:[%s10301_s0 + $0x18] sm:$0x77]  ;;  %v148_v45 = vrot.slane %v8057_v40, 6 }
 0x17d   :  { %1232 = vst [vmem:[#allocation2 + $0x1b0] sm:$0xcc] %v1211_v11  ;;  %v188_v42 = vsel %vm101_vm0, %v176_v9, %v10373_v2  ;;  %938 = vrot.lane.b32.xlu1 %v919_v54, %s6878_s25  ;;  %v231_v54 = vrot.slane %v221_v47, 7  ;;  %v8078_v0 = vld [vmem:[%s10301_s0 + $0x20] sm:$0x7] }
 0x17e   :  { %v189_v51 = vsel %vm186_vm14, %v7900_v19, %v188_v42  ;;  %1006 = vrot.lane.b32.xlu2 %v997_v34, %s10401_s21  ;;  %v153_v42 = vrot.slane %v148_v45, 4  ;;  %v659_v47 = vrot.slane %v8078_v0, 6  ;;  %s10403_s21 = smov 124   ;;  %v10418_v0 = vrot.slane %v7575_v60, 4 }
 0x17f   :  { %211 = vst [vmem:[#allocation2 + $0x28] sm:$0xcc] %v189_v51  ;;  %v72_v7 = vpop.permute.xlu1 %71  ;;  %v10402_v51 = vrot.slane %v7147_v13, 4 }
 0x180   :  { %928 = vrot.lane.b32.xlu0 %v914_v20, %s6878_s25  ;;  %v91_v6 = vrot.slane %v72_v7, 4  ;;  %v8066_v50 = vpop.permute.xlu2 %936 }
 0x181   :  { %v10375_v32 = vrot.slane %v8066_v50, 4 }
 0x182   :  { %v102_v41 = vsel %vm101_vm0, %v91_v6, %v92_v21  ;;  %v8073_v34 = vpop.permute.xlu0 %1319 }
 0x183   :  { %v104_v20 = vsel %vm103_vm1, %v72_v7, %v102_v41  ;;  %v963_v22 = vsel %vm101_vm0, %v947_v31, %v10375_v32  ;;  %v10377_v11 = vrot.slane %v8073_v34, 4 }
 0x184   :  { %127 = vst [vmem:[#allocation2] sm:$0x88] %v104_v20  ;;  %v964_v21 = vsel %vm951_vm7, %v7387_v25, %v963_v22  ;;  %v5393_v25 = vld [vmem:[#allocation2 + $0x8] sm:$0xf]  ;;  %v732_v22 = vld [vmem:[%s10301_s0 + $0x20] sm:$0x7] }
 0x185   :  { %981 = vst [vmem:[#allocation2 + $0x170] sm:$0x11] %v964_v21  ;;  %v1347_v31 = vsel %vm101_vm0, %v10402_v51, %v10377_v11  ;;  %239 = vrot.lane.b32.xlu1 %v231_v54, %s6884_s24  ;;  %v10405_v51 = vrot.slane %v7314_v57, 4 }
 0x186   :  { %v1348_v7 = vsel %vm103_vm1, %v7147_v13, %v1347_v31  ;;  %281 = vrot.lane.b32.xlu2 %v268_v16, %s10403_s21  ;;  %v6385_v6 = vld [vmem:[#allocation2 + $0x24] sm:$0xf0]  ;;  %v664_v16 = vrot.slane %v659_v47, 4 }
 0x187   :  { %1369 = vst [vmem:[#allocation2 + $0x1f0] sm:$0x88] %v1348_v7  ;;  %v8104_v41 = vpop.permute.xlu1 %1517  ;;  %v5394_v20 = vor.u32 %v6385_v6, %v5393_v25  ;;  %v742_v25 = vrot.slane %v732_v22, 7  ;;  %v10406_v6 = vrot.slane %v7441_v23, 4 }
 0x188   :  { %171 = vrot.lane.b32.xlu0 %v153_v42, %s10404_s20  ;;  %v1525_v54 = vrot.slane %v8104_v41, 4  ;;  %v8111_v21 = vpop.permute.xlu2 %1327 }
 0x189   :  { %v1340_v13 = vrot.slane %v8111_v21, 4  ;;  %2115 = vmatpush.bf16.msrb.mxu1 %v5394_v20 }
 0x18a   :  { %v1530_v31 = vsel %vm101_vm0, %v10405_v51, %v1525_v54  ;;  %v156_v7 = vpop.permute.xlu0 %155 }
 0x18b   :  { %v1531_v42 = vsel %vm291_vm6, %v7314_v57, %v1530_v31  ;;  %v1353_v20 = vsel %vm101_vm0, %v10406_v6, %v1340_v13  ;;  %v175_v15 = vrot.slane %v156_v7, 4  ;;  %v8141_v31 = vld [vmem:[%s10301_s0 + $0x18] sm:$0x77]  ;;  %v10408_v6 = vrot.slane %v7495_v39, 4  ;;  %v6380_v32 = vld [vmem:[#allocation2 + $0x4] sm:$0xf] }
 0x18c   :  { %1541 = vst [vmem:[#allocation2 + $0x248] sm:$0x77] %v1531_v42  ;;  %v1354_v2 = vsel %vm103_vm1, %v7441_v23, %v1353_v20 }
 0x18d   :  { %1372 = vst [vmem:[#allocation2 + $0x208] sm:$0x33] %v1354_v2  ;;  %v185_v51 = vsel %vm101_vm0, %v175_v15, %v176_v9  ;;  %683 = vrot.lane.b32.xlu1 %v664_v16, %s10396_s13  ;;  %v6378_v15 = vld [vmem:[%s10302_s1 + $0x4] sm:$0xf]  ;;  %v5379_v9 = vld [vmem:[%s10302_s1 + $0x8] sm:$0x30] }
 0x18e   :  { %v187_v57 = vsel %vm186_vm14, %v156_v7, %v185_v51  ;;  %751 = vrot.lane.b32.xlu2 %v742_v25, %s10394_s30  ;;  %v8156_v16 = vor.u32 %v6378_v15, %v5379_v9  ;;  %v64_v25 = vrot.slane %v8141_v31, 5  ;;  %v6442_v11 = vld [vmem:[#allocation2 + $0x1ec] sm:$0xf0]  ;;  %s5366_s30 = sshll.u32 %s10313_s12, 4  ;;  %s5367_s30 = int_to_ptr.hbm [resolvable:$true] %s5366_s30 }
 0x18f   :  { %210 = vst [vmem:[#allocation2 + $0x20] sm:$0xcc] %v187_v57  ;;  %v8136_v22 = vpop.permute.xlu1 %1108 }
 0x190   :  { %333 = vrot.lane.b32.xlu0 %v320_v36, %s6887_s19  ;;  %v10378_v23 = vrot.slane %v8136_v22, 4  ;;  %v8147_v19 = vpop.permute.xlu2 %1476  ;;  %5671 = vmatmul.msk.bf16.vlgmr.msra.gmra.mxu1 %vm2023_vm12, %v8156_v16 }
 0x191   :  { %v10380_v2 = vrot.slane %v8147_v19, 4  ;;  %5672 = vmatmul.msk.bf16.vlgmr.msra.gmra.mxu3 %vm2023_vm12, %v8156_v16 }
 0x192   :  { %v1135_v36 = vsel %vm101_vm0, %v10407_v18, %v10378_v23  ;;  %v8163_v7 = vpop.permute.xlu0 %1098  ;;  %v10409_v18 = vrot.slane %v7278_v43, 4 }
 0x193   :  { %v1136_v42 = vsel %vm1123_vm4, %v7195_v35, %v1135_v36  ;;  %v1489_v20 = vsel %vm101_vm0, %v10408_v6, %v10380_v2  ;;  %v10379_v51 = vrot.slane %v8163_v7, 4  ;;  %v1619_v57 = vld [vmem:[#allocation2 + $0x248] sm:$0x77]  ;;  %v779_v35 = vld [vmem:[%s10301_s0 + $0x20] sm:$0x7]  ;;  %v10410_v6 = vrot.slane %v7979_v10, 5 }
 0x194   :  { %1153 = vst [vmem:[#allocation2 + $0x1b0] sm:$0x33] %v1136_v42  ;;  %v1490_v31 = vsel %vm10392_vm15, %v7495_v39, %v1489_v20  ;;  %v1865_v15 = vunpack.c.l.b16 %v1619_v57  ;;  %v1866_v9 = vunpack.c.h.b16 %v1619_v57  ;;  %v5385_v42 = vld [vmem:[#allocation2] sm:$0xf]  ;;  %v5625_v2 = vld [vmem:[#allocation2 + $0x1d0] sm:$0xf] }
 0x195   :  { %1500 = vst [vmem:[#allocation2 + $0x228] sm:$0xee] %v1490_v31  ;;  %v1127_v36 = vsel %vm101_vm0, %v10409_v18, %v10379_v51  ;;  %845 = vrot.lane.b32.xlu1 %v10410_v6, %s6877_s16  ;;  %s6894_s16 = smov 122  }
 0x196   :  { %v1128_v39 = vsel %vm1123_vm4, %v7278_v43, %v1127_v36  ;;  %77 = vrot.lane.b32.xlu2 %v64_v25, %s10411_s29  ;;  %v6384_v20 = vld [vmem:[#allocation2 + $0x1c] sm:$0xf0]  ;;  %v5387_v57 = vld [vmem:[#allocation2 + $0x20] sm:$0xf0]  ;;  %v1945_v31 = vpack.c.b16 %v1865_v15, %v1865_v15  ;;  %v1946_v59 = vpack.c.b16 %v1866_v9, %v1866_v9  ;;  %v5377_v15 = vld [vmem:[%s10302_s1] sm:$0xf] }
 0x197   :  { %1149 = vst [vmem:[#allocation2 + $0x190] sm:$0x88] %v1128_v39  ;;  %v8194_v23 = vpop.permute.xlu1 %926  ;;  %v5386_v18 = vor.u32 %v6384_v20, %v5385_v42  ;;  %v5390_v51 = vor.u32 %v6380_v32, %v5387_v57  ;;  %v5626_v32 = vor.u32 %v6442_v11, %v5625_v2  ;;  %v10412_v42 = vrot.slane %v7292_v49, 4  ;;  %v566_v20 = vld [vmem:[%s10301_s0 + $0x20] sm:$0x7] }
 0x198   :  { %793 = vrot.lane.b32.xlu0 %v779_v35, %s10395_s23  ;;  %v10385_v10 = vrot.slane %v8194_v23, 4  ;;  %v8198_v6 = vpop.permute.xlu2 %791  ;;  %v2035_v43 = vsel %vm2027_vm8, %v1945_v31, 0  ;;  %v2038_v36 = vsel %vm2027_vm8, %v1946_v59, 0  ;;  %v6379_v35 = vld [vmem:[%s10302_s1 + $0x4] sm:$0x30]  ;;  %v10413_v2 = vrot.slane %v7493_v29, 4 }
 0x199   :  { %v10384_v9 = vrot.slane %v8198_v6, 4  ;;  %2059 = vmatpush.bf16.msra.mxu0 %v5386_v18  ;;  %2087 = vmatpush.bf16.msra.mxu2 %v5390_v51  ;;  %v8219_v51 = vor.u32 %v6379_v35, %v5377_v15  ;;  %v524_v18 = vld [vmem:[%s10301_s0 + $0x20] sm:$0x7]  ;;  %s6900_s1 = smov 72  }
 0x19a   :  { %v955_v39 = vsel %vm101_vm0, %v10412_v42, %v10385_v10  ;;  %v8214_v59 = vpop.permute.xlu0 %853  ;;  %2128 = vmatpush.bf16.msrb.mxu3 %v2035_v43  ;;  %v5627_v10 = vld [vmem:[#allocation2 + $0x1f0] sm:$0xf0] }
 0x19b   :  { %v956_v11 = vsel %vm951_vm7, %v7292_v49, %v955_v39  ;;  %v805_v57 = vsel %vm101_vm0, %v10413_v2, %v10384_v9  ;;  %v10390_v31 = vrot.slane %v8214_v59, 4  ;;  %v10414_v49 = vrot.slane %v7370_v63, 4  ;;  %v6434_v35 = vld [vmem:[#allocation2 + $0x1ac] sm:$0xf0] }
 0x19c   :  { %977 = vst [vmem:[#allocation2 + $0x150] sm:$0xcc] %v956_v11  ;;  %v806_v43 = vsel %vm10381_vm13, %v7493_v29, %v805_v57  ;;  %2060 = vmatmul.bf16.vlgmr.msra.gmra.mxu0 %v8219_v51  ;;  %2088 = vmatmul.bf16.vlgmr.msra.gmra.mxu2 %v8219_v51  ;;  %vm10417_vm13 = vcmask 261120  }
 0x19d   :  { %2156 = vmatpush.bf16.msrb.mxu0 %v2038_v36  ;;  %2164 = vmatpush.bf16.msrb.mxu2 %v5626_v32  ;;  %v69_v36 = vrot.slane %v64_v25, 4  ;;  %815 = vst [vmem:[#allocation2 + $0x130] sm:$0x77] %v806_v43  ;;  %v880_v15 = vsel %vm101_vm0, %v10414_v49, %v10390_v31  ;;  %v576_v32 = vrot.slane %v566_v20, 5  ;;  %v394_v49 = vld [vmem:[%s10301_s0 + $0x20] sm:$0x7] }
 0x19e   :  { %161 = vrot.lane.b32.xlu1 %v148_v45, %s10404_s20  ;;  %v881_v29 = vsel %vm868_vm9, %v7370_v63, %v880_v15  ;;  %538 = vrot.lane.b32.xlu2 %v524_v18, %s10397_s27  ;;  %v5593_v25 = vld [vmem:[#allocation2 + $0x190] sm:$0xf]  ;;  %v10415_v18 = vrot.slane %v7925_v33, 4  ;;  %v6890_v31 = vmov 0  }
 0x19f   :  { %898 = vst [vmem:[#allocation2 + $0x150] sm:$0x33] %v881_v29  ;;  %v8247_v42 = vpop.permute.xlu1 %1519  ;;  %v5594_v39 = vor.u32 %v6434_v35, %v5593_v25  ;;  %v581_v40 = vrot.slane %v576_v32, 4  ;;  %v8279_v29 = vld [vmem:[%s10301_s0 + $0x20] sm:$0x7]  ;;  %6660 = vset.pattern.permute.xlu1 %v6890_v31  ;;  %6661 = vset.pattern.permute.xlu2 %v6890_v31 }
 0x1a0   :  { %87 = vrot.lane.b32.xlu0 %v69_v36, %s10411_s29  ;;  %v10382_v11 = vrot.slane %v8247_v42, 4  ;;  %v1262_v2 = vpop.permute.xlu2 %1261  ;;  %2116 = vmatmul.bf16.vlgmr.msrb.gmra.mxu1 %v8219_v51 }
 0x1a1   :  { %v1267_v57 = vrot.slane %v1262_v2, 4  ;;  %2165 = vmatpush.bf16.msrb.mxu2 %v5594_v39  ;;  %6737 = vset.pattern.permute.xlu0 %v6890_v31 }
 0x1a2   :  { %v1532_v63 = vsel %vm101_vm0, %v1525_v54, %v10382_v11  ;;  %v8256_v45 = vpop.permute.xlu0 %1004 }
 0x1a3   :  { %v1533_v20 = vsel %vm291_vm6, %v8104_v41, %v1532_v63  ;;  %v1275_v43 = vsel %vm101_vm0, %v10415_v18, %v1267_v57  ;;  %v10388_v36 = vrot.slane %v8256_v45, 4  ;;  %v10416_v41 = vrot.slane %v7416_v61, 4 }
 0x1a4   :  { %1542 = vst [vmem:[#allocation2 + $0x250] sm:$0x77] %v1533_v20  ;;  %v1276_v54 = vsel %vm1269_vm2, %v7925_v33, %v1275_v43  ;;  %v404_v33 = vrot.slane %v394_v49, 6  ;;  %v321_v57 = vrot.slane %v8279_v29, 5  ;;  %v10419_v18 = vrot.slane %v7646_v37, 4 }
 0x1a5   :  { %1284 = vst [vmem:[#allocation2 + $0x1d8] sm:$0xee] %v1276_v54  ;;  %v1018_v15 = vsel %vm101_vm0, %v10416_v41, %v10388_v36  ;;  %v8317_v41 = vld [vmem:[%s10301_s0 + $0x20] sm:$0x7]  ;;  %vm10420_vm2 = vcmask 752640   ;;  %v10428_v29 = vrot.slane %v7552_v52, 4 }
 0x1a6   :  { %600 = vrot.lane.b32.xlu1 %v581_v40, %s10398_s22  ;;  %v1019_v25 = vsel %vm10417_vm13, %v7416_v61, %v1018_v15  ;;  %673 = vrot.lane.b32.xlu2 %v659_v47, %s10396_s13  ;;  %v1288_v61 = vld [vmem:[%s10301_s0 + $0x1c] sm:$0x77]  ;;  %v409_v63 = vrot.slane %v404_v33, 4  ;;  %vm10423_vm13 = vcmask 515072   ;;  %v5619_v36 = vld [vmem:[#allocation2 + $0x1e8] sm:$0xf0] }
 0x1a7   :  { %1028 = vst [vmem:[#allocation2 + $0x170] sm:$0xee] %v1019_v25  ;;  %v8286_v35 = vpop.permute.xlu1 %1409 }
 0x1a8   :  { %590 = vrot.lane.b32.xlu0 %v576_v32, %s10398_s22  ;;  %v1422_v39 = vrot.slane %v8286_v35, 4  ;;  %v8290_v2 = vpop.permute.xlu2 %588  ;;  %1292 = vst [vmem:[#allocation2 + $0x1f8] sm:$0x77] %v1288_v61  ;;  %v10421_v61 = vrot.slane %v7550_v3, 4  ;;  %s6899_s22 = smov 47  }
 0x1a9   :  { %v10383_v40 = vrot.slane %v8290_v2, 4 }
 0x1aa   :  { %v1435_v47 = vsel %vm101_vm0, %v10418_v0, %v1422_v39  ;;  %v8302_v32 = vpop.permute.xlu0 %1399 }
 0x1ab   :  { %v1436_v20 = vsel %vm186_vm14, %v7575_v60, %v1435_v47  ;;  %v617_v43 = vsel %vm101_vm0, %v10419_v18, %v10383_v40  ;;  %v10389_v49 = vrot.slane %v8302_v32, 4  ;;  %v8312_v54 = vld [vmem:[#allocation2 + $0x250] sm:$0x77]  ;;  %v326_v60 = vrot.slane %v321_v57, 4 }
 0x1ac   :  { %1454 = vst [vmem:[#allocation2 + $0x228] sm:$0x11] %v1436_v20  ;;  %v618_v15 = vsel %vm10420_vm2, %v7646_v37, %v617_v43  ;;  %v1867_v25 = vunpack.c.l.b16 %v8312_v54  ;;  %v5561_v37 = vld [vmem:[#allocation2 + $0x150] sm:$0xf]  ;;  %v149_v43 = vrot.slane %v8317_v41, 6  ;;  %vm10425_vm2 = vcmask 523264  }
 0x1ad   :  { %639 = vst [vmem:[#allocation2 + $0xd0] sm:$0x88] %v618_v15  ;;  %v1427_v0 = vsel %vm101_vm0, %v10421_v61, %v10389_v49  ;;  %v6438_v49 = vld [vmem:[#allocation2 + $0x1d4] sm:$0xf] }
 0x1ae   :  { %418 = vrot.lane.b32.xlu1 %v404_v33, %s10399_s15  ;;  %v1428_v47 = vsel %vm186_vm14, %v7550_v3, %v1427_v0  ;;  %428 = vrot.lane.b32.xlu2 %v409_v63, %s10399_s15  ;;  %v6426_v20 = vld [vmem:[#allocation2 + $0x16c] sm:$0xf0]  ;;  %v1947_v18 = vpack.c.b16 %v1867_v25, %v1867_v25  ;;  %v477_v63 = vld [vmem:[%s10301_s0 + $0x20] sm:$0x7]  ;;  %v10422_v25 = vrot.slane %v7389_v26, 4  ;;  %s6902_s15 = smov 44  }
 0x1af   :  { %1450 = vst [vmem:[#allocation2 + $0x208] sm:$0xcc] %v1428_v47  ;;  %v8334_v15 = vpop.permute.xlu1 %749  ;;  %v5562_v11 = vor.u32 %v6426_v20, %v5561_v37  ;;  %v1507_v47 = vld [vmem:[%s10301_s0 + $0x24] sm:$0x7]  ;;  %v487_v9 = vrot.slane %v477_v63, 7 }
 0x1b0   :  { %345 = vrot.lane.b32.xlu0 %v326_v60, %s6887_s19  ;;  %v10386_v61 = vrot.slane %v8334_v15, 4  ;;  %v8338_v40 = vpop.permute.xlu2 %1329  ;;  %v2041_v33 = vsel %vm2027_vm8, %v1947_v18, 0 }
 0x1b1   :  { %v10387_v3 = vrot.slane %v8338_v40, 4  ;;  %2166 = vmatpush.bf16.msrb.mxu2 %v5562_v11  ;;  %2184 = vmatpush.bf16.msra.mxu1 %v2041_v33  ;;  %v154_v11 = vrot.slane %v149_v43, 4  ;;  %v6437_v33 = vld [vmem:[#allocation2 + $0x1cc] sm:$0xf] }
 0x1b2   :  { %v763_v60 = vsel %vm101_vm0, %v10422_v25, %v10386_v61  ;;  %v8350_v0 = vpop.permute.xlu0 %681 }
 0x1b3   :  { %v764_v37 = vsel %vm10423_vm13, %v7389_v26, %v763_v60  ;;  %v1355_v20 = vsel %vm101_vm0, %v1340_v13, %v10387_v3  ;;  %v10391_v18 = vrot.slane %v8350_v0, 4  ;;  %v10424_v26 = vrot.slane %v7476_v56, 4  ;;  %v6449_v61 = vld [vmem:[#allocation2 + $0x224] sm:$0xf0]  ;;  %v5651_v13 = vld [vmem:[#allocation2 + $0x228] sm:$0xf0] }
 0x1b4   :  { %773 = vst [vmem:[#allocation2 + $0x110] sm:$0xee] %v764_v37  ;;  %v1356_v25 = vsel %vm103_vm1, %v8111_v21, %v1355_v20  ;;  %vm10429_vm13 = vcmask 760832  }
 0x1b5   :  { %1373 = vst [vmem:[#allocation2 + $0x210] sm:$0x33] %v1356_v25  ;;  %v708_v60 = vsel %vm101_vm0, %v10424_v26, %v10391_v18  ;;  %v5622_v18 = vor.u32 %v6437_v33, %v5619_v36  ;;  %v8394_v36 = vld [vmem:[%s10301_s0 + $0x20] sm:$0x7] }
 0x1b6   :  { %1521 = vrot.lane.b32.xlu1 %v1507_v47, %s10403_s21  ;;  %v709_v3 = vsel %vm10425_vm2, %v7476_v56, %v708_v60  ;;  %173 = vrot.lane.b32.xlu2 %v154_v11, %s10404_s20  ;;  %v5649_v37 = vld [vmem:[#allocation2 + $0x208] sm:$0xf]  ;;  %v6445_v21 = vld [vmem:[#allocation2 + $0x20c] sm:$0xf]  ;;  %v5630_v56 = vor.u32 %v6438_v49, %v5627_v10  ;;  %v269_v10 = vld [vmem:[%s10301_s0 + $0x20] sm:$0x7] }
 0x1b7   :  { %726 = vst [vmem:[#allocation2 + $0x110] sm:$0x11] %v709_v3  ;;  %v1194_v63 = vpop.permute.xlu1 %1193  ;;  %v5650_v20 = vor.u32 %v6449_v61, %v5649_v37  ;;  %v5654_v25 = vor.u32 %v6445_v21, %v5651_v13  ;;  %v5587_v3 = vld [vmem:[#allocation2 + $0x1a8] sm:$0xf0]  ;;  %v222_v61 = vld [vmem:[%s10301_s0 + $0x20] sm:$0x7] }
 0x1b8   :  { %496 = vrot.lane.b32.xlu0 %v487_v9, %s10400_s17  ;;  %v1204_v47 = vrot.slane %v1194_v63, 4  ;;  %v8377_v26 = vpop.permute.xlu2 %1478  ;;  %v6430_v9 = vld [vmem:[#allocation2 + $0x194] sm:$0xf]  ;;  %v6429_v37 = vld [vmem:[#allocation2 + $0x18c] sm:$0xf] }
 0x1b9   :  { %v1485_v11 = vrot.slane %v8377_v26, 4  ;;  %2129 = vmatpush.bf16.msrb.mxu3 %v5650_v20  ;;  %2157 = vmatpush.bf16.msrb.mxu0 %v5654_v25  ;;  %v5590_v63 = vor.u32 %v6429_v37, %v5587_v3  ;;  %v5595_v20 = vld [vmem:[#allocation2 + $0x1b0] sm:$0xf0]  ;;  %v232_v25 = vrot.slane %v222_v61, 7 }
 0x1ba   :  { %v1220_v60 = vsel %vm101_vm0, %v1203_v38, %v1204_v47  ;;  %v8386_v13 = vpop.permute.xlu0 %843  ;;  %v10426_v38 = vrot.slane %v8147_v19, 4  ;;  %v5598_v47 = vor.u32 %v6430_v9, %v5595_v20  ;;  %v5563_v61 = vld [vmem:[#allocation2 + $0x170] sm:$0xf0]  ;;  %v1379_v20 = vld [vmem:[%s10301_s0 + $0x24] sm:$0x7] }
 0x1bb   :  { %v1221_v49 = vsel %vm1206_vm3, %v8020_v28, %v1220_v60  ;;  %v860_v33 = vrot.slane %v8386_v13, 4  ;;  %v10427_v28 = vrot.slane %v7528_v30, 4 }
 0x1bc   :  { %1237 = vst [vmem:[#allocation2 + $0x1d8] sm:$0x11] %v1221_v49  ;;  %5673 = vmatmul.msk.bf16.vlgmr.msrb.gmra.mxu3 %vm2023_vm12, %v8156_v16  ;;  %5674 = vmatmul.msk.bf16.vlgmr.msrb.gmra.mxu0 %vm2023_vm12, %v8156_v16  ;;  %v6421_v49 = vld [vmem:[#allocation2 + $0x14c] sm:$0xf] }
 0x1bd   :  { %2136 = vmatpush.bf16.msra.mxu3 %v5622_v18  ;;  %2192 = vmatpush.bf16.msra.mxu0 %v5630_v56  ;;  %v1491_v18 = vsel %vm101_vm0, %v10426_v38, %v1485_v11  ;;  %v872_v31 = vsel %vm101_vm0, %v10427_v28, %v860_v33  ;;  %v65_v56 = vrot.slane %v8394_v36, 5  ;;  %v6422_v38 = vld [vmem:[#allocation2 + $0x154] sm:$0xf]  ;;  %v10430_v28 = vrot.slane %v8136_v22, 4 }
 0x1be   :  { %v1492_v21 = vsel %vm10392_vm15, %v8147_v19, %v1491_v18  ;;  %283 = vrot.lane.b32.xlu1 %v269_v10, %s10403_s21  ;;  %v5555_v19 = vld [vmem:[#allocation2 + $0x168] sm:$0xf0]  ;;  %v873_v3 = vsel %vm868_vm9, %v7528_v30, %v872_v31  ;;  %335 = vrot.lane.b32.xlu2 %v321_v57, %s6887_s19  ;;  %v5566_v30 = vor.u32 %v6422_v38, %v5563_v61  ;;  %v1389_v38 = vrot.slane %v1379_v20, 6 }
 0x1bf   :  { %1501 = vst [vmem:[#allocation2 + $0x230] sm:$0xee] %v1492_v21  ;;  %v8422_v60 = vpop.permute.xlu1 %536  ;;  %v5558_v36 = vor.u32 %v6421_v49, %v5555_v19  ;;  %v70_v37 = vrot.slane %v65_v56, 4  ;;  %v5523_v21 = vld [vmem:[#allocation2 + $0x128] sm:$0xf0] }
 0x1c0   :  { %894 = vst [vmem:[#allocation2 + $0x130] sm:$0x88] %v873_v3  ;;  %241 = vrot.lane.b32.xlu0 %v232_v25, %s6884_s24  ;;  %v543_v10 = vrot.slane %v8422_v60, 4  ;;  %v1111_v9 = vpop.permute.xlu2 %1110  ;;  %v6413_v19 = vld [vmem:[#allocation2 + $0x10c] sm:$0xf] }
 0x1c1   :  { %2137 = vmatpush.bf16.msra.mxu3 %v5590_v63  ;;  %2193 = vmatpush.bf16.msra.mxu0 %v5598_v47  ;;  %v1121_v18 = vrot.slane %v1111_v9, 4  ;;  %v5526_v61 = vor.u32 %v6413_v19, %v5523_v21  ;;  %v5491_v49 = vld [vmem:[#allocation2 + $0xe8] sm:$0xf0]  ;;  %v10431_v9 = vrot.slane %v8073_v34, 4 }
 0x1c2   :  { %v550_v57 = vsel %vm101_vm0, %v10428_v29, %v543_v10  ;;  %v1322_v63 = vpop.permute.xlu0 %1321 }
 0x1c3   :  { %v551_v25 = vsel %vm10429_vm13, %v7552_v52, %v550_v57  ;;  %v1137_v31 = vsel %vm101_vm0, %v10430_v28, %v1121_v18  ;;  %v1337_v47 = vrot.slane %v1322_v63, 4  ;;  %v5529_v52 = vld [vmem:[#allocation2 + $0x110] sm:$0xf]  ;;  %v10432_v28 = vrot.slane %v7594_v62, 4 }
 0x1c4   :  { %560 = vst [vmem:[#allocation2 + $0xd0] sm:$0x77] %v551_v25  ;;  %v1138_v3 = vsel %vm1123_vm4, %v8136_v22, %v1137_v31  ;;  %v6405_v25 = vld [vmem:[#allocation2 + $0xcc] sm:$0xf]  ;;  %vm10436_vm13 = vcmask 752640  }
 0x1c5   :  { %2138 = vmatpush.bf16.msra.mxu3 %v5558_v36  ;;  %2194 = vmatpush.bf16.msra.mxu0 %v5566_v30  ;;  %1154 = vst [vmem:[#allocation2 + $0x1b8] sm:$0x33] %v1138_v3  ;;  %v1349_v36 = vsel %vm101_vm0, %v10431_v9, %v1337_v47  ;;  %v6414_v30 = vld [vmem:[#allocation2 + $0x114] sm:$0xf]  ;;  %v10433_v3 = vrot.slane %v7755_v53, 4 }
 0x1c6   :  { %89 = vrot.lane.b32.xlu1 %v70_v37, %s10411_s29  ;;  %v1350_v18 = vsel %vm103_vm1, %v8073_v34, %v1349_v36  ;;  %163 = vrot.lane.b32.xlu2 %v149_v43, %s10404_s20  ;;  %v5494_v34 = vor.u32 %v6405_v25, %v5491_v49  ;;  %v5459_v43 = vld [vmem:[#allocation2 + $0xa8] sm:$0xf0]  ;;  %v10434_v36 = vrot.slane %v7846_v48, 5 }
 0x1c7   :  { %v6418_v22 = vld [vmem:[#allocation2 + $0x12c] sm:$0xf0]  ;;  %v5531_v21 = vld [vmem:[#allocation2 + $0x130] sm:$0xf0]  ;;  %1370 = vst [vmem:[#allocation2 + $0x1f8] sm:$0x88] %v1350_v18  ;;  %v8450_v29 = vpop.permute.xlu1 %671 }
 0x1c8   :  { %v5530_v57 = vor.u32 %v6418_v22, %v5529_v52  ;;  %v5534_v63 = vor.u32 %v6414_v30, %v5531_v21  ;;  %79 = vrot.lane.b32.xlu0 %v65_v56, %s10411_s29  ;;  %v688_v37 = vrot.slane %v8450_v29, 4  ;;  %v8454_v20 = vpop.permute.xlu2 %416  ;;  %v1394_v56 = vrot.slane %v1389_v38, 4  ;;  %v6397_v9 = vld [vmem:[#allocation2 + $0x8c] sm:$0xf] }
 0x1c9   :  { %2139 = vmatpush.bf16.msra.mxu3 %v5526_v61  ;;  %v433_v41 = vrot.slane %v8454_v20, 4  ;;  %v1312_v52 = vrot.slane %v10434_v36, 4  ;;  %v5462_v22 = vor.u32 %v6397_v9, %v5459_v43  ;;  %v5427_v21 = vld [vmem:[#allocation2 + $0x68] sm:$0xf0] }
 0x1ca   :  { %2167 = vmatpush.bf16.msrb.mxu2 %v5530_v57  ;;  %2195 = vmatpush.bf16.msra.mxu0 %v5534_v63  ;;  %v700_v31 = vsel %vm101_vm0, %v10432_v28, %v688_v37  ;;  %v8462_v47 = vpop.permute.xlu0 %598  ;;  %v5395_v28 = vld [vmem:[#allocation2 + $0x28] sm:$0xf0] }
 0x1cb   :  { %v701_v19 = vsel %vm10425_vm2, %v7594_v62, %v700_v31  ;;  %v445_v61 = vsel %vm101_vm0, %v10433_v3, %v433_v41  ;;  %v610_v49 = vrot.slane %v8462_v47, 4  ;;  %v10435_v62 = vrot.slane %v7683_v55, 4 }
 0x1cc   :  { %722 = vst [vmem:[#allocation2 + $0xf0] sm:$0xcc] %v701_v19  ;;  %v446_v18 = vsel %vm441_vm11, %v7755_v53, %v445_v61  ;;  %v6389_v53 = vld [vmem:[#allocation2 + $0x4c] sm:$0xf]  ;;  %v10437_v61 = vrot.slane %v8214_v59, 4  ;;  %vm10441_vm2 = vcmask 261120  }
 0x1cd   :  { %2140 = vmatpush.bf16.msra.mxu3 %v5494_v34  ;;  %467 = vst [vmem:[#allocation2 + $0x90] sm:$0xcc] %v446_v18  ;;  %v625_v30 = vsel %vm101_vm0, %v10435_v62, %v610_v49  ;;  %v5430_v34 = vor.u32 %v6389_v53, %v5427_v21  ;;  %v6406_v53 = vld [vmem:[#allocation2 + $0xd4] sm:$0xf] }
 0x1ce   :  { %1403 = vrot.lane.b32.xlu1 %v1389_v38, %s10404_s20  ;;  %v626_v57 = vsel %vm10436_vm13, %v7683_v55, %v625_v30  ;;  %1413 = vrot.lane.b32.xlu2 %v1394_v56, %s10404_s20  ;;  %v1461_v38 = vld [vmem:[%s10301_s0 + $0x24] sm:$0x7]  ;;  %v6443_v19 = vld [vmem:[#allocation2 + $0x1f4] sm:$0xf0]  ;;  %v10438_v30 = vrot.slane %v8302_v32, 4  ;;  %vm10458_vm13 = vcmask 523264  }
 0x1cf   :  { %643 = vst [vmem:[#allocation2 + $0xf0] sm:$0x33] %v626_v57  ;;  %v8485_v48 = vpop.permute.xlu1 %1411  ;;  %v1622_v56 = vld [vmem:[%s10303_s2] sm:$0xff]  ;;  %v1471_v62 = vrot.slane %v1461_v38, 7  ;;  %v5497_v57 = vld [vmem:[#allocation2 + $0xd0] sm:$0xf] }
 0x1d0   :  { %1331 = vrot.lane.b32.xlu0 %v1312_v52, %s10411_s29  ;;  %v1423_v63 = vrot.slane %v8485_v48, 4  ;;  %v856_v25 = vpop.permute.xlu2 %855  ;;  %v6381_v52 = vld [vmem:[#allocation2 + $0xc] sm:$0xf] }
 0x1d1   :  { %2141 = vmatpush.bf16.msra.mxu3 %v5462_v22  ;;  %v866_v43 = vrot.slane %v856_v25, 4  ;;  %v5398_v18 = vor.u32 %v6381_v52, %v5395_v28  ;;  %v5633_v22 = vld [vmem:[#allocation2 + $0x1d8] sm:$0xf] }
 0x1d2   :  { %v1437_v55 = vsel %vm101_vm0, %v1422_v39, %v1423_v63  ;;  %v8497_v31 = vpop.permute.xlu0 %1401  ;;  %v5634_v21 = vor.u32 %v6443_v19, %v5633_v22  ;;  %v10440_v22 = vrot.slane %v8256_v45, 4 }
 0x1d3   :  { %v1438_v3 = vsel %vm186_vm14, %v8286_v35, %v1437_v55  ;;  %v882_v9 = vsel %vm101_vm0, %v10437_v61, %v866_v43  ;;  %v1418_v36 = vrot.slane %v8497_v31, 4  ;;  %v45_v43 = vld [vmem:[%s10301_s0 + $0x10] sm:$0x77]  ;;  %v1868_v61 = vunpack.c.h.b16 %v8312_v54 }
 0x1d4   :  { %1455 = vst [vmem:[#allocation2 + $0x230] sm:$0x11] %v1438_v3  ;;  %v883_v39 = vsel %vm868_vm9, %v8214_v59, %v882_v9  ;;  %v10439_v9 = vrot.slane %v8163_v7, 4  ;;  %v10442_v54 = vrot.slane %v7996_v46, 4 }
 0x1d5   :  { %2142 = vmatpush.bf16.msra.mxu3 %v5430_v34  ;;  %899 = vst [vmem:[#allocation2 + $0x158] sm:$0x33] %v883_v39  ;;  %v1429_v35 = vsel %vm101_vm0, %v10438_v30, %v1418_v36 }
 0x1d6   :  { %1626 = vperm.xlu1 %6660, %v1622_v56   ;;  %v1430_v25 = vsel %vm186_vm14, %v8302_v32, %v1429_v35  ;;  %v6410_v34 = vld [vmem:[#allocation2 + $0xec] sm:$0xf0]  ;;  %v5499_v59 = vld [vmem:[#allocation2 + $0xf0] sm:$0xf0]  ;;  %v1623_v56 = vld [vmem:[%s10303_s2 + $0x8] sm:$0xf] }
 0x1d7   :  { %1451 = vst [vmem:[#allocation2 + $0x210] sm:$0xcc] %v1430_v25  ;;  %v1101_v28 = vpop.permute.xlu1 %1100  ;;  %v5498_v38 = vor.u32 %v6410_v34, %v5497_v57  ;;  %v5502_v55 = vor.u32 %v6406_v53, %v5499_v59  ;;  %1631 = vperm.xlu2 %6661, %v1623_v56   ;;  %v1948_v57 = vpack.c.b16 %v1868_v61, %v1868_v61  ;;  %v10444_v61 = vrot.slane %v7908_v1, 4  ;;  %s6901_s2 = smov 97  }
 0x1d8   :  { %1480 = vrot.lane.b32.xlu0 %v1471_v62, %s6884_s24  ;;  %v1116_v19 = vrot.slane %v1101_v28, 4  ;;  %v1007_v32 = vpop.permute.xlu2 %1006  ;;  %49 = vst [vmem:[#allocation2 + $0x10] sm:$0x77] %v45_v43 }
 0x1d9   :  { %2143 = vmatpush.bf16.msra.mxu3 %v5398_v18  ;;  %v1012_v3 = vrot.slane %v1007_v32, 4  ;;  %2168 = vmatpush.bf16.msrb.mxu2 %v5498_v38  ;;  %v2044_v38 = vsel %vm2027_vm8, %v1948_v57, 0  ;;  %v5635_v32 = vld [vmem:[#allocation2 + $0x1f8] sm:$0xf0] }
 0x1da   :  { %v1129_v52 = vsel %vm101_vm0, %v10439_v9, %v1116_v19  ;;  %2196 = vmatpush.bf16.msra.mxu0 %v5502_v55  ;;  %v1049_v39 = vpop.permute.xlu0 %1048 }
 0x1db   :  { %v1130_v18 = vsel %vm1123_vm4, %v8163_v7, %v1129_v52  ;;  %v1020_v62 = vsel %vm101_vm0, %v10440_v22, %v1012_v3  ;;  %v1054_v30 = vrot.slane %v1049_v39, 4  ;;  %v6450_v7 = vld [vmem:[#allocation2 + $0x22c] sm:$0xf0]  ;;  %v5659_v39 = vld [vmem:[#allocation2 + $0x230] sm:$0xf0]  ;;  %vm10447_vm4 = vcmask 769024  }
 0x1dc   :  { %2144 = vmatmul.bf16.vlgmr.msra.gmra.mxu3 %v8219_v51  ;;  %1150 = vst [vmem:[#allocation2 + $0x198] sm:$0x88] %v1130_v18  ;;  %v1021_v35 = vsel %vm10441_vm2, %v8256_v45, %v1020_v62  ;;  %v6439_v62 = vld [vmem:[#allocation2 + $0x1dc] sm:$0xf]  ;;  %vm10459_vm2 = vmmov %vm10458_vm13 }
 0x1dd   :  { %2220 = vmatpush.bf16.msrb.mxu3 %v5634_v21  ;;  %1029 = vst [vmem:[#allocation2 + $0x178] sm:$0xee] %v1021_v35  ;;  %v1062_v21 = vsel %vm101_vm0, %v10442_v54, %v1054_v30  ;;  %v5638_v35 = vor.u32 %v6439_v62, %v5635_v32 }
 0x1de   :  { %v1063_v53 = vsel %vm1056_vm5, %v7996_v46, %v1062_v21  ;;  %v5657_v25 = vld [vmem:[#allocation2 + $0x210] sm:$0xf]  ;;  %v6446_v55 = vld [vmem:[#allocation2 + $0x214] sm:$0xf]  ;;  %v10443_v46 = vrot.slane %v7648_v27, 4  ;;  %vm10455_vm5 = vcmask 760832  }
 0x1df   :  { %1071 = vst [vmem:[#allocation2 + $0x198] sm:$0x77] %v1063_v53  ;;  %v8541_v34 = vpop.permute.xlu1 %343  ;;  %v5658_v59 = vor.u32 %v6450_v7, %v5657_v25  ;;  %v5662_v22 = vor.u32 %v6446_v55, %v5659_v39  ;;  %v10446_v25 = vrot.slane %v7707_v5, 4 }
 0x1e0   :  { %v355_v43 = vrot.slane %v8541_v34, 4  ;;  %v8544_v28 = vpop.permute.xlu2 %281 }
 0x1e1   :  { %v288_v45 = vrot.slane %v8544_v28, 4  ;;  %2185 = vmatpush.bf16.msra.mxu1 %v5658_v59 }
 0x1e2   :  { %v370_v56 = vsel %vm101_vm0, %v10443_v46, %v355_v43  ;;  %v1184_v19 = vpop.permute.xlu0 %1183 }
 0x1e3   :  { %v371_v3 = vsel %vm358_vm10, %v7648_v27, %v370_v56  ;;  %v295_v9 = vsel %vm101_vm0, %v10444_v61, %v288_v45  ;;  %v1199_v52 = vrot.slane %v1184_v19, 4  ;;  %v10445_v27 = vrot.slane %v8027_v14, 4 }
 0x1e4   :  { %388 = vst [vmem:[#allocation2 + $0x90] sm:$0x33] %v371_v3  ;;  %v296_v18 = vsel %vm291_vm6, %v7908_v1, %v295_v9  ;;  %5675 = vmatmul.msk.bf16.vlgmr.msra.gmra.mxu1 %vm2023_vm12, %v8156_v16  ;;  %v10450_v19 = vrot.slane %v7791_v8, 4 }
 0x1e5   :  { %2212 = vmatpush.bf16.msrb.mxu1 %v2044_v38  ;;  %305 = vst [vmem:[#allocation2 + $0x70] sm:$0x77] %v296_v18  ;;  %v1212_v30 = vsel %vm101_vm0, %v10445_v27, %v1199_v52  ;;  %v10448_v38 = vrot.slane %v8334_v15, 4 }
 0x1e6   :  { %v1213_v54 = vsel %vm1206_vm3, %v8027_v14, %v1212_v30  ;;  %vm10449_vm3 = vcmask 515072   ;;  %v5601_v3 = vld [vmem:[#allocation2 + $0x198] sm:$0xf]  ;;  %v6431_v9 = vld [vmem:[#allocation2 + $0x19c] sm:$0xf]  ;;  %v10451_v30 = vrot.slane %v8066_v50, 4 }
 0x1e7   :  { %1233 = vst [vmem:[#allocation2 + $0x1b8] sm:$0xcc] %v1213_v54  ;;  %v8569_v21 = vpop.permute.xlu1 %494 }
 0x1e8   :  { %v501_v1 = vrot.slane %v8569_v21, 4  ;;  %v752_v57 = vpop.permute.xlu2 %751 }
 0x1e9   :  { %2213 = vmatpush.bf16.msrb.mxu1 %v5662_v22  ;;  %v757_v53 = vrot.slane %v752_v57, 4  ;;  %v10452_v57 = vrot.slane %v7871_v58, 4 }
 0x1ea   :  { %v508_v7 = vsel %vm101_vm0, %v10446_v25, %v501_v1  ;;  %v8577_v59 = vpop.permute.xlu0 %426 }
 0x1eb   :  { %v509_v14 = vsel %vm10447_vm4, %v7707_v5, %v508_v7  ;;  %v765_v55 = vsel %vm101_vm0, %v10448_v38, %v757_v53  ;;  %v438_v46 = vrot.slane %v8577_v59, 4  ;;  %vm10462_vm4 = vcmask 506880  }
 0x1ec   :  { %518 = vst [vmem:[#allocation2 + $0xb0] sm:$0xee] %v509_v14  ;;  %v766_v56 = vsel %vm10449_vm3, %v8334_v15, %v765_v55  ;;  %v10453_v14 = vrot.slane %v8194_v23, 4 }
 0x1ed   :  { %2248 = vmatpush.bf16.msra.mxu1 %v5638_v35  ;;  %774 = vst [vmem:[#allocation2 + $0x118] sm:$0xee] %v766_v56  ;;  %v453_v32 = vsel %vm101_vm0, %v10450_v19, %v438_v46  ;;  %v6398_v19 = vld [vmem:[#allocation2 + $0x94] sm:$0xf] }
 0x1ee   :  { %v454_v5 = vsel %vm441_vm11, %v7791_v8, %v453_v32  ;;  %v6435_v61 = vld [vmem:[#allocation2 + $0x1b4] sm:$0xf0]  ;;  %v5603_v52 = vld [vmem:[#allocation2 + $0x1b8] sm:$0xf0] }
 0x1ef   :  { %471 = vst [vmem:[#allocation2 + $0xb0] sm:$0x11] %v454_v5  ;;  %v939_v39 = vpop.permute.xlu1 %938  ;;  %v5602_v18 = vor.u32 %v6435_v61, %v5601_v3  ;;  %v5606_v22 = vor.u32 %v6431_v9, %v5603_v52 }
 0x1f0   :  { %v949_v62 = vrot.slane %v939_v39, 4  ;;  %v8594_v15 = vpop.permute.xlu2 %77  ;;  %v10454_v39 = vrot.slane %v7869_v24, 4 }
 0x1f1   :  { %v94_v27 = vrot.slane %v8594_v15, 4  ;;  %2221 = vmatpush.bf16.msrb.mxu3 %v5602_v18  ;;  %2249 = vmatpush.bf16.msra.mxu1 %v5606_v22 }
 0x1f2   :  { %v965_v35 = vsel %vm101_vm0, %v10451_v30, %v949_v62  ;;  %v929_v54 = vpop.permute.xlu0 %928 }
 0x1f3   :  { %v966_v8 = vsel %vm951_vm7, %v8066_v50, %v965_v35  ;;  %v107_v53 = vsel %vm101_vm0, %v10452_v57, %v94_v27  ;;  %v944_v25 = vrot.slane %v929_v54, 4  ;;  %v5465_v50 = vld [vmem:[#allocation2 + $0x90] sm:$0xf]  ;;  %v10456_v54 = vrot.slane %v7760_v4, 4 }
 0x1f4   :  { %982 = vst [vmem:[#allocation2 + $0x178] sm:$0x11] %v966_v8  ;;  %v108_v7 = vsel %vm103_vm1, %v7871_v58, %v107_v53  ;;  %5676 = vmatmul.msk.bf16.vlgmr.msrb.gmra.mxu1 %vm2023_vm12, %v8156_v16 }
 0x1f5   :  { %129 = vst [vmem:[#allocation2 + $0x10] sm:$0x88] %v108_v7  ;;  %v957_v38 = vsel %vm101_vm0, %v10453_v14, %v944_v25 }
 0x1f6   :  { %v958_v55 = vsel %vm951_vm7, %v8194_v23, %v957_v38  ;;  %v6402_v56 = vld [vmem:[#allocation2 + $0xac] sm:$0xf0]  ;;  %v5467_v32 = vld [vmem:[#allocation2 + $0xb0] sm:$0xf0] }
 0x1f7   :  { %978 = vst [vmem:[#allocation2 + $0x158] sm:$0xcc] %v958_v55  ;;  %v8616_v3 = vpop.permute.xlu1 %239  ;;  %v5466_v5 = vor.u32 %v6402_v56, %v5465_v50  ;;  %v5470_v58 = vor.u32 %v6398_v19, %v5467_v32 }
 0x1f8   :  { %v246_v61 = vrot.slane %v8616_v3, 4  ;;  %v539_v9 = vpop.permute.xlu2 %538 }
 0x1f9   :  { %v544_v52 = vrot.slane %v539_v9, 4  ;;  %2169 = vmatpush.bf16.msrb.mxu2 %v5466_v5  ;;  %2197 = vmatpush.bf16.msra.mxu0 %v5470_v58 }
 0x1fa   :  { %v253_v23 = vsel %vm101_vm0, %v10454_v39, %v246_v61  ;;  %v8624_v18 = vpop.permute.xlu0 %171 }
 0x1fb   :  { %v254_v22 = vsel %vm10392_vm15, %v7869_v24, %v253_v23  ;;  %v552_v62 = vsel %vm101_vm0, %v543_v10, %v544_v52  ;;  %v183_v30 = vrot.slane %v8624_v18, 4  ;;  %v6427_v57 = vld [vmem:[#allocation2 + $0x174] sm:$0xf0]  ;;  %v5571_v7 = vld [vmem:[#allocation2 + $0x178] sm:$0xf0]  ;;  %v10460_v52 = vrot.slane %v7819_v17, 4 }
 0x1fc   :  { %263 = vst [vmem:[#allocation2 + $0x50] sm:$0xee] %v254_v22  ;;  %v553_v35 = vsel %vm10455_vm5, %v8422_v60, %v552_v62  ;;  %v10457_v60 = vrot.slane %v8350_v0, 4  ;;  %vm2478_vm5 = vcmask 713728  }
 0x1fd   :  { %561 = vst [vmem:[#allocation2 + $0xd8] sm:$0x77] %v553_v35  ;;  %v198_v8 = vsel %vm101_vm0, %v10456_v54, %v183_v30 }
 0x1fe   :  { %v199_v53 = vsel %vm186_vm14, %v7760_v4, %v198_v8  ;;  %v5569_v24 = vld [vmem:[#allocation2 + $0x158] sm:$0xf]  ;;  %v6423_v25 = vld [vmem:[#allocation2 + $0x15c] sm:$0xf] }
 0x1ff   :  { %216 = vst [vmem:[#allocation2 + $0x50] sm:$0x11] %v199_v53  ;;  %v684_v10 = vpop.permute.xlu1 %683  ;;  %v5570_v14 = vor.u32 %v6427_v57, %v5569_v24  ;;  %v5574_v38 = vor.u32 %v6423_v25, %v5571_v7  ;;  %v10461_v53 = vrot.slane %v8198_v6, 4 }
 0x200   :  { %v694_v50 = vrot.slane %v684_v10, 4  ;;  %v674_v55 = vpop.permute.xlu2 %673 }
 0x201   :  { %v689_v56 = vrot.slane %v674_v55, 4  ;;  %2222 = vmatpush.bf16.msrb.mxu3 %v5570_v14  ;;  %2250 = vmatpush.bf16.msra.mxu1 %v5574_v38 }
 0x202   :  { %v710_v19 = vsel %vm101_vm0, %v10457_v60, %v694_v50  ;;  %v8642_v32 = vpop.permute.xlu0 %333 }
 0x203   :  { %v711_v4 = vsel %vm10458_vm13, %v8350_v0, %v710_v19  ;;  %v702_v5 = vsel %vm101_vm0, %v688_v37, %v689_v56  ;;  %v350_v58 = vrot.slane %v8642_v32, 4  ;;  %v10463_v56 = vrot.slane %v8036_v44, 4 }
 0x204   :  { %727 = vst [vmem:[#allocation2 + $0x118] sm:$0x11] %v711_v4  ;;  %v703_v9 = vsel %vm10459_vm2, %v8450_v29, %v702_v5  ;;  %vm2474_vm13 = vcmask 715776   ;;  %vm10473_vm2 = vmmov %vm10462_vm4 }
 0x205   :  { %723 = vst [vmem:[#allocation2 + $0xf8] sm:$0xcc] %v703_v9  ;;  %v362_v39 = vsel %vm101_vm0, %v10460_v52, %v350_v58  ;;  %v10464_v52 = vrot.slane %v7991_v12, 4 }
 0x206   :  { %v363_v23 = vsel %vm358_vm10, %v7819_v17, %v362_v39  ;;  %v5433_v25 = vld [vmem:[#allocation2 + $0x50] sm:$0xf] }
 0x207   :  { %384 = vst [vmem:[#allocation2 + $0x70] sm:$0x88] %v363_v23  ;;  %v846_v0 = vpop.permute.xlu1 %845 }
 0x208   :  { %v861_v22 = vrot.slane %v846_v0, 4  ;;  %v429_v62 = vpop.permute.xlu2 %428 }
 0x209   :  { %v439_v35 = vrot.slane %v429_v62, 4 }
 0x20a   :  { %v874_v37 = vsel %vm101_vm0, %v860_v33, %v861_v22  ;;  %v794_v54 = vpop.permute.xlu0 %793 }
 0x20b   :  { %v875_v29 = vsel %vm868_vm9, %v8386_v13, %v874_v37  ;;  %v455_v8 = vsel %vm101_vm0, %v438_v46, %v439_v35  ;;  %v799_v57 = vrot.slane %v794_v54, 4  ;;  %v6390_v13 = vld [vmem:[#allocation2 + $0x54] sm:$0xf]  ;;  %v5537_v23 = vld [vmem:[#allocation2 + $0x118] sm:$0xf]  ;;  %vm10465_vm9 = vcmask 752640  }
 0x20c   :  { %895 = vst [vmem:[#allocation2 + $0x138] sm:$0x88] %v875_v29  ;;  %v456_v17 = vsel %vm441_vm11, %v8577_v59, %v455_v8  ;;  %v6415_v22 = vld [vmem:[#allocation2 + $0x11c] sm:$0xf]  ;;  %vm10467_vm3 = vmmov %vm10465_vm9 }
 0x20d   :  { %472 = vst [vmem:[#allocation2 + $0xb8] sm:$0x11] %v456_v17  ;;  %v807_v24 = vsel %vm101_vm0, %v10461_v53, %v799_v57 }
 0x20e   :  { %v808_v33 = vsel %vm10462_vm4, %v8198_v6, %v807_v24  ;;  %v6394_v7 = vld [vmem:[#allocation2 + $0x6c] sm:$0xf0]  ;;  %v5435_v10 = vld [vmem:[#allocation2 + $0x70] sm:$0xf0]  ;;  %vm10474_vm4 = vmmov %vm10473_vm2 }
 0x20f   :  { %816 = vst [vmem:[#allocation2 + $0x138] sm:$0x77] %v808_v33  ;;  %v5434_v46 = vor.u32 %v6394_v7, %v5433_v25  ;;  %v5438_v38 = vor.u32 %v6390_v13, %v5435_v10  ;;  %v10466_v25 = vrot.slane %v8290_v2, 4  ;;  %v5401_v7 = vld [vmem:[#allocation2 + $0x10] sm:$0xf] }
 0x210   :  { %v8672_v14 = vpop.permute.xlu1 %161  ;;  %v174_v59 = vpop.permute.xlu2 %173  ;;  %v6382_v10 = vld [vmem:[#allocation2 + $0x14] sm:$0xf] }
 0x211   :  { %v178_v50 = vrot.slane %v8672_v14, 4  ;;  %v184_v55 = vrot.slane %v174_v59, 4  ;;  %2170 = vmatpush.bf16.msrb.mxu2 %v5434_v46  ;;  %2198 = vmatpush.bf16.msra.mxu0 %v5438_v38 }
 0x212   :  { %v8678_v19 = vpop.permute.xlu0 %87 }
 0x213   :  { %v190_v60 = vsel %vm101_vm0, %v10463_v56, %v178_v50  ;;  %v200_v4 = vsel %vm101_vm0, %v183_v30, %v184_v55  ;;  %v99_v5 = vrot.slane %v8678_v19, 4 }
 0x214   :  { %v191_v6 = vsel %vm186_vm14, %v8036_v44, %v190_v60  ;;  %v201_v9 = vsel %vm186_vm14, %v8624_v18, %v200_v4 }
 0x215   :  { %212 = vst [vmem:[#allocation2 + $0x30] sm:$0xcc] %v191_v6  ;;  %v115_v39 = vsel %vm101_vm0, %v10464_v52, %v99_v5 }
 0x216   :  { %217 = vst [vmem:[#allocation2 + $0x58] sm:$0x11] %v201_v9  ;;  %v116_v0 = vsel %vm103_vm1, %v7991_v12, %v115_v39  ;;  %v6419_v44 = vld [vmem:[#allocation2 + $0x134] sm:$0xf0]  ;;  %v5539_v30 = vld [vmem:[#allocation2 + $0x138] sm:$0xf0] }
 0x217   :  { %133 = vst [vmem:[#allocation2 + $0x30] sm:$0x33] %v116_v0  ;;  %v5538_v35 = vor.u32 %v6419_v44, %v5537_v23  ;;  %v5542_v37 = vor.u32 %v6415_v22, %v5539_v30 }
 0x218   :  { %v601_v62 = vpop.permute.xlu1 %600  ;;  %v336_v18 = vpop.permute.xlu2 %335 }
 0x219   :  { %v611_v54 = vrot.slane %v601_v62, 4  ;;  %v351_v29 = vrot.slane %v336_v18, 4  ;;  %2223 = vmatpush.bf16.msrb.mxu3 %v5538_v35  ;;  %2251 = vmatpush.bf16.msra.mxu1 %v5542_v37  ;;  %v10468_v37 = vrot.slane %v8247_v42, 4 }
 0x21a   :  { %v591_v57 = vpop.permute.xlu0 %590 }
 0x21b   :  { %v627_v8 = vsel %vm101_vm0, %v610_v49, %v611_v54  ;;  %v364_v17 = vsel %vm101_vm0, %v350_v58, %v351_v29  ;;  %v606_v53 = vrot.slane %v591_v57, 4 }
 0x21c   :  { %v628_v12 = vsel %vm10465_vm9, %v8462_v47, %v627_v8  ;;  %v365_v24 = vsel %vm358_vm10, %v8642_v32, %v364_v17  ;;  %v46_v32 = vld [vmem:[%s10301_s0 + $0x18] sm:$0x77]  ;;  %s6891_s0 = smov 120   ;;  %vm2636_vm9 = vcmask 982016  }
 0x21d   :  { %644 = vst [vmem:[#allocation2 + $0xf8] sm:$0x33] %v628_v12  ;;  %v619_v33 = vsel %vm101_vm0, %v10466_v25, %v606_v53 }
 0x21e   :  { %385 = vst [vmem:[#allocation2 + $0x78] sm:$0x88] %v365_v24  ;;  %v620_v49 = vsel %vm10467_vm3, %v8290_v2, %v619_v33  ;;  %v6386_v13 = vld [vmem:[#allocation2 + $0x2c] sm:$0xf0]  ;;  %v5403_v46 = vld [vmem:[#allocation2 + $0x30] sm:$0xf0]  ;;  %vm10475_vm3 = vmmov %vm10473_vm2 }
 0x21f   :  { %640 = vst [vmem:[#allocation2 + $0xd8] sm:$0x88] %v620_v49  ;;  %v5402_v58 = vor.u32 %v6386_v13, %v5401_v7  ;;  %v5406_v38 = vor.u32 %v6382_v10, %v5403_v46 }
 0x220   :  { %v419_v47 = vpop.permute.xlu1 %418  ;;  %v164_v55 = vpop.permute.xlu2 %163  ;;  %50 = vst [vmem:[#allocation2 + $0x18] sm:$0x77] %v46_v32 }
 0x221   :  { %v434_v59 = vrot.slane %v419_v47, 4  ;;  %v179_v56 = vrot.slane %v164_v55, 4  ;;  %2171 = vmatpush.bf16.msrb.mxu2 %v5402_v58  ;;  %2199 = vmatpush.bf16.msra.mxu0 %v5406_v38 }
 0x222   :  { %v346_v60 = vpop.permute.xlu0 %345 }
 0x223   :  { %v447_v2 = vsel %vm101_vm0, %v433_v41, %v434_v59  ;;  %v192_v4 = vsel %vm101_vm0, %v178_v50, %v179_v56  ;;  %v356_v9 = vrot.slane %v346_v60, 4 }
 0x224   :  { %v448_v6 = vsel %vm441_vm11, %v8454_v20, %v447_v2  ;;  %v193_v52 = vsel %vm186_vm14, %v8672_v14, %v192_v4  ;;  %2172 = vmatmul.bf16.vlgmr.msrb.gmra.mxu2 %v8219_v51  ;;  %2200 = vmatmul.bf16.vlgmr.msra.gmra.mxu0 %v8219_v51  ;;  %v6411_v39 = vld [vmem:[#allocation2 + $0xf4] sm:$0xf0]  ;;  %v5507_v0 = vld [vmem:[#allocation2 + $0xf8] sm:$0xf0]  ;;  %vm10469_vm11 = vcmask 769024   ;;  %v2089_v4 = vpop.f32.mrf.mxu2 }
 0x225   :  { %468 = vst [vmem:[#allocation2 + $0x98] sm:$0xcc] %v448_v6  ;;  %v372_v41 = vsel %vm101_vm0, %v355_v43, %v356_v9  ;;  %v2061_v6 = vpop.f32.mrf.mxu0 }
 0x226   :  { %213 = vst [vmem:[#allocation2 + $0x38] sm:$0xcc] %v193_v52  ;;  %v373_v20 = vsel %vm358_vm10, %v8541_v34, %v372_v41  ;;  %v5505_v23 = vld [vmem:[#allocation2 + $0xd8] sm:$0xf]  ;;  %v6407_v50 = vld [vmem:[#allocation2 + $0xdc] sm:$0xf] }
 0x227   :  { %389 = vst [vmem:[#allocation2 + $0x98] sm:$0x33] %v373_v20  ;;  %v5506_v22 = vor.u32 %v6411_v39, %v5505_v23  ;;  %v5510_v14 = vor.u32 %v6407_v50, %v5507_v0 }
 0x228   :  { %v1522_v44 = vpop.permute.xlu1 %1521  ;;  %v1414_v62 = vpop.permute.xlu2 %1413 }
 0x229   :  { %v1527_v30 = vrot.slane %v1522_v44, 4  ;;  %v1424_v35 = vrot.slane %v1414_v62, 4  ;;  %2224 = vmatpush.bf16.msrb.mxu3 %v5506_v22  ;;  %2252 = vmatpush.bf16.msra.mxu1 %v5510_v14  ;;  %v2075_v22 = vpop.f32.mrf.mxu1  ;;  %v10470_v62 = vrot.slane %v8338_v40, 4 }
 0x22a   :  { %v497_v54 = vpop.permute.xlu0 %496 }
 0x22b   :  { %v1534_v43 = vsel %vm101_vm0, %v10468_v37, %v1527_v30  ;;  %v1439_v18 = vsel %vm101_vm0, %v1423_v63, %v1424_v35  ;;  %v502_v29 = vrot.slane %v497_v54, 4 }
 0x22c   :  { %v1535_v34 = vsel %vm291_vm6, %v8247_v42, %v1534_v43  ;;  %v1440_v8 = vsel %vm186_vm14, %v8485_v48, %v1439_v18 }
 0x22d   :  { %1543 = vst [vmem:[#allocation2 + $0x258] sm:$0x77] %v1535_v34  ;;  %v510_v57 = vsel %vm101_vm0, %v501_v1, %v502_v29  ;;  %v8744_v1 = vpop.f32.mrf.mxu3  ;;  %v2063_v29 = vpop.f32.mrf.mxu0 }
 0x22e   :  { %1456 = vst [vmem:[#allocation2 + $0x238] sm:$0x11] %v1440_v8  ;;  %v511_v12 = vsel %vm10469_vm11, %v8569_v21, %v510_v57  ;;  %v5473_v49 = vld [vmem:[#allocation2 + $0x98] sm:$0xf]  ;;  %v6399_v10 = vld [vmem:[#allocation2 + $0x9c] sm:$0xf]  ;;  %v2091_v8 = vpop.f32.mrf.mxu2  ;;  %vm10476_vm11 = vmmov %vm10473_vm2 }
 0x22f   :  { %519 = vst [vmem:[#allocation2 + $0xb8] sm:$0xee] %v511_v12 }
 0x230   :  { %v284_v17 = vpop.permute.xlu1 %283 }
 0x231   :  { %v289_v42 = vrot.slane %v284_v17, 4  ;;  %v8775_v12 = vpop.permute.xlu2 %1631 }
 0x232   :  { %v242_v53 = vpop.permute.xlu0 %241 }
 0x233   :  { %v297_v63 = vsel %vm101_vm0, %v288_v45, %v289_v42  ;;  %v247_v48 = vrot.slane %v242_v53, 4 }
 0x234   :  { %v298_v24 = vsel %vm291_vm6, %v8544_v28, %v297_v63  ;;  %v1621_v25 = vld [vmem:[#allocation2 + $0x258] sm:$0x77] }
 0x235   :  { %306 = vst [vmem:[#allocation2 + $0x78] sm:$0x77] %v298_v24  ;;  %v1869_v33 = vunpack.c.l.b16 %v1621_v25  ;;  %v1870_v7 = vunpack.c.h.b16 %v1621_v25  ;;  %v255_v21 = vsel %vm101_vm0, %v246_v61, %v247_v48  ;;  %v2105_v23 = vpop.f32.mrf.mxu3  ;;  %v2064_v48 = vadd.f32 %v2063_v29, %v8775_v12 }
 0x236   :  { %v256_v13 = vsel %vm10392_vm15, %v8616_v3, %v255_v21  ;;  %v6403_v45 = vld [vmem:[#allocation2 + $0xb4] sm:$0xf0]  ;;  %v5475_v46 = vld [vmem:[#allocation2 + $0xb8] sm:$0xf0]  ;;  %v2092_v25 = vadd.f32 %v2091_v8, %v8775_v12 }
 0x237   :  { %v1949_v47 = vpack.c.b16 %v1869_v33, %v1869_v33  ;;  %v1950_v28 = vpack.c.b16 %v1870_v7, %v1870_v7  ;;  %264 = vst [vmem:[#allocation2 + $0x58] sm:$0xee] %v256_v13  ;;  %v5474_v38 = vor.u32 %v6403_v45, %v5473_v49  ;;  %v5478_v59 = vor.u32 %v6399_v10, %v5475_v46  ;;  %v2077_v7 = vpop.f32.mrf.mxu1 }
 0x238   :  { %v90_v58 = vpop.permute.xlu1 %89  ;;  %v8796_v13 = vadd.f32 %v2105_v23, %v2092_v25  ;;  %v8798_v45 = vadd.f32 %v2077_v7, %v2064_v48 }
 0x239   :  { %v100_v55 = vrot.slane %v90_v58, 4  ;;  %v2047_v32 = vsel %vm2027_vm8, %v1949_v47, 0  ;;  %v2050_v56 = vsel %vm2027_vm8, %v1950_v28, 0  ;;  %2225 = vmatpush.bf16.msrb.mxu3 %v5474_v38  ;;  %2253 = vmatpush.bf16.msra.mxu1 %v5478_v59  ;;  %vm2487_vm8 = vcmask 1045508  }
 0x23a   :  { %v80_v61 = vpop.permute.xlu0 %79  ;;  %2240 = vmatpush.bf16.msra.mxu2 %v2047_v32  ;;  %2268 = vmatpush.bf16.msrb.mxu0 %v2050_v56  ;;  %v6677_v10 = vpack.i.bf16 %v8796_v13, %v8798_v45 }
 0x23b   :  { %v117_v3 = vsel %vm101_vm0, %v99_v5, %v100_v55  ;;  %v95_v60 = vrot.slane %v80_v61, 4  ;;  %v2159_v55 = vpop.f32.mrf.mxu0 }
 0x23c   :  { %v118_v2 = vsel %vm103_vm1, %v8678_v19, %v117_v3  ;;  %v6395_v52 = vld [vmem:[#allocation2 + $0x74] sm:$0xf0]  ;;  %v5443_v20 = vld [vmem:[#allocation2 + $0x78] sm:$0xf0] }
 0x23d   :  { %134 = vst [vmem:[#allocation2 + $0x38] sm:$0x33] %v118_v2  ;;  %v109_v9 = vsel %vm101_vm0, %v94_v27, %v95_v60 }
 0x23e   :  { %v110_v41 = vsel %vm103_vm1, %v8594_v15, %v109_v9  ;;  %v5441_v39 = vld [vmem:[#allocation2 + $0x58] sm:$0xf]  ;;  %v6391_v5 = vld [vmem:[#allocation2 + $0x5c] sm:$0xf] }
 0x23f   :  { %130 = vst [vmem:[#allocation2 + $0x18] sm:$0x88] %v110_v41  ;;  %v5442_v0 = vor.u32 %v6395_v52, %v5441_v39  ;;  %v5446_v19 = vor.u32 %v6391_v5, %v5443_v20  ;;  %v2131_v63 = vpop.f32.mrf.mxu3  ;;  %v2117_v47 = vpop.f32.mrf.mxu1 }
 0x240   :  { %v1404_v50 = vpop.permute.xlu1 %1403 }
 0x241   :  { %v1419_v44 = vrot.slane %v1404_v50, 4  ;;  %2226 = vmatpush.bf16.msrb.mxu3 %v5442_v0  ;;  %2254 = vmatpush.bf16.msra.mxu1 %v5446_v19 }
 0x242   :  { %v1332_v14 = vpop.permute.xlu0 %1331 }
 0x243   :  { %v1431_v27 = vsel %vm101_vm0, %v1418_v36, %v1419_v44  ;;  %v1342_v30 = vrot.slane %v1332_v14, 4  ;;  %v2161_v9 = vpop.f32.mrf.mxu0 }
 0x244   :  { %v1432_v15 = vsel %vm186_vm14, %v8497_v31, %v1431_v27  ;;  %v6387_v37 = vld [vmem:[#allocation2 + $0x34] sm:$0xf0]  ;;  %v5411_v18 = vld [vmem:[#allocation2 + $0x38] sm:$0xf0] }
 0x245   :  { %1452 = vst [vmem:[#allocation2 + $0x218] sm:$0xcc] %v1432_v15  ;;  %v1357_v35 = vsel %vm101_vm0, %v10470_v62, %v1342_v30 }
 0x246   :  { %v1358_v43 = vsel %vm103_vm1, %v8338_v40, %v1357_v35  ;;  %v5409_v54 = vld [vmem:[#allocation2 + $0x18] sm:$0xf]  ;;  %v6383_v34 = vld [vmem:[#allocation2 + $0x1c] sm:$0xf] }
 0x247   :  { %1374 = vst [vmem:[#allocation2 + $0x218] sm:$0x33] %v1358_v43  ;;  %v5410_v57 = vor.u32 %v6387_v37, %v5409_v54  ;;  %v5414_v31 = vor.u32 %v6383_v34, %v5411_v18  ;;  %v2133_v46 = vpop.f32.mrf.mxu3  ;;  %v2119_v61 = vpop.f32.mrf.mxu1 }
 0x248   :  { %v8773_v36 = vpop.permute.xlu1 %1626 }
 0x249   :  { %v2062_v17 = vadd.f32 %v2061_v6, %v8773_v36  ;;  %v2090_v42 = vadd.f32 %v2089_v4, %v8773_v36  ;;  %2227 = vmatpush.bf16.msrb.mxu3 %v5410_v57  ;;  %2255 = vmatpush.bf16.msra.mxu1 %v5414_v31  ;;  %v2118_v59 = vadd.f32 %v2117_v47, %v8773_v36 }
 0x24a   :  { %v1481_v24 = vpop.permute.xlu0 %1480  ;;  %v2120_v6 = vadd.f32 %v2119_v61, %v8775_v12 }
 0x24b   :  { %v8780_v40 = vadd.f32 %v8744_v1, %v2090_v42  ;;  %v8782_v53 = vadd.f32 %v2075_v22, %v2062_v17  ;;  %v1486_v33 = vrot.slane %v1481_v24, 4  ;;  %v8808_v56 = vadd.f32 %v2131_v63, %v2118_v59 }
 0x24c   :  { %2228 = vmatmul.bf16.vlgmr.msrb.gmra.mxu3 %v8219_v51  ;;  %2256 = vmatmul.bf16.vlgmr.msra.gmra.mxu1 %v8219_v51  ;;  %v2134_v52 = vadd.f32 %v2133_v46, %v2120_v6 }
 0x24d   :  { %v6662_v21 = vpack.i.bf16 %v8780_v40, %v8782_v53  ;;  %v1493_v1 = vsel %vm101_vm0, %v1485_v11, %v1486_v33 }
 0x24e   :  { %v1494_v49 = vsel %vm10392_vm15, %v8377_v26, %v1493_v1  ;;  %v5665_v51 = vld [vmem:[#allocation2 + $0x218] sm:$0xf]  ;;  %v6447_v11 = vld [vmem:[#allocation2 + $0x21c] sm:$0xf] }
 0x24f   :  { %6663 = vrot.lane.b32.xlu0 %v6662_v21, %s10411_s29  ;;  %1502 = vst [vmem:[#allocation2 + $0x238] sm:$0xee] %v1494_v49 }
 0x256   :  { %v6451_v28 = vld [vmem:[#allocation2 + $0x234] sm:$0xf0]  ;;  %v5667_v58 = vld [vmem:[#allocation2 + $0x238] sm:$0xf0] }
 0x257   :  { %6678 = vrot.lane.b32.xlu0 %v6677_v10, %s10411_s29  ;;  %v5666_v38 = vor.u32 %v6451_v28, %v5665_v51  ;;  %v5670_v26 = vor.u32 %v6447_v11, %v5667_v58 }
 0x259   :  { %2241 = vmatpush.bf16.msra.mxu2 %v5666_v38  ;;  %2269 = vmatpush.bf16.msrb.mxu0 %v5670_v26 }
 0x25c   :  { %5677 = vmatmul.msk.bf16.vlgmr.msra.gmra.mxu2 %vm2023_vm12, %v8156_v16  ;;  %5678 = vmatmul.msk.bf16.vlgmr.msrb.gmra.mxu0 %vm2023_vm12, %v8156_v16 }
 0x25f   :  { %v2145_v32 = vpop.f32.mrf.mxu3 }
 0x260   :  { %v2146_v3 = vadd.f32 %v2145_v32, %v8773_v36 }
 0x261   :  { %v2187_v5 = vpop.f32.mrf.mxu1 }
 0x262   :  { %v8811_v2 = vadd.f32 %v2159_v55, %v2146_v3 }
 0x264   :  { %v6667_v60 = vpack.i.bf16 %v8811_v2, %v8808_v56 }
 0x266   :  { %6668 = vrot.lane.b32.xlu1 %v6667_v60, %s10411_s29 }
 0x267   :  { %v2147_v4 = vpop.f32.mrf.mxu3 }
 0x268   :  { %v2148_v41 = vadd.f32 %v2147_v4, %v8775_v12 }
 0x269   :  { %v2189_v20 = vpop.f32.mrf.mxu1 }
 0x26a   :  { %v8818_v16 = vadd.f32 %v2161_v9, %v2148_v41 }
 0x26c   :  { %v6682_v39 = vpack.i.bf16 %v8818_v16, %v2134_v52 }
 0x26e   :  { %6683 = vrot.lane.b32.xlu1 %v6682_v39, %s10411_s29 }
 0x271   :  { %v2215_v50 = vpop.f32.mrf.mxu1 }
 0x279   :  { %v2217_v62 = vpop.f32.mrf.mxu1 }
 0x2a1   :  { %v2201_v23 = vpop.f32.mrf.mxu0 }
 0x2a2   :  { %v2202_v0 = vadd.f32 %v2201_v23, %v8773_v36 }
 0x2a4   :  { %v8824_v22 = vadd.f32 %v2215_v50, %v2202_v0 }
 0x2a7   :  { %v2173_v19 = vpop.f32.mrf.mxu2 }
 0x2a8   :  { %v2174_v44 = vadd.f32 %v2173_v19, %v8773_v36 }
 0x2a9   :  { %v2203_v14 = vpop.f32.mrf.mxu0 }
 0x2aa   :  { %v8826_v27 = vadd.f32 %v2187_v5, %v2174_v44  ;;  %v2204_v30 = vadd.f32 %v2203_v14, %v8775_v12 }
 0x2ac   :  { %v6672_v15 = vpack.i.bf16 %v8824_v22, %v8826_v27  ;;  %v8833_v43 = vadd.f32 %v2217_v62, %v2204_v30 }
 0x2ae   :  { %6673 = vrot.lane.b32.xlu2 %v6672_v15, %s10411_s29 }
 0x2af   :  { %v2175_v35 = vpop.f32.mrf.mxu2 }
 0x2b0   :  { %v2176_v37 = vadd.f32 %v2175_v35, %v8775_v12 }
 0x2b2   :  { %v8835_v54 = vadd.f32 %v2189_v20, %v2176_v37 }
 0x2b4   :  { %v6687_v34 = vpack.i.bf16 %v8833_v43, %v8835_v54 }
 0x2b6   :  { %6688 = vrot.lane.b32.xlu2 %v6687_v34, %s10411_s29 }
 0x2c1   :  { %v6664_v18 = vpop.permute.xlu0 %6663 }
 0x2c2   :  { %v6666_v29 = vunpack.i.h.bf16 %v6664_v18  ;;  %v6665_v8 = vunpack.i.l.bf16 %v6664_v18 }
 0x2c4   :  { %v2325_v31 = vsel %vm103_vm1, %v6665_v8, %v6666_v29 }
 0x2c5   :  { %v8843_v63 = vmax.f32 %v8782_v53, %v2325_v31 }
 0x2c9   :  { %v2257_v24 = vpop.f32.mrf.mxu1  ;;  %v6679_v33 = vpop.permute.xlu0 %6678 }
 0x2ca   :  { %v6681_v1 = vunpack.i.h.bf16 %v6679_v33  ;;  %v2258_v10 = vadd.f32 %v2257_v24, %v8773_v36 }
 0x2cf   :  { %v2229_v48 = vpop.f32.mrf.mxu3 }
 0x2d0   :  { %v2230_v46 = vadd.f32 %v2229_v48, %v8773_v36 }
 0x2d1   :  { %v2259_v55 = vpop.f32.mrf.mxu1 }
 0x2d2   :  { %v2260_v61 = vadd.f32 %v2259_v55, %v8775_v12 }
 0x2d7   :  { %v2231_v32 = vpop.f32.mrf.mxu3 }
 0x2d8   :  { %v6669_v57 = vpop.permute.xlu1 %6668  ;;  %v2232_v60 = vadd.f32 %v2231_v32, %v8775_v12 }
 0x2d9   :  { %v6670_v17 = vunpack.i.l.bf16 %v6669_v57  ;;  %v2271_v7 = vpop.f32.mrf.mxu0  ;;  %v6671_v41 = vunpack.i.h.bf16 %v6669_v57 }
 0x2da   :  { %v2272_v28 = vadd.f32 %v2271_v7, %v2258_v10 }
 0x2db   :  { %v2326_v42 = vsel %vm103_vm1, %v6666_v29, %v6670_v17  ;;  %v2327_v20 = vsel %vm103_vm1, %v6670_v17, %v6671_v41 }
 0x2dc   :  { %v8846_v25 = vmax.f32 %v8780_v40, %v2326_v42  ;;  %v2355_v44 = vmax.f32 %v8808_v56, %v2327_v20 }
 0x2de   :  { %v6702_v21 = vpack.i.bf16 %v8846_v25, %v8843_v63 }
 0x2df   :  { %v2243_v51 = vpop.f32.mrf.mxu2 }
 0x2e0   :  { %v6684_v49 = vpop.permute.xlu1 %6683  ;;  %6703 = vrot.lane.b32.xlu2 %v6702_v21, %s6887_s19  ;;  %v2244_v58 = vadd.f32 %v2243_v51, %v2230_v46 }
 0x2e1   :  { %v6686_v53 = vunpack.i.h.bf16 %v6684_v49  ;;  %v6685_v47 = vunpack.i.l.bf16 %v6684_v49  ;;  %v2273_v3 = vpop.f32.mrf.mxu0 }
 0x2e2   :  { %v6692_v59 = vpack.i.bf16 %v2272_v28, %v2244_v58 }
 0x2e3   :  { %v2333_v40 = vsel %vm103_vm1, %v6681_v1, %v6685_v47  ;;  %v2334_v11 = vsel %vm103_vm1, %v6685_v47, %v6686_v53 }
 0x2e4   :  { %v8856_v38 = vmax.f32 %v8796_v13, %v2333_v40  ;;  %v8858_v26 = vmax.f32 %v2134_v52, %v2334_v11  ;;  %6693 = vrot.lane.b32.xlu0 %v6692_v59, %s10411_s29  ;;  %v2274_v13 = vadd.f32 %v2273_v3, %v2260_v61  ;;  %v6680_v52 = vunpack.i.l.bf16 %v6679_v33 }
 0x2e6   :  { %v6717_v36 = vpack.i.bf16 %v8858_v26, %v8856_v38  ;;  %v2332_v5 = vsel %vm103_vm1, %v6680_v52, %v6681_v1 }
 0x2e7   :  { %v2245_v6 = vpop.f32.mrf.mxu2  ;;  %v8872_v12 = vmax.f32 %v8798_v45, %v2332_v5 }
 0x2e8   :  { %6718 = vrot.lane.b32.xlu2 %v6717_v36, %s6887_s19  ;;  %v2246_v4 = vadd.f32 %v2245_v6, %v2232_v60 }
 0x2ea   :  { %v6697_v9 = vpack.i.bf16 %v2274_v13, %v2246_v4 }
 0x2ec   :  { %6698 = vrot.lane.b32.xlu1 %v6697_v9, %s10411_s29  ;;  %s6893_s29 = smov 56  }
 0x308   :  { %v6674_v39 = vpop.permute.xlu2 %6673 }
 0x309   :  { %v6676_v23 = vunpack.i.h.bf16 %v6674_v39  ;;  %v6675_v50 = vunpack.i.l.bf16 %v6674_v39 }
 0x30b   :  { %v2328_v0 = vsel %vm103_vm1, %v6671_v41, %v6675_v50  ;;  %v2329_v19 = vsel %vm103_vm1, %v6675_v50, %v6676_v23 }
 0x30c   :  { %v2356_v14 = vmax.f32 %v8811_v2, %v2328_v0  ;;  %v8877_v15 = vmax.f32 %v8826_v27, %v2329_v19 }
 0x30e   :  { %v6707_v30 = vpack.i.bf16 %v2356_v14, %v2355_v44  ;;  %v6712_v62 = vpack.i.bf16 %v8872_v12, %v8877_v15 }
 0x310   :  { %v6689_v35 = vpop.permute.xlu2 %6688  ;;  %6708 = vrot.lane.b32.xlu0 %v6707_v30, %s6887_s19  ;;  %6713 = vrot.lane.b32.xlu1 %v6712_v62, %s6887_s19 }
 0x311   :  { %v6691_v37 = vunpack.i.h.bf16 %v6689_v35  ;;  %v6690_v34 = vunpack.i.l.bf16 %v6689_v35 }
 0x313   :  { %v2335_v45 = vsel %vm103_vm1, %v6686_v53, %v6690_v34  ;;  %v2336_v56 = vsel %vm103_vm1, %v6690_v34, %v6691_v37 }
 0x314   :  { %v8886_v2 = vmax.f32 %v8818_v16, %v2335_v45  ;;  %v8889_v27 = vmax.f32 %v8835_v54, %v2336_v56 }
 0x316   :  { %v6722_v18 = vpack.i.bf16 %v8889_v27, %v8886_v2 }
 0x318   :  { %6723 = vrot.lane.b32.xlu0 %v6722_v18, %s6887_s19 }
 0x33a   :  { %v6704_v10 = vpop.permute.xlu2 %6703 }
 0x33b   :  { %v6706_v53 = vunpack.i.h.bf16 %v6704_v10  ;;  %v6705_v47 = vunpack.i.l.bf16 %v6704_v10 }
 0x33d   :  { %v2410_v40 = vsel %vm358_vm10, %v6705_v47, %v6706_v53 }
 0x342   :  { %v6719_v46 = vpop.permute.xlu2 %6718 }
 0x343   :  { %v6721_v51 = vunpack.i.h.bf16 %v6719_v46  ;;  %v6720_v28 = vunpack.i.l.bf16 %v6719_v46 }
 0x345   :  { %v2417_v11 = vsel %vm358_vm10, %v6720_v28, %v6721_v51 }
 0x356   :  { %v6694_v29 = vpop.permute.xlu0 %6693 }
 0x357   :  { %v6696_v8 = vunpack.i.h.bf16 %v6694_v29  ;;  %v6695_v57 = vunpack.i.l.bf16 %v6694_v29 }
 0x359   :  { %v2330_v31 = vsel %vm103_vm1, %v6676_v23, %v6695_v57  ;;  %v2331_v17 = vsel %vm103_vm1, %v6695_v57, %v6696_v8 }
 0x35a   :  { %v8897_v42 = vmax.f32 %v8824_v22, %v2330_v31  ;;  %v8899_v16 = vmax.f32 %v2244_v58, %v2331_v17  ;;  %v2444_v58 = vmax.f32 %v8856_v38, %v2417_v11 }
 0x35c   :  { %v6727_v54 = vpack.i.bf16 %v8899_v16, %v8897_v42  ;;  %v2458_v39 = vmax.f32 %v2444_v58, 0.0 }
 0x35e   :  { %v6699_v24 = vpop.permute.xlu1 %6698  ;;  %6728 = vrot.lane.b32.xlu1 %v6727_v54, %s6887_s19 }
 0x35f   :  { %v6701_v48 = vunpack.i.h.bf16 %v6699_v24  ;;  %v6700_v33 = vunpack.i.l.bf16 %v6699_v24 }
 0x361   :  { %v2337_v7 = vsel %vm103_vm1, %v6691_v37, %v6700_v33  ;;  %v2338_v21 = vsel %vm103_vm1, %v6700_v33, %v6701_v48  ;;  %vm10393_vm1 = vcmask 1041408  }
 0x362   :  { %v8907_v1 = vmax.f32 %v8833_v43, %v2337_v7  ;;  %v8909_v49 = vmax.f32 %v2246_v4, %v2338_v21  ;;  %v2436_v43 = vmax.f32 %v8843_v63, %v2410_v40  ;;  %vm8967_vm12 = vmor %vm10393_vm1, %vm2487_vm8  ;;  %vm10477_vm8 = vcmask 523264  }
 0x364   :  { %v6732_v22 = vpack.i.bf16 %v8909_v49, %v8907_v1  ;;  %v2450_v41 = vmax.f32 %v2436_v43, 0.0 }
 0x366   :  { %6733 = vrot.lane.b32.xlu2 %v6732_v22, %s6887_s19  ;;  %s6892_s19 = smov 58  }
 0x382   :  { %v6709_v59 = vpop.permute.xlu0 %6708  ;;  %v8918_v55 = vpop.permute.xlu1 %6713 }
 0x383   :  { %v6711_v32 = vunpack.i.h.bf16 %v6709_v59  ;;  %v6710_v36 = vunpack.i.l.bf16 %v6709_v59  ;;  %v6716_v3 = vunpack.i.h.bf16 %v8918_v55  ;;  %v6715_v61 = vunpack.i.l.bf16 %v8918_v55 }
 0x385   :  { %v2411_v60 = vsel %vm358_vm10, %v6706_v53, %v6710_v36  ;;  %v2412_v6 = vsel %vm358_vm10, %v6710_v36, %v6711_v32  ;;  %v2413_v13 = vsel %vm358_vm10, %v6711_v32, %v6715_v61  ;;  %v2416_v63 = vsel %vm358_vm10, %v6716_v3, %v6720_v28 }
 0x386   :  { %v2437_v38 = vmax.f32 %v8846_v25, %v2411_v60  ;;  %v2438_v4 = vmax.f32 %v2355_v44, %v2412_v6  ;;  %v2439_v9 = vmax.f32 %v2356_v14, %v2413_v13  ;;  %v2443_v52 = vmax.f32 %v8872_v12, %v2416_v63 }
 0x388   :  { %v2451_v5 = vmax.f32 %v2437_v38, 0.0  ;;  %v2452_v20 = vmax.f32 %v2438_v4, 0.0  ;;  %v2453_v23 = vmax.f32 %v2439_v9, 0.0  ;;  %v2457_v50 = vmax.f32 %v2443_v52, 0.0 }
 0x38a   :  { %v8930_v0 = vpack.c.bf16 %v2451_v5, %v2450_v41  ;;  %v8932_v19 = vpack.c.bf16 %v2453_v23, %v2452_v20  ;;  %v2468_v30 = vpack.c.bf16 %v2458_v39, %v2457_v50  ;;  %v6724_v62 = vpop.permute.xlu0 %6723 }
 0x38b   :  { %v6726_v35 = vunpack.i.h.bf16 %v6724_v62  ;;  %v6725_v37 = vunpack.i.l.bf16 %v6724_v62 }
 0x38c   :  { %2472 = vst [vmem:[#allocation3] sm:$0xff] %v8930_v0  ;;  %v2858_v25 = vrot.slane %v8930_v0, 4  ;;  %v2859_v12 = vrot.slane %v8932_v19, 4  ;;  %2617 = vrot.lane.b32.xlu2 %v8930_v0, %s6891_s0  ;;  %2696 = vrot.lane.b32.xlu0 %v8930_v0, %s10395_s23  ;;  %v8953_v57 = vrot.slane %v8930_v0, 6  ;;  %v2861_v31 = vrot.slane %v2468_v30, 4 }
 0x38d   :  { %2476 = vst [vmem:[#allocation3 + $0x14] sm:$0x33] %v2468_v30  ;;  %v2418_v44 = vsel %vm358_vm10, %v6721_v51, %v6725_v37  ;;  %v2419_v14 = vsel %vm358_vm10, %v6725_v37, %v6726_v35  ;;  %2776 = vrot.lane.b32.xlu1 %v8930_v0, %s6892_s19  ;;  %v2493_v24 = vrot.slane %v2468_v30, 6  ;;  %v2490_v33 = vrot.slane %v8932_v19, 6 }
 0x38e   :  { %2473 = vst [vmem:[#allocation3 + $0x8] sm:$0xff] %v8932_v19  ;;  %v2445_v34 = vmax.f32 %v8858_v26, %v2418_v44  ;;  %v2446_v45 = vmax.f32 %v8886_v2, %v2419_v14  ;;  %v2864_v56 = vsel %vm101_vm0, %v2858_v25, %v2859_v12  ;;  %v2492_v17 = vrot.slane %v8953_v57, 4 }
 0x38f   :  { %3060 = vst [vmem:[#allocation3 + $0x258] sm:$0xff] %v8932_v19 }
 0x390   :  { %v2459_v18 = vmax.f32 %v2445_v34, 0.0  ;;  %v2460_v29 = vmax.f32 %v2446_v45, 0.0  ;;  %2874 = vst [vmem:[#allocation3 + $0x12c] sm:$0xff] %v2864_v56  ;;  %v8973_v48 = vsel %vm8967_vm12, %v2492_v17, %v2493_v24 }
 0x392   :  { %v2469_v8 = vpack.c.bf16 %v2460_v29, %v2459_v18 }
 0x394   :  { %2477 = vst [vmem:[#allocation3 + $0x1c] sm:$0x33] %v2469_v8  ;;  %2736 = vrot.lane.b32.xlu0 %v8953_v57, %s6878_s25  ;;  %2817 = vrot.lane.b32.xlu2 %v8953_v57, %s6893_s29  ;;  %v2862_v26 = vrot.slane %v2469_v8, 4 }
 0x395   :  { %3063 = vst [vmem:[#allocation3 + $0x26c] sm:$0x33] %v2469_v8  ;;  %2702 = vrot.lane.b32.xlu1 %v2468_v30, %s10395_s23 }
 0x396   :  { %v2866_v2 = vsel %vm101_vm0, %v2861_v31, %v2862_v26 }
 0x397   :  { %2877 = vst [vmem:[#allocation3 + $0x140] sm:$0x33] %v2866_v2 }
 0x39c   :  { %2656 = vrot.lane.b32.xlu0 %v8953_v57, %s10396_s13  ;;  %2546 = vrot.lane.b32.xlu2 %v2468_v30, %s10403_s21 }
 0x39d   :  { %2623 = vrot.lane.b32.xlu1 %v2468_v30, %s6891_s0 }
 0x3a4   :  { %2782 = vrot.lane.b32.xlu0 %v2468_v30, %s6892_s19  ;;  %2742 = vrot.lane.b32.xlu2 %v8973_v48, %s6878_s25 }
 0x3a5   :  { %2662 = vrot.lane.b32.xlu1 %v8973_v48, %s10396_s13 }
 0x3ac   :  { %2778 = vrot.lane.b32.xlu2 %v8932_v19, %s6892_s19  ;;  %2823 = vrot.lane.b32.xlu0 %v8973_v48, %s6893_s29 }
 0x3ad   :  { %2698 = vrot.lane.b32.xlu1 %v8932_v19, %s10395_s23 }
 0x3b4   :  { %2503 = vrot.lane.b32.xlu2 %v2490_v33, %s10404_s20  ;;  %2619 = vrot.lane.b32.xlu0 %v8932_v19, %s6891_s0 }
 0x3b5   :  { %2738 = vrot.lane.b32.xlu1 %v2490_v33, %s6878_s25 }
 0x3bc   :  { %2704 = vrot.lane.b32.xlu2 %v2469_v8, %s10395_s23  ;;  %2819 = vrot.lane.b32.xlu0 %v2490_v33, %s6893_s29 }
 0x3bd   :  { %2658 = vrot.lane.b32.xlu1 %v2490_v33, %s10396_s13 }
 0x3c0   :  { %v6734_v7 = vpop.permute.xlu2 %6733 }
 0x3c1   :  { %v6736_v21 = vunpack.i.h.bf16 %v6734_v7  ;;  %v6735_v22 = vunpack.i.l.bf16 %v6734_v7 }
 0x3c3   :  { %v2449_v10 = vmax.f32 %v8909_v49, %v6736_v21  ;;  %v2420_v46 = vsel %vm358_vm10, %v6726_v35, %v6735_v22  ;;  %v2421_v53 = vsel %vm358_vm10, %v6735_v22, %v6736_v21  ;;  %v2496_v49 = vrot.slane %v2469_v8, 6 }
 0x3c4   :  { %v2447_v47 = vmax.f32 %v8889_v27, %v2420_v46  ;;  %v2448_v51 = vmax.f32 %v8907_v1, %v2421_v53  ;;  %2625 = vrot.lane.b32.xlu2 %v2469_v8, %s6891_s0  ;;  %2548 = vrot.lane.b32.xlu0 %v2469_v8, %s10403_s21  ;;  %v2495_v27 = vrot.slane %v2490_v33, 4 }
 0x3c5   :  { %v2463_v28 = vmax.f32 %v2449_v10, 0.0  ;;  %2784 = vrot.lane.b32.xlu1 %v2469_v8, %s6892_s19 }
 0x3c6   :  { %v2461_v40 = vmax.f32 %v2447_v47, 0.0  ;;  %v2462_v11 = vmax.f32 %v2448_v51, 0.0  ;;  %v2497_v59 = vsel %vm8967_vm12, %v2495_v27, %v2496_v49 }
 0x3c7   :  { %v9002_v43 = vpack.c.bf16 %v2463_v28, %v2463_v28 }
 0x3c8   :  { %v9004_v58 = vpack.c.bf16 %v2462_v11, %v2461_v40 }
 0x3c9   :  { %3065 = vst.msk [vmem:[#allocation3 + $0x27c] sm:$0x3] %vm2478_vm5, %v9002_v43  ;;  %v2948_v40 = vrot.slane %v9002_v43, 6 }
 0x3ca   :  { %2479 = vst.msk [vmem:[#allocation3 + $0x24] sm:$0x3] %vm2478_vm5, %v9004_v58  ;;  %v2863_v1 = vrot.slane %v9004_v58, 4  ;;  %v2499_v23 = vrot.slane %v9004_v58, 6 }
 0x3cb   :  { %3064 = vst [vmem:[#allocation3 + $0x274] sm:$0x33] %v9004_v58 }
 0x3cc   :  { %2664 = vrot.lane.b32.xlu2 %v2497_v59, %s10396_s13  ;;  %2744 = vrot.lane.b32.xlu0 %v2497_v59, %s6878_s25  ;;  %v2867_v32 = vsel %vm101_vm0, %v2862_v26, %v2863_v1  ;;  %2879 = vst.msk [vmem:[#allocation3 + $0x150] sm:$0x3] %vm2478_vm5, %v2863_v1 }
 0x3cd   :  { %2825 = vrot.lane.b32.xlu1 %v2497_v59, %s6893_s29  ;;  %2878 = vst [vmem:[#allocation3 + $0x148] sm:$0x33] %v2867_v32 }
 0x3d0   :  { %v6729_v36 = vpop.permute.xlu1 %6728 }
 0x3d1   :  { %v6731_v3 = vunpack.i.h.bf16 %v6729_v36  ;;  %v6730_v60 = vunpack.i.l.bf16 %v6729_v36 }
 0x3d3   :  { %v2442_v6 = vmax.f32 %v8899_v16, %v6731_v3  ;;  %v2414_v13 = vsel %vm358_vm10, %v6715_v61, %v6730_v60  ;;  %v2415_v63 = vsel %vm358_vm10, %v6730_v60, %v6731_v3  ;;  %vm2795_vm10 = vcmask 474112  }
 0x3d4   :  { %v2440_v38 = vmax.f32 %v8877_v15, %v2414_v13  ;;  %v2441_v4 = vmax.f32 %v8897_v42, %v2415_v63  ;;  %2580 = vrot.lane.b32.xlu2 %v2490_v33, %s6894_s16 }
 0x3d5   :  { %v2456_v9 = vmax.f32 %v2442_v6, 0.0  ;;  %2578 = vrot.lane.b32.xlu1 %v8953_v57, %s6894_s16 }
 0x3d6   :  { %v2454_v52 = vmax.f32 %v2440_v38, 0.0  ;;  %v2455_v16 = vmax.f32 %v2441_v4, 0.0 }
 0x3d7   :  { %v9029_v41 = vpack.c.bf16 %v2456_v9, %v2456_v9 }
 0x3d8   :  { %v2466_v55 = vpack.c.bf16 %v2455_v16, %v2454_v52 }
 0x3d9   :  { %3062 = vst.msk [vmem:[#allocation3 + $0x268] sm:$0xf] %vm2474_vm13, %v9029_v41  ;;  %v9109_v33 = vrot.slane %v9029_v41, 6 }
 0x3da   :  { %v2860_v61 = vrot.slane %v2466_v55, 4  ;;  %2475 = vst.msk [vmem:[#allocation3 + $0x10] sm:$0xf] %vm2474_vm13, %v2466_v55  ;;  %v2491_v15 = vrot.slane %v2466_v55, 6 }
 0x3db   :  { %3061 = vst [vmem:[#allocation3 + $0x260] sm:$0xff] %v2466_v55  ;;  %v2947_v53 = vrot.slane %v9109_v33, 4 }
 0x3dc   :  { %2876 = vst.msk [vmem:[#allocation3 + $0x13c] sm:$0xf] %vm2474_vm13, %v2860_v61  ;;  %2621 = vrot.lane.b32.xlu2 %v2466_v55, %s6891_s0  ;;  %2505 = vrot.lane.b32.xlu0 %v2491_v15, %s10404_s20  ;;  %v2865_v42 = vsel %vm101_vm0, %v2859_v12, %v2860_v61  ;;  %v2498_v20 = vrot.slane %v2491_v15, 4 }
 0x3dd   :  { %2586 = vrot.lane.b32.xlu1 %v2497_v59, %s6894_s16  ;;  %2875 = vst [vmem:[#allocation3 + $0x134] sm:$0xff] %v2865_v42 }
 0x3de   :  { %v2500_v50 = vsel %vm8967_vm12, %v2498_v20, %v2499_v23 }
 0x3e4   :  { %2509 = vrot.lane.b32.xlu2 %v2497_v59, %s10404_s20  ;;  %2584 = vrot.lane.b32.xlu0 %v8973_v48, %s6894_s16  ;;  %v9140_v59 = vsel %vm8967_vm12, %v2947_v53, %v2948_v40  ;;  %vm10478_vm12 = vmmov %vm10477_vm8 }
 0x3e5   :  { %2507 = vrot.lane.b32.xlu1 %v8973_v48, %s10404_s20 }
 0x3e6   :  { %v9046_v39 = vpop.permute.xlu2 %2617 }
 0x3e7   :  { %v2629_v3 = vrot.slane %v9046_v39, 4 }
 0x3ec   :  { %2501 = vrot.lane.b32.xlu2 %v8953_v57, %s10404_s20  ;;  %2627 = vrot.lane.b32.xlu0 %v9004_v58, %s6891_s0 }
 0x3ed   :  { %2542 = vrot.lane.b32.xlu1 %v8932_v19, %s10403_s21 }
 0x3ee   :  { %v9054_v5 = vpop.permute.xlu2 %2817 }
 0x3f4   :  { %2588 = vrot.lane.b32.xlu2 %v2500_v50, %s6894_s16  ;;  %2540 = vrot.lane.b32.xlu0 %v8930_v0, %s10403_s21 }
 0x3f5   :  { %2582 = vrot.lane.b32.xlu1 %v2491_v15, %s6894_s16 }
 0x3f6   :  { %v9063_v30 = vpop.permute.xlu2 %2546 }
 0x3fc   :  { %2827 = vrot.lane.b32.xlu2 %v2500_v50, %s6893_s29  ;;  %2550 = vrot.lane.b32.xlu0 %v9004_v58, %s10403_s21 }
 0x3fd   :  { %2544 = vrot.lane.b32.xlu1 %v2466_v55, %s10403_s21 }
 0x3fe   :  { %v2697_v19 = vpop.permute.xlu0 %2696  ;;  %v9069_v62 = vpop.permute.xlu2 %2742 }
 0x3ff   :  { %v2777_v35 = vpop.permute.xlu1 %2776  ;;  %v2708_v47 = vrot.slane %v2697_v19, 4 }
 0x400   :  { %v2788_v25 = vrot.slane %v2777_v35, 4 }
 0x404   :  { %2821 = vrot.lane.b32.xlu2 %v2491_v15, %s6893_s29  ;;  %2511 = vrot.lane.b32.xlu0 %v2500_v50, %s10404_s20 }
 0x405   :  { %2786 = vrot.lane.b32.xlu1 %v9004_v58, %s6892_s19 }
 0x406   :  { %v9075_v0 = vpop.permute.xlu0 %2736  ;;  %v9077_v37 = vpop.permute.xlu2 %2778 }
 0x407   :  { %v2703_v12 = vpop.permute.xlu1 %2702  ;;  %v2789_v44 = vrot.slane %v9077_v37, 4  ;;  %v2748_v63 = vrot.slane %v9075_v0, 4 }
 0x408   :  { %v2711_v31 = vrot.slane %v2703_v12, 4 }
 0x409   :  { %v2794_v14 = vsel %vm101_vm0, %v2788_v25, %v2789_v44 }
 0x40a   :  { %v2796_v34 = vsel %vm2795_vm10, %v2777_v35, %v2794_v14  ;;  %v3020_v45 = vsel %vm2795_vm10, %v2794_v14, %v9077_v37 }
 0x40b   :  { %2811 = vst [vmem:[#allocation3 + $0xf0] sm:$0xff] %v2796_v34 }
 0x40c   :  { %3032 = vst [vmem:[#allocation3 + $0x21c] sm:$0xff] %v3020_v45  ;;  %2746 = vrot.lane.b32.xlu2 %v2500_v50, %s6878_s25  ;;  %2780 = vrot.lane.b32.xlu0 %v2466_v55, %s6892_s19 }
 0x40d   :  { %2740 = vrot.lane.b32.xlu1 %v2491_v15, %s6878_s25 }
 0x40e   :  { %v9089_v56 = vpop.permute.xlu0 %2656  ;;  %v9091_v18 = vpop.permute.xlu2 %2503 }
 0x40f   :  { %v2624_v29 = vpop.permute.xlu1 %2623 }
 0x410   :  { %v2632_v22 = vrot.slane %v2624_v29, 4 }
 0x414   :  { %2660 = vrot.lane.b32.xlu2 %v2491_v15, %s10396_s13  ;;  %2706 = vrot.lane.b32.xlu0 %v9004_v58, %s10395_s23 }
 0x415   :  { %2700 = vrot.lane.b32.xlu1 %v2466_v55, %s10395_s23 }
 0x416   :  { %v9097_v8 = vpop.permute.xlu0 %2782  ;;  %v9099_v57 = vpop.permute.xlu2 %2704 }
 0x417   :  { %v2663_v26 = vpop.permute.xlu1 %2662  ;;  %v2712_v2 = vrot.slane %v9099_v57, 4 }
 0x418   :  { %v2671_v54 = vrot.slane %v2663_v26, 4 }
 0x419   :  { %v2719_v17 = vsel %vm101_vm0, %v2711_v31, %v2712_v2 }
 0x41a   :  { %v2720_v24 = vsel %vm10473_vm2, %v2703_v12, %v2719_v17  ;;  %v2979_v48 = vsel %vm10474_vm4, %v2719_v17, %v9099_v57  ;;  %vm2836_vm2 = vcmask 457728   ;;  %vm10479_vm4 = vmmov %vm10477_vm8 }
 0x41b   :  { %2733 = vst [vmem:[#allocation3 + $0xc8] sm:$0x33] %v2720_v24 }
 0x41c   :  { %2991 = vst [vmem:[#allocation3 + $0x1f4] sm:$0x33] %v2979_v48  ;;  %3128 = vrot.lane.b32.xlu2 %v9002_v43, %s6891_s0  ;;  %2666 = vrot.lane.b32.xlu0 %v2500_v50, %s10396_s13  ;;  %v2555_v48 = vrot.slane %v9063_v30, 4 }
 0x41d   :  { %3126 = vrot.lane.b32.xlu1 %v9029_v41, %s6891_s0  ;;  %s6903_s0 = smov 19  }
 0x41e   :  { %v9116_v7 = vpop.permute.xlu2 %2625  ;;  %v9118_v21 = vpop.permute.xlu0 %2823 }
 0x41f   :  { %v9120_v10 = vpop.permute.xlu1 %2698  ;;  %v2633_v46 = vrot.slane %v9116_v7, 4 }
 0x420   :  { %v2709_v51 = vrot.slane %v9120_v10, 4 }
 0x421   :  { %v2640_v28 = vsel %vm101_vm0, %v2632_v22, %v2633_v46  ;;  %v2791_v22 = vrot.slane %v9097_v8, 4 }
 0x422   :  { %v2714_v11 = vsel %vm101_vm0, %v2708_v47, %v2709_v51  ;;  %v2641_v49 = vsel %vm2636_vm9, %v2624_v29, %v2640_v28  ;;  %v2930_v1 = vsel %vm2636_vm9, %v2640_v28, %v9116_v7 }
 0x423   :  { %v2715_v58 = vsel %vm10475_vm3, %v2697_v19, %v2714_v11  ;;  %v2976_v27 = vsel %vm10476_vm11, %v2714_v11, %v9120_v10  ;;  %2653 = vst [vmem:[#allocation3 + $0x8c] sm:$0x33] %v2641_v49  ;;  %v2829_v19 = vrot.slane %v9054_v5, 4  ;;  %vm10480_vm3 = vmmov %vm10479_vm4  ;;  %vm2597_vm11 = vcmask 998400  }
 0x424   :  { %2730 = vst [vmem:[#allocation3 + $0xb4] sm:$0xff] %v2715_v58  ;;  %3108 = vrot.lane.b32.xlu2 %v9140_v59, %s6894_s16  ;;  %3066 = vrot.lane.b32.xlu0 %v9109_v33, %s10404_s20  ;;  %vm10482_vm15 = vmmov %vm10480_vm3 }
 0x425   :  { %2988 = vst [vmem:[#allocation3 + $0x1e0] sm:$0xff] %v2976_v27  ;;  %3106 = vrot.lane.b32.xlu1 %v9109_v33, %s6894_s16 }
 0x426   :  { %2941 = vst [vmem:[#allocation3 + $0x1b8] sm:$0x33] %v2930_v1  ;;  %v9148_v32 = vpop.permute.xlu2 %2664  ;;  %v2620_v36 = vpop.permute.xlu0 %2619 }
 0x427   :  { %v9151_v60 = vpop.permute.xlu1 %2738  ;;  %v2672_v6 = vrot.slane %v9148_v32, 4  ;;  %v2630_v13 = vrot.slane %v2620_v36, 4 }
 0x428   :  { %v2749_v38 = vrot.slane %v9151_v60, 4 }
 0x429   :  { %v2679_v4 = vsel %vm101_vm0, %v2671_v54, %v2672_v6  ;;  %v2635_v9 = vsel %vm101_vm0, %v2629_v3, %v2630_v13 }
 0x42a   :  { %v2754_v52 = vsel %vm101_vm0, %v2748_v63, %v2749_v38  ;;  %v2680_v16 = vsel %vm10477_vm8, %v2663_v26, %v2679_v4  ;;  %v2957_v15 = vsel %vm10478_vm12, %v2679_v4, %v9148_v32  ;;  %v2637_v42 = vsel %vm2636_vm9, %v9046_v39, %v2635_v9 }
 0x42b   :  { %v2755_v55 = vsel %vm951_vm7, %v9075_v0, %v2754_v52  ;;  %v2998_v61 = vsel %vm951_vm7, %v2754_v52, %v9151_v60  ;;  %2693 = vst [vmem:[#allocation3 + $0xa0] sm:$0xff] %v2680_v16  ;;  %v2928_v20 = vsel %vm2636_vm9, %v2635_v9, %v2620_v36  ;;  %v2668_v0 = vrot.slane %v9089_v56, 4 }
 0x42c   :  { %2770 = vst [vmem:[#allocation3 + $0xc8] sm:$0xcc] %v2755_v55  ;;  %3018 = vrot.lane.b32.xlu2 %v9002_v43, %s6892_s19  ;;  %3088 = vrot.lane.b32.xlu0 %v9002_v43, %s10403_s21  ;;  %vm2535_vm8 = vcmask 715778   ;;  %vm3818_vm12 = vcmask 1045504  }
 0x42d   :  { %3010 = vst [vmem:[#allocation3 + $0x1f4] sm:$0xcc] %v2998_v61  ;;  %3086 = vrot.lane.b32.xlu1 %v9029_v41, %s10403_s21 }
 0x42e   :  { %2969 = vst [vmem:[#allocation3 + $0x1cc] sm:$0xff] %v2957_v15  ;;  %v9179_v23 = vpop.permute.xlu2 %2580  ;;  %v9181_v50 = vpop.permute.xlu0 %2819 }
 0x42f   :  { %2650 = vst [vmem:[#allocation3 + $0x78] sm:$0xff] %v2637_v42  ;;  %v9184_v39 = vpop.permute.xlu1 %2658  ;;  %v2830_v35 = vrot.slane %v9181_v50, 4 }
 0x430   :  { %2938 = vst [vmem:[#allocation3 + $0x1a4] sm:$0xff] %v2928_v20  ;;  %v2669_v25 = vrot.slane %v9184_v39, 4  ;;  %v2591_v20 = vrot.slane %v9179_v23, 4 }
 0x431   :  { %v2835_v12 = vsel %vm101_vm0, %v2829_v19, %v2830_v35 }
 0x432   :  { %v2674_v14 = vsel %vm101_vm0, %v2668_v0, %v2669_v25  ;;  %v2837_v34 = vsel %vm2836_vm2, %v9054_v5, %v2835_v12  ;;  %v3042_v31 = vsel %vm2836_vm2, %v2835_v12, %v9181_v50 }
 0x433   :  { %v2675_v45 = vsel %vm10479_vm4, %v9089_v56, %v2674_v14  ;;  %v2954_v29 = vsel %vm10480_vm3, %v2674_v14, %v9184_v39  ;;  %2852 = vst [vmem:[#allocation3 + $0x104] sm:$0xcc] %v2837_v34  ;;  %v3269_v14 = vld [vmem:[%s10305_s4 + $0x8] sm:$0xff]  ;;  %v6495_v34 = vld [vmem:[#allocation3 + $0x128] sm:$0xf0]  ;;  %vm10481_vm4 = vmmov %vm10480_vm3 }
 0x434   :  { %2690 = vst [vmem:[#allocation3 + $0x8c] sm:$0xcc] %v2675_v45  ;;  %2996 = vrot.lane.b32.xlu2 %v9140_v59, %s6878_s25  ;;  %3068 = vrot.lane.b32.xlu0 %v9140_v59, %s10404_s20  ;;  %v5847_v45 = vld [vmem:[#allocation3 + $0x12c] sm:$0xf0] }
 0x435   :  { %2966 = vst [vmem:[#allocation3 + $0x1b8] sm:$0xcc] %v2954_v29  ;;  %3040 = vrot.lane.b32.xlu1 %v9140_v59, %s6893_s29 }
 0x436   :  { %3054 = vst [vmem:[#allocation3 + $0x230] sm:$0xcc] %v3042_v31  ;;  %v9209_v5 = vpop.permute.xlu2 %2621  ;;  %v9211_v56 = vpop.permute.xlu0 %2548 }
 0x437   :  { %v9213_v26 = vpop.permute.xlu1 %2784  ;;  %v9216_v17 = vrot.slane %v9209_v5, 4  ;;  %2652 = vst.msk [vmem:[#allocation3 + $0x88] sm:$0xf] %vm2474_vm13, %v9209_v5  ;;  %v2556_v24 = vrot.slane %v9211_v56, 4 }
 0x438   :  { %v2792_v53 = vrot.slane %v9213_v26, 4 }
 0x439   :  { %v2638_v47 = vsel %vm101_vm0, %v2630_v13, %v9216_v17  ;;  %2940 = vst.msk [vmem:[#allocation3 + $0x1b4] sm:$0xf] %vm2474_vm13, %v9216_v17  ;;  %v2562_v11 = vsel %vm101_vm0, %v2555_v48, %v2556_v24 }
 0x43a   :  { %v2800_v28 = vsel %vm101_vm0, %v2791_v22, %v2792_v53  ;;  %v2639_v40 = vsel %vm2636_vm9, %v2620_v36, %v2638_v47  ;;  %v2929_v27 = vsel %vm2636_vm9, %v2638_v47, %v9209_v5  ;;  %v2563_v1 = vsel %vm291_vm6, %v9063_v30, %v2562_v11 }
 0x43b   :  { %v2801_v49 = vsel %vm2795_vm10, %v9097_v8, %v2800_v28  ;;  %v3023_v58 = vsel %vm2795_vm10, %v2800_v28, %v9213_v26  ;;  %2651 = vst [vmem:[#allocation3 + $0x80] sm:$0xff] %v2639_v40  ;;  %v2898_v8 = vsel %vm291_vm6, %v2562_v11, %v9211_v56  ;;  %v2832_v30 = vrot.slane %v9118_v21, 4 }
 0x43c   :  { %2814 = vst [vmem:[#allocation3 + $0x104] sm:$0x33] %v2801_v49  ;;  %2974 = vrot.lane.b32.xlu2 %v9002_v43, %s10395_s23  ;;  %3038 = vrot.lane.b32.xlu0 %v9109_v33, %s6893_s29  ;;  %v2751_v43 = vrot.slane %v9069_v62, 4  ;;  %s6906_s29 = smov 119  }
 0x43d   :  { %3035 = vst [vmem:[#allocation3 + $0x230] sm:$0x33] %v3023_v58  ;;  %2972 = vrot.lane.b32.xlu1 %v9029_v41, %s10395_s23 }
 0x43e   :  { %2939 = vst [vmem:[#allocation3 + $0x1ac] sm:$0xff] %v2929_v27  ;;  %v9251_v36 = vpop.permute.xlu2 %2509  ;;  %v9253_v3 = vpop.permute.xlu0 %2744 }
 0x43f   :  { %3140 = vst [vmem:[#allocation3 + $0x2d0] sm:$0xff] %v2639_v40  ;;  %v9256_v54 = vpop.permute.xlu1 %2825  ;;  %v2752_v13 = vrot.slane %v9253_v3, 4 }
 0x440   :  { %2575 = vst [vmem:[#allocation3 + $0x50] sm:$0x33] %v2563_v1  ;;  %v2833_v63 = vrot.slane %v9256_v54, 4  ;;  %v5825_v1 = vld [vmem:[#allocation3 + $0xf0] sm:$0xf] }
 0x441   :  { %2909 = vst [vmem:[#allocation3 + $0x17c] sm:$0x33] %v2898_v8  ;;  %v2759_v4 = vsel %vm101_vm0, %v2751_v43, %v2752_v13 }
 0x442   :  { %v2841_v9 = vsel %vm101_vm0, %v2832_v30, %v2833_v63  ;;  %v2760_v52 = vsel %vm951_vm7, %v9069_v62, %v2759_v4  ;;  %v3001_v61 = vsel %vm951_vm7, %v2759_v4, %v9253_v3  ;;  %v6488_v30 = vld [vmem:[#allocation3 + $0xf4] sm:$0xf] }
 0x443   :  { %v2842_v16 = vsel %vm2836_vm2, %v9118_v21, %v2841_v9  ;;  %v3045_v55 = vsel %vm2836_vm2, %v2841_v9, %v9256_v54  ;;  %2773 = vst [vmem:[#allocation3 + $0xdc] sm:$0xff] %v2760_v52  ;;  %v2514_v21 = vrot.slane %v9091_v18, 4  ;;  %v6490_v11 = vld [vmem:[#allocation3 + $0x100] sm:$0xf0]  ;;  %v5827_v49 = vld [vmem:[#allocation3 + $0x104] sm:$0xf0] }
 0x444   :  { %2855 = vst [vmem:[#allocation3 + $0x118] sm:$0xff] %v2842_v16  ;;  %2952 = vrot.lane.b32.xlu2 %v9140_v59, %s10396_s13  ;;  %3016 = vrot.lane.b32.xlu0 %v9029_v41, %s6892_s19  ;;  %v3270_v41 = vld [vmem:[%s10305_s4 + $0x10] sm:$0xff]  ;;  %v5826_v9 = vor.u32 %v6490_v11, %v5825_v1  ;;  %v5830_v52 = vor.u32 %v6488_v30, %v5827_v49  ;;  %v5787_v49 = vld [vmem:[#allocation3 + $0xb4] sm:$0xf0]  ;;  %s6904_s19 = smov 22  }
 0x445   :  { %3057 = vst [vmem:[#allocation3 + $0x244] sm:$0xff] %v3045_v55  ;;  %2950 = vrot.lane.b32.xlu1 %v9109_v33, %s10396_s13 }
 0x446   :  { %3013 = vst [vmem:[#allocation3 + $0x208] sm:$0xff] %v3001_v61  ;;  %v2502_v62 = vpop.permute.xlu2 %2501 }
 0x447   :  { %v2579_v15 = vpop.permute.xlu1 %2578  ;;  %v2513_v42 = vrot.slane %v2502_v62, 4 }
 0x448   :  { %v2590_v19 = vrot.slane %v2579_v15, 4 }
 0x449   :  { %v2519_v0 = vsel %vm101_vm0, %v2513_v42, %v2514_v21  ;;  %v3271_v42 = vld [vmem:[%s10305_s4 + $0x18] sm:$0xff] }
 0x44a   :  { %v2596_v59 = vsel %vm101_vm0, %v2590_v19, %v2591_v20  ;;  %v2520_v12 = vsel %vm186_vm14, %v2502_v62, %v2519_v0  ;;  %v2880_v48 = vsel %vm186_vm14, %v2519_v0, %v9091_v18  ;;  %v6485_v55 = vld [vmem:[#allocation3 + $0xd8] sm:$0xf0]  ;;  %v5807_v61 = vld [vmem:[#allocation3 + $0xdc] sm:$0xf0]  ;;  %v5805_v0 = vld [vmem:[#allocation3 + $0xc8] sm:$0xf] }
 0x44b   :  { %v2598_v29 = vsel %vm2597_vm11, %v2579_v15, %v2596_v59  ;;  %v2912_v31 = vsel %vm2597_vm11, %v2596_v59, %v9179_v23  ;;  %2533 = vst [vmem:[#allocation3 + $0x14] sm:$0xcc] %v2520_v12  ;;  %v5845_v22 = vld [vmem:[#allocation3 + $0x118] sm:$0xf]  ;;  %v6493_v47 = vld [vmem:[#allocation3 + $0x11c] sm:$0xf]  ;;  %v5806_v59 = vor.u32 %v6485_v55, %v5805_v0 }
 0x44c   :  { %2611 = vst [vmem:[#allocation3 + $0x50] sm:$0xcc] %v2598_v29  ;;  %3284 = vperm.xlu2 %6661, %v3270_v41   ;;  %2994 = vrot.lane.b32.xlu0 %v9109_v33, %s6878_s25  ;;  %v5846_v28 = vor.u32 %v6495_v34, %v5845_v22  ;;  %v5850_v40 = vor.u32 %v6493_v47, %v5847_v45  ;;  %v6483_v41 = vld [vmem:[#allocation3 + $0xcc] sm:$0xf]  ;;  %v6478_v29 = vld [vmem:[#allocation3 + $0xa4] sm:$0xf] }
 0x44d   :  { %2922 = vst [vmem:[#allocation3 + $0x17c] sm:$0xcc] %v2912_v31  ;;  %3279 = vperm.xlu1 %6660, %v3269_v14   ;;  %v5810_v12 = vor.u32 %v6483_v41, %v5807_v61  ;;  %v5785_v14 = vld [vmem:[#allocation3 + $0xa0] sm:$0xf]  ;;  %v6480_v47 = vld [vmem:[#allocation3 + $0xb0] sm:$0xf0] }
 0x44e   :  { %2890 = vst [vmem:[#allocation3 + $0x140] sm:$0xcc] %v2880_v48  ;;  %3834 = vmatpush.bf16.msrb.mxu2 %v5846_v28  ;;  %3891 = vmatpush.bf16.msrb.mxu1 %v5850_v40  ;;  %v9301_v58 = vpop.permute.xlu2 %2588  ;;  %v9303_v27 = vpop.permute.xlu0 %2505  ;;  %v2517_v28 = vrot.slane %v9251_v36, 4  ;;  %v5786_v11 = vor.u32 %v6480_v47, %v5785_v14  ;;  %v6475_v61 = vld [vmem:[#allocation3 + $0x88] sm:$0xf0] }
 0x44f   :  { %v9305_v8 = vpop.permute.xlu1 %2586  ;;  %v9308_v43 = vrot.slane %v9301_v58, 4  ;;  %2616 = vst.msk [vmem:[#allocation3 + $0x74] sm:$0xf] %vm2474_vm13, %v9301_v58  ;;  %v9313_v33 = vrot.slane %v9303_v27, 4 }
 0x450   :  { %v2594_v4 = vrot.slane %v9305_v8, 4  ;;  %2536 = vst.msk [vmem:[#allocation3 + $0x24] sm:$0xc] %vm2535_vm8, %v9303_v27 }
 0x451   :  { %2927 = vst.msk [vmem:[#allocation3 + $0x1a0] sm:$0xf] %vm2474_vm13, %v9308_v43  ;;  %v2521_v16 = vsel %vm101_vm0, %v2514_v21, %v9313_v33 }
 0x452   :  { %v2603_v62 = vsel %vm101_vm0, %v2594_v4, %v9308_v43  ;;  %v2522_v15 = vsel %vm186_vm14, %v9091_v18, %v2521_v16  ;;  %2892 = vst.msk [vmem:[#allocation3 + $0x150] sm:$0xc] %vm2535_vm8, %v9313_v33  ;;  %3835 = vmatpush.bf16.msrb.mxu2 %v5826_v9  ;;  %3892 = vmatpush.bf16.msrb.mxu1 %v5830_v52 }
 0x453   :  { %v2604_v21 = vsel %vm2597_vm11, %v9305_v8, %v2603_v62  ;;  %v2915_v19 = vsel %vm2597_vm11, %v2603_v62, %v9301_v58  ;;  %2534 = vst [vmem:[#allocation3 + $0x1c] sm:$0xcc] %v2522_v15  ;;  %v2881_v18 = vsel %vm186_vm14, %v2521_v16, %v9303_v27  ;;  %v5790_v52 = vor.u32 %v6478_v29, %v5787_v49  ;;  %v5767_v62 = vld [vmem:[#allocation3 + $0x8c] sm:$0xf0] }
 0x454   :  { %2615 = vst [vmem:[#allocation3 + $0x6c] sm:$0xff] %v2604_v21 }
 0x455   :  { %2926 = vst [vmem:[#allocation3 + $0x198] sm:$0xff] %v2915_v19  ;;  %3289 = vperm.xlu1 %6660, %v3271_v42   ;;  %v6473_v19 = vld [vmem:[#allocation3 + $0x7c] sm:$0xf] }
 0x456   :  { %3123 = vst [vmem:[#allocation3 + $0x2bc] sm:$0xff] %v2604_v21  ;;  %3836 = vmatpush.bf16.msrb.mxu2 %v5806_v59  ;;  %3893 = vmatpush.bf16.msrb.mxu1 %v5810_v12  ;;  %v2828_v34 = vpop.permute.xlu2 %2827  ;;  %v2585_v45 = vpop.permute.xlu0 %2584  ;;  %v5765_v21 = vld [vmem:[#allocation3 + $0x78] sm:$0xf]  ;;  %v5770_v41 = vor.u32 %v6473_v19, %v5767_v62 }
 0x457   :  { %2891 = vst [vmem:[#allocation3 + $0x148] sm:$0xcc] %v2881_v18  ;;  %v2508_v31 = vpop.permute.xlu1 %2507  ;;  %v9337_v48 = vrot.slane %v2828_v34, 4  ;;  %v2593_v22 = vrot.slane %v2585_v45, 4  ;;  %v5766_v0 = vor.u32 %v6475_v61, %v5765_v21  ;;  %v6005_v18 = vld [vmem:[#allocation3 + $0x258] sm:$0xf] }
 0x458   :  { %3080 = vst [vmem:[#allocation3 + $0x26c] sm:$0xcc] %v2522_v15  ;;  %v2516_v40 = vrot.slane %v2508_v31, 4 }
 0x459   :  { %v2843_v1 = vsel %vm101_vm0, %v2833_v63, %v9337_v48  ;;  %v2845_v30 = vsel %vm2836_vm2, %v2828_v34, %v9337_v48  ;;  %v2601_v9 = vsel %vm101_vm0, %v2593_v22, %v2594_v4 }
 0x45a   :  { %v2523_v16 = vsel %vm101_vm0, %v2516_v40, %v2517_v28  ;;  %v2844_v55 = vsel %vm2836_vm2, %v9256_v54, %v2843_v1  ;;  %2857 = vst.msk [vmem:[#allocation3 + $0x128] sm:$0xf] %vm2474_vm13, %v2845_v30  ;;  %v3046_v4 = vsel %vm2836_vm2, %v2843_v1, %v2828_v34  ;;  %3837 = vmatpush.bf16.msrb.mxu2 %v5786_v11  ;;  %v6530_v40 = vld [vmem:[#allocation3 + $0x240] sm:$0xf0] }
 0x45b   :  { %v2524_v15 = vsel %vm186_vm14, %v2508_v31, %v2523_v16  ;;  %v2882_v63 = vsel %vm186_vm14, %v2523_v16, %v9251_v36  ;;  %2856 = vst [vmem:[#allocation3 + $0x120] sm:$0xff] %v2844_v55  ;;  %3894 = vmatpush.bf16.msrb.mxu1 %v5790_v52  ;;  %v2602_v42 = vsel %vm2597_vm11, %v2585_v45, %v2601_v9  ;;  %v5745_v52 = vld [vmem:[#allocation3 + $0x50] sm:$0xf]  ;;  %v6468_v16 = vld [vmem:[#allocation3 + $0x54] sm:$0xf] }
 0x45c   :  { %2537 = vst [vmem:[#allocation3 + $0x28] sm:$0xff] %v2524_v15  ;;  %v2914_v54 = vsel %vm2597_vm11, %v2601_v9, %v9305_v8  ;;  %v5965_v9 = vld [vmem:[#allocation3 + $0x208] sm:$0xf]  ;;  %v6525_v15 = vld [vmem:[#allocation3 + $0x218] sm:$0xf0] }
 0x45d   :  { %2893 = vst [vmem:[#allocation3 + $0x154] sm:$0xff] %v2882_v63  ;;  %v5966_v19 = vor.u32 %v6525_v15, %v5965_v9 }
 0x45e   :  { %3058 = vst [vmem:[#allocation3 + $0x24c] sm:$0xff] %v3046_v4  ;;  %v2822_v59 = vpop.permute.xlu2 %2821  ;;  %v9360_v12 = vpop.permute.xlu0 %2627  ;;  %3838 = vmatpush.bf16.msrb.mxu2 %v5766_v0 }
 0x45f   :  { %2614 = vst [vmem:[#allocation3 + $0x64] sm:$0xff] %v2602_v42  ;;  %v6535_v14 = vld [vmem:[#allocation3 + $0x268] sm:$0xf0]  ;;  %3895 = vmatpush.bf16.msrb.mxu1 %v5770_v41  ;;  %v9362_v34 = vpop.permute.xlu1 %2542  ;;  %v9364_v45 = vrot.slane %v2822_v59, 4  ;;  %v9367_v29 = vrot.slane %v9360_v12, 4 }
 0x460   :  { %2925 = vst [vmem:[#allocation3 + $0x190] sm:$0xff] %v2914_v54  ;;  %v6006_v8 = vor.u32 %v6535_v14, %v6005_v18  ;;  %v2553_v0 = vrot.slane %v9362_v34, 4  ;;  %v6520_v18 = vld [vmem:[#allocation3 + $0x1f0] sm:$0xf0] }
 0x461   :  { %v2838_v31 = vsel %vm101_vm0, %v2830_v35, %v9364_v45  ;;  %v2840_v22 = vsel %vm2836_vm2, %v2822_v59, %v9364_v45  ;;  %v2642_v47 = vsel %vm101_vm0, %v2633_v46, %v9367_v29  ;;  %2655 = vst.msk [vmem:[#allocation3 + $0x9c] sm:$0x3] %vm2478_vm5, %v9360_v12  ;;  %v5985_v46 = vld [vmem:[#allocation3 + $0x230] sm:$0xf] }
 0x462   :  { %3853 = vmatpush.bf16.msra.mxu3 %v6006_v8  ;;  %v2839_v11 = vsel %vm2836_vm2, %v9181_v50, %v2838_v31  ;;  %2854 = vst.msk [vmem:[#allocation3 + $0x114] sm:$0xc] %vm2535_vm8, %v2840_v22  ;;  %v3043_v35 = vsel %vm2836_vm2, %v2838_v31, %v2822_v59  ;;  %v2643_v49 = vsel %vm2636_vm9, %v9116_v7, %v2642_v47  ;;  %v5945_v22 = vld [vmem:[#allocation3 + $0x1e0] sm:$0xf] }
 0x463   :  { %2853 = vst [vmem:[#allocation3 + $0x10c] sm:$0xcc] %v2839_v11  ;;  %v2931_v1 = vsel %vm2636_vm9, %v2642_v47, %v9360_v12  ;;  %v5986_v30 = vor.u32 %v6530_v40, %v5985_v46  ;;  %v5946_v47 = vor.u32 %v6520_v18, %v5945_v22  ;;  %v5925_v11 = vld [vmem:[#allocation3 + $0x1b8] sm:$0xf] }
 0x464   :  { %3055 = vst [vmem:[#allocation3 + $0x238] sm:$0xcc] %v3043_v35 }
 0x465   :  { %2654 = vst [vmem:[#allocation3 + $0x94] sm:$0x33] %v2643_v49 }
 0x466   :  { %2942 = vst [vmem:[#allocation3 + $0x1c0] sm:$0x33] %v2931_v1  ;;  %3854 = vmatpush.bf16.msra.mxu3 %v5986_v30  ;;  %v6470_v50 = vld [vmem:[#allocation3 + $0x60] sm:$0xf0]  ;;  %v5747_v55 = vld [vmem:[#allocation3 + $0x64] sm:$0xf0]  ;;  %v2747_v61 = vpop.permute.xlu2 %2746  ;;  %v2541_v62 = vpop.permute.xlu0 %2540 }
 0x467   :  { %2943 = vst.msk [vmem:[#allocation3 + $0x1c8] sm:$0x3] %vm2478_vm5, %v9367_v29  ;;  %v5746_v7 = vor.u32 %v6470_v50, %v5745_v52  ;;  %v5750_v63 = vor.u32 %v6468_v16, %v5747_v55  ;;  %v9391_v4 = vpop.permute.xlu1 %2582  ;;  %v9393_v42 = vrot.slane %v2747_v61, 4  ;;  %v2552_v21 = vrot.slane %v2541_v62, 4 }
 0x468   :  { %3143 = vst [vmem:[#allocation3 + $0x2e4] sm:$0x33] %v2643_v49  ;;  %v9396_v54 = vrot.slane %v9391_v4, 4  ;;  %v6065_v49 = vld [vmem:[#allocation3 + $0x2d0] sm:$0xf] }
 0x469   :  { %3839 = vmatpush.bf16.msrb.mxu2 %v5746_v7  ;;  %3896 = vmatpush.bf16.msrb.mxu1 %v5750_v63  ;;  %2613 = vst.msk [vmem:[#allocation3 + $0x60] sm:$0xc] %vm2535_vm8, %v9391_v4  ;;  %v2761_v41 = vsel %vm101_vm0, %v2752_v13, %v9393_v42  ;;  %v2558_v13 = vsel %vm101_vm0, %v2552_v21, %v2553_v0 }
 0x46a   :  { %3855 = vmatpush.bf16.msra.mxu3 %v5966_v19  ;;  %v2599_v59 = vsel %vm101_vm0, %v2591_v20, %v9396_v54  ;;  %2924 = vst.msk [vmem:[#allocation3 + $0x18c] sm:$0xc] %vm2535_vm8, %v9396_v54  ;;  %v2762_v14 = vsel %vm951_vm7, %v9253_v3, %v2761_v41  ;;  %v2763_v20 = vsel %vm951_vm7, %v2747_v61, %v9393_v42 }
 0x46b   :  { %v2600_v8 = vsel %vm2597_vm11, %v9179_v23, %v2599_v59  ;;  %v2913_v31 = vsel %vm2597_vm11, %v2599_v59, %v9391_v4  ;;  %2774 = vst [vmem:[#allocation3 + $0xe4] sm:$0xff] %v2762_v14  ;;  %v3002_v40 = vsel %vm951_vm7, %v2761_v41, %v2747_v61  ;;  %v2559_v3 = vsel %vm291_vm6, %v2541_v62, %v2558_v13  ;;  %v6515_v23 = vld [vmem:[#allocation3 + $0x1c8] sm:$0xf0]  ;;  %v5905_v62 = vld [vmem:[#allocation3 + $0x190] sm:$0xf] }
 0x46c   :  { %2612 = vst [vmem:[#allocation3 + $0x58] sm:$0xcc] %v2600_v8  ;;  %v2896_v46 = vsel %vm291_vm6, %v2558_v13, %v9362_v34  ;;  %v5926_v16 = vor.u32 %v6515_v23, %v5925_v11  ;;  %v6510_v41 = vld [vmem:[#allocation3 + $0x1a0] sm:$0xf0]  ;;  %v5725_v59 = vld [vmem:[#allocation3 + $0x28] sm:$0xf] }
 0x46d   :  { %2923 = vst [vmem:[#allocation3 + $0x184] sm:$0xcc] %v2913_v31  ;;  %v6505_v31 = vld [vmem:[#allocation3 + $0x178] sm:$0xf0]  ;;  %v6463_v13 = vld [vmem:[#allocation3 + $0x2c] sm:$0xf] }
 0x46e   :  { %3120 = vst [vmem:[#allocation3 + $0x2a8] sm:$0xcc] %v2600_v8  ;;  %3856 = vmatpush.bf16.msra.mxu3 %v5946_v47  ;;  %v2661_v35 = vpop.permute.xlu2 %2660  ;;  %v9422_v1 = vpop.permute.xlu0 %2550  ;;  %v6548_v23 = vld [vmem:[#allocation3 + $0x2d4] sm:$0xf] }
 0x46f   :  { %2775 = vst.msk [vmem:[#allocation3 + $0xec] sm:$0xf] %vm2474_vm13, %v2763_v20  ;;  %v9427_v30 = vpop.permute.xlu1 %2544  ;;  %v9429_v9 = vrot.slane %v2661_v35, 4  ;;  %v6550_v52 = vld [vmem:[#allocation3 + $0x2e0] sm:$0x30]  ;;  %v9435_v61 = vrot.slane %v9422_v1, 4 }
 0x470   :  { %3014 = vst [vmem:[#allocation3 + $0x210] sm:$0xff] %v3002_v40  ;;  %v9432_v50 = vrot.slane %v9427_v30, 4  ;;  %v6066_v55 = vor.u32 %v6550_v52, %v6065_v49  ;;  %v6460_v20 = vld [vmem:[#allocation3 + $0x10] sm:$0xf0]  ;;  %v5853_v49 = vld [vmem:[#allocation3 + $0x120] sm:$0xf] }
 0x471   :  { %2572 = vst [vmem:[#allocation3 + $0x3c] sm:$0xff] %v2559_v3  ;;  %v2676_v15 = vsel %vm101_vm0, %v2669_v25, %v9429_v9  ;;  %v2564_v25 = vsel %vm101_vm0, %v2556_v24, %v9435_v61  ;;  %v6067_v24 = vld [vmem:[#allocation3 + $0x2e4] sm:$0x30]  ;;  %v5707_v3 = vld [vmem:[#allocation3 + $0x14] sm:$0xf0] }
 0x472   :  { %2906 = vst [vmem:[#allocation3 + $0x168] sm:$0xff] %v2896_v46  ;;  %3857 = vmatpush.bf16.msra.mxu3 %v5926_v16  ;;  %v2560_v7 = vsel %vm101_vm0, %v2553_v0, %v9432_v50  ;;  %v3820_v63 = vsel %vm3818_vm12, %v6066_v55, 0  ;;  %v5906_v0 = vor.u32 %v6510_v41, %v5905_v62  ;;  %v2677_v18 = vsel %vm10481_vm4, %v9184_v39, %v2676_v15  ;;  %v5705_v62 = vld [vmem:[#allocation3] sm:$0xf] }
 0x473   :  { %v2561_v21 = vsel %vm291_vm6, %v9362_v34, %v2560_v7  ;;  %2574 = vst.msk [vmem:[#allocation3 + $0x4c] sm:$0xf] %vm2474_vm13, %v9427_v30  ;;  %v2897_v19 = vsel %vm291_vm6, %v2560_v7, %v9427_v30  ;;  %3877 = vmatpush.bf16.msra.mxu0 %v3820_v63  ;;  %v2678_v34 = vsel %vm10480_vm3, %v2661_v35, %v9429_v9  ;;  %v6500_v7 = vld [vmem:[#allocation3 + $0x150] sm:$0xf0] }
 0x474   :  { %2573 = vst [vmem:[#allocation3 + $0x44] sm:$0xff] %v2561_v21  ;;  %v2955_v39 = vsel %vm10482_vm15, %v2676_v15, %v2661_v35  ;;  %v2565_v47 = vsel %vm291_vm6, %v9211_v56, %v2564_v25  ;;  %v5681_v56 = vld [vmem:[%s10304_s3] sm:$0xf]  ;;  %v2899_v15 = vsel %vm291_vm6, %v2564_v25, %v9422_v1  ;;  %v5683_v25 = vld [vmem:[%s10304_s3 + $0xc] sm:$0xf0]  ;;  %vm10483_vm15 = vcmask 506880  }
 0x475   :  { %2907 = vst [vmem:[#allocation3 + $0x170] sm:$0xff] %v2897_v19  ;;  %v6452_v19 = vld [vmem:[%s10304_s3 + $0x4] sm:$0xf]  ;;  %vm10484_vm4 = vmmov %vm10483_vm15 }
 0x476   :  { %2908 = vst.msk [vmem:[#allocation3 + $0x178] sm:$0xf] %vm2474_vm13, %v9432_v50  ;;  %3858 = vmatpush.bf16.msra.mxu3 %v5906_v0  ;;  %v9460_v14 = vpop.permute.xlu2 %3128  ;;  %v9462_v8 = vpop.permute.xlu0 %2511  ;;  %vm10485_vm3 = vmmov %vm10484_vm4 }
 0x477   :  { %3100 = vst [vmem:[#allocation3 + $0x294] sm:$0xff] %v2561_v21  ;;  %v2787_v22 = vpop.permute.xlu1 %2786  ;;  %v3131_v55 = vrot.slane %v9460_v14, 4  ;;  %v6453_v21 = vld [vmem:[%s10304_s3 + $0x8] sm:$0xf0]  ;;  %v9487_v0 = vrot.slane %v9462_v8, 4  ;;  %vm10487_vm1 = vmmov %vm10485_vm3 }
 0x478   :  { %2691 = vst [vmem:[#allocation3 + $0x94] sm:$0xcc] %v2677_v18  ;;  %v6465_v40 = vld [vmem:[#allocation3 + $0x38] sm:$0xf0]  ;;  %v5727_v11 = vld [vmem:[#allocation3 + $0x3c] sm:$0xf0]  ;;  %v6070_v18 = vor.u32 %v6548_v23, %v6067_v24 }
 0x479   :  { %2692 = vst.msk [vmem:[#allocation3 + $0x9c] sm:$0xc] %vm2535_vm8, %v2678_v34  ;;  %v5726_v46 = vor.u32 %v6465_v40, %v5725_v59  ;;  %v5885_v52 = vld [vmem:[#allocation3 + $0x168] sm:$0xf]  ;;  %v5730_v16 = vor.u32 %v6463_v13, %v5727_v11  ;;  %v9468_v35 = vrot.slane %v2787_v22, 4  ;;  %v5706_v34 = vor.u32 %v6460_v20, %v5705_v62 }
 0x47a   :  { %2967 = vst [vmem:[#allocation3 + $0x1c0] sm:$0xcc] %v2955_v39  ;;  %v5886_v63 = vor.u32 %v6505_v31, %v5885_v52  ;;  %v6458_v59 = vld [vmem:[#allocation3 + $0x4] sm:$0xf]  ;;  %v6496_v39 = vld [vmem:[#allocation3 + $0x130] sm:$0xf0]  ;;  %v9502_v20 = vor.u32 %v6453_v21, %v5681_v56  ;;  %v9506_v52 = vor.u32 %v6452_v19, %v5683_v25 }
 0x47b   :  { %2576 = vst [vmem:[#allocation3 + $0x58] sm:$0x33] %v2565_v47  ;;  %3840 = vmatpush.bf16.msrb.mxu2 %v5726_v46  ;;  %3897 = vmatpush.bf16.msrb.mxu1 %v5730_v16  ;;  %v2802_v41 = vsel %vm101_vm0, %v2792_v53, %v9468_v35  ;;  %v3134_v53 = vsel %vm101_vm0, %v9367_v29, %v3131_v55  ;;  %v5865_v13 = vld [vmem:[#allocation3 + $0x140] sm:$0xf] }
 0x47c   :  { %2577 = vst.msk [vmem:[#allocation3 + $0x60] sm:$0x3] %vm2478_vm5, %v9422_v1  ;;  %3859 = vmatpush.bf16.msra.mxu3 %v5886_v63  ;;  %v2803_v31 = vsel %vm2795_vm10, %v9213_v26, %v2802_v41  ;;  %v5710_v24 = vor.u32 %v6458_v59, %v5707_v3  ;;  %v5854_v40 = vor.u32 %v6496_v39, %v5853_v49  ;;  %v3823_v49 = vsel %vm3818_vm12, %v6070_v18, 0  ;;  %v6047_v56 = vld [vmem:[#allocation3 + $0x2bc] sm:$0xf0]  ;;  %v3268_v39 = vld [vmem:[%s10305_s4] sm:$0xff] }
 0x47d   :  { %2910 = vst [vmem:[#allocation3 + $0x184] sm:$0x33] %v2899_v15  ;;  %v2804_v11 = vsel %vm2795_vm10, %v2787_v22, %v9468_v35  ;;  %v5866_v23 = vor.u32 %v6500_v7, %v5865_v13  ;;  %v3024_v29 = vsel %vm2795_vm10, %v2802_v41, %v2787_v22  ;;  %v2525_v3 = vsel %vm101_vm0, %v2517_v28, %v9487_v0  ;;  %v5693_v13 = vld [vmem:[%s10304_s3 + $0x18] sm:$0xf] }
 0x47e   :  { %2911 = vst.msk [vmem:[#allocation3 + $0x18c] sm:$0x3] %vm2478_vm5, %v9435_v61  ;;  %v9504_v46 = vpop.permute.xlu2 %3108  ;;  %v9508_v26 = vpop.permute.xlu0 %2780  ;;  %v3135_v55 = vsel %vm2636_vm9, %v9360_v12, %v3134_v53  ;;  %v2526_v28 = vsel %vm186_vm14, %v9251_v36, %v2525_v3  ;;  %v2883_v12 = vsel %vm186_vm14, %v2525_v3, %v9462_v8  ;;  %v6007_v53 = vld [vmem:[#allocation3 + $0x26c] sm:$0xf0]  ;;  %3274 = vperm.xlu0 %6737, %v3268_v39   ;;  %v5855_v3 = vld [vmem:[#allocation3 + $0x134] sm:$0xf0] }
 0x47f   :  { %3103 = vst [vmem:[#allocation3 + $0x2a8] sm:$0x33] %v2565_v47  ;;  %3841 = vmatpush.bf16.msrb.mxu2 %v5706_v34  ;;  %3898 = vmatpush.bf16.msrb.mxu1 %v5710_v24  ;;  %v2741_v16 = vpop.permute.xlu1 %2740  ;;  %v3111_v22 = vrot.slane %v9504_v46, 4  ;;  %v6545_v47 = vld [vmem:[#allocation3 + $0x2b8] sm:$0xf0]  ;;  %v9536_v7 = vrot.slane %v9508_v26, 4 }
 0x480   :  { %2815 = vst [vmem:[#allocation3 + $0x10c] sm:$0x33] %v2803_v31  ;;  %3860 = vmatpush.bf16.msra.mxu3 %v5866_v23  ;;  %v9518_v62 = vrot.slane %v2741_v16, 4  ;;  %v6456_v24 = vld [vmem:[%s10304_s3 + $0x20] sm:$0xf0] }
 0x481   :  { %2816 = vst.msk [vmem:[#allocation3 + $0x114] sm:$0x3] %vm2478_vm5, %v2804_v11  ;;  %v6494_v23 = vld [vmem:[#allocation3 + $0x124] sm:$0xf] }
 0x482   :  { %3036 = vst [vmem:[#allocation3 + $0x238] sm:$0x33] %v3024_v29  ;;  %3842 = vmatmul.bf16.vlgmr.msrb.gmra.mxu2 %v9502_v20  ;;  %3899 = vmatmul.bf16.vlgmr.msrb.gmra.mxu1 %v9502_v20  ;;  %v2756_v36 = vsel %vm101_vm0, %v2749_v38, %v9518_v62  ;;  %v3114_v38 = vsel %vm101_vm0, %v9308_v43, %v3111_v22 }
 0x483   :  { %3934 = vmatpush.bf16.msra.mxu2 %v3823_v49  ;;  %3144 = vst [vmem:[#allocation3 + $0x2ec] sm:$0x33] %v3135_v55  ;;  %3861 = vmatmul.bf16.vlgmr.msra.gmra.mxu3 %v9506_v52  ;;  %v2757_v41 = vsel %vm951_vm7, %v9151_v60, %v2756_v36  ;;  %v2758_v34 = vsel %vm951_vm7, %v2741_v16, %v9518_v62  ;;  %v5695_v49 = vld [vmem:[%s10304_s3 + $0x24] sm:$0xf0]  ;;  %v6454_v55 = vld [vmem:[%s10304_s3 + $0x10] sm:$0xf0] }
 0x484   :  { %3948 = vmatpush.bf16.msrb.mxu3 %v5854_v40  ;;  %3145 = vst.msk [vmem:[#allocation3 + $0x2f4] sm:$0x3] %vm2478_vm5, %v9460_v14  ;;  %v2999_v60 = vsel %vm951_vm7, %v2756_v36, %v2741_v16  ;;  %v2797_v43 = vsel %vm101_vm0, %v2789_v44, %v9536_v7  ;;  %v3115_v31 = vsel %vm2597_vm11, %v9301_v58, %v3114_v38  ;;  %v6533_v40 = vld [vmem:[#allocation3 + $0x25c] sm:$0xf]  ;;  %v5689_v16 = vld [vmem:[%s10304_s3 + $0x8] sm:$0xf] }
 0x485   :  { %2538 = vst [vmem:[#allocation3 + $0x30] sm:$0xff] %v2526_v28  ;;  %v2798_v44 = vsel %vm2795_vm10, %v9077_v37, %v2797_v43  ;;  %v2799_v29 = vsel %vm2795_vm10, %v9508_v26, %v9536_v7  ;;  %v6455_v37 = vld [vmem:[%s10304_s3 + $0x1c] sm:$0xf]  ;;  %v5858_v38 = vor.u32 %v6494_v23, %v5855_v3 }
 0x486   :  { %2539 = vst.msk [vmem:[#allocation3 + $0x38] sm:$0xf] %vm2474_vm13, %v9462_v8  ;;  %v6045_v15 = vld [vmem:[#allocation3 + $0x2a8] sm:$0xf]  ;;  %v6543_v63 = vld [vmem:[#allocation3 + $0x2ac] sm:$0xf]  ;;  %v3019_v14 = vpop.permute.xlu2 %3018  ;;  %v9540_v21 = vpop.permute.xlu0 %2706 }
 0x487   :  { %2894 = vst [vmem:[#allocation3 + $0x15c] sm:$0xff] %v2883_v12  ;;  %v6046_v19 = vor.u32 %v6545_v47, %v6045_v15  ;;  %v6050_v18 = vor.u32 %v6543_v63, %v6047_v56  ;;  %v2701_v25 = vpop.permute.xlu1 %2700  ;;  %v9576_v11 = vrot.slane %v9540_v21, 4  ;;  %v6540_v36 = vld [vmem:[#allocation3 + $0x290] sm:$0xf0]  ;;  %v6027_v47 = vld [vmem:[#allocation3 + $0x294] sm:$0xf0] }
 0x488   :  { %2895 = vst.msk [vmem:[#allocation3 + $0x164] sm:$0xf] %vm2474_vm13, %v9487_v0  ;;  %v9550_v59 = vrot.slane %v2701_v25, 4 }
 0x489   :  { %3083 = vst [vmem:[#allocation3 + $0x280] sm:$0xff] %v2526_v28  ;;  %3878 = vmatpush.bf16.msra.mxu0 %v6046_v19  ;;  %3935 = vmatpush.bf16.msra.mxu2 %v6050_v18  ;;  %v9597_v28 = vor.u32 %v6456_v24, %v5693_v13  ;;  %v9610_v18 = vor.u32 %v6455_v37, %v5695_v49  ;;  %v6528_v13 = vld [vmem:[#allocation3 + $0x234] sm:$0xf] }
 0x48a   :  { %2771 = vst [vmem:[#allocation3 + $0xd0] sm:$0xcc] %v2757_v41  ;;  %v2716_v58 = vsel %vm101_vm0, %v2709_v51, %v9550_v59  ;;  %v3021_v51 = vsel %vm2795_vm10, %v2797_v43, %v9508_v26  ;;  %v6010_v26 = vor.u32 %v6533_v40, %v6007_v53  ;;  %v2718_v19 = vsel %vm10484_vm4, %v2701_v25, %v9550_v59  ;;  %v5987_v53 = vld [vmem:[#allocation3 + $0x244] sm:$0xf0] }
 0x48b   :  { %2772 = vst.msk [vmem:[#allocation3 + $0xd8] sm:$0xc] %vm2535_vm8, %v2758_v34  ;;  %v2721_v41 = vsel %vm101_vm0, %v2712_v2, %v9576_v11  ;;  %v2977_v39 = vsel %vm10485_vm3, %v2716_v58, %v2701_v25  ;;  %v3025_v43 = vsel %vm2795_vm10, %v9468_v35, %v3019_v14  ;;  %vm3811_vm4 = vcmask 359424  }
 0x48c   :  { %3011 = vst [vmem:[#allocation3 + $0x1fc] sm:$0xcc] %v2999_v60  ;;  %v2723_v14 = vsel %vm10485_vm3, %v9540_v21, %v9576_v11  ;;  %v2980_v24 = vsel %vm10487_vm1, %v2721_v41, %v9540_v21  ;;  %vm10488_vm1 = vcmask 523264  }
 0x48d   :  { %3124 = vst [vmem:[#allocation3 + $0x2c4] sm:$0xff] %v3115_v31  ;;  %v9615_v31 = vor.u32 %v6454_v55, %v5689_v16 }
 0x48e   :  { %3125 = vst.msk [vmem:[#allocation3 + $0x2cc] sm:$0xf] %vm2474_vm13, %v9504_v46  ;;  %v2997_v22 = vpop.permute.xlu2 %2996  ;;  %v9599_v12 = vpop.permute.xlu0 %2666  ;;  %v2717_v46 = vsel %vm10483_vm15, %v9120_v10, %v2716_v58  ;;  %vm10486_vm15 = vmmov %vm10485_vm3 }
 0x48f   :  { %2812 = vst [vmem:[#allocation3 + $0xf8] sm:$0xff] %v2798_v44  ;;  %v3127_v56 = vpop.permute.xlu1 %3126  ;;  %v9620_v2 = vrot.slane %v9599_v12, 4  ;;  %v2722_v25 = vsel %vm10486_vm15, %v9099_v57, %v2721_v41  ;;  %v6491_v44 = vld [vmem:[#allocation3 + $0x108] sm:$0xf0]  ;;  %v5835_v57 = vld [vmem:[#allocation3 + $0x10c] sm:$0xf0]  ;;  %v3003_v55 = vsel %vm951_vm7, %v9393_v42, %v2997_v22  ;;  %vm10489_vm15 = vmmov %vm10488_vm1 }
 0x490   :  { %2813 = vst.msk [vmem:[#allocation3 + $0x100] sm:$0xf] %vm2474_vm13, %v2799_v29  ;;  %v6025_v15 = vld [vmem:[#allocation3 + $0x280] sm:$0xf]  ;;  %v6538_v63 = vld [vmem:[#allocation3 + $0x284] sm:$0xf]  ;;  %vm10490_vm3 = vmmov %vm10488_vm1 }
 0x491   :  { %3033 = vst [vmem:[#allocation3 + $0x224] sm:$0xff] %v3021_v51  ;;  %v6026_v34 = vor.u32 %v6540_v36, %v6025_v15  ;;  %v6030_v10 = vor.u32 %v6538_v63, %v6027_v47  ;;  %v3130_v60 = vrot.slane %v3127_v56, 4  ;;  %v2681_v29 = vsel %vm101_vm0, %v2672_v6, %v9620_v2  ;;  %v6523_v51 = vld [vmem:[#allocation3 + $0x20c] sm:$0xf]  ;;  %v5967_v6 = vld [vmem:[#allocation3 + $0x21c] sm:$0xf0] }
 0x492   :  { %2731 = vst [vmem:[#allocation3 + $0xbc] sm:$0xff] %v2717_v46  ;;  %3847 = vmatmul.bf16.gmra.mxu2 %v9597_v28  ;;  %3904 = vmatmul.bf16.gmra.mxu1 %v9597_v28  ;;  %v2682_v47 = vsel %vm10488_vm1, %v9148_v32, %v2681_v29  ;;  %v5970_v46 = vor.u32 %v6523_v51, %v5967_v6  ;;  %v6518_v15 = vld [vmem:[#allocation3 + $0x1e4] sm:$0xf]  ;;  %v5947_v63 = vld [vmem:[#allocation3 + $0x1f4] sm:$0xf0]  ;;  %vm10491_vm1 = vcmask 506880  }
 0x493   :  { %3879 = vmatpush.bf16.msra.mxu0 %v6026_v34  ;;  %3936 = vmatpush.bf16.msra.mxu2 %v6030_v10  ;;  %2732 = vst.msk [vmem:[#allocation3 + $0xc4] sm:$0xf] %vm2474_vm13, %v2718_v19  ;;  %v3132_v35 = vsel %vm101_vm0, %v9216_v17, %v3130_v60  ;;  %v5990_v17 = vor.u32 %v6528_v13, %v5987_v53  ;;  %v6486_v32 = vld [vmem:[#allocation3 + $0xe0] sm:$0xf0]  ;;  %v5815_v19 = vld [vmem:[#allocation3 + $0xe4] sm:$0xf0] }
 0x494   :  { %2989 = vst [vmem:[#allocation3 + $0x1e8] sm:$0xff] %v2977_v39  ;;  %3866 = vmatmul.bf16.gmra.mxu3 %v9610_v18  ;;  %v3133_v23 = vsel %vm2636_vm9, %v9209_v5, %v3132_v35  ;;  %v2958_v22 = vsel %vm10490_vm3, %v2681_v29, %v9599_v12  ;;  %v5950_v34 = vor.u32 %v6518_v15, %v5947_v63  ;;  %v6513_v60 = vld [vmem:[#allocation3 + $0x1bc] sm:$0xf]  ;;  %v5927_v13 = vld [vmem:[#allocation3 + $0x1cc] sm:$0xf0] }
 0x495   :  { %3037 = vst.msk [vmem:[#allocation3 + $0x240] sm:$0x3] %vm2478_vm5, %v3025_v43  ;;  %v5701_v43 = vld [vmem:[%s10304_s3 + $0x20] sm:$0xf]  ;;  %v6013_v6 = vld [vmem:[#allocation3 + $0x260] sm:$0xf] }
 0x496   :  { %2734 = vst [vmem:[#allocation3 + $0xd0] sm:$0x33] %v2722_v25  ;;  %6083 = vmatmul.msk.bf16.vlgmr.msra.gmra.mxu0 %vm3811_vm4, %v9615_v31  ;;  %v5833_v58 = vld [vmem:[#allocation3 + $0xf8] sm:$0xf]  ;;  %v6489_v40 = vld [vmem:[#allocation3 + $0xfc] sm:$0xf]  ;;  %v2975_v21 = vpop.permute.xlu2 %2974  ;;  %v9642_v3 = vpop.permute.xlu0 %3066 }
 0x497   :  { %3910 = vmatpush.bf16.msrb.mxu0 %v6010_v26  ;;  %4005 = vmatpush.bf16.msrb.mxu2 %v5858_v38  ;;  %2735 = vst.msk [vmem:[#allocation3 + $0xd8] sm:$0x3] %vm2478_vm5, %v2723_v14  ;;  %v5834_v37 = vor.u32 %v6491_v44, %v5833_v58  ;;  %v5838_v49 = vor.u32 %v6489_v40, %v5835_v57  ;;  %v3107_v16 = vpop.permute.xlu1 %3106  ;;  %v3070_v36 = vrot.slane %v9642_v3, 4  ;;  %v6457_v25 = vld [vmem:[%s10304_s3 + $0x28] sm:$0xf0]  ;;  %s6905_s3 = smov 69  }
 0x498   :  { %2992 = vst [vmem:[#allocation3 + $0x1fc] sm:$0x33] %v2980_v24  ;;  %v3110_v5 = vrot.slane %v3107_v16, 4  ;;  %v2683_v26 = vsel %vm10489_vm15, %v9599_v12, %v9620_v2  ;;  %v2981_v39 = vsel %vm10491_vm1, %v9576_v11, %v2975_v21  ;;  %v6508_v24 = vld [vmem:[#allocation3 + $0x194] sm:$0xf]  ;;  %v5930_v44 = vor.u32 %v6513_v60, %v5927_v13  ;;  %vm10492_vm15 = vmmov %vm10490_vm3 }
 0x499   :  { %3949 = vmatpush.bf16.msrb.mxu3 %v5834_v37  ;;  %3141 = vst [vmem:[#allocation3 + $0x2d8] sm:$0xff] %v3133_v23  ;;  %v3072_v41 = vsel %vm101_vm0, %v9313_v33, %v3070_v36  ;;  %v9678_v57 = vor.u32 %v6457_v25, %v5701_v43  ;;  %v5795_v58 = vld [vmem:[#allocation3 + $0xbc] sm:$0xf0]  ;;  %v5907_v37 = vld [vmem:[#allocation3 + $0x1a4] sm:$0xf0] }
 0x49a   :  { %3142 = vst.msk [vmem:[#allocation3 + $0x2e0] sm:$0xf] %vm2474_vm13, %v3127_v56  ;;  %v3112_v42 = vsel %vm101_vm0, %v9396_v54, %v3110_v5  ;;  %v3073_v33 = vsel %vm186_vm14, %v9303_v27, %v3072_v41  ;;  %v6503_v36 = vld [vmem:[#allocation3 + $0x16c] sm:$0xf]  ;;  %v5755_v43 = vld [vmem:[#allocation3 + $0x6c] sm:$0xf0] }
 0x49b   :  { %3911 = vmatpush.bf16.msrb.mxu0 %v5990_v17  ;;  %4006 = vmatpush.bf16.msrb.mxu2 %v5838_v49  ;;  %3015 = vst.msk [vmem:[#allocation3 + $0x218] sm:$0xf] %vm2474_vm13, %v3003_v55  ;;  %v3113_v56 = vsel %vm2597_vm11, %v9391_v4, %v3112_v42  ;;  %v6481_v17 = vld [vmem:[#allocation3 + $0xb8] sm:$0xf0]  ;;  %v5910_v55 = vor.u32 %v6508_v24, %v5907_v37  ;;  %v5753_v42 = vld [vmem:[#allocation3 + $0x58] sm:$0xf] }
 0x49c   :  { %2694 = vst [vmem:[#allocation3 + $0xa8] sm:$0xff] %v2682_v47  ;;  %v6531_v25 = vld [vmem:[#allocation3 + $0x248] sm:$0xf0]  ;;  %v6466_v13 = vld [vmem:[#allocation3 + $0x40] sm:$0xf0] }
 0x49d   :  { %2695 = vst.msk [vmem:[#allocation3 + $0xb0] sm:$0xf] %vm2474_vm13, %v2683_v26  ;;  %v5813_v54 = vld [vmem:[#allocation3 + $0xd0] sm:$0xf]  ;;  %v6484_v38 = vld [vmem:[#allocation3 + $0xd4] sm:$0xf] }
 0x49e   :  { %2970 = vst [vmem:[#allocation3 + $0x1d4] sm:$0xff] %v2958_v22  ;;  %v5814_v10 = vor.u32 %v6486_v32, %v5813_v54  ;;  %v5818_v12 = vor.u32 %v6484_v38, %v5815_v19  ;;  %v3089_v4 = vpop.permute.xlu0 %3088  ;;  %v2953_v14 = vpop.permute.xlu2 %2952  ;;  %v6471_v32 = vld [vmem:[#allocation3 + $0x68] sm:$0xf0]  ;;  %v5867_v54 = vld [vmem:[#allocation3 + $0x154] sm:$0xf0] }
 0x49f   :  { %3912 = vmatpush.bf16.msrb.mxu0 %v5970_v46  ;;  %3121 = vst [vmem:[#allocation3 + $0x2b0] sm:$0xcc] %v3113_v56  ;;  %v3087_v53 = vpop.permute.xlu1 %3086  ;;  %v3091_v35 = vrot.slane %v3089_v4, 4  ;;  %v2959_v21 = vsel %vm10492_vm15, %v9620_v2, %v2953_v14  ;;  %v5775_v2 = vld [vmem:[#allocation3 + $0x94] sm:$0xf0]  ;;  %v5754_v60 = vor.u32 %v6471_v32, %v5753_v42 }
 0x4a0   :  { %3950 = vmatpush.bf16.msrb.mxu3 %v5814_v10  ;;  %3122 = vst.msk [vmem:[#allocation3 + $0x2b8] sm:$0xc] %vm2535_vm8, %v3107_v16  ;;  %v3090_v11 = vrot.slane %v3087_v53, 4  ;;  %4007 = vmatpush.bf16.msrb.mxu2 %v5818_v12  ;;  %v5887_v46 = vld [vmem:[#allocation3 + $0x17c] sm:$0xf0] }
 0x4a1   :  { %2993 = vst.msk [vmem:[#allocation3 + $0x204] sm:$0x3] %vm2478_vm5, %v2981_v39  ;;  %v3094_v27 = vsel %vm101_vm0, %v9435_v61, %v3091_v35  ;;  %v6073_v63 = vld [vmem:[#allocation3 + $0x2d8] sm:$0xf]  ;;  %v5890_v41 = vor.u32 %v6503_v36, %v5887_v46  ;;  %v5735_v24 = vld [vmem:[#allocation3 + $0x44] sm:$0xf0] }
 0x4a2   :  { %3081 = vst [vmem:[#allocation3 + $0x274] sm:$0xcc] %v3073_v33  ;;  %6085 = vmatmul.msk.bf16.vlgmr.msra.gmra.mxu2 %vm3811_vm4, %v9615_v31  ;;  %v3092_v40 = vsel %vm101_vm0, %v9432_v50, %v3090_v11  ;;  %v3095_v16 = vsel %vm291_vm6, %v9422_v1, %v3094_v27  ;;  %v5773_v50 = vld [vmem:[#allocation3 + $0x80] sm:$0xf]  ;;  %v5993_v12 = vld [vmem:[#allocation3 + $0x238] sm:$0xf] }
 0x4a3   :  { %3913 = vmatpush.bf16.msrb.mxu0 %v5950_v34  ;;  %3082 = vst.msk [vmem:[#allocation3 + $0x27c] sm:$0xc] %vm2535_vm8, %v9642_v3  ;;  %v5793_v23 = vld [vmem:[#allocation3 + $0xa8] sm:$0xf]  ;;  %v6479_v29 = vld [vmem:[#allocation3 + $0xac] sm:$0xf]  ;;  %v3093_v61 = vsel %vm291_vm6, %v9427_v30, %v3092_v40  ;;  %v5994_v35 = vor.u32 %v6531_v25, %v5993_v12  ;;  %vm10493_vm6 = vmmov %vm10491_vm1 }
 0x4a4   :  { %v5794_v49 = vor.u32 %v6481_v17, %v5793_v23  ;;  %v5798_v51 = vor.u32 %v6479_v29, %v5795_v58  ;;  %3101 = vst [vmem:[#allocation3 + $0x29c] sm:$0xff] %v3093_v61  ;;  %v6476_v3 = vld [vmem:[#allocation3 + $0x90] sm:$0xf0]  ;;  %v6474_v30 = vld [vmem:[#allocation3 + $0x84] sm:$0xf] }
 0x4a5   :  { %3102 = vst.msk [vmem:[#allocation3 + $0x2a4] sm:$0xf] %vm2474_vm13, %v3087_v53  ;;  %v5774_v26 = vor.u32 %v6476_v3, %v5773_v50  ;;  %v5778_v15 = vor.u32 %v6474_v30, %v5775_v2  ;;  %v6469_v34 = vld [vmem:[#allocation3 + $0x5c] sm:$0xf]  ;;  %v5733_v33 = vld [vmem:[#allocation3 + $0x30] sm:$0xf] }
 0x4a6   :  { %6084 = vmatmul.msk.bf16.gmra.mxu0 %vm3811_vm4, %v9678_v57  ;;  %3951 = vmatpush.bf16.msrb.mxu3 %v5794_v49  ;;  %2971 = vst.msk [vmem:[#allocation3 + $0x1dc] sm:$0xf] %vm2474_vm13, %v2959_v21  ;;  %v3069_v5 = vpop.permute.xlu0 %3068  ;;  %v6464_v11 = vld [vmem:[#allocation3 + $0x34] sm:$0xf]  ;;  %v6526_v27 = vld [vmem:[#allocation3 + $0x220] sm:$0xf0]  ;;  %v5734_v40 = vor.u32 %v6466_v13, %v5733_v33 }
 0x4a7   :  { %3914 = vmatpush.bf16.msrb.mxu0 %v5930_v44  ;;  %4008 = vmatpush.bf16.msrb.mxu2 %v5798_v51  ;;  %3104 = vst [vmem:[#allocation3 + $0x2b0] sm:$0x33] %v3095_v16  ;;  %v3041_v47 = vpop.permute.xlu1 %3040  ;;  %v3071_v1 = vrot.slane %v3069_v5, 4  ;;  %v6546_v23 = vld [vmem:[#allocation3 + $0x2c0] sm:$0xf0]  ;;  %v5738_v61 = vor.u32 %v6464_v11, %v5735_v24 }
 0x4a8   :  { %3105 = vst.msk [vmem:[#allocation3 + $0x2b8] sm:$0x3] %vm2478_vm5, %v3089_v4  ;;  %v3047_v22 = vsel %vm2836_vm2, %v9337_v48, %v3041_v47  ;;  %v6551_v48 = vld [vmem:[#allocation3 + $0x2e8] sm:$0x30]  ;;  %v5758_v4 = vor.u32 %v6469_v34, %v5755_v43  ;;  %v5713_v21 = vld [vmem:[#allocation3 + $0x8] sm:$0xf]  ;;  %vm10494_vm5 = vmmov %vm10490_vm3 }
 0x4a9   :  { %v6536_v19 = vld [vmem:[#allocation3 + $0x270] sm:$0xf0]  ;;  %3059 = vst.msk [vmem:[#allocation3 + $0x254] sm:$0xf] %vm2474_vm13, %v3047_v22  ;;  %v3074_v56 = vsel %vm101_vm0, %v9487_v0, %v3071_v1  ;;  %v6074_v39 = vor.u32 %v6551_v48, %v6073_v63  ;;  %v6498_v0 = vld [vmem:[#allocation3 + $0x144] sm:$0xf] }
 0x4aa   :  { %3952 = vmatpush.bf16.msrb.mxu3 %v5774_v26  ;;  %v6014_v38 = vor.u32 %v6536_v19, %v6013_v6  ;;  %v3075_v10 = vsel %vm186_vm14, %v9462_v8, %v3074_v56  ;;  %3085 = vst.msk [vmem:[#allocation3 + $0x290] sm:$0xf] %vm2474_vm13, %v3069_v5  ;;  %v5870_v53 = vor.u32 %v6498_v0, %v5867_v54  ;;  %v6461_v37 = vld [vmem:[#allocation3 + $0x18] sm:$0xf0]  ;;  %v5973_v49 = vld [vmem:[#allocation3 + $0x210] sm:$0xf] }
 0x4ab   :  { %3915 = vmatpush.bf16.msrb.mxu0 %v5910_v55  ;;  %4009 = vmatpush.bf16.msrb.mxu2 %v5778_v15  ;;  %3084 = vst [vmem:[#allocation3 + $0x288] sm:$0xff] %v3075_v10  ;;  %v3826_v58 = vsel %vm3818_vm12, %v6074_v39, 0  ;;  %v5715_v16 = vld [vmem:[#allocation3 + $0x1c] sm:$0xf0]  ;;  %v6015_v50 = vld [vmem:[#allocation3 + $0x274] sm:$0xf0]  ;;  %v5714_v2 = vor.u32 %v6461_v37, %v5713_v21 }
 0x4ac   :  { %3967 = vmatpush.bf16.msra.mxu1 %v6014_v38  ;;  %v5953_v55 = vld [vmem:[#allocation3 + $0x1e8] sm:$0xf]  ;;  %v6521_v30 = vld [vmem:[#allocation3 + $0x1f8] sm:$0xf0]  ;;  %v6459_v5 = vld [vmem:[#allocation3 + $0xc] sm:$0xf] }
 0x4ad   :  { %v6534_v36 = vld [vmem:[#allocation3 + $0x264] sm:$0xf]  ;;  %v6541_v6 = vld [vmem:[#allocation3 + $0x298] sm:$0xf0]  ;;  %v5718_v47 = vor.u32 %v6459_v5, %v5715_v16  ;;  %v6021_v46 = vld [vmem:[#allocation3 + $0x268] sm:$0xf]  ;;  %v5954_v15 = vor.u32 %v6521_v30, %v5953_v55 }
 0x4ae   :  { %3953 = vmatpush.bf16.msrb.mxu3 %v5754_v60  ;;  %v6053_v8 = vld [vmem:[#allocation3 + $0x2b0] sm:$0xf]  ;;  %v3039_v14 = vpop.permute.xlu0 %3038  ;;  %v6018_v1 = vor.u32 %v6534_v36, %v6015_v50  ;;  %v5861_v42 = vld [vmem:[#allocation3 + $0x128] sm:$0xf]  ;;  %v6529_v63 = vld [vmem:[#allocation3 + $0x23c] sm:$0xf] }
 0x4af   :  { %3916 = vmatpush.bf16.msrb.mxu0 %v5890_v41  ;;  %4010 = vmatpush.bf16.msrb.mxu2 %v5758_v4  ;;  %v2973_v44 = vpop.permute.xlu1 %2972  ;;  %v3044_v17 = vsel %vm2836_vm2, %v9364_v45, %v3039_v14  ;;  %v6054_v51 = vor.u32 %v6546_v23, %v6053_v8  ;;  %v5974_v45 = vor.u32 %v6526_v27, %v5973_v49  ;;  %v6497_v32 = vld [vmem:[#allocation3 + $0x138] sm:$0xf0]  ;;  %v6516_v56 = vld [vmem:[#allocation3 + $0x1d0] sm:$0xf0]  ;;  %v5995_v10 = vld [vmem:[#allocation3 + $0x24c] sm:$0xf0] }
 0x4b0   :  { %3968 = vmatpush.bf16.msra.mxu1 %v5994_v35  ;;  %v2978_v29 = vsel %vm10493_vm6, %v9550_v59, %v2973_v44  ;;  %3056 = vst.msk [vmem:[#allocation3 + $0x240] sm:$0xc] %vm2535_vm8, %v3044_v17  ;;  %v6537_v59 = vld [vmem:[#allocation3 + $0x278] sm:$0xf0]  ;;  %v6532_v34 = vld [vmem:[#allocation3 + $0x250] sm:$0xf0]  ;;  %v5862_v12 = vor.u32 %v6497_v32, %v5861_v42  ;;  %v5998_v60 = vor.u32 %v6529_v63, %v5995_v10  ;;  %vm10498_vm2 = vmmov %vm10490_vm3 }
 0x4b1   :  { %2990 = vst.msk [vmem:[#allocation3 + $0x1f0] sm:$0xf] %vm2474_vm13, %v2978_v29  ;;  %v6022_v22 = vor.u32 %v6537_v59, %v6021_v46  ;;  %v5933_v43 = vld [vmem:[#allocation3 + $0x1c0] sm:$0xf]  ;;  %v5975_v4 = vld [vmem:[#allocation3 + $0x224] sm:$0xf0]  ;;  %vm10503_vm1 = vmmov %vm10498_vm2 }
 0x4b2   :  { %3954 = vmatpush.bf16.msrb.mxu3 %v5734_v40  ;;  %6086 = vmatmul.msk.bf16.gmra.mxu2 %vm3811_vm4, %v9678_v57  ;;  %v6033_v3 = vld [vmem:[#allocation3 + $0x288] sm:$0xf]  ;;  %v5934_v0 = vor.u32 %v6516_v56, %v5933_v43  ;;  %v5913_v33 = vld [vmem:[#allocation3 + $0x198] sm:$0xf]  ;;  %v6492_v25 = vld [vmem:[#allocation3 + $0x110] sm:$0xf0] }
 0x4b3   :  { %3917 = vmatpush.bf16.msrb.mxu0 %v5870_v53  ;;  %4011 = vmatpush.bf16.msrb.mxu2 %v5738_v61  ;;  %v6034_v26 = vor.u32 %v6541_v6, %v6033_v3  ;;  %v6511_v11 = vld [vmem:[#allocation3 + $0x1a8] sm:$0xf0]  ;;  %v5821_v8 = vld [vmem:[#allocation3 + $0xd8] sm:$0xf]  ;;  %v5955_v27 = vld [vmem:[#allocation3 + $0x1fc] sm:$0xf0] }
 0x4b4   :  { %3969 = vmatpush.bf16.msra.mxu1 %v5974_v45  ;;  %v6487_v14 = vld [vmem:[#allocation3 + $0xe8] sm:$0xf0]  ;;  %v5914_v13 = vor.u32 %v6511_v11, %v5913_v33  ;;  %v5893_v44 = vld [vmem:[#allocation3 + $0x170] sm:$0xf]  ;;  %v5981_v23 = vld [vmem:[#allocation3 + $0x218] sm:$0xf] }
 0x4b5   :  { %v6519_v24 = vld [vmem:[#allocation3 + $0x1ec] sm:$0xf]  ;;  %v5822_v61 = vor.u32 %v6487_v14, %v5821_v8  ;;  %v6549_v49 = vld [vmem:[#allocation3 + $0x2dc] sm:$0xf]  ;;  %v5935_v45 = vld [vmem:[#allocation3 + $0x1d4] sm:$0xf0] }
 0x4b6   :  { %3918 = vmatmul.bf16.vlgmr.msrb.gmra.mxu0 %v9506_v52  ;;  %3955 = vmatpush.bf16.msrb.mxu3 %v5714_v2  ;;  %v3017_v19 = vpop.permute.xlu0 %3016  ;;  %v5958_v37 = vor.u32 %v6519_v24, %v5955_v27  ;;  %v5801_v16 = vld [vmem:[#allocation3 + $0xb0] sm:$0xf]  ;;  %v6501_v50 = vld [vmem:[#allocation3 + $0x158] sm:$0xf0]  ;;  %v6482_v55 = vld [vmem:[#allocation3 + $0xc0] sm:$0xf0] }
 0x4b7   :  { %3991 = vmatpush.bf16.msra.mxu0 %v3826_v58  ;;  %4012 = vmatpush.bf16.msrb.mxu2 %v5718_v47  ;;  %v2951_v41 = vpop.permute.xlu1 %2950  ;;  %v3022_v54 = vsel %vm2795_vm10, %v9536_v7, %v3017_v19  ;;  %v6001_v38 = vld [vmem:[#allocation3 + $0x240] sm:$0xf]  ;;  %v6506_v58 = vld [vmem:[#allocation3 + $0x180] sm:$0xf0]  ;;  %v6075_v3 = vld [vmem:[#allocation3 + $0x2ec] sm:$0x30]  ;;  %v5802_v5 = vor.u32 %v6482_v55, %v5801_v16 }
 0x4b8   :  { %3970 = vmatpush.bf16.msra.mxu1 %v5954_v15  ;;  %v2956_v48 = vsel %vm10494_vm5, %v9429_v9, %v2951_v41  ;;  %3034 = vst.msk [vmem:[#allocation3 + $0x22c] sm:$0xf] %vm2474_vm13, %v3022_v54  ;;  %v6002_v39 = vor.u32 %v6532_v34, %v6001_v38  ;;  %v5841_v7 = vld [vmem:[#allocation3 + $0x100] sm:$0xf]  ;;  %v6524_v9 = vld [vmem:[#allocation3 + $0x214] sm:$0xf]  ;;  %v6078_v59 = vor.u32 %v6549_v49, %v6075_v3  ;;  %vm10496_vm13 = vmmov %vm10490_vm3 }
 0x4b9   :  { %3956 = vmatmul.bf16.vlgmr.msrb.gmra.mxu3 %v9502_v20  ;;  %2968 = vst.msk [vmem:[#allocation3 + $0x1c8] sm:$0xc] %vm2535_vm8, %v2956_v48  ;;  %v5842_v53 = vor.u32 %v6492_v25, %v5841_v7  ;;  %v5978_v35 = vor.u32 %v6524_v9, %v5975_v4  ;;  %v5873_v2 = vld [vmem:[#allocation3 + $0x148] sm:$0xf]  ;;  %v6509_v6 = vld [vmem:[#allocation3 + $0x19c] sm:$0xf]  ;;  %vm10497_vm10 = vmmov %vm10490_vm3 }
 0x4ba   :  { %4024 = vmatpush.bf16.msra.mxu3 %v6018_v1  ;;  %v5874_v36 = vor.u32 %v6501_v50, %v5873_v2  ;;  %v6477_v47 = vld [vmem:[#allocation3 + $0x98] sm:$0xf0]  ;;  %v5961_v1 = vld [vmem:[#allocation3 + $0x1f0] sm:$0xf]  ;;  %v3829_v42 = vsel %vm3818_vm12, %v6078_v59, 0  ;;  %vm10504_vm15 = vmmov %vm10503_vm1  ;;  %vm4651_vm5 = vcmask 162816  }
 0x4bb   :  { %3992 = vmatpush.bf16.msra.mxu0 %v6054_v51  ;;  %4081 = vmatpush.bf16.msra.mxu2 %v6022_v22  ;;  %v5894_v51 = vor.u32 %v6506_v58, %v5893_v44  ;;  %v6544_v22 = vld [vmem:[#allocation3 + $0x2b4] sm:$0xf]  ;;  %v5781_v32 = vld [vmem:[#allocation3 + $0x88] sm:$0xf]  ;;  %v5761_v10 = vld [vmem:[#allocation3 + $0x60] sm:$0xf] }
 0x4bc   :  { %3971 = vmatpush.bf16.msra.mxu1 %v5934_v0  ;;  %v6504_v56 = vld [vmem:[#allocation3 + $0x174] sm:$0xf]  ;;  %v5895_v41 = vld [vmem:[#allocation3 + $0x184] sm:$0xf0]  ;;  %v5782_v38 = vor.u32 %v6477_v47, %v5781_v32  ;;  %v6517_v48 = vld [vmem:[#allocation3 + $0x1d8] sm:$0xf0] }
 0x4bd   :  { %v6055_v54 = vld [vmem:[#allocation3 + $0x2c4] sm:$0xf0]  ;;  %v5898_v43 = vor.u32 %v6504_v56, %v5895_v41  ;;  %v6472_v7 = vld [vmem:[#allocation3 + $0x70] sm:$0xf0]  ;;  %v5921_v0 = vld [vmem:[#allocation3 + $0x1a0] sm:$0xf] }
 0x4be   :  { %4025 = vmatpush.bf16.msra.mxu3 %v5998_v60  ;;  %v2995_v17 = vpop.permute.xlu0 %2994  ;;  %v6058_v34 = vor.u32 %v6544_v22, %v6055_v54  ;;  %v5875_v4 = vld [vmem:[#allocation3 + $0x15c] sm:$0xf0]  ;;  %v5762_v25 = vor.u32 %v6472_v7, %v5761_v10  ;;  %v6552_v9 = vld [vmem:[#allocation3 + $0x2f0] sm:$0x30]  ;;  %v5741_v11 = vld [vmem:[#allocation3 + $0x38] sm:$0xf] }
 0x4bf   :  { %3993 = vmatpush.bf16.msra.mxu0 %v6034_v26  ;;  %4082 = vmatpush.bf16.msra.mxu2 %v6002_v39  ;;  %v3000_v40 = vsel %vm951_vm7, %v9518_v62, %v2995_v17  ;;  %v6527_v29 = vld [vmem:[#allocation3 + $0x228] sm:$0xf0]  ;;  %v6514_v62 = vld [vmem:[#allocation3 + $0x1c4] sm:$0xf]  ;;  %v5915_v26 = vld [vmem:[#allocation3 + $0x1ac] sm:$0xf0] }
 0x4c0   :  { %3972 = vmatpush.bf16.msra.mxu1 %v5914_v13  ;;  %3012 = vst.msk [vmem:[#allocation3 + $0x204] sm:$0xc] %vm2535_vm8, %v3000_v40  ;;  %v5982_v21 = vor.u32 %v6527_v29, %v5981_v23  ;;  %v5938_v30 = vor.u32 %v6514_v62, %v5935_v45  ;;  %v5918_v63 = vor.u32 %v6509_v6, %v5915_v26  ;;  %v5941_v19 = vld [vmem:[#allocation3 + $0x1c8] sm:$0xf]  ;;  %v6081_v39 = vld [vmem:[#allocation3 + $0x2e0] sm:$0xf]  ;;  %vm10495_vm7 = vmmov %vm10490_vm3 }
 0x4c1   :  { %v5942_v60 = vor.u32 %v6517_v48, %v5941_v19  ;;  %v6035_v33 = vld [vmem:[#allocation3 + $0x29c] sm:$0xf0]  ;;  %v6499_v8 = vld [vmem:[#allocation3 + $0x14c] sm:$0xf]  ;;  %v6512_v14 = vld [vmem:[#allocation3 + $0x1b0] sm:$0xf0] }
 0x4c2   :  { %4026 = vmatpush.bf16.msra.mxu3 %v5978_v35  ;;  %4013 = vmatmul.bf16.vlgmr.msrb.gmra.mxu2 %v9502_v20  ;;  %v6082_v35 = vor.u32 %v6552_v9, %v6081_v39  ;;  %v5878_v13 = vor.u32 %v6499_v8, %v5875_v4  ;;  %v6467_v24 = vld [vmem:[#allocation3 + $0x48] sm:$0xf0]  ;;  %v5922_v27 = vor.u32 %v6512_v14, %v5921_v0  ;;  %v5901_v17 = vld [vmem:[#allocation3 + $0x178] sm:$0xf]  ;;  %v6462_v29 = vld [vmem:[#allocation3 + $0x20] sm:$0xf0] }
 0x4c3   :  { %4062 = vmatpush.bf16.msrb.mxu0 %v5862_v12  ;;  %4083 = vmatpush.bf16.msra.mxu2 %v5982_v21  ;;  %v6539_v12 = vld [vmem:[#allocation3 + $0x28c] sm:$0xf]  ;;  %v5742_v44 = vor.u32 %v6467_v24, %v5741_v11  ;;  %v6061_v23 = vld [vmem:[#allocation3 + $0x2b8] sm:$0xf]  ;;  %v5721_v21 = vld [vmem:[#allocation3 + $0x10] sm:$0xf] }
 0x4c4   :  { %3973 = vmatpush.bf16.msra.mxu1 %v5894_v51  ;;  %v6507_v58 = vld [vmem:[#allocation3 + $0x188] sm:$0xf0]  ;;  %v3832_v40 = vsel %vm3818_vm12, %v6082_v35, 0  ;;  %v5722_v51 = vor.u32 %v6462_v29, %v5721_v21  ;;  %v6502_v45 = vld [vmem:[#allocation3 + $0x160] sm:$0xf0]  ;;  %vm10499_vm8 = vcmask 1041408   ;;  %vm10500_vm12 = vmmov %vm10498_vm2 }
 0x4c5   :  { %v6041_v16 = vld [vmem:[#allocation3 + $0x290] sm:$0xf]  ;;  %v6542_v3 = vld [vmem:[#allocation3 + $0x2a0] sm:$0xf0]  ;;  %vm10502_vm3 = vmmov %vm10498_vm2 }
 0x4c6   :  { %4027 = vmatpush.bf16.msra.mxu3 %v5958_v37  ;;  %3923 = vmatmul.bf16.gmra.mxu0 %v9610_v18  ;;  %v5902_v37 = vor.u32 %v6507_v58, %v5901_v17  ;;  %v5881_v50 = vld [vmem:[#allocation3 + $0x150] sm:$0xf]  ;;  %v6042_v59 = vor.u32 %v6542_v3, %v6041_v16  ;;  %vm10505_vm6 = vmmov %vm10503_vm1 }
 0x4c7   :  { %4063 = vmatpush.bf16.msrb.mxu0 %v5842_v53  ;;  %v6522_v46 = vld [vmem:[#allocation3 + $0x200] sm:$0xf0]  ;;  %v6038_v53 = vor.u32 %v6539_v12, %v6035_v33  ;;  %v5882_v62 = vor.u32 %v6502_v45, %v5881_v50  ;;  %v9766_v12 = vpop.permute.xlu2 %3284 }
 0x4c8   :  { %3974 = vmatpush.bf16.msra.mxu1 %v5874_v36  ;;  %v5962_v15 = vor.u32 %v6522_v46, %v5961_v1 }
 0x4c9   :  { %3961 = vmatmul.bf16.gmra.mxu3 %v9597_v28 }
 0x4ca   :  { %4028 = vmatpush.bf16.msra.mxu3 %v5938_v30  ;;  %4084 = vmatpush.bf16.msra.mxu2 %v5962_v15 }
 0x4cb   :  { %4064 = vmatpush.bf16.msrb.mxu0 %v5822_v61  ;;  %3975 = vmatmul.bf16.vlgmr.msra.gmra.mxu1 %v9506_v52  ;;  %v6547_v61 = vld [vmem:[#allocation3 + $0x2c8] sm:$0xf0] }
 0x4cc   :  { %4048 = vmatpush.bf16.msrb.mxu1 %v3829_v42  ;;  %v6062_v49 = vor.u32 %v6547_v61, %v6061_v23 }
 0x4ce   :  { %4029 = vmatpush.bf16.msra.mxu3 %v5918_v63  ;;  %4085 = vmatpush.bf16.msra.mxu2 %v5942_v60 }
 0x4cf   :  { %4065 = vmatpush.bf16.msrb.mxu0 %v5802_v5 }
 0x4d0   :  { %4049 = vmatpush.bf16.msrb.mxu1 %v6058_v34 }
 0x4d2   :  { %4030 = vmatpush.bf16.msra.mxu3 %v5898_v43  ;;  %4018 = vmatmul.bf16.gmra.mxu2 %v9597_v28 }
 0x4d3   :  { %4066 = vmatpush.bf16.msrb.mxu0 %v5782_v38  ;;  %4086 = vmatpush.bf16.msra.mxu2 %v5922_v27 }
 0x4d4   :  { %4050 = vmatpush.bf16.msrb.mxu1 %v6038_v53 }
 0x4d6   :  { %4031 = vmatpush.bf16.msra.mxu3 %v5878_v13  ;;  %6087 = vmatmul.msk.bf16.vlgmr.msra.gmra.mxu0 %vm3811_vm4, %v9615_v31  ;;  %v9777_v13 = vpop.permute.xlu1 %3279 }
 0x4d7   :  { %4067 = vmatpush.bf16.msrb.mxu0 %v5762_v25  ;;  %4087 = vmatpush.bf16.msra.mxu2 %v5902_v37 }
 0x4d9   :  { %4032 = vmatmul.bf16.vlgmr.msra.gmra.mxu3 %v9506_v52 }
 0x4da   :  { %4105 = vmatpush.bf16.msrb.mxu3 %v3832_v40 }
 0x4db   :  { %4068 = vmatpush.bf16.msrb.mxu0 %v5742_v44  ;;  %3980 = vmatmul.bf16.gmra.mxu1 %v9610_v18 }
 0x4dc   :  { %4088 = vmatpush.bf16.msra.mxu2 %v5882_v62 }
 0x4de   :  { %4106 = vmatpush.bf16.msrb.mxu3 %v6062_v49 }
 0x4df   :  { %4069 = vmatpush.bf16.msrb.mxu0 %v5722_v51 }
 0x4e2   :  { %4107 = vmatpush.bf16.msrb.mxu3 %v6042_v59  ;;  %4089 = vmatmul.bf16.vlgmr.msra.gmra.mxu2 %v9506_v52 }
 0x4e6   :  { %6088 = vmatmul.msk.bf16.gmra.mxu0 %vm3811_vm4, %v9678_v57 }
 0x4e9   :  { %4037 = vmatmul.bf16.gmra.mxu3 %v9610_v18 }
 0x4eb   :  { %6089 = vmatmul.msk.bf16.vlgmr.msrb.gmra.mxu1 %vm3811_vm4, %v9615_v31 }
 0x4f0   :  { %v9753_v46 = vpop.permute.xlu0 %3274 }
 0x4f2   :  { %4094 = vmatmul.bf16.gmra.mxu2 %v9610_v18 }
 0x4f6   :  { %4070 = vmatmul.bf16.vlgmr.msrb.gmra.mxu0 %v9502_v20 }
 0x4f9   :  { %6091 = vmatmul.msk.bf16.vlgmr.msrb.gmra.mxu3 %vm3811_vm4, %v9615_v31 }
 0x4fb   :  { %6090 = vmatmul.msk.bf16.gmra.mxu1 %vm3811_vm4, %v9678_v57 }
 0x4ff   :  { %v3900_v6 = vpop.f32.mrf.mxu1 }
 0x505   :  { %v3843_v55 = vpop.f32.mrf.mxu2 }
 0x506   :  { %4075 = vmatmul.bf16.gmra.mxu0 %v9597_v28  ;;  %v3862_v5 = vpop.f32.mrf.mxu3  ;;  %v3844_v42 = vadd.f32 %v3843_v55, %v9753_v46 }
 0x507   :  { %v3902_v28 = vpop.f32.mrf.mxu1 }
 0x508   :  { %v3863_v22 = vadd.f32 %v3862_v5, %v3844_v42  ;;  %v3903_v37 = vadd.f32 %v3902_v28, %v9777_v13 }
 0x509   :  { %6092 = vmatmul.msk.bf16.gmra.mxu3 %vm3811_vm4, %v9678_v57  ;;  %v3901_v57 = vadd.f32 %v3900_v6, %v9753_v46  ;;  %vm10501_vm4 = vmmov %vm10498_vm2 }
 0x50d   :  { %v3845_v52 = vpop.f32.mrf.mxu2 }
 0x50e   :  { %v3864_v20 = vpop.f32.mrf.mxu3  ;;  %v3846_v24 = vadd.f32 %v3845_v52, %v9777_v13  ;;  %v9794_v52 = vpop.permute.xlu1 %3289 }
 0x50f   :  { %v3905_v54 = vpop.f32.mrf.mxu1 }
 0x510   :  { %v3906_v43 = vadd.f32 %v3905_v54, %v9766_v12  ;;  %v3865_v17 = vadd.f32 %v3864_v20, %v3846_v24 }
 0x513   :  { %v3881_v30 = vpop.f32.mrf.mxu0 }
 0x514   :  { %v9759_v56 = vadd.f32 %v3881_v30, %v3863_v22 }
 0x515   :  { %v3848_v2 = vpop.f32.mrf.mxu2 }
 0x516   :  { %v3849_v39 = vadd.f32 %v3848_v2, %v9766_v12 }
 0x517   :  { %v3867_v1 = vpop.f32.mrf.mxu3  ;;  %v3907_v60 = vpop.f32.mrf.mxu1 }
 0x518   :  { %v3868_v0 = vadd.f32 %v3867_v1, %v3849_v39 }
 0x51b   :  { %v3883_v36 = vpop.f32.mrf.mxu0 }
 0x51c   :  { %v9781_v29 = vadd.f32 %v3883_v36, %v3865_v17 }
 0x51d   :  { %v9751_v18 = vpop.f32.mrf.mxu2 }
 0x51e   :  { %v3851_v2 = vadd.f32 %v9751_v18, %v9794_v52 }
 0x51f   :  { %v3869_v32 = vpop.f32.mrf.mxu3 }
 0x520   :  { %v3870_v20 = vadd.f32 %v3869_v32, %v3851_v2 }
 0x523   :  { %v3886_v47 = vpop.f32.mrf.mxu0 }
 0x524   :  { %v9770_v25 = vadd.f32 %v3886_v47, %v3868_v0 }
 0x525   :  { %v3938_v31 = vpop.f32.mrf.mxu2 }
 0x52b   :  { %v9755_v26 = vpop.f32.mrf.mxu0 }
 0x52d   :  { %v3940_v15 = vpop.f32.mrf.mxu2 }
 0x533   :  { %v3919_v63 = vpop.f32.mrf.mxu0 }
 0x534   :  { %v3920_v19 = vadd.f32 %v3919_v63, %v3901_v57  ;;  %v3908_v57 = vadd.f32 %v3907_v60, %v9794_v52 }
 0x535   :  { %v3943_v10 = vpop.f32.mrf.mxu2 }
 0x536   :  { %v9761_v41 = vadd.f32 %v3938_v31, %v3920_v19  ;;  %v9803_v31 = vadd.f32 %v9755_v26, %v3870_v20 }
 0x538   :  { %v6738_v38 = vpack.i.bf16 %v9761_v41, %v9759_v56 }
 0x53a   :  { %6739 = vrot.lane.b32.xlu2 %v6738_v38, %s10404_s20 }
 0x53b   :  { %v3921_v34 = vpop.f32.mrf.mxu0 }
 0x53c   :  { %v3957_v48 = vpop.f32.mrf.mxu3  ;;  %v3922_v51 = vadd.f32 %v3921_v34, %v3903_v37 }
 0x53d   :  { %v3945_v53 = vpop.f32.mrf.mxu2  ;;  %v3958_v27 = vadd.f32 %v3957_v48, %v9753_v46 }
 0x53e   :  { %v9790_v62 = vadd.f32 %v3940_v15, %v3922_v51 }
 0x543   :  { %v3924_v7 = vpop.f32.mrf.mxu0 }
 0x544   :  { %v3925_v4 = vadd.f32 %v3924_v7, %v3906_v43  ;;  %v3959_v33 = vpop.f32.mrf.mxu3 }
 0x545   :  { %v4014_v44 = vpop.f32.mrf.mxu2  ;;  %v3960_v45 = vadd.f32 %v3959_v33, %v9777_v13 }
 0x546   :  { %v9772_v9 = vadd.f32 %v3943_v10, %v3925_v4  ;;  %v4015_v33 = vadd.f32 %v4014_v44, %v9753_v46 }
 0x548   :  { %v6753_v35 = vpack.i.bf16 %v9772_v9, %v9770_v25  ;;  %v3976_v11 = vpop.f32.mrf.mxu1 }
 0x549   :  { %v3977_v58 = vadd.f32 %v3976_v11, %v3958_v27 }
 0x54a   :  { %6754 = vrot.lane.b32.xlu2 %v6753_v35, %s10404_s20 }
 0x54b   :  { %v3926_v8 = vpop.f32.mrf.mxu0 }
 0x54c   :  { %v3962_v14 = vpop.f32.mrf.mxu3  ;;  %v3927_v15 = vadd.f32 %v3926_v8, %v3908_v57 }
 0x54d   :  { %v4016_v16 = vpop.f32.mrf.mxu2  ;;  %v3963_v36 = vadd.f32 %v3962_v14, %v9766_v12 }
 0x54e   :  { %v9813_v54 = vadd.f32 %v3945_v53, %v3927_v15 }
 0x550   :  { %v3978_v23 = vpop.f32.mrf.mxu1 }
 0x551   :  { %v3979_v50 = vadd.f32 %v3978_v23, %v3960_v45 }
 0x553   :  { %v3995_v40 = vpop.f32.mrf.mxu0 }
 0x554   :  { %v9783_v61 = vadd.f32 %v3995_v40, %v3977_v58  ;;  %v3964_v21 = vpop.f32.mrf.mxu3 }
 0x555   :  { %v4019_v1 = vpop.f32.mrf.mxu2  ;;  %v3965_v63 = vadd.f32 %v3964_v21, %v9794_v52  ;;  %v4017_v21 = vadd.f32 %v4016_v16, %v9777_v13 }
 0x556   :  { %v6743_v49 = vpack.i.bf16 %v9781_v29, %v9783_v61  ;;  %v4020_v19 = vadd.f32 %v4019_v1, %v9766_v12 }
 0x558   :  { %6744 = vrot.lane.b32.xlu0 %v6743_v49, %s10404_s20  ;;  %v3981_v30 = vpop.f32.mrf.mxu1 }
 0x559   :  { %v3982_v6 = vadd.f32 %v3981_v30, %v3963_v36 }
 0x55b   :  { %v3997_v3 = vpop.f32.mrf.mxu0 }
 0x55c   :  { %v9792_v59 = vadd.f32 %v3997_v3, %v3979_v50  ;;  %v4033_v55 = vpop.f32.mrf.mxu3 }
 0x55d   :  { %v4021_v48 = vpop.f32.mrf.mxu2  ;;  %v4034_v11 = vadd.f32 %v4033_v55, %v4015_v33 }
 0x55e   :  { %v6748_v5 = vpack.i.bf16 %v9792_v59, %v9790_v62  ;;  %v4022_v60 = vadd.f32 %v4021_v48, %v9794_v52 }
 0x560   :  { %6749 = vrot.lane.b32.xlu1 %v6748_v5, %s10404_s20  ;;  %v3983_v22 = vpop.f32.mrf.mxu1 }
 0x561   :  { %v3984_v32 = vadd.f32 %v3983_v22, %v3965_v63 }
 0x563   :  { %v4000_v47 = vpop.f32.mrf.mxu0 }
 0x564   :  { %v9805_v28 = vadd.f32 %v4000_v47, %v3982_v6  ;;  %v4035_v42 = vpop.f32.mrf.mxu3 }
 0x565   :  { %v4090_v4 = vpop.f32.mrf.mxu2  ;;  %v4036_v37 = vadd.f32 %v4035_v42, %v4017_v21 }
 0x566   :  { %v6758_v18 = vpack.i.bf16 %v9803_v31, %v9805_v28 }
 0x568   :  { %6759 = vrot.lane.b32.xlu0 %v6758_v18, %s10404_s20  ;;  %v4052_v35 = vpop.f32.mrf.mxu1 }
 0x569   :  { %v4053_v27 = vadd.f32 %v4052_v35, %v4034_v11 }
 0x56b   :  { %v4002_v26 = vpop.f32.mrf.mxu0 }
 0x56c   :  { %v9815_v38 = vadd.f32 %v4002_v26, %v3984_v32  ;;  %v4038_v34 = vpop.f32.mrf.mxu3 }
 0x56d   :  { %v9817_v10 = vadd.f32 %v4038_v34, %v4020_v19  ;;  %v4092_v23 = vpop.f32.mrf.mxu2 }
 0x56e   :  { %v6763_v39 = vpack.i.bf16 %v9815_v38, %v9813_v54 }
 0x570   :  { %6764 = vrot.lane.b32.xlu1 %v6763_v39, %s10404_s20  ;;  %v4054_v44 = vpop.f32.mrf.mxu1 }
 0x571   :  { %v9833_v51 = vadd.f32 %v4054_v44, %v4036_v37 }
 0x573   :  { %v4071_v43 = vpop.f32.mrf.mxu0 }
 0x574   :  { %v4040_v7 = vpop.f32.mrf.mxu3  ;;  %v4072_v53 = vadd.f32 %v4071_v43, %v9753_v46 }
 0x575   :  { %v9823_v0 = vadd.f32 %v4040_v7, %v4022_v60 }
 0x576   :  { %v4091_v8 = vadd.f32 %v4090_v4, %v4072_v53 }
 0x57b   :  { %v4073_v14 = vpop.f32.mrf.mxu0 }
 0x57c   :  { %v4109_v24 = vpop.f32.mrf.mxu3  ;;  %v4074_v58 = vadd.f32 %v4073_v14, %v9777_v13  ;;  %v4095_v14 = vpop.f32.mrf.mxu2 }
 0x57d   :  { %v9827_v17 = vadd.f32 %v4109_v24, %v4091_v8 }
 0x57e   :  { %v4093_v46 = vadd.f32 %v4092_v23, %v4074_v58  ;;  %v4057_v23 = vpop.f32.mrf.mxu1 }
 0x57f   :  { %v6768_v40 = vpack.i.bf16 %v9827_v17, %v4053_v27 }
 0x581   :  { %6769 = vrot.lane.b32.xlu2 %v6768_v40, %s10404_s20 }
 0x583   :  { %v4076_v60 = vpop.f32.mrf.mxu0 }
 0x584   :  { %v4111_v49 = vpop.f32.mrf.mxu3  ;;  %v4077_v35 = vadd.f32 %v4076_v60, %v9766_v12  ;;  %v6553_v60 = vld [vmem:[%s10306_s5] sm:$0xff] }
 0x585   :  { %v9835_v45 = vadd.f32 %v4111_v49, %v4093_v46 }
 0x586   :  { %v4096_v40 = vadd.f32 %v4095_v14, %v4077_v35  ;;  %v6576_v35 = vld [vmem:[%s10306_s5 + $0xb8] sm:$0xff] }
 0x587   :  { %v6773_v50 = vpack.i.bf16 %v9835_v45, %v9833_v51  ;;  %v6584_v14 = vld [vmem:[%s10306_s5 + $0xf8] sm:$0xff]  ;;  %4700 = vmatpush.bf16.msrb.mxu2 %v6576_v35  ;;  %v4449_v35 = vld [vmem:[%s10306_s5 + $0x108] sm:$0x3] }
 0x588   :  { %4719 = vmatpush.bf16.msra.mxu3 %v6584_v14  ;;  %v6562_v14 = vld [vmem:[%s10306_s5 + $0x48] sm:$0xff] }
 0x589   :  { %6774 = vrot.lane.b32.xlu0 %v6773_v50, %s10404_s20  ;;  %v9911_v50 = vadd.f32 %v4057_v23, %v9817_v10 }
 0x594   :  { %v6740_v3 = vpop.permute.xlu2 %6739 }
 0x595   :  { %v6742_v55 = vunpack.i.h.bf16 %v6740_v3  ;;  %v6741_v30 = vunpack.i.l.bf16 %v6740_v3 }
 0x597   :  { %v4180_v13 = vsel %vm186_vm14, %v6741_v30, %v6742_v55  ;;  %v4078_v30 = vpop.f32.mrf.mxu0 }
 0x598   :  { %v9843_v36 = vmax.f32 %v9759_v56, %v4180_v13 }
 0x5a4   :  { %v6755_v1 = vpop.permute.xlu2 %6754 }
 0x5a5   :  { %v6757_v63 = vunpack.i.h.bf16 %v6755_v1  ;;  %v6756_v32 = vunpack.i.l.bf16 %v6755_v1  ;;  %v4079_v1 = vadd.f32 %v4078_v30, %v9794_v52  ;;  %v4059_v52 = vpop.f32.mrf.mxu1 }
 0x5a7   :  { %v4188_v34 = vsel %vm186_vm14, %v6756_v32, %v6757_v63  ;;  %v6558_v32 = vld [vmem:[%s10306_s5 + $0x28] sm:$0xff] }
 0x5a8   :  { %v9874_v7 = vmax.f32 %v9770_v25, %v4188_v34  ;;  %v6555_v34 = vld [vmem:[%s10306_s5 + $0x10] sm:$0xff] }
 0x5ca   :  { %v6745_v2 = vpop.permute.xlu0 %6744 }
 0x5cb   :  { %v6746_v16 = vunpack.i.l.bf16 %v6745_v2  ;;  %v6747_v42 = vunpack.i.h.bf16 %v6745_v2 }
 0x5cd   :  { %v4181_v5 = vsel %vm186_vm14, %v6742_v55, %v6746_v16 }
 0x5ce   :  { %v9846_v20 = vmax.f32 %v9761_v41, %v4181_v5 }
 0x5d0   :  { %v6778_v6 = vpack.i.bf16 %v9846_v20, %v9843_v36 }
 0x5d2   :  { %v9850_v47 = vpop.permute.xlu1 %6749  ;;  %6779 = vrot.lane.b32.xlu1 %v6778_v6, %s10396_s13 }
 0x5d3   :  { %v6752_v57 = vunpack.i.h.bf16 %v9850_v47  ;;  %v6751_v18 = vunpack.i.l.bf16 %v9850_v47 }
 0x5d5   :  { %v4184_v22 = vsel %vm186_vm14, %v6747_v42, %v6751_v18  ;;  %v4185_v56 = vsel %vm186_vm14, %v6751_v18, %v6752_v57 }
 0x5d6   :  { %v9858_v41 = vmax.f32 %v9781_v29, %v4184_v22  ;;  %v9861_v15 = vmax.f32 %v9790_v62, %v4185_v56  ;;  %v4097_v22 = vpop.f32.mrf.mxu2 }
 0x5d8   :  { %v6783_v19 = vpack.i.bf16 %v9861_v15, %v9858_v41 }
 0x5da   :  { %v9865_v26 = vpop.permute.xlu0 %6759  ;;  %6784 = vrot.lane.b32.xlu2 %v6783_v19, %s10396_s13  ;;  %v6557_v19 = vld [vmem:[%s10306_s5 + $0x20] sm:$0xff] }
 0x5db   :  { %v6761_v48 = vunpack.i.l.bf16 %v9865_v26  ;;  %v6770_v39 = vpop.permute.xlu2 %6769  ;;  %v6762_v12 = vunpack.i.h.bf16 %v9865_v26  ;;  %v6582_v26 = vld [vmem:[%s10306_s5 + $0xe8] sm:$0xff] }
 0x5dc   :  { %v6772_v29 = vunpack.i.h.bf16 %v6770_v39  ;;  %v6771_v43 = vunpack.i.l.bf16 %v6770_v39  ;;  %v6554_v39 = vld [vmem:[%s10306_s5 + $0x8] sm:$0xff] }
 0x5dd   :  { %v4189_v62 = vsel %vm186_vm14, %v6757_v63, %v6761_v48 }
 0x5de   :  { %v9877_v4 = vmax.f32 %v9772_v9, %v4189_v62  ;;  %v4182_v33 = vsel %vm186_vm14, %v6746_v16, %v6771_v43  ;;  %v4183_v53 = vsel %vm186_vm14, %v6771_v43, %v6772_v29  ;;  %v4114_v9 = vpop.f32.mrf.mxu3  ;;  %v9926_v16 = vmax.f32 %v9827_v17, %v6772_v29 }
 0x5df   :  { %v9883_v11 = vmax.f32 %v9783_v61, %v4182_v33  ;;  %v9885_v8 = vmax.f32 %v4053_v27, %v4183_v53  ;;  %v9898_v21 = vadd.f32 %v4114_v9, %v4096_v40  ;;  %v6568_v53 = vld [vmem:[%s10306_s5 + $0x78] sm:$0xff] }
 0x5e0   :  { %v6788_v24 = vpack.i.bf16 %v9877_v4, %v9874_v7  ;;  %4681 = vmatpush.bf16.msra.mxu0 %v6568_v53 }
 0x5e1   :  { %v6798_v25 = vpack.i.bf16 %v9885_v8, %v9883_v11  ;;  %v6808_v55 = vpack.i.bf16 %v9898_v21, %v9911_v50 }
 0x5e2   :  { %v9891_v58 = vpop.permute.xlu1 %6764  ;;  %6789 = vrot.lane.b32.xlu0 %v6788_v24, %s10396_s13 }
 0x5e3   :  { %v6767_v61 = vunpack.i.h.bf16 %v9891_v58  ;;  %v6766_v27 = vunpack.i.l.bf16 %v9891_v58  ;;  %6799 = vrot.lane.b32.xlu2 %v6798_v25, %s10396_s13 }
 0x5e5   :  { %v4192_v44 = vsel %vm186_vm14, %v6762_v12, %v6766_v27  ;;  %v4193_v37 = vsel %vm186_vm14, %v6766_v27, %v6767_v61 }
 0x5e6   :  { %v9905_v46 = vmax.f32 %v9803_v31, %v4192_v44  ;;  %v9908_v49 = vmax.f32 %v9813_v54, %v4193_v37  ;;  %v6560_v31 = vld [vmem:[%s10306_s5 + $0x38] sm:$0xff]  ;;  %v6559_v54 = vld [vmem:[%s10306_s5 + $0x30] sm:$0xff]  ;;  %v4116_v56 = vpop.f32.mrf.mxu3 }
 0x5e7   :  { %4662 = vmatpush.bf16.msra.mxu1 %v6560_v31  ;;  %v6567_v37 = vld [vmem:[%s10306_s5 + $0x70] sm:$0xff] }
 0x5e8   :  { %v6793_v3 = vpack.i.bf16 %v9908_v49, %v9905_v46  ;;  %4682 = vmatpush.bf16.msra.mxu0 %v6567_v37  ;;  %v6561_v37 = vld [vmem:[%s10306_s5 + $0x40] sm:$0xff] }
 0x5ea   :  { %6794 = vrot.lane.b32.xlu1 %v6793_v3, %s10396_s13  ;;  %v6575_v3 = vld [vmem:[%s10306_s5 + $0xb0] sm:$0xff] }
 0x5eb   :  { %6809 = vrot.lane.b32.xlu2 %v6808_v55, %s10404_s20  ;;  %4663 = vmatpush.bf16.msra.mxu1 %v6559_v54  ;;  %v6583_v55 = vld [vmem:[%s10306_s5 + $0xf0] sm:$0xff] }
 0x5ec   :  { %4701 = vmatpush.bf16.msrb.mxu2 %v6575_v3  ;;  %4720 = vmatpush.bf16.msra.mxu3 %v6583_v55  ;;  %v6569_v55 = vld [vmem:[%s10306_s5 + $0x80] sm:$0xff] }
 0x5ef   :  { %4664 = vmatpush.bf16.msra.mxu1 %v6558_v32  ;;  %v6579_v32 = vld [vmem:[%s10306_s5 + $0xd0] sm:$0xff] }
 0x5f0   :  { %4721 = vmatpush.bf16.msra.mxu3 %v6582_v26 }
 0x5f3   :  { %4665 = vmatpush.bf16.msra.mxu1 %v6557_v19 }
 0x5fb   :  { %v6775_v10 = vpop.permute.xlu0 %6774 }
 0x5fc   :  { %v6777_v2 = vunpack.i.h.bf16 %v6775_v10  ;;  %v6776_v13 = vunpack.i.l.bf16 %v6775_v10  ;;  %v6566_v10 = vld [vmem:[%s10306_s5 + $0x68] sm:$0xff] }
 0x5fd   :  { %4683 = vmatpush.bf16.msra.mxu0 %v6566_v10 }
 0x5fe   :  { %v9929_v5 = vmax.f32 %v9835_v45, %v6777_v2  ;;  %v4186_v6 = vsel %vm186_vm14, %v6752_v57, %v6776_v13  ;;  %v4187_v47 = vsel %vm186_vm14, %v6776_v13, %v6777_v2  ;;  %v4098_v57 = vadd.f32 %v4097_v22, %v4079_v1  ;;  %v6565_v1 = vld [vmem:[%s10306_s5 + $0x60] sm:$0xff] }
 0x5ff   :  { %v9935_v42 = vmax.f32 %v9792_v59, %v4186_v6  ;;  %v9938_v18 = vmax.f32 %v9833_v51, %v4187_v47  ;;  %v9949_v59 = vadd.f32 %v4059_v52, %v9823_v0  ;;  %v6556_v0 = vld [vmem:[%s10306_s5 + $0x18] sm:$0xff]  ;;  %v6573_v22 = vld [vmem:[%s10306_s5 + $0xa0] sm:$0xff]  ;;  %v6563_v52 = vld [vmem:[%s10306_s5 + $0x50] sm:$0xff] }
 0x600   :  { %v6803_v17 = vpack.i.bf16 %v9929_v5, %v9926_v16  ;;  %v9946_v63 = vadd.f32 %v4116_v56, %v4098_v57  ;;  %4666 = vmatpush.bf16.msra.mxu1 %v6556_v0  ;;  %v6580_v56 = vld [vmem:[%s10306_s5 + $0xd8] sm:$0xff] }
 0x601   :  { %v6813_v45 = vpack.i.bf16 %v9938_v18, %v9935_v42  ;;  %4684 = vmatpush.bf16.msra.mxu0 %v6565_v1 }
 0x602   :  { %6804 = vrot.lane.b32.xlu1 %v6803_v17, %s10396_s13  ;;  %v6818_v51 = vpack.i.bf16 %v9946_v63, %v9949_v59  ;;  %v6564_v17 = vld [vmem:[%s10306_s5 + $0x58] sm:$0xff] }
 0x603   :  { %6814 = vrot.lane.b32.xlu0 %v6813_v45, %s10396_s13  ;;  %v6572_v45 = vld [vmem:[%s10306_s5 + $0x98] sm:$0xff] }
 0x604   :  { %4667 = vmatpush.bf16.msra.mxu1 %v6555_v34 }
 0x605   :  { %4685 = vmatpush.bf16.msra.mxu0 %v6564_v17 }
 0x608   :  { %4668 = vmatpush.bf16.msra.mxu1 %v6554_v39 }
 0x609   :  { %4686 = vmatpush.bf16.msra.mxu0 %v6563_v52 }
 0x60b   :  { %6819 = vrot.lane.b32.xlu0 %v6818_v51, %s10404_s20  ;;  %v6571_v51 = vld [vmem:[%s10306_s5 + $0x90] sm:$0xff]  ;;  %s6898_s20 = smov 75  }
 0x60c   :  { %4669 = vmatpush.bf16.msra.mxu1 %v6553_v60 }
 0x60d   :  { %4687 = vmatpush.bf16.msra.mxu0 %v6562_v14 }
 0x611   :  { %4688 = vmatpush.bf16.msra.mxu0 %v6561_v37 }
 0x634   :  { %v9972_v29 = vpop.permute.xlu2 %6784 }
 0x635   :  { %v6787_v62 = vunpack.i.h.bf16 %v9972_v29  ;;  %v6786_v33 = vunpack.i.l.bf16 %v9972_v29 }
 0x637   :  { %v4301_v24 = vsel %vm10495_vm7, %v6786_v33, %v6787_v62  ;;  %vm10506_vm7 = vmmov %vm10503_vm1 }
 0x638   :  { %v4338_v27 = vmax.f32 %v9858_v41, %v4301_v24  ;;  %v6570_v24 = vld [vmem:[%s10306_s5 + $0x88] sm:$0xff] }
 0x63d   :  { %v9974_v43 = vpop.permute.xlu2 %6799 }
 0x63e   :  { %v6801_v26 = vunpack.i.l.bf16 %v9974_v43 }
 0x644   :  { %v9990_v25 = vpop.permute.xlu1 %6779 }
 0x645   :  { %v6782_v9 = vunpack.i.h.bf16 %v9990_v25  ;;  %v6781_v40 = vunpack.i.l.bf16 %v9990_v25  ;;  %v9994_v12 = vpop.permute.xlu2 %6809 }
 0x646   :  { %v6812_v23 = vunpack.i.h.bf16 %v9994_v12  ;;  %v6811_v44 = vunpack.i.l.bf16 %v9994_v12 }
 0x647   :  { %v4297_v41 = vsel %vm10496_vm13, %v6781_v40, %v6782_v9  ;;  %vm10507_vm13 = vmmov %vm10503_vm1 }
 0x648   :  { %v4333_v31 = vmax.f32 %v9843_v36, %v4297_v41  ;;  %v4190_v54 = vsel %vm186_vm14, %v6761_v48, %v6811_v44  ;;  %v4191_v30 = vsel %vm186_vm14, %v6811_v44, %v6812_v23  ;;  %v6574_v36 = vld [vmem:[%s10306_s5 + $0xa8] sm:$0xff]  ;;  %v4358_v48 = vmax.f32 %v4338_v27, 0.0  ;;  %v6577_v41 = vld [vmem:[%s10306_s5 + $0xc0] sm:$0xff] }
 0x649   :  { %v10022_v2 = vmax.f32 %v9805_v28, %v4190_v54  ;;  %v10031_v6 = vmax.f32 %v9911_v50, %v4191_v30  ;;  %4702 = vmatpush.bf16.msrb.mxu2 %v6574_v36  ;;  %v6581_v50 = vld [vmem:[%s10306_s5 + $0xe0] sm:$0xff]  ;;  %v4583_v27 = vunpack.c.l.b16 %v4449_v35  ;;  %v6802_v36 = vunpack.i.h.bf16 %v9974_v43 }
 0x64a   :  { %v4353_v13 = vmax.f32 %v4333_v31, 0.0  ;;  %4722 = vmatpush.bf16.msra.mxu3 %v6581_v50  ;;  %v6585_v30 = vld [vmem:[%s10306_s5 + $0x100] sm:$0xff] }
 0x64b   :  { %v6823_v28 = vpack.i.bf16 %v10031_v6, %v10022_v2  ;;  %v4617_v3 = vpack.c.b16 %v4583_v27, %v4583_v27 }
 0x64c   :  { %v4373_v47 = vpack.c.bf16 %v4358_v48, %v4353_v13  ;;  %v4299_v48 = vsel %vm10500_vm12, %v6801_v26, %v6802_v36  ;;  %v4298_v13 = vsel %vm10501_vm4, %v6782_v9, %v6801_v26  ;;  %vm4761_vm12 = vcmask 196608  }
 0x64d   :  { %6824 = vrot.lane.b32.xlu1 %v6823_v28, %s10396_s13  ;;  %4703 = vmatpush.bf16.msrb.mxu2 %v6573_v22  ;;  %v4335_v50 = vmax.f32 %v9883_v11, %v4299_v48  ;;  %vm4793_vm4 = vcmask 1040384  }
 0x64e   :  { %4670 = vmatmul.bf16.vlgmr.msra.gmra.mxu1 %v4373_v47  ;;  %4723 = vmatpush.bf16.msra.mxu3 %v6580_v56  ;;  %v4334_v56 = vmax.f32 %v9846_v20, %v4298_v13 }
 0x651   :  { %4704 = vmatpush.bf16.msrb.mxu2 %v6572_v45 }
 0x652   :  { %4724 = vmatpush.bf16.msra.mxu3 %v6579_v32 }
 0x654   :  { %v10054_v57 = vpop.permute.xlu0 %6789 }
 0x655   :  { %v6792_v19 = vunpack.i.h.bf16 %v10054_v57  ;;  %v6791_v0 = vunpack.i.l.bf16 %v10054_v57  ;;  %4705 = vmatpush.bf16.msrb.mxu2 %v6571_v51 }
 0x657   :  { %v4305_v34 = vsel %vm10497_vm10, %v6791_v0, %v6792_v19  ;;  %vm10509_vm10 = vmmov %vm10503_vm1 }
 0x658   :  { %v4343_v53 = vmax.f32 %v9874_v7, %v4305_v34  ;;  %v6578_v7 = vld [vmem:[%s10306_s5 + $0xc8] sm:$0xff]  ;;  %s6895_s5 = smov 25  }
 0x659   :  { %4706 = vmatpush.bf16.msrb.mxu2 %v6570_v24  ;;  %4725 = vmatpush.bf16.msra.mxu3 %v6578_v7 }
 0x65a   :  { %v4363_v31 = vmax.f32 %v4343_v53, 0.0 }
 0x65c   :  { %v10070_v39 = vpop.permute.xlu1 %6794 }
 0x65d   :  { %v6797_v60 = vunpack.i.h.bf16 %v10070_v39  ;;  %v6796_v33 = vunpack.i.l.bf16 %v10070_v39  ;;  %4707 = vmatpush.bf16.msrb.mxu2 %v6569_v55  ;;  %4726 = vmatpush.bf16.msra.mxu3 %v6577_v41 }
 0x65f   :  { %v4309_v40 = vsel %vm10498_vm2, %v6796_v33, %v6797_v60  ;;  %v4355_v33 = vmax.f32 %v4335_v50, 0.0  ;;  %vm10510_vm2 = vmmov %vm10503_vm1 }
 0x660   :  { %v4348_v44 = vmax.f32 %v9905_v46, %v4309_v40  ;;  %v4660_v46 = vsel %vm10499_vm8, %v4617_v3, 0  ;;  %vm10511_vm8 = vmmov %vm10503_vm1 }
 0x661   :  { %4744 = vmatpush.bf16.msrb.mxu1 %v4660_v46 }
 0x662   :  { %v4368_v54 = vmax.f32 %v4348_v44, 0.0 }
 0x664   :  { %v4378_v10 = vpack.c.bf16 %v4368_v54, %v4363_v31 }
 0x665   :  { %4745 = vmatpush.bf16.msrb.mxu1 %v6585_v30 }
 0x666   :  { %4675 = vmatmul.bf16.gmra.mxu1 %v4378_v10 }
 0x674   :  { %v6805_v47 = vpop.permute.xlu1 %6804 }
 0x675   :  { %v6807_v28 = vunpack.i.h.bf16 %v6805_v47  ;;  %v6806_v1 = vunpack.i.l.bf16 %v6805_v47  ;;  %v6815_v22 = vpop.permute.xlu0 %6814 }
 0x676   :  { %v6817_v17 = vunpack.i.h.bf16 %v6815_v22  ;;  %v6816_v45 = vunpack.i.l.bf16 %v6815_v22 }
 0x677   :  { %v4342_v52 = vmax.f32 %v9929_v5, %v6807_v28  ;;  %v4300_v43 = vsel %vm10502_vm3, %v6802_v36, %v6806_v1  ;;  %v4337_v51 = vmax.f32 %v9926_v16, %v6806_v1  ;;  %vm4771_vm3 = vcmask 401608  }
 0x678   :  { %v4336_v25 = vmax.f32 %v9885_v8, %v4300_v43  ;;  %v4302_v9 = vsel %vm10503_vm1, %v6787_v62, %v6816_v45  ;;  %v4303_v32 = vsel %vm10504_vm15, %v6816_v45, %v6817_v17  ;;  %v4304_v11 = vsel %vm10505_vm6, %v6817_v17, %v6807_v28 }
 0x679   :  { %v4362_v0 = vmax.f32 %v4342_v52, 0.0  ;;  %v4357_v34 = vmax.f32 %v4337_v51, 0.0  ;;  %v4339_v20 = vmax.f32 %v9861_v15, %v4302_v9  ;;  %v4340_v5 = vmax.f32 %v9935_v42, %v4303_v32 }
 0x67a   :  { %v4356_v53 = vmax.f32 %v4336_v25, 0.0  ;;  %v4341_v16 = vmax.f32 %v9938_v18, %v4304_v11  ;;  %v4354_v8 = vmax.f32 %v4334_v56, 0.0  ;;  %v4230_v42 = vmax.f32 %v9898_v21, %v6812_v23 }
 0x67b   :  { %v4377_v35 = vpack.c.bf16 %v4362_v0, %v4357_v34  ;;  %v4359_v29 = vmax.f32 %v4339_v20, 0.0  ;;  %v4360_v14 = vmax.f32 %v4340_v5, 0.0  ;;  %vm4789_vm15 = vcmask 811608  }
 0x67c   :  { %v4361_v62 = vmax.f32 %v4341_v16, 0.0  ;;  %vm4801_vm6 = vcmask 1016608  }
 0x67d   :  { %v4374_v24 = vpack.c.bf16 %v4359_v29, %v4354_v8  ;;  %v6820_v40 = vpop.permute.xlu0 %6819  ;;  %6225 = vmatmul.msk.bf16.vlgmr.msrb.gmra.mxu1 %vm4651_vm5, %v4377_v35  ;;  %v4375_v27 = vpack.c.bf16 %v4360_v14, %v4355_v33 }
 0x67e   :  { %v4376_v7 = vpack.c.bf16 %v4361_v62, %v4356_v53  ;;  %v6822_v44 = vunpack.i.h.bf16 %v6820_v40  ;;  %v6821_v15 = vunpack.i.l.bf16 %v6820_v40 }
 0x67f   :  { %4689 = vmatmul.bf16.vlgmr.msra.gmra.mxu0 %v4374_v24  ;;  %4708 = vmatmul.bf16.vlgmr.msrb.gmra.mxu2 %v4375_v27 }
 0x680   :  { %v4235_v18 = vmax.f32 %v9946_v63, %v6822_v44  ;;  %v4194_v37 = vsel %vm186_vm14, %v6767_v61, %v6821_v15  ;;  %v4195_v3 = vsel %vm186_vm14, %v6821_v15, %v6822_v44  ;;  %4727 = vmatmul.bf16.vlgmr.msra.gmra.mxu3 %v4376_v7  ;;  %vm10508_vm14 = vmmov %vm10503_vm1  ;;  %vm4780_vm1 = vcmask 606608  }
 0x681   :  { %v4233_v55 = vmax.f32 %v9815_v38, %v4194_v37  ;;  %v4234_v41 = vmax.f32 %v9949_v59, %v4195_v3 }
 0x682   :  { %v6833_v31 = vpack.i.bf16 %v4235_v18, %v4230_v42 }
 0x683   :  { %v6828_v54 = vpack.i.bf16 %v4234_v41, %v4233_v55 }
 0x684   :  { %6834 = vrot.lane.b32.xlu0 %v6833_v31, %s10396_s13 }
 0x685   :  { %6829 = vrot.lane.b32.xlu2 %v6828_v54, %s10396_s13  ;;  %s6896_s13 = smov 100  }
 0x6bf   :  { %v6825_v21 = vpop.permute.xlu1 %6824 }
 0x6c0   :  { %v6827_v12 = vunpack.i.h.bf16 %v6825_v21  ;;  %v6826_v63 = vunpack.i.l.bf16 %v6825_v21 }
 0x6c2   :  { %v4306_v58 = vsel %vm10506_vm7, %v6792_v19, %v6826_v63  ;;  %v4307_v61 = vsel %vm10507_vm13, %v6826_v63, %v6827_v12  ;;  %vm4813_vm7 = vcmask 173057  }
 0x6c3   :  { %v4344_v59 = vmax.f32 %v9877_v4, %v4306_v58  ;;  %v4345_v30 = vmax.f32 %v10022_v2, %v4307_v61 }
 0x6c5   :  { %v4364_v19 = vmax.f32 %v4344_v59, 0.0  ;;  %v4365_v47 = vmax.f32 %v4345_v30, 0.0 }
 0x6cb   :  { %v4671_v46 = vpop.f32.mrf.mxu1 }
 0x6d3   :  { %v4673_v4 = vpop.f32.mrf.mxu1 }
 0x6df   :  { %v6830_v23 = vpop.permute.xlu2 %6829 }
 0x6e0   :  { %v6832_v38 = vunpack.i.h.bf16 %v6830_v23  ;;  %v6831_v10 = vunpack.i.l.bf16 %v6830_v23 }
 0x6e2   :  { %v4310_v36 = vsel %vm10508_vm14, %v6797_v60, %v6831_v10  ;;  %v4311_v26 = vsel %vm10509_vm10, %v6831_v10, %v6832_v38  ;;  %vm10512_vm14 = vcmask 1022976   ;;  %vm4823_vm10 = vcmask 377008  }
 0x6e3   :  { %v4349_v57 = vmax.f32 %v9908_v49, %v4310_v36  ;;  %v4350_v48 = vmax.f32 %v4233_v55, %v4311_v26  ;;  %v10148_v50 = vpop.f32.mrf.mxu1 }
 0x6e5   :  { %v4369_v13 = vmax.f32 %v4349_v57, 0.0  ;;  %v4370_v28 = vmax.f32 %v4350_v48, 0.0 }
 0x6e7   :  { %v4379_v1 = vpack.c.bf16 %v4369_v13, %v4364_v19  ;;  %v4380_v22 = vpack.c.bf16 %v4370_v28, %v4365_v47 }
 0x6e9   :  { %4694 = vmatmul.bf16.gmra.mxu0 %v4379_v1  ;;  %4713 = vmatmul.bf16.gmra.mxu2 %v4380_v22 }
 0x6eb   :  { %v10153_v9 = vpop.f32.mrf.mxu1 }
 0x6f6   :  { %v6835_v2 = vpop.permute.xlu0 %6834 }
 0x6f7   :  { %v6837_v39 = vunpack.i.h.bf16 %v6835_v2  ;;  %v6836_v17 = vunpack.i.l.bf16 %v6835_v2 }
 0x6f9   :  { %v4352_v60 = vmax.f32 %v4235_v18, %v6837_v39  ;;  %v4308_v45 = vsel %vm10510_vm2, %v6827_v12, %v6836_v17  ;;  %v4312_v49 = vsel %vm10511_vm8, %v6832_v38, %v6837_v39  ;;  %v4347_v56 = vmax.f32 %v4230_v42, %v6836_v17 }
 0x6fa   :  { %v4346_v52 = vmax.f32 %v10031_v6, %v4308_v45  ;;  %v4351_v43 = vmax.f32 %v4234_v41, %v4312_v49  ;;  %v4747_v8 = vpop.f32.mrf.mxu1  ;;  %vm4832_vm2 = vcmask 582008   ;;  %vm4863_vm8 = vcmask 1041360  }
 0x6fb   :  { %v4372_v51 = vmax.f32 %v4352_v60, 0.0  ;;  %v4367_v25 = vmax.f32 %v4347_v56, 0.0 }
 0x6fc   :  { %v4690_v32 = vpop.f32.mrf.mxu0  ;;  %v4366_v11 = vmax.f32 %v4346_v52, 0.0  ;;  %v4371_v0 = vmax.f32 %v4351_v43, 0.0 }
 0x6fd   :  { %v4382_v34 = vpack.c.bf16 %v4372_v51, %v4367_v25  ;;  %v4691_v5 = vadd.f32 %v4690_v32, %v4671_v46  ;;  %v6593_v25 = vld [vmem:[%s10307_s6 + $0x38] sm:$0xff] }
 0x6fe   :  { %v4381_v20 = vpack.c.bf16 %v4371_v0, %v4366_v11  ;;  %v6609_v32 = vld [vmem:[%s10307_s6 + $0xb8] sm:$0xff]  ;;  %5136 = vmatpush.bf16.msrb.mxu0 %v6593_v25  ;;  %v6592_v0 = vld [vmem:[%s10307_s6 + $0x30] sm:$0xff] }
 0x6ff   :  { %6226 = vmatmul.msk.bf16.gmra.mxu1 %vm4651_vm5, %v4382_v34  ;;  %5162 = vmatpush.bf16.msrb.mxu3 %v6609_v32  ;;  %v6600_v34 = vld [vmem:[%s10307_s6 + $0x70] sm:$0xff]  ;;  %vm4812_vm5 = vcmask 1041384   ;;  %v6621_v25 = vld [vmem:[%s10311_s10 + $0x18] sm:$0xff] }
 0x700   :  { %4732 = vmatmul.bf16.gmra.mxu3 %v4381_v20  ;;  %v6608_v20 = vld [vmem:[%s10307_s6 + $0xb0] sm:$0xff]  ;;  %vm4814_vm13 = vmor %vm4813_vm7, %vm4812_vm5  ;;  %vm4894_vm5 = vcmask 762408   ;;  %vm4915_vm7 = vcmask 1041336  }
 0x702   :  { %v4709_v33 = vpop.f32.mrf.mxu2  ;;  %v4749_v44 = vpop.f32.mrf.mxu1  ;;  %5137 = vmatpush.bf16.msrb.mxu0 %v6592_v0 }
 0x703   :  { %v4710_v53 = vadd.f32 %v4709_v33, %v4691_v5  ;;  %v4728_v16 = vpop.f32.mrf.mxu3  ;;  %v6591_v33 = vld [vmem:[%s10307_s6 + $0x28] sm:$0xff]  ;;  %5163 = vmatpush.bf16.msrb.mxu3 %v6608_v20 }
 0x704   :  { %v4692_v6 = vpop.f32.mrf.mxu0 }
 0x705   :  { %v4729_v35 = vadd.f32 %v4728_v16, %v4710_v53  ;;  %v4693_v62 = vadd.f32 %v4692_v6, %v4673_v4  ;;  %v6599_v53 = vld [vmem:[%s10307_s6 + $0x68] sm:$0xff] }
 0x706   :  { %v6607_v16 = vld [vmem:[%s10307_s6 + $0xa8] sm:$0xff]  ;;  %5138 = vmatpush.bf16.msrb.mxu0 %v6591_v33 }
 0x707   :  { %v4748_v29 = vadd.f32 %v4747_v8, %v4729_v35  ;;  %5164 = vmatpush.bf16.msrb.mxu3 %v6607_v16 }
 0x709   :  { %v4757_v14 = vpack.c.bf16 %v4748_v29, %v4748_v29 }
 0x70a   :  { %v4711_v24 = vpop.f32.mrf.mxu2 }
 0x70b   :  { %4764 = vst [vmem:[#allocation1] sm:$0xff] %v4757_v14  ;;  %v4712_v40 = vadd.f32 %v4711_v24, %v4693_v62  ;;  %v4730_v27 = vpop.f32.mrf.mxu3 }
 0x70c   :  { %4762 = vst.msk [vmem:[#allocation4] sm:$0x1] %vm4761_vm12, %v4757_v14  ;;  %vm4864_vm12 = vcmask 148481  }
 0x70d   :  { %v4731_v7 = vadd.f32 %v4730_v27, %v4712_v40  ;;  %v6590_v27 = vld [vmem:[%s10307_s6 + $0x20] sm:$0xff] }
 0x70e   :  { %5139 = vmatpush.bf16.msrb.mxu0 %v6590_v27 }
 0x70f   :  { %v4750_v15 = vadd.f32 %v4749_v44, %v4731_v7  ;;  %v6598_v7 = vld [vmem:[%s10307_s6 + $0x60] sm:$0xff] }
 0x710   :  { %v6606_v44 = vld [vmem:[%s10307_s6 + $0xa0] sm:$0xff] }
 0x711   :  { %v4758_v42 = vpack.c.bf16 %v4750_v15, %v4750_v15  ;;  %5165 = vmatpush.bf16.msrb.mxu3 %v6606_v44 }
 0x712   :  { %v4766_v18 = vld [vmem:[#allocation1 + $0x1] ss:$4 sm:$0xff] }
 0x713   :  { %4773 = vst [vmem:[#allocation1] sm:$0xff] %v4757_v14  ;;  %4768 = vrot.lane.b32.xlu1 %v4766_v18, %s6895_s5  ;;  %v4792_v37 = vrot.slane %v4758_v42, 3  ;;  %v6597_v18 = vld [vmem:[%s10307_s6 + $0x58] sm:$0xff] }
 0x715   :  { %v4796_v3 = vsel %vm4793_vm4, %v4758_v42, %v4792_v37 }
 0x716   :  { %4798 = vrot.lane.b32.xlu2 %v4796_v3, %s6896_s13  ;;  %v6605_v3 = vld [vmem:[%s10307_s6 + $0x98] sm:$0xff] }
 0x717   :  { %5166 = vmatpush.bf16.msrb.mxu3 %v6605_v3 }
 0x71a   :  { %v4775_v55 = vld [vmem:[#allocation1 + $0x2] ss:$4 sm:$0xff] }
 0x71b   :  { %4782 = vst [vmem:[#allocation1] sm:$0xff] %v4757_v14 }
 0x71e   :  { %4777 = vrot.lane.b32.xlu2 %v4775_v55, %s6897_s14 }
 0x722   :  { %v4784_v41 = vld [vmem:[#allocation1 + $0x3] ss:$4 sm:$0xff] }
 0x723   :  { %4803 = vst [vmem:[#allocation1] sm:$0xff] %v4758_v42  ;;  %4786 = vrot.lane.b32.xlu1 %v4784_v41, %s6898_s20  ;;  %v6588_v41 = vld [vmem:[%s10307_s6 + $0x10] sm:$0xff] }
 0x72a   :  { %v4805_v31 = vld [vmem:[#allocation1 + $0x1] ss:$4 sm:$0xff] }
 0x72b   :  { %4816 = vst [vmem:[#allocation1] sm:$0xff] %v4758_v42 }
 0x732   :  { %v4818_v54 = vld [vmem:[#allocation1 + $0x2] ss:$4 sm:$0xff] }
 0x733   :  { %4825 = vst [vmem:[#allocation1] sm:$0xff] %v4758_v42  ;;  %v6589_v42 = vld [vmem:[%s10307_s6 + $0x18] sm:$0xff] }
 0x734   :  { %5140 = vmatpush.bf16.msrb.mxu0 %v6589_v42 }
 0x738   :  { %5141 = vmatpush.bf16.msrb.mxu0 %v6588_v41 }
 0x73a   :  { %v4827_v21 = vld [vmem:[#allocation1 + $0x3] ss:$4 sm:$0xff] }
 0x73b   :  { %4829 = vrot.lane.b32.xlu1 %v4827_v21, %s6899_s22  ;;  %v6587_v21 = vld [vmem:[%s10307_s6 + $0x8] sm:$0xff] }
 0x73c   :  { %5142 = vmatpush.bf16.msrb.mxu0 %v6587_v21 }
 0x766   :  { %v4695_v12 = vpop.f32.mrf.mxu0 }
 0x767   :  { %v4696_v61 = vadd.f32 %v4695_v12, %v10148_v50  ;;  %v6595_v12 = vld [vmem:[%s10307_s6 + $0x48] sm:$0xff] }
 0x76c   :  { %v4714_v58 = vpop.f32.mrf.mxu2 }
 0x76d   :  { %v4715_v23 = vadd.f32 %v4714_v58, %v4696_v61  ;;  %v6586_v61 = vld [vmem:[%s10307_s6] sm:$0xff] }
 0x76e   :  { %v4697_v59 = vpop.f32.mrf.mxu0  ;;  %5143 = vmatpush.bf16.msrb.mxu0 %v6586_v61 }
 0x76f   :  { %v4698_v48 = vadd.f32 %v4697_v59, %v10153_v9  ;;  %v6601_v9 = vld [vmem:[%s10307_s6 + $0x78] sm:$0xff] }
 0x770   :  { %v4799_v63 = vpop.permute.xlu2 %4798  ;;  %5149 = vmatpush.bf16.msra.mxu2 %v6601_v9  ;;  %v6838_v9 = vld [vmem:[%s10308_s7] ss:$0 sm:$0xff] }
 0x774   :  { %v4716_v57 = vpop.f32.mrf.mxu2  ;;  %5150 = vmatpush.bf16.msra.mxu2 %v6600_v34 }
 0x775   :  { %v4717_v13 = vadd.f32 %v4716_v57, %v4698_v48 }
 0x778   :  { %v4778_v36 = vpop.permute.xlu2 %4777  ;;  %5151 = vmatpush.bf16.msra.mxu2 %v6599_v53 }
 0x77c   :  { %v4752_v46 = vpop.f32.mrf.mxu1  ;;  %5152 = vmatpush.bf16.msra.mxu2 %v6598_v7 }
 0x780   :  { %5153 = vmatpush.bf16.msra.mxu2 %v6597_v18  ;;  %v6840_v18 = vld [vmem:[%s10312_s11] ss:$0 sm:$0xff] }
 0x783   :  { %v4733_v38 = vpop.f32.mrf.mxu3 }
 0x784   :  { %v4734_v10 = vadd.f32 %v4733_v38, %v4715_v23  ;;  %v4754_v4 = vpop.f32.mrf.mxu1  ;;  %v6594_v23 = vld [vmem:[%s10307_s6 + $0x40] sm:$0xff] }
 0x785   :  { %v4769_v30 = vpop.permute.xlu1 %4768  ;;  %v6610_v38 = vld [vmem:[%s10307_s6 + $0xc0] sm:$0xff] }
 0x786   :  { %v4753_v26 = vadd.f32 %v4752_v46, %v4734_v10  ;;  %4772 = vst.msk [vmem:[#allocation4] sm:$0x1] %vm4771_vm3, %v4769_v30  ;;  %vm4852_vm3 = vcmask 992008   ;;  %v6602_v46 = vld [vmem:[%s10307_s6 + $0x80] sm:$0xff]  ;;  %5182 = vmatpush.bf16.msra.mxu0 %v6610_v38 }
 0x787   :  { %4781 = vst.msk [vmem:[#allocation4] sm:$0x1] %vm4780_vm1, %v4778_v36  ;;  %vm4865_vm1 = vmor %vm4864_vm12, %vm4863_vm8  ;;  %v5204_v36 = vld [vmem:[%s10309_s8 + $0x38] sm:$0xf]  ;;  %vm5325_vm8 = vcmask 687104  }
 0x788   :  { %v4759_v19 = vpack.c.bf16 %v4753_v26, %v4753_v26  ;;  %v5238_v26 = vunpack.c.l.b16 %v5204_v36 }
 0x78a   :  { %4845 = vst [vmem:[#allocation1] sm:$0xff] %v4759_v19  ;;  %v4835_v47 = vrot.slane %v4759_v19, 3  ;;  %v5246_v57 = vpack.c.b16 %v5238_v26, %v5238_v26 }
 0x78b   :  { %v4735_v28 = vpop.f32.mrf.mxu3 }
 0x78c   :  { %v4736_v1 = vadd.f32 %v4735_v28, %v4717_v13  ;;  %v4838_v22 = vsel %vm4793_vm4, %v4759_v19, %v4835_v47  ;;  %v5260_v48 = vsel %vm101_vm0, %v5246_v57, 0  ;;  %vm10513_vm0 = vcmask 1041408  }
 0x78d   :  { %4840 = vrot.lane.b32.xlu0 %v4838_v22, %s6900_s1  ;;  %5262 = vmatpush.bf16.msra.mxu1 %v5260_v48 }
 0x78e   :  { %v4755_v50 = vadd.f32 %v4754_v4, %v4736_v1  ;;  %v6616_v4 = vld [vmem:[%s10309_s8 + $0x28] sm:$0xff] }
 0x790   :  { %v4760_v2 = vpack.c.bf16 %v4755_v50, %v4755_v50  ;;  %v6615_v50 = vld [vmem:[%s10309_s8 + $0x20] sm:$0xff] }
 0x791   :  { %v4847_v39 = vld [vmem:[#allocation1 + $0x1] ss:$4 sm:$0xff] }
 0x792   :  { %4849 = vrot.lane.b32.xlu1 %v4847_v39, %s6901_s2  ;;  %4854 = vst [vmem:[#allocation1] sm:$0xff] %v4759_v19  ;;  %v4877_v17 = vrot.slane %v4760_v2, 3  ;;  %v6613_v39 = vld [vmem:[%s10309_s8 + $0x10] sm:$0xff] }
 0x794   :  { %v4880_v60 = vsel %vm4793_vm4, %v4760_v2, %v4877_v17  ;;  %vm4843_vm4 = vcmask 787008   ;;  %v6612_v17 = vld [vmem:[%s10309_s8 + $0x8] sm:$0xff] }
 0x795   :  { %v4787_v45 = vpop.permute.xlu1 %4786  ;;  %4882 = vrot.lane.b32.xlu0 %v4880_v60, %s6902_s15  ;;  %v6611_v60 = vld [vmem:[%s10309_s8] sm:$0xff] }
 0x796   :  { %4790 = vst.msk [vmem:[#allocation4] sm:$0x1] %vm4789_vm15, %v4787_v45  ;;  %vm4874_vm15 = vcmask 352408   ;;  %v5287_v45 = vld [vmem:[%s10311_s10 + $0x28] sm:$0x3] }
 0x797   :  { %4802 = vst.msk [vmem:[#allocation4] sm:$0x1] %vm4801_vm6, %v4799_v63  ;;  %vm4885_vm6 = vcmask 557408   ;;  %v6603_v63 = vld [vmem:[%s10307_s6 + $0x88] sm:$0xff] }
 0x799   :  { %v4856_v49 = vld [vmem:[#allocation1 + $0x2] ss:$4 sm:$0xff] }
 0x79a   :  { %4858 = vrot.lane.b32.xlu2 %v4856_v49, %s6894_s16  ;;  %4867 = vst [vmem:[#allocation1] sm:$0xff] %v4759_v19  ;;  %v6617_v19 = vld [vmem:[%s10309_s8 + $0x30] sm:$0xff]  ;;  %v5313_v49 = vunpack.c.l.b16 %v5287_v45 }
 0x79b   :  { %5263 = vmatpush.bf16.msra.mxu1 %v6617_v19 }
 0x79d   :  { %4807 = vrot.lane.b32.xlu0 %v4805_v31, %s6884_s24  ;;  %v6596_v31 = vld [vmem:[%s10307_s6 + $0x50] sm:$0xff] }
 0x79e   :  { %5154 = vmatpush.bf16.msra.mxu2 %v6596_v31 }
 0x79f   :  { %5264 = vmatpush.bf16.msra.mxu1 %v6616_v4 }
 0x7a1   :  { %v4869_v56 = vld [vmem:[#allocation1 + $0x3] ss:$4 sm:$0xff] }
 0x7a2   :  { %4871 = vrot.lane.b32.xlu2 %v4869_v56, %s6903_s0  ;;  %4887 = vst [vmem:[#allocation1] sm:$0xff] %v4760_v2  ;;  %5155 = vmatpush.bf16.msra.mxu2 %v6595_v12  ;;  %v5319_v56 = vpack.c.b16 %v5313_v49, %v5313_v49 }
 0x7a3   :  { %5265 = vmatpush.bf16.msra.mxu1 %v6615_v50 }
 0x7a5   :  { %4820 = vrot.lane.b32.xlu0 %v4818_v54, %s6904_s19  ;;  %v6604_v54 = vld [vmem:[%s10307_s6 + $0x90] sm:$0xff] }
 0x7a6   :  { %5167 = vmatpush.bf16.msrb.mxu3 %v6604_v54  ;;  %5156 = vmatpush.bf16.msra.mxu2 %v6594_v23 }
 0x7a9   :  { %v4889_v52 = vld [vmem:[#allocation1 + $0x1] ss:$4 sm:$0xff] }
 0x7aa   :  { %4891 = vrot.lane.b32.xlu2 %v4889_v52, %s6905_s3  ;;  %4896 = vst [vmem:[#allocation1] sm:$0xff] %v4760_v2  ;;  %5168 = vmatpush.bf16.msrb.mxu3 %v6603_v63  ;;  %v5330_v52 = vsel %vm10513_vm0, %v5319_v56, 0 }
 0x7ab   :  { %5334 = vmatpush.bf16.msrb.mxu2 %v5330_v52 }
 0x7ad   :  { %v4830_v29 = vpop.permute.xlu1 %4829 }
 0x7ae   :  { %5169 = vmatpush.bf16.msrb.mxu3 %v6602_v46 }
 0x7b1   :  { %v4898_v43 = vld [vmem:[#allocation1 + $0x2] ss:$4 sm:$0xff] }
 0x7b2   :  { %4900 = vrot.lane.b32.xlu0 %v4898_v43, %s10400_s17  ;;  %4905 = vst [vmem:[#allocation1] sm:$0xff] %v4760_v2  ;;  %v6614_v2 = vld [vmem:[%s10309_s8 + $0x18] sm:$0xff]  ;;  %v6622_v43 = vld [vmem:[%s10311_s10 + $0x20] sm:$0xff] }
 0x7b3   :  { %5266 = vmatpush.bf16.msra.mxu1 %v6614_v2  ;;  %5335 = vmatpush.bf16.msrb.mxu2 %v6622_v43 }
 0x7b7   :  { %5267 = vmatpush.bf16.msra.mxu1 %v6613_v39  ;;  %5336 = vmatpush.bf16.msrb.mxu2 %v6621_v25 }
 0x7b9   :  { %v4907_v51 = vld [vmem:[#allocation1 + $0x3] ss:$4 sm:$0xff] }
 0x7ba   :  { %4909 = vrot.lane.b32.xlu1 %v4907_v51, %s6906_s29 }
 0x7bb   :  { %5268 = vmatpush.bf16.msra.mxu1 %v6612_v17 }
 0x7bf   :  { %5269 = vmatpush.bf16.msra.mxu1 %v6611_v60 }
 0x7f4   :  { %v4859_v8 = vpop.permute.xlu2 %4858 }
 0x7f5   :  { %v4860_v24 = vrot.slane %v4859_v8, 7 }
 0x7f7   :  { %v4861_v37 = vsel %vm2597_vm11, %v4860_v24, %v4859_v8  ;;  %vm4903_vm11 = vcmask 967408   ;;  %v6618_v24 = vld [vmem:[%s10311_s10] sm:$0xff] }
 0x7fc   :  { %v4872_v62 = vpop.permute.xlu2 %4871 }
 0x7ff   :  { %v4841_v11 = vpop.permute.xlu0 %4840 }
 0x804   :  { %v4850_v15 = vpop.permute.xlu1 %4849  ;;  %v4892_v55 = vpop.permute.xlu2 %4891 }
 0x807   :  { %v4883_v5 = vpop.permute.xlu0 %4882 }
 0x80f   :  { %v4808_v35 = vpop.permute.xlu0 %4807 }
 0x810   :  { %v4809_v6 = vrot.slane %v4808_v35, 7 }
 0x812   :  { %v4810_v14 = vsel %vm10512_vm14, %v4809_v6, %v4808_v35  ;;  %vm4912_vm14 = vcmask 973824  }
 0x813   :  { %4815 = vst.msk [vmem:[#allocation4] sm:$0x3] %vm4814_vm13, %v4810_v14  ;;  %vm4916_vm13 = vcmask 123905  }
 0x817   :  { %v4821_v40 = vpop.permute.xlu0 %4820 }
 0x818   :  { %4824 = vst.msk [vmem:[#allocation4 + $0x1] sm:$0x1] %vm4823_vm10, %v4821_v40  ;;  %vm4917_vm10 = vmor %vm4916_vm13, %vm4915_vm7  ;;  %v6839_v40 = vld [vmem:[%s10310_s9] ss:$0 sm:$0xff]  ;;  %s6907_s9 = smov [#allocation5]  }
 0x819   :  { %4833 = vst.msk [vmem:[#allocation4 + $0x1] sm:$0x1] %vm4832_vm2, %v4830_v29  ;;  %vm5133_vm2 = vcmask 130048  }
 0x81a   :  { %4844 = vst.msk [vmem:[#allocation4 + $0x1] sm:$0x1] %vm4843_vm4, %v4841_v11  ;;  %v6620_v11 = vld [vmem:[%s10311_s10 + $0x10] sm:$0xff] }
 0x81b   :  { %4853 = vst.msk [vmem:[#allocation4 + $0x1] sm:$0x1] %vm4852_vm3, %v4850_v15  ;;  %5337 = vmatpush.bf16.msrb.mxu2 %v6620_v11 }
 0x81c   :  { %4866 = vst.msk [vmem:[#allocation4 + $0x1] sm:$0x3] %vm4865_vm1, %v4861_v37 }
 0x81d   :  { %4875 = vst.msk [vmem:[#allocation4 + $0x2] sm:$0x1] %vm4874_vm15, %v4872_v62  ;;  %v6619_v62 = vld [vmem:[%s10311_s10 + $0x8] sm:$0xff]  ;;  %s5364_s10 = sshll.u32 %s6907_s9, 4  ;;  %s5365_s10 = int_to_ptr.vmem [resolvable:$true] %s5364_s10 }
 0x81e   :  { %4886 = vst.msk [vmem:[#allocation4 + $0x2] sm:$0x1] %vm4885_vm6, %v4883_v5 }
 0x81f   :  { %4895 = vst.msk [vmem:[#allocation4 + $0x2] sm:$0x1] %vm4894_vm5, %v4892_v55  ;;  %5338 = vmatpush.bf16.msrb.mxu2 %v6619_v62 }
 0x823   :  { %5339 = vmatpush.bf16.msrb.mxu2 %v6618_v24 }
 0x824   :  { %v4901_v58 = vpop.permute.xlu0 %4900 }
 0x825   :  { %4904 = vst.msk [vmem:[#allocation4 + $0x2] sm:$0x1] %vm4903_vm11, %v4901_v58 }
 0x82c   :  { %v4910_v10 = vpop.permute.xlu1 %4909 }
 0x82d   :  { %v4911_v59 = vrot.slane %v4910_v10, 7 }
 0x82f   :  { %v4913_v30 = vsel %vm4912_vm14, %v4911_v59, %v4910_v10 }
 0x830   :  { %4918 = vst.msk [vmem:[#allocation4 + $0x2] sm:$0x3] %vm4917_vm10, %v4913_v30 }
 0x837   :  { %v4919_v13 = vld [vmem:[#allocation4] sm:$0xf] }
 0x838   :  { %4975 = vst [vmem:[#allocation1] ss:$9 sm:$0xff] %v4919_v13 }
 0x83f   :  { %v4976_v47 = vld [vmem:[#allocation1] sm:$0xff]  ;;  %v4977_v28 = vld [vmem:[#allocation1 + $0x9] sm:$0xff]  ;;  %v4978_v1 = vld [vmem:[#allocation1 + $0x12] sm:$0xff] }
 0x840   :  { %5144 = vmatmul.bf16.vlgmr.msrb.gmra.mxu0 %v4976_v47  ;;  %5157 = vmatmul.bf16.vlgmr.msra.gmra.mxu2 %v4977_v28  ;;  %v4979_v22 = vld [vmem:[#allocation1 + $0x1b] sm:$0xff] }
 0x841   :  { %5170 = vmatmul.bf16.vlgmr.msrb.gmra.mxu3 %v4978_v1 }
 0x850   :  { %6327 = vmatmul.msk.bf16.vlgmr.msra.gmra.mxu0 %vm5133_vm2, %v4979_v22 }
 0x8bd   :  { %v5145_v51 = vpop.f32.mrf.mxu0 }
 0x8be   :  { %v5146_v20 = vadd.f32 %v6838_v9, %v5145_v51 }
 0x8c3   :  { %v5158_v32 = vpop.f32.mrf.mxu2 }
 0x8c4   :  { %v5171_v0 = vpop.f32.mrf.mxu3  ;;  %v5159_v5 = vadd.f32 %v5158_v32, %v5146_v20 }
 0x8c5   :  { %v5147_v34 = vpop.f32.mrf.mxu0 }
 0x8c6   :  { %v5172_v53 = vadd.f32 %v5171_v0, %v5159_v5 }
 0x8cb   :  { %v5160_v33 = vpop.f32.mrf.mxu2 }
 0x8cc   :  { %v5173_v16 = vpop.f32.mrf.mxu3 }
 0x8cd   :  { %v5184_v8 = vpop.f32.mrf.mxu0 }
 0x8ce   :  { %v5185_v35 = vadd.f32 %v5184_v8, %v5172_v53 }
 0x8d0   :  { %v5188_v6 = vmax.f32 %v5185_v35, 0.0 }
 0x8d2   :  { %v5189_v29 = vpack.c.bf16 %v5188_v6, %v5188_v6 }
 0x8d4   :  { %6356 = vmatmul.msk.bf16.vlgmr.msra.gmra.mxu1 %vm2636_vm9, %v5189_v29  ;;  %vm5345_vm9 = vcmask 74752  }
 0x8d5   :  { %v5186_v14 = vpop.f32.mrf.mxu0 }
 0x951   :  { %v5271_v27 = vpop.f32.mrf.mxu1 }
 0x952   :  { %v5272_v7 = vadd.f32 %v6839_v40, %v5271_v27 }
 0x954   :  { %v5275_v44 = vmax.f32 %v5272_v7, 0.0 }
 0x956   :  { %v5276_v15 = vpack.c.bf16 %v5275_v44, %v5275_v44 }
 0x958   :  { %6377 = vmatmul.msk.bf16.vlgmr.msrb.gmra.mxu2 %vm5325_vm8, %v5276_v15 }
 0x959   :  { %v5273_v42 = vpop.f32.mrf.mxu1 }
 0x9db   :  { %v5341_v37 = vpop.f32.mrf.mxu2 }
 0x9dc   :  { %v5342_v3 = vadd.f32 %v6840_v18, %v5341_v37 }
 0x9de   :  { %v5346_v55 = vsel %vm5345_vm9, %v5342_v3, -inf }
 0x9df   :  { %5347 = vmax.xlane.f32.xlu1 %v5346_v55 }
 0x9e3   :  { %v5343_v41 = vpop.f32.mrf.mxu2 }
 0xa52   :  { %v5348_v31 = vpop.xlane.xlu1 %5347 }
 0xa53   :  { %v5349_v54 = vsub.f32 %v5342_v3, %v5348_v31 }
 0xa55   :  { %v5350_v21 = vmul.f32 1.442695, %v5349_v54 }
 0xa57   :  { %6841 = vpow2.f32 %v5350_v21 }
 0xa5d   :  { %v6842_v12 = vpop.eup %6841 }
 0xa5e   :  { %v5352_v63 = vsel %vm5345_vm9, %v6842_v12, 0.0 }
 0xa5f   :  { %5353 = vadd.xlane.f32.xlu2 %v5352_v63 }
 0xad2   :  { %v5354_v58 = vpop.xlane.xlu2 %5353 }
 0xad3   :  { %6843 = vlog2.f32 %v5354_v58 }
 0xad9   :  { %v6844_v61 = vpop.eup %6843 }
 0xada   :  { %v5356_v23 = vmul.f32 0.6931472, %v6844_v61 }
 0xadc   :  { %v5357_v46 = vsub.f32 %v5349_v54, %v5356_v23 }
 0xade   :  { %5358 = vst.msk [vmem:[#allocation5] sm:$0x3] %vm5345_vm9, %v5357_v46 }
 0xadf   :  { %5369 = dma.vmem_to_hbm [thread:$0]  %s5365_s10, 32, %s5367_s30, [#allocation6]  }
 0xae0   :  { %6869 = dma.done.wait [#allocation6], 32  }
 0xae1   :  { %6870 = vsyncadd [#allocation6], 4294967264 }
 0xae2   :  { %5374 = vsyncpa [#allocation6], 1 }

</bundles_post_ra>
